<compile_context>
chip_gen: v7x
topology: tpu7x:2x2x1
jax: 0.10.0
libtpu: 0.0.40
codegen_flags: <defaults>
</compile_context>

<pallas_src>
import math

import jax
import jax.numpy as jnp
from jax.experimental import pallas as pl
from jax.experimental.pallas import tpu as pltpu


# ------------------------------ fused kernel ------------------------------- #

def _make_bottle2neck_kernel(H, W, Cin, width, scale_num, planes, Ks, Ds, Ps):
    HW = H * W
    nums = scale_num - 1
    WS = width * scale_num
    pad_branches = [i for i in range(nums) if Ks[i] > 1]
    Pmax = max([Ps[i] for i in pad_branches], default=0)
    R0 = (Pmax + 1) * W                 # flat row offset of the image inside vpad_ref
    TOT = (H + 2 * Pmax + 2) * W        # total rows of vpad_ref
    pow2_w = (W & (W - 1)) == 0
    # Distinct horizontal tap shifts that need an out-of-bounds lane mask.
    dx_needed = sorted({kx * Ds[i] - Ps[i]
                        for i in pad_branches for kx in range(Ks[i])} - {0})

    def kernel(*refs):
        it = iter(refs)
        x_ref = next(it)
        w1_ref, s1_ref, b1_ref = next(it), next(it), next(it)
        wb_refs, sb_refs, bb_refs = [], [], []
        for _ in range(nums):
            wb_refs.append(next(it))
            sb_refs.append(next(it))
            bb_refs.append(next(it))
        w3_ref, s3_ref, b3_ref = next(it), next(it), next(it)
        o_ref = next(it)
        out1_ref = next(it)
        if pad_branches:
            vpad_ref = next(it)
            col_ref = next(it)

        # ---- conv1 (1x1, bf16 x bf16 -> f32) + bn1 + relu -------------------
        x2d = x_ref[0]                                            # (HW, Cin) bf16
        acc1 = jnp.dot(x2d, w1_ref[...], preferred_element_type=jnp.float32)
        out1_ref[...] = jnp.maximum(acc1 * s1_ref[...] + b1_ref[...], 0.0)

        # Horizontal boundary masks: one per distinct tap shift dx, hoisted out
        # of the tap loops and shared across all branches.
        masks = {}
        if dx_needed:
            m_idx = jax.lax.broadcasted_iota(jnp.int32, (HW, 1), 0)
            x_pos = (m_idx & (W - 1)) if pow2_w else (m_idx % W)
            for dx in dx_needed:
                masks[dx] = jnp.logical_and(x_pos + dx >= 0, x_pos + dx < W)

        if pad_branches:
            # Zero only the halo rows; the interior [R0, R0+HW) is fully
            # rewritten before every use.  Done every grid step so the kernel
            # stays correct when the batch axis is sharded across TensorCores.
            vpad_ref[0:R0, :] = jnp.zeros((R0, width), jnp.float32)
            vpad_ref[R0 + HW:TOT, :] = jnp.zeros((TOT - R0 - HW, width),
                                                 jnp.float32)

        # ---- per-scale dilated convs + bn + relu (stype='normal' chaining) --
        # Each branch output is written back into out1_ref chunk i (safe: chunk
        # i+1 is read only after branch i finishes), so after the loop out1_ref
        # IS the channel concat and conv3 becomes a single deep dot.
        sp = None
        for i in range(nums):
            chunk = out1_ref[:, i * width:(i + 1) * width]        # (HW, width) f32
            sp_in = chunk if i == 0 else sp + chunk
            K, D, P = Ks[i], Ds[i], Ps[i]
            KK = K * K
            if K == 1:
                col = sp_in.astype(jnp.bfloat16)                  # plain 1x1 conv
            else:
                # In-kernel im2col: scatter the image into the zero-padded flat
                # buffer, read each tap as a statically shifted contiguous
                # slice, pack all K*K taps into one deep MXU contraction.
                vpad_ref[R0:R0 + HW, :] = sp_in
                for ky in range(K):
                    dy = ky * D - P
                    for kx in range(K):
                        dx = kx * D - P
                        t = ky * K + kx
                        start = R0 + dy * W + dx
                        tap = vpad_ref[start:start + HW, :]       # (HW, width) f32
                        if dx != 0:
                            tap = jnp.where(masks[dx], tap, 0.0)
                        col_ref[:, t * width:(t + 1) * width] = tap.astype(jnp.bfloat16)
                col = col_ref[:, :KK * width]                     # (HW, KK*width) bf16
            acc = jnp.dot(col, wb_refs[i][...], preferred_element_type=jnp.float32)
            sp = jnp.maximum(acc * sb_refs[i][...] + bb_refs[i][...], 0.0)
            out1_ref[:, i * width:(i + 1) * width] = sp
        # The last chunk (untouched conv1 output) already sits in out1_ref.

        # ---- conv3 (1x1) + bn3, emitted transposed: (planes, HW) == NCHW ----
        # Single NT dot, contraction depth = width*scale; lane-dense result.
        cat = out1_ref[...].astype(jnp.bfloat16)                  # (HW, WS)
        acc3 = jax.lax.dot_general(
            w3_ref[...], cat,
            dimension_numbers=(((1,), (1,)), ((), ())),
            preferred_element_type=jnp.float32)                   # (planes, HW)
        o_ref[0] = acc3 * s3_ref[...] + b3_ref[...]               # no final relu

    return kernel


def bottle2neck_forward(x_nchw, kp, *, Ks, Ds, Ps, width, scale_num, planes):
    """Fused Pallas forward.  x_nchw: (N, Cin, H, W) f32 -> (N, planes, H, W) f32."""
    N, Cin, H, W = x_nchw.shape
    HW = H * W
    WS = width * scale_num
    nums = scale_num - 1
    Pmax = max([Ps[i] for i in range(nums) if Ks[i] > 1], default=0)
    KKmax = max([Ks[i] ** 2 for i in range(nums) if Ks[i] > 1], default=0)
    assert Pmax <= W, (Pmax, W)

    # NCHW -> flat channels-last bf16 operand for the MXU.
    x = jnp.transpose(x_nchw, (0, 2, 3, 1)).reshape(N, HW, Cin).astype(jnp.bfloat16)

    kernel = _make_bottle2neck_kernel(H, W, Cin, width, scale_num, planes, Ks, Ds, Ps)

    inputs = [x, kp['w1'], kp['s1'], kp['b1']]
    in_specs = [
        pl.BlockSpec((1, HW, Cin), lambda n: (n, 0, 0)),
        pl.BlockSpec(kp['w1'].shape, lambda n: (0, 0)),
        pl.BlockSpec(kp['s1'].shape, lambda n: (0, 0)),
        pl.BlockSpec(kp['b1'].shape, lambda n: (0, 0)),
    ]
    for i in range(nums):
        for arr in (kp['wb'][i], kp['sb'][i], kp['bb'][i]):
            inputs.append(arr)
            in_specs.append(pl.BlockSpec(arr.shape, lambda n: (0, 0)))
    for arr in (kp['w3'], kp['s3'], kp['b3']):
        inputs.append(arr)
        in_specs.append(pl.BlockSpec(arr.shape, lambda n: (0, 0)))

    scratch_shapes = [pltpu.VMEM((HW, WS), jnp.float32)]          # conv1 out / concat
    if KKmax:
        scratch_shapes.append(                                     # padded flat image
            pltpu.VMEM(((H + 2 * Pmax + 2) * W, width), jnp.float32))
        scratch_shapes.append(                                     # folded im2col taps
            pltpu.VMEM((HW, KKmax * width), jnp.bfloat16))

    out = pl.pallas_call(
        kernel,
        out_shape=jax.ShapeDtypeStruct((N, planes, HW), jnp.float32),
        grid_spec=pltpu.PrefetchScalarGridSpec(
            num_scalar_prefetch=0,
            grid=(N,),
            in_specs=in_specs,
            out_specs=pl.BlockSpec((1, planes, HW), lambda n: (n, 0, 0)),
            scratch_shapes=scratch_shapes),
        compiler_params=pltpu.CompilerParams(
            dimension_semantics=("parallel",)),
    )(*inputs)
    return out.reshape(N, planes, H, W)                           # already NCHW


# ------------------------------ parameter prep ------------------------------ #

def conv_w_to_matmul(w_oihw):
    """PyTorch OIHW conv weight -> (K*K*Cin, Cout) folded im2col weight."""
    cout, cin, kh, kw = w_oihw.shape
    return jnp.transpose(w_oihw, (2, 3, 1, 0)).reshape(kh * kw * cin, cout)


def bn_fold(gamma, beta, mean, var, eps=1e-5, conv_bias=None):
    """Fold inference-mode BN (and an optional preceding conv bias)."""
    s = gamma / jnp.sqrt(var + eps)
    sh = beta - mean * s
    if conv_bias is not None:
        sh = sh + conv_bias * s
    return s, sh


def make_params(key, inplanes, planes, width, scale_num, Ks):
    keys = list(jax.random.split(key, 64))
    it = iter(keys)

    def conv_w(cout, cin, k):
        fan_in = cin * k * k
        return jax.random.normal(next(it), (cout, cin, k, k),
                                 jnp.float32) / math.sqrt(fan_in)

    def bn_raw(c):
        gamma = 0.5 + jax.random.uniform(next(it), (c,), jnp.float32)
        beta = 0.1 * jax.random.normal(next(it), (c,), jnp.float32)
        mean = 0.1 * jax.random.normal(next(it), (c,), jnp.float32)
        var = 0.5 + jax.random.uniform(next(it), (c,), jnp.float32)
        return gamma, beta, mean, var

    p = {}
    ws = width * scale_num
    p['w1'] = conv_w(ws, inplanes, 1)                 # conv1 (no bias)
    p['bn1_s'], p['bn1_sh'] = bn_fold(*bn_raw(ws))
    p['wb'], p['bnb_s'], p['bnb_sh'] = [], [], []
    for k in Ks:                                      # per-scale convs (with bias)
        wb = conv_w(width, width, k)
        bb = 0.1 * jax.random.normal(next(it), (width,), jnp.float32)
        s, sh = bn_fold(*bn_raw(width), conv_bias=bb)
        p['wb'].append(wb)
        p['bnb_s'].append(s)
        p['bnb_sh'].append(sh)
    p['w3'] = conv_w(planes, ws, 1)                   # conv3 (no bias)
    p['bn3_s'], p['bn3_sh'] = bn_fold(*bn_raw(planes))
    return p


def prepare_kernel_params(prm):
    """Convert PyTorch-layout f32 params into bf16 matmul-form kernel params."""
    return {
        'w1': jnp.transpose(prm['w1'][:, :, 0, 0]).astype(jnp.bfloat16),   # (Cin, WS)
        's1': prm['bn1_s'].reshape(1, -1).astype(jnp.float32),
        'b1': prm['bn1_sh'].reshape(1, -1).astype(jnp.float32),
        'wb': [conv_w_to_matmul(w).astype(jnp.bfloat16) for w in prm['wb']],
        'sb': [s.reshape(1, -1).astype(jnp.float32) for s in prm['bnb_s']],
        'bb': [b.reshape(1, -1).astype(jnp.float32) for b in prm['bnb_sh']],
        'w3': prm['w3'][:, :, 0, 0].astype(jnp.bfloat16),                  # (planes, WS)
        's3': prm['bn3_s'].reshape(-1, 1).astype(jnp.float32),
        'b3': prm['bn3_sh'].reshape(-1, 1).astype(jnp.float32),
    }


# ------------------------- pure-JAX reference (NCHW) ------------------------ #
# Mirrors the kernel's numerics: conv operands in bf16, f32 accumulation,
# BN/ReLU epilogues in f32.

def _affine(x_nchw, s, sh):
    return x_nchw * s.reshape(1, -1, 1, 1) + sh.reshape(1, -1, 1, 1)


def ref_forward(x_nchw, prm, Ks, Ds, Ps, width, scale_num):
    def conv(x, w, pad, dil):
        return jax.lax.conv_general_dilated(
            x.astype(jnp.bfloat16), w.astype(jnp.bfloat16),
            window_strides=(1, 1),
            padding=[(pad, pad), (pad, pad)],
            rhs_dilation=(dil, dil),
            dimension_numbers=('NCHW', 'OIHW', 'NCHW'),
            preferred_element_type=jnp.float32)

    out = jnp.maximum(_affine(conv(x_nchw, prm['w1'], 0, 1),
                              prm['bn1_s'], prm['bn1_sh']), 0.0)
    spx = jnp.split(out, scale_num, axis=1)
    branch_outs = []
    sp = None
    for i in range(scale_num - 1):
        sp_in = spx[i] if i == 0 else sp + spx[i]
        y = conv(sp_in, prm['wb'][i], Ps[i], Ds[i])   # conv bias folded into shift
        sp = jnp.maximum(_affine(y, prm['bnb_s'][i], prm['bnb_sh'][i]), 0.0)
        branch_outs.append(sp)
    branch_outs.append(spx[-1])
    cat = jnp.concatenate(branch_outs, axis=1)
    return _affine(conv(cat, prm['w3'], 0, 1), prm['bn3_s'], prm['bn3_sh'])


# ------------------------------------ main ---------------------------------- #

if __name__ == "__main__":
    inplanes, planes = 8, 8
    width, scale_num = 24, 4          # hidden_planes=24, scale=4 (module defaults)
    N, H, W = 2, 16, 16
    # Deterministic stand-ins for random.choice([1,3,5]) / random.choice([1,2,3])
    Ks = [3, 5, 1]
    Ds = [1, 2, 3]
    Ps = [((k - 1) // 2) * d for k, d in zip(Ks, Ds)]

    key = jax.random.PRNGKey(0)
    kx, kparam = jax.random.split(key)
    x_nchw = jax.random.normal(kx, (N, inplanes, H, W), jnp.float32)
    prm = make_params(kparam, inplanes, planes, width, scale_num, Ks)
    kprm = prepare_kernel_params(prm)

    fwd = jax.jit(lambda xx, pp: bottle2neck_forward(
        xx, pp, Ks=Ks, Ds=Ds, Ps=Ps, width=width,
        scale_num=scale_num, planes=planes))

    out = jax.block_until_ready(fwd(x_nchw, kprm))

    ref = ref_forward(x_nchw, prm, Ks, Ds, Ps, width, scale_num)
    assert out.shape == (N, planes, H, W), out.shape
    max_diff = float(jnp.max(jnp.abs(out - ref)))
    assert bool(jnp.allclose(out, ref, rtol=5e-3, atol=5e-3)), max_diff
    print("KERNEL_OK")
</pallas_src>

<mosaic_0001>
module attributes {stable_mosaic.version = 11 : i64} {
  func.func @kernel(%arg0: i32, %arg1: memref<1x256x8xbf16, #tpu.memory_space<vmem>>, %arg2: memref<8x96xbf16, #tpu.memory_space<vmem>>, %arg3: memref<1x96xf32, #tpu.memory_space<vmem>>, %arg4: memref<1x96xf32, #tpu.memory_space<vmem>>, %arg5: memref<216x24xbf16, #tpu.memory_space<vmem>>, %arg6: memref<1x24xf32, #tpu.memory_space<vmem>>, %arg7: memref<1x24xf32, #tpu.memory_space<vmem>>, %arg8: memref<600x24xbf16, #tpu.memory_space<vmem>>, %arg9: memref<1x24xf32, #tpu.memory_space<vmem>>, %arg10: memref<1x24xf32, #tpu.memory_space<vmem>>, %arg11: memref<24x24xbf16, #tpu.memory_space<vmem>>, %arg12: memref<1x24xf32, #tpu.memory_space<vmem>>, %arg13: memref<1x24xf32, #tpu.memory_space<vmem>>, %arg14: memref<8x96xbf16, #tpu.memory_space<vmem>>, %arg15: memref<8x1xf32, #tpu.memory_space<vmem>>, %arg16: memref<8x1xf32, #tpu.memory_space<vmem>>, %arg17: memref<1x8x256xf32, #tpu.memory_space<vmem>>, %arg18: memref<256x96xf32, #tpu.memory_space<vmem>>, %arg19: memref<416x24xf32, #tpu.memory_space<vmem>>, %arg20: memref<256x600xbf16, #tpu.memory_space<vmem>>) attributes {dimension_semantics = [#tpu.dimension_semantics<parallel>], iteration_bounds = array<i64: 2>, scalar_prefetch = 0 : i64, scratch_operands = 3 : i64, tpu.core_type = #tpu.core_type<tc>, window_params = [{transform_indices = @transform_0, window_bounds = array<i64: 1, 256, 8>}, {pipeline_mode = #tpu.pipeline_mode<synchronous>, transform_indices = @transform_1, window_bounds = array<i64: 8, 96>}, {pipeline_mode = #tpu.pipeline_mode<synchronous>, transform_indices = @transform_2, window_bounds = array<i64: 1, 96>}, {pipeline_mode = #tpu.pipeline_mode<synchronous>, transform_indices = @transform_3, window_bounds = array<i64: 1, 96>}, {pipeline_mode = #tpu.pipeline_mode<synchronous>, transform_indices = @transform_4, window_bounds = array<i64: 216, 24>}, {pipeline_mode = #tpu.pipeline_mode<synchronous>, transform_indices = @transform_5, window_bounds = array<i64: 1, 24>}, {pipeline_mode = #tpu.pipeline_mode<synchronous>, transform_indices = @transform_6, window_bounds = array<i64: 1, 24>}, {pipeline_mode = #tpu.pipeline_mode<synchronous>, transform_indices = @transform_7, window_bounds = array<i64: 600, 24>}, {pipeline_mode = #tpu.pipeline_mode<synchronous>, transform_indices = @transform_8, window_bounds = array<i64: 1, 24>}, {pipeline_mode = #tpu.pipeline_mode<synchronous>, transform_indices = @transform_9, window_bounds = array<i64: 1, 24>}, {pipeline_mode = #tpu.pipeline_mode<synchronous>, transform_indices = @transform_10, window_bounds = array<i64: 24, 24>}, {pipeline_mode = #tpu.pipeline_mode<synchronous>, transform_indices = @transform_11, window_bounds = array<i64: 1, 24>}, {pipeline_mode = #tpu.pipeline_mode<synchronous>, transform_indices = @transform_12, window_bounds = array<i64: 1, 24>}, {pipeline_mode = #tpu.pipeline_mode<synchronous>, transform_indices = @transform_13, window_bounds = array<i64: 8, 96>}, {pipeline_mode = #tpu.pipeline_mode<synchronous>, transform_indices = @transform_14, window_bounds = array<i64: 8, 1>}, {pipeline_mode = #tpu.pipeline_mode<synchronous>, transform_indices = @transform_15, window_bounds = array<i64: 8, 1>}, {transform_indices = @transform_16, window_bounds = array<i64: 1, 8, 256>}]} {
    %c0 = arith.constant 0 : index
    %c0_0 = arith.constant 0 : index
    %c0_1 = arith.constant 0 : index
    %0 = vector.load %arg1[%c0, %c0_0, %c0_1] : memref<1x256x8xbf16, #tpu.memory_space<vmem>>, vector<1x256x8xbf16>
    %1 = vector.shape_cast %0 : vector<1x256x8xbf16> to vector<256x8xbf16>
    %c0_2 = arith.constant 0 : index
    %c0_3 = arith.constant 0 : index
    %2 = vector.load %arg2[%c0_2, %c0_3] : memref<8x96xbf16, #tpu.memory_space<vmem>>, vector<8x96xbf16>
    %cst = arith.constant dense<0.000000e+00> : vector<256x96xf32>
    %3 = tpu.matmul %1, %2, %cst {dimension_numbers = #tpu.dot_dimension_numbers<[1], [0], [0], [1], [0, 0, 1, 1], [], []>} : vector<256x8xbf16>, vector<8x96xbf16>, vector<256x96xf32> -> vector<256x96xf32>
    %c0_4 = arith.constant 0 : index
    %c0_5 = arith.constant 0 : index
    %4 = vector.load %arg3[%c0_4, %c0_5] : memref<1x96xf32, #tpu.memory_space<vmem>>, vector<1x96xf32>
    %5 = vector.broadcast %4 : vector<1x96xf32> to vector<256x96xf32>
    %6 = arith.mulf %3, %5 : vector<256x96xf32>
    %c0_6 = arith.constant 0 : index
    %c0_7 = arith.constant 0 : index
    %7 = vector.load %arg4[%c0_6, %c0_7] : memref<1x96xf32, #tpu.memory_space<vmem>>, vector<1x96xf32>
    %8 = vector.broadcast %7 : vector<1x96xf32> to vector<256x96xf32>
    %9 = arith.addf %6, %8 : vector<256x96xf32>
    %cst_8 = arith.constant 0.000000e+00 : f32
    %10 = vector.broadcast %cst_8 : f32 to vector<256x96xf32>
    %11 = arith.maximumf %9, %10 : vector<256x96xf32>
    %c0_9 = arith.constant 0 : index
    %c0_10 = arith.constant 0 : index
    %12 = vector.load %arg18[%c0_9, %c0_10] : memref<256x96xf32, #tpu.memory_space<vmem>>, vector<256x96xf32>
    tpu.vector_store %arg18[%c0_9, %c0_10], %11 {strides = array<i32>} : memref<256x96xf32, #tpu.memory_space<vmem>>, vector<256x96xf32>,
    %13 = tpu.iota {dimensions = array<i32: 0>} : vector<256x1xi32>
    %c15_i32 = arith.constant 15 : i32
    %14 = vector.broadcast %c15_i32 : i32 to vector<256x1xi32>
    %15 = arith.andi %13, %14 : vector<256x1xi32>
    %c-4_i32 = arith.constant -4 : i32
    %16 = vector.broadcast %c-4_i32 : i32 to vector<256x1xi32>
    %17 = arith.addi %15, %16 : vector<256x1xi32>
    %c0_i32 = arith.constant 0 : i32
    %18 = vector.broadcast %c0_i32 : i32 to vector<256x1xi32>
    %19 = arith.cmpi sge, %17, %18 : vector<256x1xi32>
    %c-4_i32_11 = arith.constant -4 : i32
    %20 = vector.broadcast %c-4_i32_11 : i32 to vector<256x1xi32>
    %21 = arith.addi %15, %20 : vector<256x1xi32>
    %c16_i32 = arith.constant 16 : i32
    %22 = vector.broadcast %c16_i32 : i32 to vector<256x1xi32>
    %23 = arith.cmpi slt, %21, %22 : vector<256x1xi32>
    %24 = arith.andi %19, %23 : vector<256x1xi1>
    %c-2_i32 = arith.constant -2 : i32
    %25 = vector.broadcast %c-2_i32 : i32 to vector<256x1xi32>
    %26 = arith.addi %15, %25 : vector<256x1xi32>
    %c0_i32_12 = arith.constant 0 : i32
    %27 = vector.broadcast %c0_i32_12 : i32 to vector<256x1xi32>
    %28 = arith.cmpi sge, %26, %27 : vector<256x1xi32>
    %c-2_i32_13 = arith.constant -2 : i32
    %29 = vector.broadcast %c-2_i32_13 : i32 to vector<256x1xi32>
    %30 = arith.addi %15, %29 : vector<256x1xi32>
    %c16_i32_14 = arith.constant 16 : i32
    %31 = vector.broadcast %c16_i32_14 : i32 to vector<256x1xi32>
    %32 = arith.cmpi slt, %30, %31 : vector<256x1xi32>
    %33 = arith.andi %28, %32 : vector<256x1xi1>
    %c-1_i32 = arith.constant -1 : i32
    %34 = vector.broadcast %c-1_i32 : i32 to vector<256x1xi32>
    %35 = arith.addi %15, %34 : vector<256x1xi32>
    %c0_i32_15 = arith.constant 0 : i32
    %36 = vector.broadcast %c0_i32_15 : i32 to vector<256x1xi32>
    %37 = arith.cmpi sge, %35, %36 : vector<256x1xi32>
    %c-1_i32_16 = arith.constant -1 : i32
    %38 = vector.broadcast %c-1_i32_16 : i32 to vector<256x1xi32>
    %39 = arith.addi %15, %38 : vector<256x1xi32>
    %c16_i32_17 = arith.constant 16 : i32
    %40 = vector.broadcast %c16_i32_17 : i32 to vector<256x1xi32>
    %41 = arith.cmpi slt, %39, %40 : vector<256x1xi32>
    %42 = arith.andi %37, %41 : vector<256x1xi1>
    %c1_i32 = arith.constant 1 : i32
    %43 = vector.broadcast %c1_i32 : i32 to vector<256x1xi32>
    %44 = arith.addi %15, %43 : vector<256x1xi32>
    %c0_i32_18 = arith.constant 0 : i32
    %45 = vector.broadcast %c0_i32_18 : i32 to vector<256x1xi32>
    %46 = arith.cmpi sge, %44, %45 : vector<256x1xi32>
    %c1_i32_19 = arith.constant 1 : i32
    %47 = vector.broadcast %c1_i32_19 : i32 to vector<256x1xi32>
    %48 = arith.addi %15, %47 : vector<256x1xi32>
    %c16_i32_20 = arith.constant 16 : i32
    %49 = vector.broadcast %c16_i32_20 : i32 to vector<256x1xi32>
    %50 = arith.cmpi slt, %48, %49 : vector<256x1xi32>
    %51 = arith.andi %46, %50 : vector<256x1xi1>
    %c2_i32 = arith.constant 2 : i32
    %52 = vector.broadcast %c2_i32 : i32 to vector<256x1xi32>
    %53 = arith.addi %15, %52 : vector<256x1xi32>
    %c0_i32_21 = arith.constant 0 : i32
    %54 = vector.broadcast %c0_i32_21 : i32 to vector<256x1xi32>
    %55 = arith.cmpi sge, %53, %54 : vector<256x1xi32>
    %c2_i32_22 = arith.constant 2 : i32
    %56 = vector.broadcast %c2_i32_22 : i32 to vector<256x1xi32>
    %57 = arith.addi %15, %56 : vector<256x1xi32>
    %c16_i32_23 = arith.constant 16 : i32
    %58 = vector.broadcast %c16_i32_23 : i32 to vector<256x1xi32>
    %59 = arith.cmpi slt, %57, %58 : vector<256x1xi32>
    %60 = arith.andi %55, %59 : vector<256x1xi1>
    %c4_i32 = arith.constant 4 : i32
    %61 = vector.broadcast %c4_i32 : i32 to vector<256x1xi32>
    %62 = arith.addi %15, %61 : vector<256x1xi32>
    %c0_i32_24 = arith.constant 0 : i32
    %63 = vector.broadcast %c0_i32_24 : i32 to vector<256x1xi32>
    %64 = arith.cmpi sge, %62, %63 : vector<256x1xi32>
    %c4_i32_25 = arith.constant 4 : i32
    %65 = vector.broadcast %c4_i32_25 : i32 to vector<256x1xi32>
    %66 = arith.addi %15, %65 : vector<256x1xi32>
    %c16_i32_26 = arith.constant 16 : i32
    %67 = vector.broadcast %c16_i32_26 : i32 to vector<256x1xi32>
    %68 = arith.cmpi slt, %66, %67 : vector<256x1xi32>
    %69 = arith.andi %64, %68 : vector<256x1xi1>
    %cst_27 = arith.constant 0.000000e+00 : f32
    %70 = vector.broadcast %cst_27 : f32 to vector<80x24xf32>
    %c0_28 = arith.constant 0 : index
    %c0_29 = arith.constant 0 : index
    %71 = vector.load %arg19[%c0_28, %c0_29] : memref<416x24xf32, #tpu.memory_space<vmem>>, vector<80x24xf32>
    tpu.vector_store %arg19[%c0_28, %c0_29], %70 {strides = array<i32>} : memref<416x24xf32, #tpu.memory_space<vmem>>, vector<80x24xf32>,
    %cst_30 = arith.constant 0.000000e+00 : f32
    %72 = vector.broadcast %cst_30 : f32 to vector<80x24xf32>
    %c336 = arith.constant 336 : index
    %c0_31 = arith.constant 0 : index
    %73 = vector.load %arg19[%c336, %c0_31] : memref<416x24xf32, #tpu.memory_space<vmem>>, vector<80x24xf32>
    tpu.vector_store %arg19[%c336, %c0_31], %72 {strides = array<i32>} : memref<416x24xf32, #tpu.memory_space<vmem>>, vector<80x24xf32>,
    %c0_32 = arith.constant 0 : index
    %c0_33 = arith.constant 0 : index
    %74 = vector.load %arg18[%c0_32, %c0_33] : memref<256x96xf32, #tpu.memory_space<vmem>>, vector<256x24xf32>
    %c80 = arith.constant 80 : index
    %c0_34 = arith.constant 0 : index
    %75 = vector.load %arg19[%c80, %c0_34] : memref<416x24xf32, #tpu.memory_space<vmem>>, vector<256x24xf32>
    tpu.vector_store %arg19[%c80, %c0_34], %74 {strides = array<i32>} : memref<416x24xf32, #tpu.memory_space<vmem>>, vector<256x24xf32>,
    %c63 = arith.constant 63 : index
    %c0_35 = arith.constant 0 : index
    %76 = vector.load %arg19[%c63, %c0_35] : memref<416x24xf32, #tpu.memory_space<vmem>>, vector<256x24xf32>
    %cst_36 = arith.constant 0.000000e+00 : f32
    %77 = vector.shape_cast %42 : vector<256x1xi1> to vector<256x1xi1>
    %78 = vector.broadcast %77 : vector<256x1xi1> to vector<256x24xi1>
    %79 = vector.broadcast %cst_36 : f32 to vector<256x24xf32>
    %80 = arith.select %78, %76, %79 : vector<256x24xi1>, vector<256x24xf32>
    %81 = arith.truncf %80 : vector<256x24xf32> to vector<256x24xbf16>
    %c0_37 = arith.constant 0 : index
    %c0_38 = arith.constant 0 : index
    %82 = vector.load %arg20[%c0_37, %c0_38] : memref<256x600xbf16, #tpu.memory_space<vmem>>, vector<256x24xbf16>
    tpu.vector_store %arg20[%c0_37, %c0_38], %81 {strides = array<i32>} : memref<256x600xbf16, #tpu.memory_space<vmem>>, vector<256x24xbf16>,
    %c64 = arith.constant 64 : index
    %c0_39 = arith.constant 0 : index
    %83 = vector.load %arg19[%c64, %c0_39] : memref<416x24xf32, #tpu.memory_space<vmem>>, vector<256x24xf32>
    %84 = arith.truncf %83 : vector<256x24xf32> to vector<256x24xbf16>
    %c0_40 = arith.constant 0 : index
    %c24 = arith.constant 24 : index
    %85 = vector.load %arg20[%c0_40, %c24] : memref<256x600xbf16, #tpu.memory_space<vmem>>, vector<256x24xbf16>
    tpu.vector_store %arg20[%c0_40, %c24], %84 {strides = array<i32>} : memref<256x600xbf16, #tpu.memory_space<vmem>>, vector<256x24xbf16>,
    %c65 = arith.constant 65 : index
    %c0_41 = arith.constant 0 : index
    %86 = vector.load %arg19[%c65, %c0_41] : memref<416x24xf32, #tpu.memory_space<vmem>>, vector<256x24xf32>
    %cst_42 = arith.constant 0.000000e+00 : f32
    %87 = vector.shape_cast %51 : vector<256x1xi1> to vector<256x1xi1>
    %88 = vector.broadcast %87 : vector<256x1xi1> to vector<256x24xi1>
    %89 = vector.broadcast %cst_42 : f32 to vector<256x24xf32>
    %90 = arith.select %88, %86, %89 : vector<256x24xi1>, vector<256x24xf32>
    %91 = arith.truncf %90 : vector<256x24xf32> to vector<256x24xbf16>
    %c0_43 = arith.constant 0 : index
    %c48 = arith.constant 48 : index
    %92 = vector.load %arg20[%c0_43, %c48] : memref<256x600xbf16, #tpu.memory_space<vmem>>, vector<256x24xbf16>
    tpu.vector_store %arg20[%c0_43, %c48], %91 {strides = array<i32>} : memref<256x600xbf16, #tpu.memory_space<vmem>>, vector<256x24xbf16>,
    %c79 = arith.constant 79 : index
    %c0_44 = arith.constant 0 : index
    %93 = vector.load %arg19[%c79, %c0_44] : memref<416x24xf32, #tpu.memory_space<vmem>>, vector<256x24xf32>
    %cst_45 = arith.constant 0.000000e+00 : f32
    %94 = vector.shape_cast %42 : vector<256x1xi1> to vector<256x1xi1>
    %95 = vector.broadcast %94 : vector<256x1xi1> to vector<256x24xi1>
    %96 = vector.broadcast %cst_45 : f32 to vector<256x24xf32>
    %97 = arith.select %95, %93, %96 : vector<256x24xi1>, vector<256x24xf32>
    %98 = arith.truncf %97 : vector<256x24xf32> to vector<256x24xbf16>
    %c0_46 = arith.constant 0 : index
    %c72 = arith.constant 72 : index
    %99 = vector.load %arg20[%c0_46, %c72] : memref<256x600xbf16, #tpu.memory_space<vmem>>, vector<256x24xbf16>
    tpu.vector_store %arg20[%c0_46, %c72], %98 {strides = array<i32>} : memref<256x600xbf16, #tpu.memory_space<vmem>>, vector<256x24xbf16>,
    %c80_47 = arith.constant 80 : index
    %c0_48 = arith.constant 0 : index
    %100 = vector.load %arg19[%c80_47, %c0_48] : memref<416x24xf32, #tpu.memory_space<vmem>>, vector<256x24xf32>
    %101 = arith.truncf %100 : vector<256x24xf32> to vector<256x24xbf16>
    %c0_49 = arith.constant 0 : index
    %c96 = arith.constant 96 : index
    %102 = vector.load %arg20[%c0_49, %c96] : memref<256x600xbf16, #tpu.memory_space<vmem>>, vector<256x24xbf16>
    tpu.vector_store %arg20[%c0_49, %c96], %101 {strides = array<i32>} : memref<256x600xbf16, #tpu.memory_space<vmem>>, vector<256x24xbf16>,
    %c81 = arith.constant 81 : index
    %c0_50 = arith.constant 0 : index
    %103 = vector.load %arg19[%c81, %c0_50] : memref<416x24xf32, #tpu.memory_space<vmem>>, vector<256x24xf32>
    %cst_51 = arith.constant 0.000000e+00 : f32
    %104 = vector.shape_cast %51 : vector<256x1xi1> to vector<256x1xi1>
    %105 = vector.broadcast %104 : vector<256x1xi1> to vector<256x24xi1>
    %106 = vector.broadcast %cst_51 : f32 to vector<256x24xf32>
    %107 = arith.select %105, %103, %106 : vector<256x24xi1>, vector<256x24xf32>
    %108 = arith.truncf %107 : vector<256x24xf32> to vector<256x24xbf16>
    %c0_52 = arith.constant 0 : index
    %c120 = arith.constant 120 : index
    %109 = vector.load %arg20[%c0_52, %c120] : memref<256x600xbf16, #tpu.memory_space<vmem>>, vector<256x24xbf16>
    tpu.vector_store %arg20[%c0_52, %c120], %108 {strides = array<i32>} : memref<256x600xbf16, #tpu.memory_space<vmem>>, vector<256x24xbf16>,
    %c95 = arith.constant 95 : index
    %c0_53 = arith.constant 0 : index
    %110 = vector.load %arg19[%c95, %c0_53] : memref<416x24xf32, #tpu.memory_space<vmem>>, vector<256x24xf32>
    %cst_54 = arith.constant 0.000000e+00 : f32
    %111 = vector.shape_cast %42 : vector<256x1xi1> to vector<256x1xi1>
    %112 = vector.broadcast %111 : vector<256x1xi1> to vector<256x24xi1>
    %113 = vector.broadcast %cst_54 : f32 to vector<256x24xf32>
    %114 = arith.select %112, %110, %113 : vector<256x24xi1>, vector<256x24xf32>
    %115 = arith.truncf %114 : vector<256x24xf32> to vector<256x24xbf16>
    %c0_55 = arith.constant 0 : index
    %c144 = arith.constant 144 : index
    %116 = vector.load %arg20[%c0_55, %c144] : memref<256x600xbf16, #tpu.memory_space<vmem>>, vector<256x24xbf16>
    tpu.vector_store %arg20[%c0_55, %c144], %115 {strides = array<i32>} : memref<256x600xbf16, #tpu.memory_space<vmem>>, vector<256x24xbf16>,
    %c96_56 = arith.constant 96 : index
    %c0_57 = arith.constant 0 : index
    %117 = vector.load %arg19[%c96_56, %c0_57] : memref<416x24xf32, #tpu.memory_space<vmem>>, vector<256x24xf32>
    %118 = arith.truncf %117 : vector<256x24xf32> to vector<256x24xbf16>
    %c0_58 = arith.constant 0 : index
    %c168 = arith.constant 168 : index
    %119 = vector.load %arg20[%c0_58, %c168] : memref<256x600xbf16, #tpu.memory_space<vmem>>, vector<256x24xbf16>
    tpu.vector_store %arg20[%c0_58, %c168], %118 {strides = array<i32>} : memref<256x600xbf16, #tpu.memory_space<vmem>>, vector<256x24xbf16>,
    %c97 = arith.constant 97 : index
    %c0_59 = arith.constant 0 : index
    %120 = vector.load %arg19[%c97, %c0_59] : memref<416x24xf32, #tpu.memory_space<vmem>>, vector<256x24xf32>
    %cst_60 = arith.constant 0.000000e+00 : f32
    %121 = vector.shape_cast %51 : vector<256x1xi1> to vector<256x1xi1>
    %122 = vector.broadcast %121 : vector<256x1xi1> to vector<256x24xi1>
    %123 = vector.broadcast %cst_60 : f32 to vector<256x24xf32>
    %124 = arith.select %122, %120, %123 : vector<256x24xi1>, vector<256x24xf32>
    %125 = arith.truncf %124 : vector<256x24xf32> to vector<256x24xbf16>
    %c0_61 = arith.constant 0 : index
    %c192 = arith.constant 192 : index
    %126 = vector.load %arg20[%c0_61, %c192] : memref<256x600xbf16, #tpu.memory_space<vmem>>, vector<256x24xbf16>
    tpu.vector_store %arg20[%c0_61, %c192], %125 {strides = array<i32>} : memref<256x600xbf16, #tpu.memory_space<vmem>>, vector<256x24xbf16>,
    %c0_62 = arith.constant 0 : index
    %c0_63 = arith.constant 0 : index
    %127 = vector.load %arg20[%c0_62, %c0_63] : memref<256x600xbf16, #tpu.memory_space<vmem>>, vector<256x216xbf16>
    %c0_64 = arith.constant 0 : index
    %c0_65 = arith.constant 0 : index
    %128 = vector.load %arg5[%c0_64, %c0_65] : memref<216x24xbf16, #tpu.memory_space<vmem>>, vector<216x24xbf16>
    %cst_66 = arith.constant dense<0.000000e+00> : vector<256x24xf32>
    %129 = tpu.matmul %127, %128, %cst_66 {dimension_numbers = #tpu.dot_dimension_numbers<[1], [0], [0], [1], [0, 0, 1, 1], [], []>} : vector<256x216xbf16>, vector<216x24xbf16>, vector<256x24xf32> -> vector<256x24xf32>
    %c0_67 = arith.constant 0 : index
    %c0_68 = arith.constant 0 : index
    %130 = vector.load %arg6[%c0_67, %c0_68] : memref<1x24xf32, #tpu.memory_space<vmem>>, vector<1x24xf32>
    %131 = vector.broadcast %130 : vector<1x24xf32> to vector<256x24xf32>
    %132 = arith.mulf %129, %131 : vector<256x24xf32>
    %c0_69 = arith.constant 0 : index
    %c0_70 = arith.constant 0 : index
    %133 = vector.load %arg7[%c0_69, %c0_70] : memref<1x24xf32, #tpu.memory_space<vmem>>, vector<1x24xf32>
    %134 = vector.broadcast %133 : vector<1x24xf32> to vector<256x24xf32>
    %135 = arith.addf %132, %134 : vector<256x24xf32>
    %cst_71 = arith.constant 0.000000e+00 : f32
    %136 = vector.broadcast %cst_71 : f32 to vector<256x24xf32>
    %137 = arith.maximumf %135, %136 : vector<256x24xf32>
    %c0_72 = arith.constant 0 : index
    %c0_73 = arith.constant 0 : index
    %138 = vector.load %arg18[%c0_72, %c0_73] : memref<256x96xf32, #tpu.memory_space<vmem>>, vector<256x24xf32>
    tpu.vector_store %arg18[%c0_72, %c0_73], %137 {strides = array<i32>} : memref<256x96xf32, #tpu.memory_space<vmem>>, vector<256x24xf32>,
    %c0_74 = arith.constant 0 : index
    %c24_75 = arith.constant 24 : index
    %139 = vector.load %arg18[%c0_74, %c24_75] : memref<256x96xf32, #tpu.memory_space<vmem>>, vector<256x24xf32>
    %140 = arith.addf %137, %139 : vector<256x24xf32>
    %c80_76 = arith.constant 80 : index
    %c0_77 = arith.constant 0 : index
    %141 = vector.load %arg19[%c80_76, %c0_77] : memref<416x24xf32, #tpu.memory_space<vmem>>, vector<256x24xf32>
    tpu.vector_store %arg19[%c80_76, %c0_77], %140 {strides = array<i32>} : memref<416x24xf32, #tpu.memory_space<vmem>>, vector<256x24xf32>,
    %c12 = arith.constant 12 : index
    %c0_78 = arith.constant 0 : index
    %142 = vector.load %arg19[%c12, %c0_78] : memref<416x24xf32, #tpu.memory_space<vmem>>, vector<256x24xf32>
    %cst_79 = arith.constant 0.000000e+00 : f32
    %143 = vector.shape_cast %24 : vector<256x1xi1> to vector<256x1xi1>
    %144 = vector.broadcast %143 : vector<256x1xi1> to vector<256x24xi1>
    %145 = vector.broadcast %cst_79 : f32 to vector<256x24xf32>
    %146 = arith.select %144, %142, %145 : vector<256x24xi1>, vector<256x24xf32>
    %147 = arith.truncf %146 : vector<256x24xf32> to vector<256x24xbf16>
    %c0_80 = arith.constant 0 : index
    %c0_81 = arith.constant 0 : index
    %148 = vector.load %arg20[%c0_80, %c0_81] : memref<256x600xbf16, #tpu.memory_space<vmem>>, vector<256x24xbf16>
    tpu.vector_store %arg20[%c0_80, %c0_81], %147 {strides = array<i32>} : memref<256x600xbf16, #tpu.memory_space<vmem>>, vector<256x24xbf16>,
    %c14 = arith.constant 14 : index
    %c0_82 = arith.constant 0 : index
    %149 = vector.load %arg19[%c14, %c0_82] : memref<416x24xf32, #tpu.memory_space<vmem>>, vector<256x24xf32>
    %cst_83 = arith.constant 0.000000e+00 : f32
    %150 = vector.shape_cast %33 : vector<256x1xi1> to vector<256x1xi1>
    %151 = vector.broadcast %150 : vector<256x1xi1> to vector<256x24xi1>
    %152 = vector.broadcast %cst_83 : f32 to vector<256x24xf32>
    %153 = arith.select %151, %149, %152 : vector<256x24xi1>, vector<256x24xf32>
    %154 = arith.truncf %153 : vector<256x24xf32> to vector<256x24xbf16>
    %c0_84 = arith.constant 0 : index
    %c24_85 = arith.constant 24 : index
    %155 = vector.load %arg20[%c0_84, %c24_85] : memref<256x600xbf16, #tpu.memory_space<vmem>>, vector<256x24xbf16>
    tpu.vector_store %arg20[%c0_84, %c24_85], %154 {strides = array<i32>} : memref<256x600xbf16, #tpu.memory_space<vmem>>, vector<256x24xbf16>,
    %c16 = arith.constant 16 : index
    %c0_86 = arith.constant 0 : index
    %156 = vector.load %arg19[%c16, %c0_86] : memref<416x24xf32, #tpu.memory_space<vmem>>, vector<256x24xf32>
    %157 = arith.truncf %156 : vector<256x24xf32> to vector<256x24xbf16>
    %c0_87 = arith.constant 0 : index
    %c48_88 = arith.constant 48 : index
    %158 = vector.load %arg20[%c0_87, %c48_88] : memref<256x600xbf16, #tpu.memory_space<vmem>>, vector<256x24xbf16>
    tpu.vector_store %arg20[%c0_87, %c48_88], %157 {strides = array<i32>} : memref<256x600xbf16, #tpu.memory_space<vmem>>, vector<256x24xbf16>,
    %c18 = arith.constant 18 : index
    %c0_89 = arith.constant 0 : index
    %159 = vector.load %arg19[%c18, %c0_89] : memref<416x24xf32, #tpu.memory_space<vmem>>, vector<256x24xf32>
    %cst_90 = arith.constant 0.000000e+00 : f32
    %160 = vector.shape_cast %60 : vector<256x1xi1> to vector<256x1xi1>
    %161 = vector.broadcast %160 : vector<256x1xi1> to vector<256x24xi1>
    %162 = vector.broadcast %cst_90 : f32 to vector<256x24xf32>
    %163 = arith.select %161, %159, %162 : vector<256x24xi1>, vector<256x24xf32>
    %164 = arith.truncf %163 : vector<256x24xf32> to vector<256x24xbf16>
    %c0_91 = arith.constant 0 : index
    %c72_92 = arith.constant 72 : index
    %165 = vector.load %arg20[%c0_91, %c72_92] : memref<256x600xbf16, #tpu.memory_space<vmem>>, vector<256x24xbf16>
    tpu.vector_store %arg20[%c0_91, %c72_92], %164 {strides = array<i32>} : memref<256x600xbf16, #tpu.memory_space<vmem>>, vector<256x24xbf16>,
    %c20 = arith.constant 20 : index
    %c0_93 = arith.constant 0 : index
    %166 = vector.load %arg19[%c20, %c0_93] : memref<416x24xf32, #tpu.memory_space<vmem>>, vector<256x24xf32>
    %cst_94 = arith.constant 0.000000e+00 : f32
    %167 = vector.shape_cast %69 : vector<256x1xi1> to vector<256x1xi1>
    %168 = vector.broadcast %167 : vector<256x1xi1> to vector<256x24xi1>
    %169 = vector.broadcast %cst_94 : f32 to vector<256x24xf32>
    %170 = arith.select %168, %166, %169 : vector<256x24xi1>, vector<256x24xf32>
    %171 = arith.truncf %170 : vector<256x24xf32> to vector<256x24xbf16>
    %c0_95 = arith.constant 0 : index
    %c96_96 = arith.constant 96 : index
    %172 = vector.load %arg20[%c0_95, %c96_96] : memref<256x600xbf16, #tpu.memory_space<vmem>>, vector<256x24xbf16>
    tpu.vector_store %arg20[%c0_95, %c96_96], %171 {strides = array<i32>} : memref<256x600xbf16, #tpu.memory_space<vmem>>, vector<256x24xbf16>,
    %c44 = arith.constant 44 : index
    %c0_97 = arith.constant 0 : index
    %173 = vector.load %arg19[%c44, %c0_97] : memref<416x24xf32, #tpu.memory_space<vmem>>, vector<256x24xf32>
    %cst_98 = arith.constant 0.000000e+00 : f32
    %174 = vector.shape_cast %24 : vector<256x1xi1> to vector<256x1xi1>
    %175 = vector.broadcast %174 : vector<256x1xi1> to vector<256x24xi1>
    %176 = vector.broadcast %cst_98 : f32 to vector<256x24xf32>
    %177 = arith.select %175, %173, %176 : vector<256x24xi1>, vector<256x24xf32>
    %178 = arith.truncf %177 : vector<256x24xf32> to vector<256x24xbf16>
    %c0_99 = arith.constant 0 : index
    %c120_100 = arith.constant 120 : index
    %179 = vector.load %arg20[%c0_99, %c120_100] : memref<256x600xbf16, #tpu.memory_space<vmem>>, vector<256x24xbf16>
    tpu.vector_store %arg20[%c0_99, %c120_100], %178 {strides = array<i32>} : memref<256x600xbf16, #tpu.memory_space<vmem>>, vector<256x24xbf16>,
    %c46 = arith.constant 46 : index
    %c0_101 = arith.constant 0 : index
    %180 = vector.load %arg19[%c46, %c0_101] : memref<416x24xf32, #tpu.memory_space<vmem>>, vector<256x24xf32>
    %cst_102 = arith.constant 0.000000e+00 : f32
    %181 = vector.shape_cast %33 : vector<256x1xi1> to vector<256x1xi1>
    %182 = vector.broadcast %181 : vector<256x1xi1> to vector<256x24xi1>
    %183 = vector.broadcast %cst_102 : f32 to vector<256x24xf32>
    %184 = arith.select %182, %180, %183 : vector<256x24xi1>, vector<256x24xf32>
    %185 = arith.truncf %184 : vector<256x24xf32> to vector<256x24xbf16>
    %c0_103 = arith.constant 0 : index
    %c144_104 = arith.constant 144 : index
    %186 = vector.load %arg20[%c0_103, %c144_104] : memref<256x600xbf16, #tpu.memory_space<vmem>>, vector<256x24xbf16>
    tpu.vector_store %arg20[%c0_103, %c144_104], %185 {strides = array<i32>} : memref<256x600xbf16, #tpu.memory_space<vmem>>, vector<256x24xbf16>,
    %c48_105 = arith.constant 48 : index
    %c0_106 = arith.constant 0 : index
    %187 = vector.load %arg19[%c48_105, %c0_106] : memref<416x24xf32, #tpu.memory_space<vmem>>, vector<256x24xf32>
    %188 = arith.truncf %187 : vector<256x24xf32> to vector<256x24xbf16>
    %c0_107 = arith.constant 0 : index
    %c168_108 = arith.constant 168 : index
    %189 = vector.load %arg20[%c0_107, %c168_108] : memref<256x600xbf16, #tpu.memory_space<vmem>>, vector<256x24xbf16>
    tpu.vector_store %arg20[%c0_107, %c168_108], %188 {strides = array<i32>} : memref<256x600xbf16, #tpu.memory_space<vmem>>, vector<256x24xbf16>,
    %c50 = arith.constant 50 : index
    %c0_109 = arith.constant 0 : index
    %190 = vector.load %arg19[%c50, %c0_109] : memref<416x24xf32, #tpu.memory_space<vmem>>, vector<256x24xf32>
    %cst_110 = arith.constant 0.000000e+00 : f32
    %191 = vector.shape_cast %60 : vector<256x1xi1> to vector<256x1xi1>
    %192 = vector.broadcast %191 : vector<256x1xi1> to vector<256x24xi1>
    %193 = vector.broadcast %cst_110 : f32 to vector<256x24xf32>
    %194 = arith.select %192, %190, %193 : vector<256x24xi1>, vector<256x24xf32>
    %195 = arith.truncf %194 : vector<256x24xf32> to vector<256x24xbf16>
    %c0_111 = arith.constant 0 : index
    %c192_112 = arith.constant 192 : index
    %196 = vector.load %arg20[%c0_111, %c192_112] : memref<256x600xbf16, #tpu.memory_space<vmem>>, vector<256x24xbf16>
    tpu.vector_store %arg20[%c0_111, %c192_112], %195 {strides = array<i32>} : memref<256x600xbf16, #tpu.memory_space<vmem>>, vector<256x24xbf16>,
    %c52 = arith.constant 52 : index
    %c0_113 = arith.constant 0 : index
    %197 = vector.load %arg19[%c52, %c0_113] : memref<416x24xf32, #tpu.memory_space<vmem>>, vector<256x24xf32>
    %cst_114 = arith.constant 0.000000e+00 : f32
    %198 = vector.shape_cast %69 : vector<256x1xi1> to vector<256x1xi1>
    %199 = vector.broadcast %198 : vector<256x1xi1> to vector<256x24xi1>
    %200 = vector.broadcast %cst_114 : f32 to vector<256x24xf32>
    %201 = arith.select %199, %197, %200 : vector<256x24xi1>, vector<256x24xf32>
    %202 = arith.truncf %201 : vector<256x24xf32> to vector<256x24xbf16>
    %c0_115 = arith.constant 0 : index
    %c216 = arith.constant 216 : index
    %203 = vector.load %arg20[%c0_115, %c216] : memref<256x600xbf16, #tpu.memory_space<vmem>>, vector<256x24xbf16>
    tpu.vector_store %arg20[%c0_115, %c216], %202 {strides = array<i32>} : memref<256x600xbf16, #tpu.memory_space<vmem>>, vector<256x24xbf16>,
    %c76 = arith.constant 76 : index
    %c0_116 = arith.constant 0 : index
    %204 = vector.load %arg19[%c76, %c0_116] : memref<416x24xf32, #tpu.memory_space<vmem>>, vector<256x24xf32>
    %cst_117 = arith.constant 0.000000e+00 : f32
    %205 = vector.shape_cast %24 : vector<256x1xi1> to vector<256x1xi1>
    %206 = vector.broadcast %205 : vector<256x1xi1> to vector<256x24xi1>
    %207 = vector.broadcast %cst_117 : f32 to vector<256x24xf32>
    %208 = arith.select %206, %204, %207 : vector<256x24xi1>, vector<256x24xf32>
    %209 = arith.truncf %208 : vector<256x24xf32> to vector<256x24xbf16>
    %c0_118 = arith.constant 0 : index
    %c240 = arith.constant 240 : index
    %210 = vector.load %arg20[%c0_118, %c240] : memref<256x600xbf16, #tpu.memory_space<vmem>>, vector<256x24xbf16>
    tpu.vector_store %arg20[%c0_118, %c240], %209 {strides = array<i32>} : memref<256x600xbf16, #tpu.memory_space<vmem>>, vector<256x24xbf16>,
    %c78 = arith.constant 78 : index
    %c0_119 = arith.constant 0 : index
    %211 = vector.load %arg19[%c78, %c0_119] : memref<416x24xf32, #tpu.memory_space<vmem>>, vector<256x24xf32>
    %cst_120 = arith.constant 0.000000e+00 : f32
    %212 = vector.shape_cast %33 : vector<256x1xi1> to vector<256x1xi1>
    %213 = vector.broadcast %212 : vector<256x1xi1> to vector<256x24xi1>
    %214 = vector.broadcast %cst_120 : f32 to vector<256x24xf32>
    %215 = arith.select %213, %211, %214 : vector<256x24xi1>, vector<256x24xf32>
    %216 = arith.truncf %215 : vector<256x24xf32> to vector<256x24xbf16>
    %c0_121 = arith.constant 0 : index
    %c264 = arith.constant 264 : index
    %217 = vector.load %arg20[%c0_121, %c264] : memref<256x600xbf16, #tpu.memory_space<vmem>>, vector<256x24xbf16>
    tpu.vector_store %arg20[%c0_121, %c264], %216 {strides = array<i32>} : memref<256x600xbf16, #tpu.memory_space<vmem>>, vector<256x24xbf16>,
    %c80_122 = arith.constant 80 : index
    %c0_123 = arith.constant 0 : index
    %218 = vector.load %arg19[%c80_122, %c0_123] : memref<416x24xf32, #tpu.memory_space<vmem>>, vector<256x24xf32>
    %219 = arith.truncf %218 : vector<256x24xf32> to vector<256x24xbf16>
    %c0_124 = arith.constant 0 : index
    %c288 = arith.constant 288 : index
    %220 = vector.load %arg20[%c0_124, %c288] : memref<256x600xbf16, #tpu.memory_space<vmem>>, vector<256x24xbf16>
    tpu.vector_store %arg20[%c0_124, %c288], %219 {strides = array<i32>} : memref<256x600xbf16, #tpu.memory_space<vmem>>, vector<256x24xbf16>,
    %c82 = arith.constant 82 : index
    %c0_125 = arith.constant 0 : index
    %221 = vector.load %arg19[%c82, %c0_125] : memref<416x24xf32, #tpu.memory_space<vmem>>, vector<256x24xf32>
    %cst_126 = arith.constant 0.000000e+00 : f32
    %222 = vector.shape_cast %60 : vector<256x1xi1> to vector<256x1xi1>
    %223 = vector.broadcast %222 : vector<256x1xi1> to vector<256x24xi1>
    %224 = vector.broadcast %cst_126 : f32 to vector<256x24xf32>
    %225 = arith.select %223, %221, %224 : vector<256x24xi1>, vector<256x24xf32>
    %226 = arith.truncf %225 : vector<256x24xf32> to vector<256x24xbf16>
    %c0_127 = arith.constant 0 : index
    %c312 = arith.constant 312 : index
    %227 = vector.load %arg20[%c0_127, %c312] : memref<256x600xbf16, #tpu.memory_space<vmem>>, vector<256x24xbf16>
    tpu.vector_store %arg20[%c0_127, %c312], %226 {strides = array<i32>} : memref<256x600xbf16, #tpu.memory_space<vmem>>, vector<256x24xbf16>,
    %c84 = arith.constant 84 : index
    %c0_128 = arith.constant 0 : index
    %228 = vector.load %arg19[%c84, %c0_128] : memref<416x24xf32, #tpu.memory_space<vmem>>, vector<256x24xf32>
    %cst_129 = arith.constant 0.000000e+00 : f32
    %229 = vector.shape_cast %69 : vector<256x1xi1> to vector<256x1xi1>
    %230 = vector.broadcast %229 : vector<256x1xi1> to vector<256x24xi1>
    %231 = vector.broadcast %cst_129 : f32 to vector<256x24xf32>
    %232 = arith.select %230, %228, %231 : vector<256x24xi1>, vector<256x24xf32>
    %233 = arith.truncf %232 : vector<256x24xf32> to vector<256x24xbf16>
    %c0_130 = arith.constant 0 : index
    %c336_131 = arith.constant 336 : index
    %234 = vector.load %arg20[%c0_130, %c336_131] : memref<256x600xbf16, #tpu.memory_space<vmem>>, vector<256x24xbf16>
    tpu.vector_store %arg20[%c0_130, %c336_131], %233 {strides = array<i32>} : memref<256x600xbf16, #tpu.memory_space<vmem>>, vector<256x24xbf16>,
    %c108 = arith.constant 108 : index
    %c0_132 = arith.constant 0 : index
    %235 = vector.load %arg19[%c108, %c0_132] : memref<416x24xf32, #tpu.memory_space<vmem>>, vector<256x24xf32>
    %cst_133 = arith.constant 0.000000e+00 : f32
    %236 = vector.shape_cast %24 : vector<256x1xi1> to vector<256x1xi1>
    %237 = vector.broadcast %236 : vector<256x1xi1> to vector<256x24xi1>
    %238 = vector.broadcast %cst_133 : f32 to vector<256x24xf32>
    %239 = arith.select %237, %235, %238 : vector<256x24xi1>, vector<256x24xf32>
    %240 = arith.truncf %239 : vector<256x24xf32> to vector<256x24xbf16>
    %c0_134 = arith.constant 0 : index
    %c360 = arith.constant 360 : index
    %241 = vector.load %arg20[%c0_134, %c360] : memref<256x600xbf16, #tpu.memory_space<vmem>>, vector<256x24xbf16>
    tpu.vector_store %arg20[%c0_134, %c360], %240 {strides = array<i32>} : memref<256x600xbf16, #tpu.memory_space<vmem>>, vector<256x24xbf16>,
    %c110 = arith.constant 110 : index
    %c0_135 = arith.constant 0 : index
    %242 = vector.load %arg19[%c110, %c0_135] : memref<416x24xf32, #tpu.memory_space<vmem>>, vector<256x24xf32>
    %cst_136 = arith.constant 0.000000e+00 : f32
    %243 = vector.shape_cast %33 : vector<256x1xi1> to vector<256x1xi1>
    %244 = vector.broadcast %243 : vector<256x1xi1> to vector<256x24xi1>
    %245 = vector.broadcast %cst_136 : f32 to vector<256x24xf32>
    %246 = arith.select %244, %242, %245 : vector<256x24xi1>, vector<256x24xf32>
    %247 = arith.truncf %246 : vector<256x24xf32> to vector<256x24xbf16>
    %c0_137 = arith.constant 0 : index
    %c384 = arith.constant 384 : index
    %248 = vector.load %arg20[%c0_137, %c384] : memref<256x600xbf16, #tpu.memory_space<vmem>>, vector<256x24xbf16>
    tpu.vector_store %arg20[%c0_137, %c384], %247 {strides = array<i32>} : memref<256x600xbf16, #tpu.memory_space<vmem>>, vector<256x24xbf16>,
    %c112 = arith.constant 112 : index
    %c0_138 = arith.constant 0 : index
    %249 = vector.load %arg19[%c112, %c0_138] : memref<416x24xf32, #tpu.memory_space<vmem>>, vector<256x24xf32>
    %250 = arith.truncf %249 : vector<256x24xf32> to vector<256x24xbf16>
    %c0_139 = arith.constant 0 : index
    %c408 = arith.constant 408 : index
    %251 = vector.load %arg20[%c0_139, %c408] : memref<256x600xbf16, #tpu.memory_space<vmem>>, vector<256x24xbf16>
    tpu.vector_store %arg20[%c0_139, %c408], %250 {strides = array<i32>} : memref<256x600xbf16, #tpu.memory_space<vmem>>, vector<256x24xbf16>,
    %c114 = arith.constant 114 : index
    %c0_140 = arith.constant 0 : index
    %252 = vector.load %arg19[%c114, %c0_140] : memref<416x24xf32, #tpu.memory_space<vmem>>, vector<256x24xf32>
    %cst_141 = arith.constant 0.000000e+00 : f32
    %253 = vector.shape_cast %60 : vector<256x1xi1> to vector<256x1xi1>
    %254 = vector.broadcast %253 : vector<256x1xi1> to vector<256x24xi1>
    %255 = vector.broadcast %cst_141 : f32 to vector<256x24xf32>
    %256 = arith.select %254, %252, %255 : vector<256x24xi1>, vector<256x24xf32>
    %257 = arith.truncf %256 : vector<256x24xf32> to vector<256x24xbf16>
    %c0_142 = arith.constant 0 : index
    %c432 = arith.constant 432 : index
    %258 = vector.load %arg20[%c0_142, %c432] : memref<256x600xbf16, #tpu.memory_space<vmem>>, vector<256x24xbf16>
    tpu.vector_store %arg20[%c0_142, %c432], %257 {strides = array<i32>} : memref<256x600xbf16, #tpu.memory_space<vmem>>, vector<256x24xbf16>,
    %c116 = arith.constant 116 : index
    %c0_143 = arith.constant 0 : index
    %259 = vector.load %arg19[%c116, %c0_143] : memref<416x24xf32, #tpu.memory_space<vmem>>, vector<256x24xf32>
    %cst_144 = arith.constant 0.000000e+00 : f32
    %260 = vector.shape_cast %69 : vector<256x1xi1> to vector<256x1xi1>
    %261 = vector.broadcast %260 : vector<256x1xi1> to vector<256x24xi1>
    %262 = vector.broadcast %cst_144 : f32 to vector<256x24xf32>
    %263 = arith.select %261, %259, %262 : vector<256x24xi1>, vector<256x24xf32>
    %264 = arith.truncf %263 : vector<256x24xf32> to vector<256x24xbf16>
    %c0_145 = arith.constant 0 : index
    %c456 = arith.constant 456 : index
    %265 = vector.load %arg20[%c0_145, %c456] : memref<256x600xbf16, #tpu.memory_space<vmem>>, vector<256x24xbf16>
    tpu.vector_store %arg20[%c0_145, %c456], %264 {strides = array<i32>} : memref<256x600xbf16, #tpu.memory_space<vmem>>, vector<256x24xbf16>,
    %c140 = arith.constant 140 : index
    %c0_146 = arith.constant 0 : index
    %266 = vector.load %arg19[%c140, %c0_146] : memref<416x24xf32, #tpu.memory_space<vmem>>, vector<256x24xf32>
    %cst_147 = arith.constant 0.000000e+00 : f32
    %267 = vector.shape_cast %24 : vector<256x1xi1> to vector<256x1xi1>
    %268 = vector.broadcast %267 : vector<256x1xi1> to vector<256x24xi1>
    %269 = vector.broadcast %cst_147 : f32 to vector<256x24xf32>
    %270 = arith.select %268, %266, %269 : vector<256x24xi1>, vector<256x24xf32>
    %271 = arith.truncf %270 : vector<256x24xf32> to vector<256x24xbf16>
    %c0_148 = arith.constant 0 : index
    %c480 = arith.constant 480 : index
    %272 = vector.load %arg20[%c0_148, %c480] : memref<256x600xbf16, #tpu.memory_space<vmem>>, vector<256x24xbf16>
    tpu.vector_store %arg20[%c0_148, %c480], %271 {strides = array<i32>} : memref<256x600xbf16, #tpu.memory_space<vmem>>, vector<256x24xbf16>,
    %c142 = arith.constant 142 : index
    %c0_149 = arith.constant 0 : index
    %273 = vector.load %arg19[%c142, %c0_149] : memref<416x24xf32, #tpu.memory_space<vmem>>, vector<256x24xf32>
    %cst_150 = arith.constant 0.000000e+00 : f32
    %274 = vector.shape_cast %33 : vector<256x1xi1> to vector<256x1xi1>
    %275 = vector.broadcast %274 : vector<256x1xi1> to vector<256x24xi1>
    %276 = vector.broadcast %cst_150 : f32 to vector<256x24xf32>
    %277 = arith.select %275, %273, %276 : vector<256x24xi1>, vector<256x24xf32>
    %278 = arith.truncf %277 : vector<256x24xf32> to vector<256x24xbf16>
    %c0_151 = arith.constant 0 : index
    %c504 = arith.constant 504 : index
    %279 = vector.load %arg20[%c0_151, %c504] : memref<256x600xbf16, #tpu.memory_space<vmem>>, vector<256x24xbf16>
    tpu.vector_store %arg20[%c0_151, %c504], %278 {strides = array<i32>} : memref<256x600xbf16, #tpu.memory_space<vmem>>, vector<256x24xbf16>,
    %c144_152 = arith.constant 144 : index
    %c0_153 = arith.constant 0 : index
    %280 = vector.load %arg19[%c144_152, %c0_153] : memref<416x24xf32, #tpu.memory_space<vmem>>, vector<256x24xf32>
    %281 = arith.truncf %280 : vector<256x24xf32> to vector<256x24xbf16>
    %c0_154 = arith.constant 0 : index
    %c528 = arith.constant 528 : index
    %282 = vector.load %arg20[%c0_154, %c528] : memref<256x600xbf16, #tpu.memory_space<vmem>>, vector<256x24xbf16>
    tpu.vector_store %arg20[%c0_154, %c528], %281 {strides = array<i32>} : memref<256x600xbf16, #tpu.memory_space<vmem>>, vector<256x24xbf16>,
    %c146 = arith.constant 146 : index
    %c0_155 = arith.constant 0 : index
    %283 = vector.load %arg19[%c146, %c0_155] : memref<416x24xf32, #tpu.memory_space<vmem>>, vector<256x24xf32>
    %cst_156 = arith.constant 0.000000e+00 : f32
    %284 = vector.shape_cast %60 : vector<256x1xi1> to vector<256x1xi1>
    %285 = vector.broadcast %284 : vector<256x1xi1> to vector<256x24xi1>
    %286 = vector.broadcast %cst_156 : f32 to vector<256x24xf32>
    %287 = arith.select %285, %283, %286 : vector<256x24xi1>, vector<256x24xf32>
    %288 = arith.truncf %287 : vector<256x24xf32> to vector<256x24xbf16>
    %c0_157 = arith.constant 0 : index
    %c552 = arith.constant 552 : index
    %289 = vector.load %arg20[%c0_157, %c552] : memref<256x600xbf16, #tpu.memory_space<vmem>>, vector<256x24xbf16>
    tpu.vector_store %arg20[%c0_157, %c552], %288 {strides = array<i32>} : memref<256x600xbf16, #tpu.memory_space<vmem>>, vector<256x24xbf16>,
    %c148 = arith.constant 148 : index
    %c0_158 = arith.constant 0 : index
    %290 = vector.load %arg19[%c148, %c0_158] : memref<416x24xf32, #tpu.memory_space<vmem>>, vector<256x24xf32>
    %cst_159 = arith.constant 0.000000e+00 : f32
    %291 = vector.shape_cast %69 : vector<256x1xi1> to vector<256x1xi1>
    %292 = vector.broadcast %291 : vector<256x1xi1> to vector<256x24xi1>
    %293 = vector.broadcast %cst_159 : f32 to vector<256x24xf32>
    %294 = arith.select %292, %290, %293 : vector<256x24xi1>, vector<256x24xf32>
    %295 = arith.truncf %294 : vector<256x24xf32> to vector<256x24xbf16>
    %c0_160 = arith.constant 0 : index
    %c576 = arith.constant 576 : index
    %296 = vector.load %arg20[%c0_160, %c576] : memref<256x600xbf16, #tpu.memory_space<vmem>>, vector<256x24xbf16>
    tpu.vector_store %arg20[%c0_160, %c576], %295 {strides = array<i32>} : memref<256x600xbf16, #tpu.memory_space<vmem>>, vector<256x24xbf16>,
    %c0_161 = arith.constant 0 : index
    %c0_162 = arith.constant 0 : index
    %297 = vector.load %arg20[%c0_161, %c0_162] : memref<256x600xbf16, #tpu.memory_space<vmem>>, vector<256x600xbf16>
    %c0_163 = arith.constant 0 : index
    %c0_164 = arith.constant 0 : index
    %298 = vector.load %arg8[%c0_163, %c0_164] : memref<600x24xbf16, #tpu.memory_space<vmem>>, vector<600x24xbf16>
    %cst_165 = arith.constant dense<0.000000e+00> : vector<256x24xf32>
    %299 = tpu.matmul %297, %298, %cst_165 {dimension_numbers = #tpu.dot_dimension_numbers<[1], [0], [0], [1], [0, 0, 1, 1], [], []>} : vector<256x600xbf16>, vector<600x24xbf16>, vector<256x24xf32> -> vector<256x24xf32>
    %c0_166 = arith.constant 0 : index
    %c0_167 = arith.constant 0 : index
    %300 = vector.load %arg9[%c0_166, %c0_167] : memref<1x24xf32, #tpu.memory_space<vmem>>, vector<1x24xf32>
    %301 = vector.broadcast %300 : vector<1x24xf32> to vector<256x24xf32>
    %302 = arith.mulf %299, %301 : vector<256x24xf32>
    %c0_168 = arith.constant 0 : index
    %c0_169 = arith.constant 0 : index
    %303 = vector.load %arg10[%c0_168, %c0_169] : memref<1x24xf32, #tpu.memory_space<vmem>>, vector<1x24xf32>
    %304 = vector.broadcast %303 : vector<1x24xf32> to vector<256x24xf32>
    %305 = arith.addf %302, %304 : vector<256x24xf32>
    %cst_170 = arith.constant 0.000000e+00 : f32
    %306 = vector.broadcast %cst_170 : f32 to vector<256x24xf32>
    %307 = arith.maximumf %305, %306 : vector<256x24xf32>
    %c0_171 = arith.constant 0 : index
    %c24_172 = arith.constant 24 : index
    %308 = vector.load %arg18[%c0_171, %c24_172] : memref<256x96xf32, #tpu.memory_space<vmem>>, vector<256x24xf32>
    tpu.vector_store %arg18[%c0_171, %c24_172], %307 {strides = array<i32>} : memref<256x96xf32, #tpu.memory_space<vmem>>, vector<256x24xf32>,
    %c0_173 = arith.constant 0 : index
    %c48_174 = arith.constant 48 : index
    %309 = vector.load %arg18[%c0_173, %c48_174] : memref<256x96xf32, #tpu.memory_space<vmem>>, vector<256x24xf32>
    %310 = arith.addf %307, %309 : vector<256x24xf32>
    %311 = arith.truncf %310 : vector<256x24xf32> to vector<256x24xbf16>
    %c0_175 = arith.constant 0 : index
    %c0_176 = arith.constant 0 : index
    %312 = vector.load %arg11[%c0_175, %c0_176] : memref<24x24xbf16, #tpu.memory_space<vmem>>, vector<24x24xbf16>
    %cst_177 = arith.constant dense<0.000000e+00> : vector<256x24xf32>
    %313 = tpu.matmul %311, %312, %cst_177 {dimension_numbers = #tpu.dot_dimension_numbers<[1], [0], [0], [1], [0, 0, 1, 1], [], []>} : vector<256x24xbf16>, vector<24x24xbf16>, vector<256x24xf32> -> vector<256x24xf32>
    %c0_178 = arith.constant 0 : index
    %c0_179 = arith.constant 0 : index
    %314 = vector.load %arg12[%c0_178, %c0_179] : memref<1x24xf32, #tpu.memory_space<vmem>>, vector<1x24xf32>
    %315 = vector.broadcast %314 : vector<1x24xf32> to vector<256x24xf32>
    %316 = arith.mulf %313, %315 : vector<256x24xf32>
    %c0_180 = arith.constant 0 : index
    %c0_181 = arith.constant 0 : index
    %317 = vector.load %arg13[%c0_180, %c0_181] : memref<1x24xf32, #tpu.memory_space<vmem>>, vector<1x24xf32>
    %318 = vector.broadcast %317 : vector<1x24xf32> to vector<256x24xf32>
    %319 = arith.addf %316, %318 : vector<256x24xf32>
    %cst_182 = arith.constant 0.000000e+00 : f32
    %320 = vector.broadcast %cst_182 : f32 to vector<256x24xf32>
    %321 = arith.maximumf %319, %320 : vector<256x24xf32>
    %c0_183 = arith.constant 0 : index
    %c48_184 = arith.constant 48 : index
    %322 = vector.load %arg18[%c0_183, %c48_184] : memref<256x96xf32, #tpu.memory_space<vmem>>, vector<256x24xf32>
    tpu.vector_store %arg18[%c0_183, %c48_184], %321 {strides = array<i32>} : memref<256x96xf32, #tpu.memory_space<vmem>>, vector<256x24xf32>,
    %c0_185 = arith.constant 0 : index
    %c0_186 = arith.constant 0 : index
    %323 = vector.load %arg18[%c0_185, %c0_186] : memref<256x96xf32, #tpu.memory_space<vmem>>, vector<256x96xf32>
    %324 = arith.truncf %323 : vector<256x96xf32> to vector<256x96xbf16>
    %c0_187 = arith.constant 0 : index
    %c0_188 = arith.constant 0 : index
    %325 = vector.load %arg14[%c0_187, %c0_188] : memref<8x96xbf16, #tpu.memory_space<vmem>>, vector<8x96xbf16>
    %cst_189 = arith.constant dense<0.000000e+00> : vector<8x256xf32>
    %326 = tpu.matmul %325, %324, %cst_189 {dimension_numbers = #tpu.dot_dimension_numbers<[1], [1], [0], [0], [0, 0, 1, 0], [], []>} : vector<8x96xbf16>, vector<256x96xbf16>, vector<8x256xf32> -> vector<8x256xf32>
    %c0_190 = arith.constant 0 : index
    %c0_191 = arith.constant 0 : index
    %327 = vector.load %arg15[%c0_190, %c0_191] : memref<8x1xf32, #tpu.memory_space<vmem>>, vector<8x1xf32>
    %328 = vector.broadcast %327 : vector<8x1xf32> to vector<8x256xf32>
    %329 = arith.mulf %326, %328 : vector<8x256xf32>
    %c0_192 = arith.constant 0 : index
    %c0_193 = arith.constant 0 : index
    %330 = vector.load %arg16[%c0_192, %c0_193] : memref<8x1xf32, #tpu.memory_space<vmem>>, vector<8x1xf32>
    %331 = vector.broadcast %330 : vector<8x1xf32> to vector<8x256xf32>
    %332 = arith.addf %329, %331 : vector<8x256xf32>
    %c0_194 = arith.constant 0 : index
    %c0_195 = arith.constant 0 : index
    %c0_196 = arith.constant 0 : index
    %333 = vector.load %arg17[%c0_194, %c0_195, %c0_196] : memref<1x8x256xf32, #tpu.memory_space<vmem>>, vector<1x8x256xf32>
    %334 = vector.shape_cast %333 : vector<1x8x256xf32> to vector<8x256xf32>
    %335 = vector.shape_cast %332 : vector<8x256xf32> to vector<1x8x256xf32>
    tpu.vector_store %arg17[%c0_194, %c0_195, %c0_196], %335 {strides = array<i32>} : memref<1x8x256xf32, #tpu.memory_space<vmem>>, vector<1x8x256xf32>,
    return
  }
  func.func @transform_0(%arg0: i32) -> (i32, i32, i32) {
    %c0_i32 = arith.constant 0 : i32
    %c0_i32_0 = arith.constant 0 : i32
    %c0_i32_1 = arith.constant 0 : i32
    return %arg0, %c0_i32, %c0_i32_0 : i32, i32, i32
  }
  func.func @transform_1(%arg0: i32) -> (i32, i32) {
    %c0_i32 = arith.constant 0 : i32
    %c0_i32_0 = arith.constant 0 : i32
    %c0_i32_1 = arith.constant 0 : i32
    return %c0_i32, %c0_i32_0 : i32, i32
  }
  func.func @transform_2(%arg0: i32) -> (i32, i32) {
    %c0_i32 = arith.constant 0 : i32
    %c0_i32_0 = arith.constant 0 : i32
    %c0_i32_1 = arith.constant 0 : i32
    return %c0_i32, %c0_i32_0 : i32, i32
  }
  func.func @transform_3(%arg0: i32) -> (i32, i32) {
    %c0_i32 = arith.constant 0 : i32
    %c0_i32_0 = arith.constant 0 : i32
    %c0_i32_1 = arith.constant 0 : i32
    return %c0_i32, %c0_i32_0 : i32, i32
  }
  func.func @transform_4(%arg0: i32) -> (i32, i32) {
    %c0_i32 = arith.constant 0 : i32
    %c0_i32_0 = arith.constant 0 : i32
    %c0_i32_1 = arith.constant 0 : i32
    return %c0_i32, %c0_i32_0 : i32, i32
  }
  func.func @transform_5(%arg0: i32) -> (i32, i32) {
    %c0_i32 = arith.constant 0 : i32
    %c0_i32_0 = arith.constant 0 : i32
    %c0_i32_1 = arith.constant 0 : i32
    return %c0_i32, %c0_i32_0 : i32, i32
  }
  func.func @transform_6(%arg0: i32) -> (i32, i32) {
    %c0_i32 = arith.constant 0 : i32
    %c0_i32_0 = arith.constant 0 : i32
    %c0_i32_1 = arith.constant 0 : i32
    return %c0_i32, %c0_i32_0 : i32, i32
  }
  func.func @transform_7(%arg0: i32) -> (i32, i32) {
    %c0_i32 = arith.constant 0 : i32
    %c0_i32_0 = arith.constant 0 : i32
    %c0_i32_1 = arith.constant 0 : i32
    return %c0_i32, %c0_i32_0 : i32, i32
  }
  func.func @transform_8(%arg0: i32) -> (i32, i32) {
    %c0_i32 = arith.constant 0 : i32
    %c0_i32_0 = arith.constant 0 : i32
    %c0_i32_1 = arith.constant 0 : i32
    return %c0_i32, %c0_i32_0 : i32, i32
  }
  func.func @transform_9(%arg0: i32) -> (i32, i32) {
    %c0_i32 = arith.constant 0 : i32
    %c0_i32_0 = arith.constant 0 : i32
    %c0_i32_1 = arith.constant 0 : i32
    return %c0_i32, %c0_i32_0 : i32, i32
  }
  func.func @transform_10(%arg0: i32) -> (i32, i32) {
    %c0_i32 = arith.constant 0 : i32
    %c0_i32_0 = arith.constant 0 : i32
    %c0_i32_1 = arith.constant 0 : i32
    return %c0_i32, %c0_i32_0 : i32, i32
  }
  func.func @transform_11(%arg0: i32) -> (i32, i32) {
    %c0_i32 = arith.constant 0 : i32
    %c0_i32_0 = arith.constant 0 : i32
    %c0_i32_1 = arith.constant 0 : i32
    return %c0_i32, %c0_i32_0 : i32, i32
  }
  func.func @transform_12(%arg0: i32) -> (i32, i32) {
    %c0_i32 = arith.constant 0 : i32
    %c0_i32_0 = arith.constant 0 : i32
    %c0_i32_1 = arith.constant 0 : i32
    return %c0_i32, %c0_i32_0 : i32, i32
  }
  func.func @transform_13(%arg0: i32) -> (i32, i32) {
    %c0_i32 = arith.constant 0 : i32
    %c0_i32_0 = arith.constant 0 : i32
    %c0_i32_1 = arith.constant 0 : i32
    return %c0_i32, %c0_i32_0 : i32, i32
  }
  func.func @transform_14(%arg0: i32) -> (i32, i32) {
    %c0_i32 = arith.constant 0 : i32
    %c0_i32_0 = arith.constant 0 : i32
    %c0_i32_1 = arith.constant 0 : i32
    return %c0_i32, %c0_i32_0 : i32, i32
  }
  func.func @transform_15(%arg0: i32) -> (i32, i32) {
    %c0_i32 = arith.constant 0 : i32
    %c0_i32_0 = arith.constant 0 : i32
    %c0_i32_1 = arith.constant 0 : i32
    return %c0_i32, %c0_i32_0 : i32, i32
  }
  func.func @transform_16(%arg0: i32) -> (i32, i32, i32) {
    %c0_i32 = arith.constant 0 : i32
    %c0_i32_0 = arith.constant 0 : i32
    %c0_i32_1 = arith.constant 0 : i32
    return %arg0, %c0_i32, %c0_i32_0 : i32, i32, i32
  }
}

</mosaic_0001>

<bundles_post_ra>
// kernel: _lambda_.1
= control target key start
LH: loop header
LB: loop body
LE: loop exit
PB: predicated region body
PF: predicated region fallthrough
CT: control target
= control target key end

     0   :  { %s11004_s21 = smov 0   ;;  %s16530_s0 = inlined_call_operand.vmem [shape: bf16[2,256,8], index: 0, kind: input, shape index: {}]   ;;  %s16531_s1 = inlined_call_operand.vmem [shape: bf16[8,96], index: 1, kind: input, shape index: {}]   ;;  %s16532_s2 = inlined_call_operand.vmem [shape: f32[1,96], index: 2, kind: input, shape index: {}]   ;;  %s16533_s3 = inlined_call_operand.vmem [shape: f32[1,96], index: 3, kind: input, shape index: {}]   ;;  %s16534_s4 = inlined_call_operand.vmem [shape: bf16[216,24], index: 4, kind: input, shape index: {}]   ;;  %s16535_s5 = inlined_call_operand.vmem [shape: f32[1,24], index: 5, kind: input, shape index: {}]   ;;  %s16536_s6 = inlined_call_operand.vmem [shape: f32[1,24], index: 6, kind: input, shape index: {}]   ;;  %s16537_s7 = inlined_call_operand.vmem [shape: bf16[600,24], index: 7, kind: input, shape index: {}]   ;;  %s16538_s8 = inlined_call_operand.vmem [shape: f32[1,24], index: 8, kind: input, shape index: {}]   ;;  %s16539_s9 = inlined_call_operand.vmem [shape: f32[1,24], index: 9, kind: input, shape index: {}]   ;;  %s16540_s10 = inlined_call_operand.vmem [shape: bf16[24,24], index: 10, kind: input, shape index: {}]   ;;  %s16541_s11 = inlined_call_operand.vmem [shape: f32[1,24], index: 11, kind: input, shape index: {}]   ;;  %s16542_s12 = inlined_call_operand.vmem [shape: f32[1,24], index: 12, kind: input, shape index: {}]   ;;  %s16543_s13 = inlined_call_operand.vmem [shape: bf16[8,96], index: 13, kind: input, shape index: {}]   ;;  %s16544_s14 = inlined_call_operand.vmem [shape: f32[8,1], index: 14, kind: input, shape index: {}]   ;;  %s16545_s15 = inlined_call_operand.vmem [shape: f32[8,1], index: 15, kind: input, shape index: {}]   ;;  %s16546_s16 = inlined_call_operand.vmem [shape: f32[2,8,256], index: 16, kind: output, shape index: {}]  }
   0x1   :  { %16896 = sst [smem:[#allocation91_spill]] %s16530_s0 }
   0x2   :  { %16897 = sst [smem:[#allocation92_spill]] %s16531_s1 }
   0x3   :  { %16898 = sst [smem:[#allocation93_spill]] %s16532_s2 }
   0x4   :  { %16899 = sst [smem:[#allocation94_spill]] %s16533_s3 }
   0x5   :  { %16900 = sst [smem:[#allocation95_spill]] %s16534_s4 }
   0x6   :  { %16901 = sst [smem:[#allocation96_spill]] %s16535_s5 }
   0x7   :  { %16902 = sst [smem:[#allocation97_spill]] %s16536_s6 }
   0x8 LB: > { %s10186_s22 = sadd.s32 4294967295, %s10900_s21   ;;  %p10190_p0 = scmp.ge.s32.totalorder %s10900_s21, 1  ;;  %s10900_s21 = sphi %s11004_s21, %s26_s21  }
   0x9   : > { %p462_p1 = scmp.lt.s32.totalorder %s10900_s21, 3 }
   0xb   : > { %p463_p2 = pnand %p10190_p0, %p462_p1 }
   0xd   : > { %466 = sbr.rel (%p463_p2) target bundleno = 2788 (0xae4), region = 84 }
  0x14   : > { %s16903_s1 = sld [smem:[#allocation92_spill]]  ;;  %vm16559_vm0 = vcmask 1043456   ;;  %p512_p3 = scmp.lt.s32.totalorder %s10186_s22, 1  ;;  %vm16860_vm1 = vcmask 195584   ;;  %v10902_v2 = vmov 0.0   ;;  %v993_v3 = vlaneseq }
  0x15   : > { %1835 = vst.msk [vmem:[#allocation3 + $0x40] sm:$0xff] %vm16860_vm1, %v10902_v2  ;;  %1836 = vst.msk [vmem:[#allocation3 + $0x48] sm:$0xff] %vm16860_vm1, %v10902_v2  ;;  %s16904_s28 = sld [smem:[#allocation91_spill]]  ;;  %vm16555_vm2 = vcmask 64512   ;;  %s16826_s30 = smov 24   ;;  %vm16650_vm15 = vcmask 392384  }
  0x16   : > { %s17901_s22 = smov (!%p512_p3, %s10186_s22), 1  ;;  %1828 = vst.msk [vmem:[#allocation3 + $0x8] sm:$0xff] %vm16860_vm1, %v10902_v2  ;;  %1829 = vst.msk [vmem:[#allocation3 + $0x10] sm:$0xff] %vm16860_vm1, %v10902_v2  ;;  %v11047_v7 = vshrl.u32 %v993_v3, 7  ;;  %s16549_s0 = smov 120  }
  0x17   : > { %1830 = vst.msk [vmem:[#allocation3 + $0x18] sm:$0xff] %vm16860_vm1, %v10902_v2  ;;  %1831 = vst.msk [vmem:[#allocation3 + $0x20] sm:$0xff] %vm16860_vm1, %v10902_v2  ;;  %s10340_s25 = sshll.u32 %s17901_s22, 7  ;;  %s16701_s17 = smov 40  }
  0x18   : > { %1832 = vst.msk [vmem:[#allocation3 + $0x28] sm:$0xff] %vm16860_vm1, %v10902_v2  ;;  %1833 = vst.msk [vmem:[#allocation3 + $0x30] sm:$0xff] %vm16860_vm1, %v10902_v2  ;;  %v11052_v8 = vand.u32 15, %v11047_v7  ;;  %v995_v10 = vadd.s32 8, %v11047_v7  ;;  %v996_v12 = vadd.s32 16, %v11047_v7  ;;  %s16784_s18 = smov 16  }
  0x19   : > { %1834 = vst.msk [vmem:[#allocation3 + $0x38] sm:$0xff] %vm16860_vm1, %v10902_v2  ;;  %1837 = vst.msk [vmem:[#allocation3 + $0x150] sm:$0xff] %vm16860_vm1, %v10902_v2  ;;  %s16703_s19 = smov 48   ;;  %s16553_s20 = smov 72  }
  0x1a   : > { %v555_v0 = vld [vmem:[%s16903_s1] sm:$0xf]  ;;  %1838 = vst.msk [vmem:[#allocation3 + $0x158] sm:$0xff] %vm16860_vm1, %v10902_v2  ;;  %1839 = vst.msk [vmem:[#allocation3 + $0x160] sm:$0xff] %vm16860_vm1, %v10902_v2  ;;  %v11059_v13 = vadd.s32 4294967292, %v11052_v8  ;;  %v11062_v14 = vand.u32 15, %v995_v10 }
  0x1b   : > { %10755 = vmatprep.subr.msk.bf16.mxu0 %vm16559_vm0, %v555_v0  ;;  %v687_v1 = vsel %vm16559_vm0, %v555_v0, 0  ;;  %1840 = vst.msk [vmem:[#allocation3 + $0x168] sm:$0xff] %vm16860_vm1, %v10902_v2  ;;  %1841 = vst.msk [vmem:[#allocation3 + $0x170] sm:$0xff] %vm16860_vm1, %v10902_v2  ;;  %s11041_s29 = scalar_lea.vmem %s16904_s28, %s10340_s25  ;;  %v11065_v15 = vand.u32 15, %v996_v12  ;;  %v11069_v17 = vadd.s32 4294967294, %v11052_v8  ;;  %s16800_s23 = smov 96  }
  0x1c   : > { %10642 = vmatpush3.bf16.msra.mxu0 %v687_v1  ;;  %1842 = vst.msk [vmem:[#allocation3 + $0x178] sm:$0xff] %vm16860_vm1, %v10902_v2  ;;  %1843 = vst.msk [vmem:[#allocation3 + $0x180] sm:$0xff] %vm16860_vm1, %v10902_v2  ;;  %v10793_v4 = vld [vmem:[%s11041_s29] sm:$0xff]   ;;  %v10794_v5 = vld [vmem:[%s11041_s29 + $0x8] sm:$0xff]   ;;  %vm16634_vm3 = vcmp.ge.s32.totalorder %v11059_v13, 0  ;;  %v11074_v19 = vadd.s32 2, %v11062_v14 }
  0x1d   : > { %1844 = vst.msk [vmem:[#allocation3 + $0x188] sm:$0xff] %vm16860_vm1, %v10902_v2  ;;  %1845 = vst.msk [vmem:[#allocation3 + $0x190] sm:$0xff] %vm16860_vm1, %v10902_v2  ;;  %10643 = vmatprep.mubr.msk.bf16.mxu0 %vm16555_vm2, %v10793_v4  ;;  %v10795_v6 = vld [vmem:[%s11041_s29 + $0x10] sm:$0xff]   ;;  %v10796_v9 = vld [vmem:[%s11041_s29 + $0x18] sm:$0xff]   ;;  %v11077_v20 = vadd.s32 4, %v11062_v14  ;;  %v11082_v24 = vadd.s32 4294967292, %v11065_v15 }
  0x1e   : > { %v10797_v11 = vld [vmem:[%s11041_s29 + $0x20] sm:$0xff]   ;;  %16905 = vst [vmem:[#allocation5_spill] sm:$0xff] %v11059_v13  ;;  %v10798_v16 = vld [vmem:[%s11041_s29 + $0x28] sm:$0xff]   ;;  %16906 = vst [vmem:[#allocation6_spill] sm:$0xff] %v11069_v17  ;;  %v11085_v25 = vadd.s32 4294967294, %v11065_v15  ;;  %vm16562_vm4 = vcmp.ge.s32.totalorder %v11069_v17, 0 }
  0x1f   : > { %10644 = vmatmul.mubr.msk.bf16.vlgmr.msra.gmra.mrb[0].mxu0 %vm16555_vm2, %v10794_v5  ;;  %v10799_v18 = vld [vmem:[%s11041_s29 + $0x30] sm:$0xff]   ;;  %16907 = vst [vmem:[#allocation7_spill] sm:$0xff] %v11074_v19  ;;  %16908 = vst [vmem:[#allocation8_spill] sm:$0xff] %v11077_v20  ;;  %v2071_v21 = vld [vmem:[#allocation3 + $0x40] sm:$0xff]  ;;  %vm16556_vm5 = vcmp.lt.s32.totalorder %v11074_v19, 16  ;;  %vm16577_vm6 = vcmp.lt.s32.totalorder %v11077_v20, 16 }
  0x20   : > { %10647 = vmatprep.mubr.msk.bf16.mxu0 %vm16555_vm2, %v10795_v6  ;;  %v2072_v22 = vld [vmem:[#allocation3 + $0x48] sm:$0xff]  ;;  %16909 = vst [vmem:[#allocation9_spill] sm:$0xff] %v11082_v24  ;;  %16910 = vst [vmem:[#allocation10_spill] sm:$0xff] %v11085_v25  ;;  %v11089_v27 = vld [vmem:[#allocation3 + $0x34] sm:$0xff]  ;;  %vm16632_vm7 = vcmp.ge.s32.totalorder %v11082_v24, 0  ;;  %vm16561_vm8 = vcmp.ge.s32.totalorder %v11085_v25, 0 }
  0x21   : > { %v11079_v23 = vld [vmem:[#allocation3 + $0x2c] sm:$0xff]  ;;  %v11087_v26 = vpack.c.bf16 %v2072_v22, %v2071_v21  ;;  %v4224_v31 = vld [vmem:[#allocation3 + $0x16] sm:$0xff]  ;;  %v10801_v42 = vld [vmem:[%s11041_s29 + $0x40] sm:$0xff]   ;;  %v1025_v5 = vadd.s32 248, %v11047_v7  ;;  %v997_v10 = vadd.s32 24, %v11047_v7  ;;  %s16551_s24 = smov 64  }
  0x22   : > { %v5055_v28 = vsel %vm16634_vm3, %v11079_v23, 0.0  ;;  %v4223_v29 = vld [vmem:[#allocation3 + $0xe] sm:$0xff]  ;;  %v4576_v32 = vld [vmem:[#allocation3 + $0x1a] sm:$0xff]  ;;  %v5026_v59 = vld [vmem:[#allocation3 + $0x44] sm:$0xff]  ;;  %s16547_s25 = smov 88   ;;  %s16917_s4 = sld [smem:[#allocation95_spill]] }
  0x23   : > { %2135 = vrot.lane.b32.xlu0 %v11087_v26, %s16826_s30  ;;  %v5087_v30 = vpack.c.bf16 %v11089_v27, %v5055_v28  ;;  %v4800_v33 = vld [vmem:[#allocation3 + $0x1c] sm:$0xff]  ;;  %v4319_v34 = vsel %vm16562_vm4, %v4223_v29, 0.0  ;;  %v3084_v35 = vld [vmem:[#allocation3 + $0x150] sm:$0xff]  ;;  %v4672_v45 = vsel %vm16556_vm5, %v4576_v32, 0.0  ;;  %v10802_v55 = vld [vmem:[%s11041_s29 + $0x48] sm:$0xff]   ;;  %v11153_v6 = vand.u32 15, %v1025_v5 }
  0x24   : > { %v3085_v36 = vld [vmem:[#allocation3 + $0x158] sm:$0xff]  ;;  %v11109_v40 = vld [vmem:[#allocation3 + $0x2e] sm:$0xff]  ;;  %v4896_v46 = vsel %vm16577_vm6, %v4800_v33, 0.0  ;;  %v4351_v49 = vpack.c.bf16 %v4224_v31, %v4319_v34  ;;  %v10805_v62 = vld [vmem:[%s11041_s29 + $0x60] sm:$0xff]   ;;  %v11160_v12 = vand.u32 15, %v997_v10  ;;  %s16918_s2 = sld [smem:[#allocation93_spill]] }
  0x25   : > { %v11105_v37 = vld [vmem:[#allocation3 + $0x3c] sm:$0xff]  ;;  %v3101_v39 = vpack.c.bf16 %v3085_v36, %v3084_v35  ;;  %v4447_v43 = vld [vmem:[#allocation3 + $0x10] sm:$0xff]  ;;  %v5231_v47 = vsel %vm16562_vm4, %v11109_v40, 0.0  ;;  %v4226_v63 = vld [vmem:[#allocation3 + $0x26] sm:$0xff]  ;;  %16911 = vst [vmem:[#allocation11_spill] sm:$0xff] %v11153_v6  ;;  %s16919_s3 = sld [smem:[#allocation94_spill]] }
  0x26   : > { %v10800_v38 = vld [vmem:[%s11041_s29 + $0x38] sm:$0xff]   ;;  %v5057_v50 = vsel %vm16632_vm7, %v11105_v37, 0.0  ;;  %v10803_v56 = vld [vmem:[%s11041_s29 + $0x50] sm:$0xff]   ;;  %v10806_v2 = vld [vmem:[%s11041_s29 + $0x68] sm:$0xff]   ;;  %v11165_v29 = vadd.s32 2, %v11160_v12  ;;  %s16920_s28 = smov 72  }
  0x27   : > { %10648 = vmatmul.mubr.msk.bf16.gmra.mrb[4].mxu0 %vm16555_vm2, %v10796_v9  ;;  %v11111_v41 = vld [vmem:[#allocation3 + $0x36] sm:$0xff]  ;;  %v4225_v48 = vld [vmem:[#allocation3 + $0x1e] sm:$0xff]  ;;  %5119 = vrot.lane.b32.xlu0 %v5087_v30, %s16549_s0  ;;  %v5088_v0 = vpack.c.bf16 %v5026_v59, %v5057_v50  ;;  %v11156_v9 = vadd.s32 1, %v11153_v6  ;;  %v4450_v28 = vld [vmem:[#allocation3 + $0x28] sm:$0xff]  ;;  %s16922_s26 = smov 120   ;;  %s16968_s5 = sld [smem:[#allocation96_spill]] }
  0x28   : > { %10651 = vmatprep.mubr.msk.bf16.mxu0 %vm16555_vm2, %v10797_v11  ;;  %v4448_v44 = vld [vmem:[#allocation3 + $0x18] sm:$0xff]  ;;  %3148 = vrot.lane.b32.xlu1 %v3101_v39, %s16701_s17  ;;  %v4321_v51 = vsel %vm16561_vm8, %v4225_v48, 0.0  ;;  %v5263_v52 = vpack.c.bf16 %v11111_v41, %v5231_v47  ;;  %v10807_v3 = vld [vmem:[%s11041_s29 + $0x70] sm:$0xff]   ;;  %v4449_v21 = vld [vmem:[#allocation3 + $0x20] sm:$0xff]  ;;  %16912 = vst [vmem:[#allocation12_spill] sm:$0xff] %v11165_v29  ;;  %vm16558_vm10 = vcmp.lt.s32.totalorder %v11165_v29, 16 }
  0x29   : > { %v4575_v53 = vld [vmem:[#allocation3 + $0x12] sm:$0xff]  ;;  %v4479_v54 = vpack.c.bf16 %v4448_v44, %v4447_v43  ;;  %v4352_v1 = vpack.c.bf16 %v4226_v63, %v4321_v51  ;;  %vm16582_vm9 = vcmp.lt.s32.totalorder %v11156_v9, 16  ;;  %v4480_v30 = vpack.c.bf16 %v4450_v28, %v4449_v21  ;;  %v4578_v31 = vld [vmem:[#allocation3 + $0x2a] sm:$0xff]  ;;  %v4577_v34 = vld [vmem:[#allocation3 + $0x22] sm:$0xff]  ;;  %s16969_s6 = sld [smem:[#allocation97_spill]]  ;;  %s16790_s27 = smov 112  }
  0x2a   : > { %v4799_v57 = vld [vmem:[#allocation3 + $0x14] sm:$0xff]  ;;  %v4703_v58 = vpack.c.bf16 %v4672_v45, %v4575_v53  ;;  %v4674_v35 = vsel %vm16558_vm10, %v4578_v31, 0.0  ;;  %v11173_v39 = vadd.s32 4, %v11160_v12  ;;  %s17145_s1 = smov 32  }
  0x2b   : > { %4383 = vrot.lane.b32.xlu0 %v4351_v49, %s16826_s30  ;;  %v4927_v60 = vpack.c.bf16 %v4896_v46, %v4799_v57  ;;  %v10804_v61 = vld [vmem:[%s11041_s29 + $0x58] sm:$0xff]   ;;  %v5359_v32 = vld [vmem:[#allocation3 + $0x30] sm:$0xff]  ;;  %v4801_v46 = vld [vmem:[#allocation3 + $0x24] sm:$0xff] }
  0x2c   : > { %5295 = vrot.lane.b32.xlu1 %v5263_v52, %s16784_s18  ;;  %v10808_v4 = vld [vmem:[%s11041_s29 + $0x78] sm:$0xff]   ;;  %16913 = vst [vmem:[#allocation13_spill] sm:$0xff] %v11173_v39  ;;  %vm16564_vm11 = vcmp.lt.s32.totalorder %v11173_v39, 16  ;;  %v5680_v52 = vsel %vm16577_vm6, %v11105_v37, 0.0  ;;  %v5202_v37 = vld [vmem:[#allocation3 + $0x46] sm:$0xff]  ;;  %s16742_s29 = smov 104  }
  0x2d   : > { %v3214_v11 = vld [vmem:[#allocation3 + $0x159] sm:$0xff]  ;;  %v4898_v47 = vsel %vm16564_vm11, %v11079_v23, 0.0  ;;  %v5711_v53 = vpack.c.bf16 %v5680_v52, %v11089_v27 }
  0x2e   : > { %v5360_v33 = vld [vmem:[#allocation3 + $0x38] sm:$0xff]  ;;  %v4928_v50 = vpack.c.bf16 %v4898_v47, %v4801_v46 }
  0x2f   : > { %10652 = vmatmul.mubr.msk.bf16.gmra.mrb[8].mxu0 %vm16555_vm2, %v10798_v16  ;;  %4511 = vrot.lane.b32.xlu0 %v4479_v54, %s16703_s19  ;;  %v3213_v16 = vld [vmem:[#allocation3 + $0x151] sm:$0xff]  ;;  %v5391_v36 = vpack.c.bf16 %v5360_v33, %v5359_v32  ;;  %v5488_v43 = vld [vmem:[#allocation3 + $0x3a] sm:$0xff]  ;;  %v999_v54 = vadd.s32 40, %v11047_v7 }
  0x30   : > { %10655 = vmatprep.mubr.msk.bf16.mxu0 %vm16555_vm2, %v10799_v18  ;;  %v3246_v18 = vsel %vm16582_vm9, %v3214_v11, 0.0  ;;  %v5487_v44 = vld [vmem:[#allocation3 + $0x32] sm:$0xff]  ;;  %v5520_v45 = vsel %vm16556_vm5, %v5488_v43, 0.0  ;;  %v11252_v11 = vld [vmem:[%s16919_s3] ss:$0 sm:$0xff]  ;;  %s17193_s3 = smov 24  }
  0x31   : > { %v3262_v22 = vpack.c.bf16 %v3246_v18, %v3213_v16  ;;  %v5551_v49 = vpack.c.bf16 %v5520_v45, %v5487_v44  ;;  %v11202_v57 = vand.u32 15, %v999_v54  ;;  %v10812_v5 = vld [vmem:[%s16917_s4 + $0x18] sm:$0xff]   ;;  %v10813_v32 = vld [vmem:[%s16917_s4 + $0x20] sm:$0xff]  }
  0x33   : > { %4735 = vrot.lane.b32.xlu0 %v4703_v58, %s16553_s20  ;;  %3309 = vrot.lane.b32.xlu1 %v3262_v22, %s16551_s24  ;;  %16915 = vst [vmem:[#allocation15_spill] sm:$0xff] %v11202_v57  ;;  %v11208_v59 = vadd.s32 2, %v11202_v57 }
  0x35   : > { %16916 = vst [vmem:[#allocation16_spill] sm:$0xff] %v11208_v59  ;;  %vm16557_vm13 = vcmp.lt.s32.totalorder %v11208_v59, 16 }
  0x37   : > { %10656 = vmatmul.mubr.msk.bf16.gmra.mrb[12].mxu0 %vm16555_vm2, %v10800_v38  ;;  %4959 = vrot.lane.b32.xlu0 %v4927_v60, %s16800_s23  ;;  %v4704_v38 = vpack.c.bf16 %v4674_v35, %v4577_v34  ;;  %v11219_v60 = vadd.s32 4294967295, %v11052_v8  ;;  %v10912_v8 = vmov 0  }
  0x38   : > { %10659 = vmatprep.mubr.msk.bf16.mxu0 %vm16555_vm2, %v10801_v42  ;;  %v998_v42 = vadd.s32 32, %v11047_v7  ;;  %5423 = vrot.lane.b32.xlu1 %v5391_v36, %s16701_s17 }
  0x39   : > { %vm1346_vm14 = vcmp.ge.s32.totalorder %v11219_v60, 0  ;;  %3536 = vmatprep.subr.bf16.mxu1 %v10912_v8  ;;  %10791 = vset.pattern.permute.xlu0 %v10912_v8 }
  0x3a   : > { %v11184_v48 = vand.u32 15, %v998_v42  ;;  %10792 = vset.pattern.permute.xlu1 %v10912_v8 }
  0x3b   : > { %5121 = vrot.lane.b32.xlu0 %v5088_v0, %s16549_s0  ;;  %s16805_s0 = smov 32  }
  0x3c   : > { %v11187_v51 = vadd.s32 4294967294, %v11184_v48  ;;  %5583 = vrot.lane.b32.xlu1 %v5551_v49, %s16551_s24  ;;  %s17037_s24 = smov 88  }
  0x3e   : > { %16914 = vst [vmem:[#allocation14_spill] sm:$0xff] %v11187_v51  ;;  %vm16563_vm12 = vcmp.ge.s32.totalorder %v11187_v51, 0 }
  0x3f   : > { %10660 = vmatmul.mubr.msk.bf16.gmra.mrb[16].mxu0 %vm16555_vm2, %v10802_v55  ;;  %4385 = vrot.lane.b32.xlu0 %v4352_v1, %s16826_s30  ;;  %v4323_v23 = vsel %vm16563_vm12, %v11109_v40, 0.0  ;;  %v4676_v40 = vsel %vm16557_vm13, %v5488_v43, 0.0 }
  0x40   : > { %10663 = vmatprep.mubr.msk.bf16.mxu0 %vm16555_vm2, %v10803_v56  ;;  %v4353_v55 = vpack.c.bf16 %v11111_v41, %v4323_v23  ;;  %5743 = vrot.lane.b32.xlu1 %v5711_v53, %s16547_s25  ;;  %v5201_v56 = vld [vmem:[#allocation3 + $0x3e] sm:$0xff]  ;;  %v4705_v41 = vpack.c.bf16 %v4676_v40, %v5487_v44  ;;  %v10814_v44 = vld [vmem:[%s16917_s4 + $0x28] sm:$0xff]   ;;  %s16921_s25 = smov 64  }
  0x41   : > { %v5233_v27 = vsel %vm16561_vm8, %v5201_v56, 0.0 }
  0x42   : > { %v5264_v58 = vpack.c.bf16 %v5202_v37, %v5233_v27 }
  0x43   : > { %4513 = vrot.lane.b32.xlu0 %v4480_v30, %s16703_s19 }
  0x44   : > { %5297 = vrot.lane.b32.xlu1 %v5264_v58, %s16784_s18 }
  0x47   : > { %10664 = vmatmul.mubr.msk.bf16.gmra.mrb[20].mxu0 %vm16555_vm2, %v10804_v61  ;;  %4737 = vrot.lane.b32.xlu0 %v4704_v38, %s16553_s20  ;;  %v1911_v61 = vld [vmem:[#allocation3 + $0x3f] sm:$0xff] }
  0x48   : > { %10667 = vmatprep.mubr.msk.bf16.mxu0 %vm16555_vm2, %v10805_v62  ;;  %5425 = vrot.lane.b32.xlu1 %v11087_v26, %s16701_s17  ;;  %v1912_v62 = vld [vmem:[#allocation3 + $0x47] sm:$0xff]  ;;  %v2007_v63 = vsel %vm1346_vm14, %v1911_v61, 0.0  ;;  %v10815_v61 = vld [vmem:[%s16917_s4 + $0x30] sm:$0xff]  }
  0x49   : > { %v2039_v0 = vpack.c.bf16 %v1912_v62, %v2007_v63  ;;  %v10809_v26 = vld [vmem:[%s16917_s4] sm:$0xff]  }
  0x4a   : > { %3537 = vmatpush1.bf16.msra.mxu1 %v10809_v26 }
  0x4b   : > { %4961 = vrot.lane.b32.xlu0 %v4928_v50, %s16800_s23  ;;  %2055 = vst.msk [vmem:[#allocation4] sm:$0xff] %vm16860_vm1, %v2039_v0  ;;  %3538 = vmatprep.subr.bf16.mxu1 %v10912_v8 }
  0x4f   : > { %10668 = vmatmul.mubr.msk.bf16.gmra.mrb[24].mxu0 %vm16555_vm2, %v10806_v2  ;;  %4387 = vrot.lane.b32.xlu0 %v4353_v55, %s16826_s30  ;;  %v10810_v2 = vld [vmem:[%s16917_s4 + $0x8] sm:$0xff]  }
  0x50   : > { %10671 = vmatprep.mubr.msk.bf16.mxu0 %vm16555_vm2, %v10807_v3  ;;  %3539 = vmatpush1.bf16.msra.mxu1 %v10810_v2  ;;  %v10811_v3 = vld [vmem:[%s16917_s4 + $0x10] sm:$0xff]  }
  0x51   : > { %3540 = vmatprep.subr.bf16.mxu1 %v10912_v8 }
  0x53   : > { %4515 = vrot.lane.b32.xlu0 %v5391_v36, %s16703_s19 }
  0x54   : > { %3541 = vmatpush1.bf16.msra.mxu1 %v10811_v3 }
  0x55   : > { %3542 = vmatprep.subr.bf16.mxu1 %v10912_v8 }
  0x57   : > { %10672 = vmatmul.mubr.msk.bf16.gmra.mrb[28].mxu0 %vm16555_vm2, %v10808_v4  ;;  %4739 = vrot.lane.b32.xlu0 %v4705_v41, %s16553_s20  ;;  %v11243_v4 = vld [vmem:[%s16918_s2] ss:$0 sm:$0xff]  ;;  %vm16560_vm2 = vcmask 785408   ;;  %s16768_s20 = smov 8   ;;  %s17171_s2 = smov 112  }
  0x58   : > { %3543 = vmatpush1.bf16.msra.mxu1 %v10812_v5 }
  0x59   : > { %3544 = vmatprep.subr.bf16.mxu1 %v10912_v8 }
  0x5c   : > { %3545 = vmatpush1.bf16.msra.mxu1 %v10813_v32  ;;  %v11308_v32 = vadd.s32 4294967295, %v11184_v48 }
  0x5d   : > { %3546 = vmatprep.subr.bf16.mxu1 %v10912_v8 }
  0x5e   : > { %vm1350_vm13 = vcmp.ge.s32.totalorder %v11308_v32, 0 }
  0x60   : > { %3547 = vmatpush1.bf16.msra.mxu1 %v10814_v44 }
  0x61   : > { %3548 = vmatprep.subr.bf16.mxu1 %v10912_v8 }
  0x64   : > { %3549 = vmatpush1.bf16.msra.mxu1 %v10815_v61 }
  0x65   : > { %3550 = vmatprep.subr.bf16.mxu1 %v10912_v8 }
  0x95   : > { %v2136_v1 = vpop.permute.xlu0 %2135 }
  0x96   : > { %2184 = vst.msk [vmem:[#allocation4] sm:$0xff] %vm16650_vm15, %v2136_v1 }
  0xf2   : > { %v10645_v10 = vpop.f32.mrb[0].mxu0 }
  0xf3   : > { %v859_v16 = vmul.f32 %v10645_v10, %v11243_v4  ;;  %v723_v18 = vpop.f32.mrb[1].mxu0  ;;  %v11294_v10 = vadd.s32 1, %v11062_v14 }
  0xf4   : > { %v857_v21 = vmul.f32 %v11243_v4, %v723_v18  ;;  %v10646_v22 = vpop.f32.mrb[2].mxu0 }
  0xf5   : > { %v898_v28 = vadd.f32 %v11252_v11, %v859_v16  ;;  %v860_v30 = vmul.f32 %v10646_v22, %v11243_v4  ;;  %v726_v31 = vpop.f32.mrb[3].mxu0  ;;  %vm1507_vm5 = vcmp.lt.s32.totalorder %v11294_v10, 16  ;;  %v11428_v10 = vadd.s32 1, %v11202_v57 }
  0xf6   : > { %v896_v33 = vadd.f32 %v11252_v11, %v857_v21  ;;  %v858_v34 = vmul.f32 %v11243_v4, %v726_v31  ;;  %v10816_v21 = vld [vmem:[%s16917_s4 + $0x38] sm:$0xff]  }
  0xf7   : > { %v930_v35 = vmax.f32 %v898_v28, 0.0  ;;  %v899_v36 = vadd.f32 %v11252_v11, %v860_v30  ;;  %3551 = vmatpush1.bf16.msra.mxu1 %v10816_v21 }
  0xf8   : > { %v928_v38 = vmax.f32 %v896_v33, 0.0  ;;  %v897_v42 = vadd.f32 %v11252_v11, %v858_v34  ;;  %3552 = vmatprep.subr.bf16.mxu1 %v10912_v8 }
  0xf9   : > { %963 = vst.msk [vmem:[#allocation2 + $0x10] sm:$0xff] %vm16560_vm2, %v930_v35  ;;  %v931_v43 = vmax.f32 %v899_v36, 0.0 }
  0xfa   : > { %961 = vst.msk [vmem:[#allocation2] sm:$0xff] %vm16560_vm2, %v928_v38  ;;  %v929_v45 = vmax.f32 %v897_v42, 0.0  ;;  %v10649_v46 = vpop.f32.mrb[4].mxu0  ;;  %v2200_v42 = vld [vmem:[#allocation3 + $0x41] sm:$0xff] }
  0xfb   : > { %964 = vst.msk [vmem:[#allocation2 + $0x18] sm:$0xff] %vm16560_vm2, %v931_v43  ;;  %v863_v47 = vmul.f32 %v10649_v46, %v11243_v4  ;;  %v739_v49 = vpop.f32.mrb[5].mxu0  ;;  %v10817_v43 = vld [vmem:[%s16917_s4 + $0x40] sm:$0xff]  }
  0xfc   : > { %962 = vst.msk [vmem:[#allocation2 + $0x8] sm:$0xff] %vm16560_vm2, %v929_v45  ;;  %v861_v50 = vmul.f32 %v11243_v4, %v739_v49  ;;  %v10650_v52 = vpop.f32.mrb[6].mxu0  ;;  %3553 = vmatpush1.bf16.msra.mxu1 %v10817_v43 }
  0xfd   : > { %v902_v53 = vadd.f32 %v11252_v11, %v863_v47  ;;  %v864_v23 = vmul.f32 %v10650_v52, %v11243_v4  ;;  %v742_v54 = vpop.f32.mrb[7].mxu0  ;;  %3554 = vmatprep.subr.bf16.mxu1 %v10912_v8 }
  0xfe   : > { %v900_v55 = vadd.f32 %v11252_v11, %v861_v50  ;;  %v862_v56 = vmul.f32 %v11243_v4, %v742_v54 }
  0xff   : > { %v934_v37 = vmax.f32 %v902_v53, 0.0  ;;  %v903_v27 = vadd.f32 %v11252_v11, %v864_v23 }
 0x100   : > { %v1849_v58 = vld [vmem:[#allocation2 + $0x10] sm:$0xff]  ;;  %v932_v40 = vmax.f32 %v900_v55, 0.0  ;;  %v901_v41 = vadd.f32 %v11252_v11, %v862_v56 }
 0x101   : > { %1881 = vst.msk [vmem:[#allocation3 + $0x60] sm:$0xff] %vm16860_vm1, %v1849_v58  ;;  %v1847_v62 = vld [vmem:[#allocation2] sm:$0xff]  ;;  %v935_v63 = vmax.f32 %v903_v27, 0.0 }
 0x102   : > { %967 = vst.msk [vmem:[#allocation2 + $0x30] sm:$0xff] %vm16560_vm2, %v934_v37  ;;  %v1850_v0 = vld [vmem:[#allocation2 + $0x18] sm:$0xff]  ;;  %965 = vst.msk [vmem:[#allocation2 + $0x20] sm:$0xff] %vm16560_vm2, %v932_v40  ;;  %v933_v1 = vmax.f32 %v901_v41, 0.0  ;;  %v10653_v26 = vpop.f32.mrb[8].mxu0 }
 0x103   : > { %1879 = vst.msk [vmem:[#allocation3 + $0x50] sm:$0xff] %vm16860_vm1, %v1847_v62  ;;  %1882 = vst.msk [vmem:[#allocation3 + $0x68] sm:$0xff] %vm16860_vm1, %v1850_v0  ;;  %v1848_v2 = vld [vmem:[#allocation2 + $0x8] sm:$0xff]  ;;  %v867_v3 = vmul.f32 %v10653_v26, %v11243_v4  ;;  %v755_v5 = vpop.f32.mrb[9].mxu0 }
 0x104   : > { %968 = vst.msk [vmem:[#allocation2 + $0x38] sm:$0xff] %vm16560_vm2, %v935_v63  ;;  %966 = vst.msk [vmem:[#allocation2 + $0x28] sm:$0xff] %vm16560_vm2, %v933_v1  ;;  %v865_v16 = vmul.f32 %v11243_v4, %v755_v5  ;;  %v10654_v18 = vpop.f32.mrb[10].mxu0  ;;  %v10818_v63 = vld [vmem:[%s16917_s4 + $0x48] sm:$0xff]  }
 0x105   : > { %1880 = vst.msk [vmem:[#allocation3 + $0x58] sm:$0xff] %vm16860_vm1, %v1848_v2  ;;  %v906_v22 = vadd.f32 %v11252_v11, %v867_v3  ;;  %v868_v28 = vmul.f32 %v10654_v18, %v11243_v4  ;;  %v758_v30 = vpop.f32.mrb[11].mxu0  ;;  %v11344_v2 = vadd.s32 4294967295, %v11065_v15  ;;  %3555 = vmatpush1.bf16.msra.mxu1 %v10818_v63 }
 0x106   : > { %v904_v14 = vadd.f32 %v11252_v11, %v865_v16  ;;  %v866_v31 = vmul.f32 %v11243_v4, %v758_v30  ;;  %3556 = vmatprep.subr.bf16.mxu1 %v10912_v8 }
 0x107   : > { %v938_v33 = vmax.f32 %v906_v22, 0.0  ;;  %v907_v34 = vadd.f32 %v11252_v11, %v868_v28 }
 0x108   : > { %v936_v36 = vmax.f32 %v904_v14, 0.0  ;;  %v905_v38 = vadd.f32 %v11252_v11, %v866_v31  ;;  %v2588_v52 = vld [vmem:[#allocation3 + $0x60] sm:$0xff]  ;;  %v10819_v31 = vld [vmem:[%s16917_s4 + $0x50] sm:$0xff]  }
 0x109   : > { %v1853_v35 = vld [vmem:[#allocation2 + $0x30] sm:$0xff]  ;;  %v1851_v44 = vld [vmem:[#allocation2 + $0x20] sm:$0xff]  ;;  %971 = vst.msk [vmem:[#allocation2 + $0x50] sm:$0xff] %vm16560_vm2, %v938_v33  ;;  %v939_v45 = vmax.f32 %v907_v34, 0.0  ;;  %3557 = vmatpush1.bf16.msra.mxu1 %v10819_v31 }
 0x10a   : > { %1885 = vst.msk [vmem:[#allocation3 + $0x80] sm:$0xff] %vm16860_vm1, %v1853_v35  ;;  %v2201_v46 = vld [vmem:[#allocation3 + $0x49] sm:$0xff]  ;;  %1883 = vst.msk [vmem:[#allocation3 + $0x70] sm:$0xff] %vm16860_vm1, %v1851_v44  ;;  %v937_v49 = vmax.f32 %v905_v38, 0.0  ;;  %v10657_v37 = vpop.f32.mrb[12].mxu0  ;;  %v11370_v38 = vadd.s32 1, %v11160_v12  ;;  %3558 = vmatprep.subr.bf16.mxu1 %v10912_v8 }
 0x10b   : > { %v1854_v47 = vld [vmem:[#allocation2 + $0x38] sm:$0xff]  ;;  %969 = vst.msk [vmem:[#allocation2 + $0x40] sm:$0xff] %vm16560_vm2, %v936_v36  ;;  %v2297_v50 = vsel %vm1507_vm5, %v2201_v46, 0.0  ;;  %v2589_v53 = vld [vmem:[#allocation3 + $0x68] sm:$0xff]  ;;  %972 = vst.msk [vmem:[#allocation2 + $0x58] sm:$0xff] %vm16560_vm2, %v939_v45  ;;  %v871_v58 = vmul.f32 %v10657_v37, %v11243_v4  ;;  %v771_v40 = vpop.f32.mrb[13].mxu0 }
 0x10c   : > { %1886 = vst.msk [vmem:[#allocation3 + $0x88] sm:$0xff] %vm16860_vm1, %v1854_v47  ;;  %v1852_v23 = vld [vmem:[#allocation2 + $0x28] sm:$0xff]  ;;  %v2328_v54 = vpack.c.bf16 %v2297_v50, %v2200_v42  ;;  %v2619_v55 = vpack.c.bf16 %v2589_v53, %v2588_v52  ;;  %v11326_v56 = vld [vmem:[#allocation3 + $0x5f] sm:$0xff]  ;;  %v869_v41 = vmul.f32 %v11243_v4, %v771_v40  ;;  %v10658_v61 = vpop.f32.mrb[14].mxu0  ;;  %v2426_v28 = vld [vmem:[#allocation3 + $0x57] sm:$0xff]  ;;  %vm1509_vm10 = vcmp.lt.s32.totalorder %v11370_v38, 16 }
 0x10d   : > { %1884 = vst.msk [vmem:[#allocation3 + $0x78] sm:$0xff] %vm16860_vm1, %v1852_v23  ;;  %v2425_v27 = vld [vmem:[#allocation3 + $0x4f] sm:$0xff]  ;;  %v2011_v62 = vsel %vm1350_vm13, %v11326_v56, 0.0  ;;  %v910_v0 = vadd.f32 %v11252_v11, %v871_v58  ;;  %v872_v1 = vmul.f32 %v10658_v61, %v11243_v4  ;;  %v774_v26 = vpop.f32.mrb[15].mxu0  ;;  %v11346_v3 = vld [vmem:[#allocation3 + $0x67] sm:$0xff]  ;;  %v2925_v22 = vsel %vm1346_vm14, %v11326_v56, 0.0 }
 0x10e   : > { %970 = vst.msk [vmem:[#allocation2 + $0x48] sm:$0xff] %vm16560_vm2, %v937_v49  ;;  %2360 = vrot.lane.b32.xlu1 %v2328_v54, %s16703_s19  ;;  %2652 = vrot.lane.b32.xlu0 %v2619_v55, %s16800_s23  ;;  %v2457_v5 = vsel %vm1346_vm14, %v2425_v27, 0.0  ;;  %v908_v16 = vadd.f32 %v11252_v11, %v869_v41  ;;  %v870_v18 = vmul.f32 %v11243_v4, %v774_v26  ;;  %vm1348_vm14 = vcmp.ge.s32.totalorder %v11344_v2, 0  ;;  %v1913_v43 = vld [vmem:[#allocation3 + $0x4f] sm:$0xff]  ;;  %v2587_v47 = vld [vmem:[#allocation3 + $0x58] sm:$0xff]  ;;  %v11389_v58 = vld [vmem:[#allocation3 + $0x61] sm:$0xff] }
 0x10f   : > { %v942_v30 = vmax.f32 %v910_v0, 0.0  ;;  %v911_v15 = vadd.f32 %v11252_v11, %v872_v1  ;;  %v2041_v14 = vpack.c.bf16 %v11346_v3, %v2011_v62  ;;  %v2957_v45 = vpack.c.bf16 %v11346_v3, %v2925_v22  ;;  %v2586_v23 = vld [vmem:[#allocation3 + $0x50] sm:$0xff]  ;;  %v10820_v41 = vld [vmem:[%s16917_s4 + $0x58] sm:$0xff]  }
 0x110   : > { %v1857_v21 = vld [vmem:[#allocation2 + $0x50] sm:$0xff]  ;;  %v940_v34 = vmax.f32 %v908_v16, 0.0  ;;  %v909_v35 = vadd.f32 %v11252_v11, %v870_v18  ;;  %v2489_v46 = vpack.c.bf16 %v2426_v28, %v2457_v5  ;;  %v2618_v27 = vpack.c.bf16 %v2587_v47, %v2586_v23  ;;  %3559 = vmatpush1.bf16.msra.mxu1 %v10820_v41  ;;  %v10821_v16 = vld [vmem:[%s16917_s4 + $0x60] sm:$0xff]  }
 0x111   : > { %1889 = vst.msk [vmem:[#allocation3 + $0xa0] sm:$0xff] %vm16860_vm1, %v1857_v21  ;;  %v11364_v60 = vld [vmem:[#allocation3 + $0x69] sm:$0xff]  ;;  %v943_v42 = vmax.f32 %v911_v15, 0.0  ;;  %2057 = vst.msk [vmem:[#allocation4 + $0x50] sm:$0xff] %vm16860_vm1, %v2041_v14  ;;  %v1914_v37 = vld [vmem:[#allocation3 + $0x57] sm:$0xff]  ;;  %3560 = vmatprep.subr.bf16.mxu1 %v10912_v8 }
 0x112   : > { %v1855_v33 = vld [vmem:[#allocation2 + $0x40] sm:$0xff]  ;;  %3118 = vrot.lane.b32.xlu1 %v2619_v55, %s16701_s17  ;;  %2139 = vrot.lane.b32.xlu0 %v2619_v55, %s16826_s30  ;;  %v1858_v36 = vld [vmem:[#allocation2 + $0x58] sm:$0xff]  ;;  %975 = vst.msk [vmem:[#allocation2 + $0x70] sm:$0xff] %vm16560_vm2, %v942_v30  ;;  %973 = vst.msk [vmem:[#allocation2 + $0x60] sm:$0xff] %vm16560_vm2, %v940_v34  ;;  %v941_v49 = vmax.f32 %v909_v35, 0.0  ;;  %v10661_v50 = vpop.f32.mrb[16].mxu0 }
 0x113   : > { %1887 = vst.msk [vmem:[#allocation3 + $0x90] sm:$0xff] %vm16860_vm1, %v1855_v33  ;;  %1890 = vst.msk [vmem:[#allocation3 + $0xa8] sm:$0xff] %vm16860_vm1, %v1858_v36  ;;  %v3216_v12 = vsel %vm1507_vm5, %v11364_v60, 0.0  ;;  %v875_v52 = vmul.f32 %v10661_v50, %v11243_v4  ;;  %v787_v53 = vpop.f32.mrb[17].mxu0  ;;  %v2009_v55 = vsel %vm1348_vm14, %v1913_v43, 0.0  ;;  %v2750_v1 = vsel %vm1509_vm10, %v11364_v60, 0.0 }
 0x114   : > { %976 = vst.msk [vmem:[#allocation2 + $0x78] sm:$0xff] %vm16560_vm2, %v943_v42  ;;  %974 = vst.msk [vmem:[#allocation2 + $0x68] sm:$0xff] %vm16560_vm2, %v941_v49  ;;  %v10662_v54 = vpop.f32.mrb[18].mxu0  ;;  %v3247_v61 = vpack.c.bf16 %v3216_v12, %v11389_v58  ;;  %v873_v63 = vmul.f32 %v11243_v4, %v787_v53  ;;  %v2040_v5 = vpack.c.bf16 %v1914_v37, %v2009_v55  ;;  %v2716_v21 = vld [vmem:[#allocation3 + $0x59] sm:$0xff]  ;;  %v2715_v34 = vld [vmem:[#allocation3 + $0x51] sm:$0xff]  ;;  %3561 = vmatpush1.bf16.msra.mxu1 %v10821_v16 }
 0x115   : > { %v1856_v44 = vld [vmem:[#allocation2 + $0x48] sm:$0xff]  ;;  %v790_v40 = vpop.f32.mrb[19].mxu0  ;;  %v914_v62 = vadd.f32 %v11252_v11, %v875_v52  ;;  %v876_v0 = vmul.f32 %v10662_v54, %v11243_v4  ;;  %v2780_v31 = vpack.c.bf16 %v2750_v1, %v11389_v58  ;;  %3562 = vmatprep.subr.bf16.mxu1 %v10912_v8  ;;  %v2299_v37 = vsel %vm1509_vm10, %v2716_v21, 0.0 }
 0x116   : > { %1888 = vst.msk [vmem:[#allocation3 + $0x98] sm:$0xff] %vm16860_vm1, %v1856_v44  ;;  %2989 = vrot.lane.b32.xlu1 %v2957_v45, %s16784_s18  ;;  %2521 = vrot.lane.b32.xlu0 %v2489_v46, %s16920_s28  ;;  %v874_v26 = vmul.f32 %v11243_v4, %v790_v40  ;;  %v912_v28 = vadd.f32 %v11252_v11, %v873_v63  ;;  %2056 = vst.msk [vmem:[#allocation4 + $0x28] sm:$0xff] %vm16860_vm1, %v2040_v5  ;;  %v2748_v44 = vsel %vm1507_vm5, %v2716_v21, 0.0  ;;  %v3058_v45 = vld [vmem:[#allocation3 + $0x80] sm:$0xff]  ;;  %v3059_v46 = vld [vmem:[#allocation3 + $0x88] sm:$0xff] }
 0x117   : > { %v946_v22 = vmax.f32 %v914_v62, 0.0  ;;  %v915_v30 = vadd.f32 %v11252_v11, %v876_v0  ;;  %v11423_v50 = vld [vmem:[#allocation3 + $0x6f] sm:$0xff]  ;;  %v2779_v52 = vpack.c.bf16 %v2748_v44, %v2715_v34  ;;  %v11432_v53 = vpack.c.bf16 %v3059_v46, %v3058_v45 }
 0x118   : > { %v913_v14 = vadd.f32 %v11252_v11, %v874_v26  ;;  %v944_v35 = vmax.f32 %v912_v28, 0.0  ;;  %v2927_v40 = vsel %vm1348_vm14, %v11423_v50, 0.0  ;;  %v2459_v63 = vsel %vm1348_vm14, %v11326_v56, 0.0  ;;  %v3056_v21 = vld [vmem:[#allocation3 + $0x70] sm:$0xff] }
 0x119   : > { %v1861_v18 = vld [vmem:[#allocation2 + $0x70] sm:$0xff]  ;;  %v1859_v15 = vld [vmem:[#allocation2 + $0x60] sm:$0xff]  ;;  %979 = vst.msk [vmem:[#allocation2 + $0x90] sm:$0xff] %vm16560_vm2, %v946_v22  ;;  %v947_v36 = vmax.f32 %v915_v30, 0.0  ;;  %vm1511_vm5 = vcmp.lt.s32.totalorder %v11428_v10, 16  ;;  %v2329_v16 = vpack.c.bf16 %v2299_v37, %v2715_v34  ;;  %v3057_v30 = vld [vmem:[#allocation3 + $0x78] sm:$0xff]  ;;  %v2490_v44 = vpack.c.bf16 %v11346_v3, %v2459_v63 }
 0x11a   : > { %2650 = vrot.lane.b32.xlu0 %v2618_v27, %s16800_s23  ;;  %3279 = vrot.lane.b32.xlu1 %v3247_v61, %s16921_s25  ;;  %1893 = vst.msk [vmem:[#allocation3 + $0xc0] sm:$0xff] %vm16860_vm1, %v1861_v18  ;;  %1891 = vst.msk [vmem:[#allocation3 + $0xb0] sm:$0xff] %vm16860_vm1, %v1859_v15  ;;  %v10665_v42 = vpop.f32.mrb[20].mxu0  ;;  %v945_v47 = vmax.f32 %v913_v14, 0.0  ;;  %v11473_v45 = vpack.c.bf16 %v3057_v30, %v3056_v21  ;;  %v2301_v46 = vsel %vm1511_vm5, %v11364_v60, 0.0 }
 0x11b   : > { %v1862_v33 = vld [vmem:[#allocation2 + $0x78] sm:$0xff]  ;;  %v1860_v43 = vld [vmem:[#allocation2 + $0x68] sm:$0xff]  ;;  %v803_v49 = vpop.f32.mrb[21].mxu0  ;;  %977 = vst.msk [vmem:[#allocation2 + $0x80] sm:$0xff] %vm16560_vm2, %v944_v35  ;;  %980 = vst.msk [vmem:[#allocation2 + $0x98] sm:$0xff] %vm16560_vm2, %v947_v36  ;;  %v879_v23 = vmul.f32 %v10665_v42, %v11243_v4  ;;  %v1000_v35 = vadd.s32 48, %v11047_v7  ;;  %v2330_v37 = vpack.c.bf16 %v2301_v46, %v11389_v58 }
 0x11c   : > { %1894 = vst.msk [vmem:[#allocation3 + $0xc8] sm:$0xff] %vm16860_vm1, %v1862_v33  ;;  %1892 = vst.msk [vmem:[#allocation3 + $0xb8] sm:$0xff] %vm16860_vm1, %v1860_v43  ;;  %v10666_v12 = vpop.f32.mrb[22].mxu0  ;;  %v877_v54 = vmul.f32 %v11243_v4, %v803_v49  ;;  %v11460_v33 = vld [vmem:[#allocation3 + $0x79] sm:$0xff]  ;;  %v1001_v36 = vadd.s32 56, %v11047_v7  ;;  %v1002_v42 = vadd.s32 64, %v11047_v7 }
 0x11d   : > { %978 = vst.msk [vmem:[#allocation2 + $0x88] sm:$0xff] %vm16560_vm2, %v945_v47  ;;  %v806_v55 = vpop.f32.mrb[23].mxu0  ;;  %v880_v41 = vmul.f32 %v10666_v12, %v11243_v4  ;;  %v918_v61 = vadd.f32 %v11252_v11, %v879_v23  ;;  %v11479_v12 = vld [vmem:[#allocation3 + $0x71] sm:$0xff]  ;;  %v10822_v3 = vld [vmem:[%s16917_s4 + $0x68] ss:$0 sps:$4 sm:$0xff]   ;;  %v11491_v60 = vand.u32 15, %v1000_v35 }
 0x11e   : > { %2137 = vrot.lane.b32.xlu0 %v2618_v27, %s16826_s30  ;;  %2813 = vrot.lane.b32.xlu1 %v2780_v31, %s16922_s26  ;;  %v11438_v27 = vld [vmem:[#allocation3 + $0x77] sm:$0xff]  ;;  %v878_v8 = vmul.f32 %v11243_v4, %v806_v55  ;;  %v916_v62 = vadd.f32 %v11252_v11, %v877_v54  ;;  %v11534_v46 = vld [vmem:[#allocation3 + $0x87] sm:$0xff] }
 0x11f   : > { %v919_v1 = vadd.f32 %v11252_v11, %v880_v41  ;;  %v2958_v18 = vpack.c.bf16 %v11438_v27, %v2927_v40  ;;  %v950_v22 = vmax.f32 %v918_v61, 0.0  ;;  %16923 = vst [vmem:[#allocation17_spill] sm:$0xff] %v11491_v60  ;;  %v11497_v40 = vand.u32 15, %v1001_v36  ;;  %v11700_v19 = vld [vmem:[#allocation3 + $0x91] sm:$0xff] }
 0x120   : > { %v1865_v0 = vld [vmem:[#allocation2 + $0x90] sm:$0xff]  ;;  %v917_v26 = vadd.f32 %v11252_v11, %v878_v8  ;;  %v948_v28 = vmax.f32 %v916_v62, 0.0  ;;  %v11499_v41 = vand.u32 15, %v1002_v42 }
 0x121   : > { %1897 = vst.msk [vmem:[#allocation3 + $0xe0] sm:$0xff] %vm16860_vm1, %v1865_v0  ;;  %v951_v56 = vmax.f32 %v919_v1, 0.0  ;;  %16924 = vst [vmem:[#allocation18_spill] sm:$0xff] %v11497_v40 }
 0x122   : > { %2811 = vrot.lane.b32.xlu0 %v2779_v52, %s16922_s26  ;;  %3122 = vrot.lane.b32.xlu1 %v11432_v53, %s16701_s17  ;;  %v10669_v5 = vpop.f32.mrb[24].mxu0  ;;  %v1863_v15 = vld [vmem:[#allocation2 + $0x80] sm:$0xff]  ;;  %v1866_v2 = vld [vmem:[#allocation2 + $0x98] sm:$0xff]  ;;  %v949_v14 = vmax.f32 %v917_v26, 0.0  ;;  %983 = vst.msk [vmem:[#allocation2 + $0xb0] sm:$0xff] %vm16560_vm2, %v950_v22  ;;  %981 = vst.msk [vmem:[#allocation2 + $0xa0] sm:$0xff] %vm16560_vm2, %v948_v28 }
 0x123   : > { %v819_v31 = vpop.f32.mrb[25].mxu0  ;;  %1895 = vst.msk [vmem:[#allocation3 + $0xd0] sm:$0xff] %vm16860_vm1, %v1863_v15  ;;  %1898 = vst.msk [vmem:[#allocation3 + $0xe8] sm:$0xff] %vm16860_vm1, %v1866_v2  ;;  %v883_v47 = vmul.f32 %v10669_v5, %v11243_v4  ;;  %v3218_v52 = vsel %vm1509_vm10, %v11460_v33, 0.0  ;;  %v2752_v5 = vsel %vm1511_vm5, %v11460_v33, 0.0  ;;  %v3534_v22 = vsel %vm16559_vm0, %v10822_v3, 0 }
 0x124   : > { %v1864_v34 = vld [vmem:[#allocation2 + $0x88] sm:$0xff]  ;;  %984 = vst.msk [vmem:[#allocation2 + $0xb8] sm:$0xff] %vm16560_vm2, %v951_v56  ;;  %982 = vst.msk [vmem:[#allocation2 + $0xa8] sm:$0xff] %vm16560_vm2, %v949_v14  ;;  %v10670_v43 = vpop.f32.mrb[26].mxu0  ;;  %v881_v23 = vmul.f32 %v11243_v4, %v819_v31  ;;  %v3248_v62 = vpack.c.bf16 %v3218_v52, %v11479_v12  ;;  %v11512_v28 = vld [vmem:[#allocation3 + $0x7f] sm:$0xff]  ;;  %v1006_v2 = vadd.s32 96, %v11047_v7  ;;  %3563 = vmatpush1.bf16.msra.mxu1 %v3534_v22 }
 0x125   : > { %1896 = vst.msk [vmem:[#allocation3 + $0xd8] sm:$0xff] %vm16860_vm1, %v1864_v34  ;;  %v822_v49 = vpop.f32.mrb[27].mxu0  ;;  %v922_v54 = vadd.f32 %v11252_v11, %v883_v47  ;;  %v884_v55 = vmul.f32 %v10670_v43, %v11243_v4  ;;  %16925 = vst [vmem:[#allocation19_spill] sm:$0xff] %v11499_v41  ;;  %v11519_v31 = vadd.s32 4294967295, %v11491_v60  ;;  %v11522_v34 = vadd.s32 4294967295, %v11499_v41  ;;  %v11542_v52 = vld [vmem:[#allocation3 + $0x89] sm:$0xff] }
 0x126   : > { %2362 = vrot.lane.b32.xlu0 %v2329_v16, %s16703_s19  ;;  %2991 = vrot.lane.b32.xlu1 %v2958_v18, %s16784_s18  ;;  %v882_v38 = vmul.f32 %v11243_v4, %v822_v49  ;;  %v920_v8 = vadd.f32 %v11252_v11, %v881_v23  ;;  %v2781_v42 = vpack.c.bf16 %v2752_v5, %v11479_v12  ;;  %v11530_v43 = vadd.s32 1, %v11497_v40  ;;  %v11544_v23 = vpop.permute.xlu0 %5119 }
 0x127   : > { %v954_v63 = vmax.f32 %v922_v54, 0.0  ;;  %v923_v0 = vadd.f32 %v11252_v11, %v884_v55  ;;  %v2929_v47 = vsel %vm1350_vm13, %v11512_v28, 0.0  ;;  %v11546_v3 = vand.u32 15, %v1006_v2 }
 0x128   : > { %v921_v1 = vadd.f32 %v11252_v11, %v882_v38  ;;  %v952_v18 = vmax.f32 %v920_v8, 0.0  ;;  %vm1352_vm10 = vcmp.ge.s32.totalorder %v11519_v31, 0  ;;  %vm1354_vm14 = vcmp.ge.s32.totalorder %v11522_v34, 0  ;;  %v3070_v41 = vld [vmem:[#allocation3 + $0xe0] sm:$0xff] }
 0x129   : > { %v1869_v58 = vld [vmem:[#allocation2 + $0xb0] sm:$0xff]  ;;  %v1867_v16 = vld [vmem:[#allocation2 + $0xa0] sm:$0xff]  ;;  %987 = vst.msk [vmem:[#allocation2 + $0xd0] sm:$0xff] %vm16560_vm2, %v954_v63  ;;  %v955_v56 = vmax.f32 %v923_v0, 0.0  ;;  %16926 = vst [vmem:[#allocation20_spill] sm:$0xff] %v11546_v3  ;;  %v1004_v55 = vadd.s32 80, %v11047_v7  ;;  %v2959_v8 = vpack.c.bf16 %v11534_v46, %v2929_v47 }
 0x12a   : > { %2523 = vrot.lane.b32.xlu0 %v2490_v44, %s16920_s28  ;;  %3120 = vrot.lane.b32.xlu1 %v11473_v45, %s16701_s17  ;;  %v10673_v61 = vpop.f32.mrb[28].mxu0  ;;  %1901 = vst.msk [vmem:[#allocation3 + $0x100] sm:$0xff] %vm16860_vm1, %v1869_v58  ;;  %1899 = vst.msk [vmem:[#allocation3 + $0xf0] sm:$0xff] %vm16860_vm1, %v1867_v16  ;;  %v953_v14 = vmax.f32 %v921_v1, 0.0  ;;  %vm1513_vm0 = vcmp.lt.s32.totalorder %v11530_v43, 16  ;;  %v2461_v63 = vsel %vm1350_vm13, %v11423_v50, 0.0 }
 0x12b   : > { %v835_v26 = vpop.f32.mrb[29].mxu0  ;;  %v887_v21 = vmul.f32 %v10673_v61, %v11243_v4  ;;  %v1870_v30 = vld [vmem:[#allocation2 + $0xb8] sm:$0xff]  ;;  %v1868_v15 = vld [vmem:[#allocation2 + $0xa8] sm:$0xff]  ;;  %985 = vst.msk [vmem:[#allocation2 + $0xc0] sm:$0xff] %vm16560_vm2, %v952_v18  ;;  %988 = vst.msk [vmem:[#allocation2 + $0xd8] sm:$0xff] %vm16560_vm2, %v955_v56  ;;  %v3220_v0 = vsel %vm1511_vm5, %v11542_v52, 0.0  ;;  %v2491_v2 = vpack.c.bf16 %v11438_v27, %v2461_v63 }
 0x12c   : > { %1902 = vst.msk [vmem:[#allocation3 + $0x108] sm:$0xff] %vm16860_vm1, %v1870_v30  ;;  %1900 = vst.msk [vmem:[#allocation3 + $0xf8] sm:$0xff] %vm16860_vm1, %v1868_v15  ;;  %v10674_v36 = vpop.f32.mrb[30].mxu0  ;;  %v885_v54 = vmul.f32 %v11243_v4, %v835_v26  ;;  %v1003_v1 = vadd.s32 72, %v11047_v7  ;;  %v1920_v58 = vld [vmem:[#allocation3 + $0x87] sm:$0xff]  ;;  %v1010_v30 = vadd.s32 128, %v11047_v7 }
 0x12d   : > { %v926_v35 = vadd.f32 %v11252_v11, %v887_v21  ;;  %986 = vst.msk [vmem:[#allocation2 + $0xc8] sm:$0xff] %vm16560_vm2, %v953_v14  ;;  %v838_v44 = vpop.f32.mrb[31].mxu0  ;;  %v888_v38 = vmul.f32 %v10674_v36, %v11243_v4  ;;  %v11576_v18 = vld [vmem:[#allocation3 + $0x81] sm:$0xff]  ;;  %v11578_v21 = vand.u32 15, %v1004_v55  ;;  %v1008_v14 = vadd.s32 112, %v11047_v7  ;;  %v1917_v36 = vld [vmem:[#allocation3 + $0x6f] sm:$0xff] }
 0x12e   : > { %2364 = vrot.lane.b32.xlu0 %v2330_v37, %s16703_s19  ;;  %3281 = vrot.lane.b32.xlu1 %v3248_v62, %s16921_s25  ;;  %v1919_v37 = vld [vmem:[#allocation3 + $0x7f] sm:$0xff]  ;;  %v924_v61 = vadd.f32 %v11252_v11, %v885_v54  ;;  %v886_v62 = vmul.f32 %v11243_v4, %v838_v44  ;;  %v11570_v4 = vadd.s32 4294967295, %v11546_v3  ;;  %v3249_v56 = vpack.c.bf16 %v3220_v0, %v11576_v18  ;;  %v1918_v47 = vld [vmem:[#allocation3 + $0x77] sm:$0xff] }
 0x12f   : > { %v958_v49 = vmax.f32 %v926_v35, 0.0  ;;  %v927_v5 = vadd.f32 %v11252_v11, %v888_v38  ;;  %v2015_v16 = vsel %vm1354_vm14, %v1919_v37, 0.0  ;;  %16927 = vst [vmem:[#allocation21_spill] sm:$0xff] %v11578_v21  ;;  %v1012_v27 = vadd.s32 144, %v11047_v7  ;;  %v1923_v54 = vld [vmem:[#allocation3 + $0x9f] sm:$0xff] }
 0x130   : > { %v1873_v26 = vld [vmem:[#allocation2 + $0xd0] sm:$0xff]  ;;  %v956_v50 = vmax.f32 %v924_v61, 0.0  ;;  %v925_v10 = vadd.f32 %v11252_v11, %v886_v62  ;;  %v11584_v11 = vpop.permute.xlu0 %4383  ;;  %v2043_v44 = vpack.c.bf16 %v1920_v58, %v2015_v16  ;;  %vm1358_vm13 = vcmp.ge.s32.totalorder %v11570_v4, 0  ;;  %v1924_v61 = vld [vmem:[#allocation3 + $0xa7] sm:$0xff]  ;;  %v3065_v3 = vld [vmem:[#allocation3 + $0xb8] sm:$0xff] }
 0x131   : > { %991 = vst.msk [vmem:[#allocation2 + $0xf0] sm:$0xff] %vm16560_vm2, %v958_v49  ;;  %v959_v15 = vmax.f32 %v927_v5, 0.0  ;;  %v11600_v55 = vadd.s32 4294967295, %v11578_v21  ;;  %v11602_v38 = vand.u32 15, %v1010_v30  ;;  %v2013_v37 = vsel %vm1352_vm10, %v1917_v36, 0.0  ;;  %v3062_v5 = vld [vmem:[#allocation3 + $0xa0] sm:$0xff] }
 0x132   : > { %2656 = vrot.lane.b32.xlu0 %v11432_v53, %s16800_s23  ;;  %2815 = vrot.lane.b32.xlu1 %v2781_v42, %s16922_s26  ;;  %1905 = vst.msk [vmem:[#allocation3 + $0x120] sm:$0xff] %vm16860_vm1, %v1873_v26  ;;  %v1871_v32 = vld [vmem:[#allocation2 + $0xc0] sm:$0xff]  ;;  %v957_v35 = vmax.f32 %v925_v10, 0.0  ;;  %v2754_v42 = vsel %vm1513_vm0, %v11542_v52, 0.0  ;;  %2059 = vst.msk [vmem:[#allocation4 + $0xa0] sm:$0xff] %vm16860_vm1, %v2043_v44  ;;  %v11610_v63 = vand.u32 15, %v1003_v1  ;;  %v2042_v26 = vpack.c.bf16 %v1918_v47, %v2013_v37 }
 0x133   : > { %1903 = vst.msk [vmem:[#allocation3 + $0x110] sm:$0xff] %vm16860_vm1, %v1871_v32  ;;  %16928 = vst [vmem:[#allocation22_spill] sm:$0xff] %v11602_v38  ;;  %v2782_v62 = vpack.c.bf16 %v2754_v42, %v11576_v18  ;;  %v11612_v0 = vand.u32 15, %v1008_v14  ;;  %v3063_v32 = vld [vmem:[#allocation3 + $0xa8] sm:$0xff]  ;;  %v2019_v58 = vsel %vm1358_vm13, %v1923_v54, 0.0  ;;  %vm1356_vm5 = vcmp.ge.s32.totalorder %v11600_v55, 0 }
 0x134   : > { %v1872_v22 = vld [vmem:[#allocation2 + $0xc8] sm:$0xff]  ;;  %989 = vst.msk [vmem:[#allocation2 + $0xe0] sm:$0xff] %vm16560_vm2, %v956_v50  ;;  %992 = vst.msk [vmem:[#allocation2 + $0xf8] sm:$0xff] %vm16560_vm2, %v959_v15  ;;  %v11614_v50 = vand.u32 15, %v1012_v27  ;;  %v11625_v1 = vpop.permute.xlu0 %4511  ;;  %v11631_v30 = vadd.s32 4294967295, %v11602_v38  ;;  %v11636_v14 = vadd.s32 1, %v11610_v63 }
 0x135   : > { %1904 = vst.msk [vmem:[#allocation3 + $0x118] sm:$0xff] %vm16860_vm1, %v1872_v22  ;;  %16929 = vst [vmem:[#allocation23_spill] sm:$0xff] %v11610_v63  ;;  %v11623_v16 = vld [vmem:[#allocation3 + $0x8f] sm:$0xff]  ;;  %v2045_v22 = vpack.c.bf16 %v1924_v61, %v2019_v58  ;;  %v2303_v42 = vsel %vm1513_vm0, %v11460_v33, 0.0  ;;  %v11646_v27 = vld [vmem:[#allocation3 + $0x97] sm:$0xff]  ;;  %v1018_v61 = vadd.s32 192, %v11047_v7 }
 0x136   : > { %2143 = vrot.lane.b32.xlu0 %v11432_v53, %s16826_s30  ;;  %2993 = vrot.lane.b32.xlu1 %v2959_v8, %s16784_s18  ;;  %v1874_v53 = vld [vmem:[#allocation2 + $0xd8] sm:$0xff]  ;;  %990 = vst.msk [vmem:[#allocation2 + $0xe8] sm:$0xff] %vm16560_vm2, %v957_v35  ;;  %v1014_v8 = vadd.s32 160, %v11047_v7  ;;  %16930 = vst [vmem:[#allocation24_spill] sm:$0xff] %v11612_v0  ;;  %v11639_v35 = vadd.s32 4294967295, %v11612_v0  ;;  %v2931_v44 = vsel %vm1352_vm10, %v11623_v16, 0.0 }
 0x137   : > { %1906 = vst.msk [vmem:[#allocation3 + $0x128] sm:$0xff] %vm16860_vm1, %v1874_v53  ;;  %16931 = vst [vmem:[#allocation25_spill] sm:$0xff] %v11614_v50  ;;  %v1016_v53 = vadd.s32 176, %v11047_v7  ;;  %vm1362_vm2 = vcmp.ge.s32.totalorder %v11631_v30, 0  ;;  %vm1515_vm8 = vcmp.lt.s32.totalorder %v11636_v14, 16  ;;  %v11687_v31 = vand.u32 15, %v1018_v61 }
 0x138   : > { %v1877_v49 = vld [vmem:[#allocation2 + $0xf0] sm:$0xff]  ;;  %v11616_v10 = vand.u32 15, %v1014_v8  ;;  %2058 = vst.msk [vmem:[#allocation4 + $0x78] sm:$0xff] %vm16860_vm1, %v2042_v26  ;;  %2061 = vst.msk [vmem:[#allocation4 + $0xf0] sm:$0xff] %vm16860_vm1, %v2045_v22  ;;  %v2331_v26 = vpack.c.bf16 %v2303_v42, %v11479_v12  ;;  %v11675_v58 = vpop.permute.xlu0 %4735  ;;  %v3061_v22 = vld [vmem:[#allocation3 + $0x98] sm:$0xff]  ;;  %vm1360_vm4 = vcmp.ge.s32.totalorder %v11639_v35, 0 }
 0x139   : > { %1909 = vst.msk [vmem:[#allocation3 + $0x140] sm:$0xff] %vm16860_vm1, %v1877_v49  ;;  %v11653_v49 = vadd.s32 4294967295, %v11614_v50  ;;  %v11663_v33 = vand.u32 15, %v1016_v53  ;;  %v1922_v8 = vld [vmem:[#allocation3 + $0x97] sm:$0xff]  ;;  %v1928_v53 = vld [vmem:[#allocation3 + $0xc7] sm:$0xff]  ;;  %16934 = vst [vmem:[#allocation28_spill] sm:$0xff] %v11687_v31 }
 0x13a   : > { %2525 = vrot.lane.b32.xlu0 %v2491_v2, %s16920_s28  ;;  %3283 = vrot.lane.b32.xlu1 %v3249_v56, %s16921_s25  ;;  %16932 = vst [vmem:[#allocation26_spill] sm:$0xff] %v11616_v10  ;;  %v1921_v2 = vld [vmem:[#allocation3 + $0x8f] sm:$0xff]  ;;  %v11633_v56 = vpack.c.bf16 %v3063_v32, %v3062_v5  ;;  %v11656_v54 = vadd.s32 4294967295, %v11616_v10  ;;  %v2463_v5 = vsel %vm1352_vm10, %v11512_v28, 0.0  ;;  %v2305_v61 = vsel %vm1515_vm8, %v11542_v52, 0.0  ;;  %v1934_v29 = vld [vmem:[#allocation3 + $0xf7] sm:$0xff] }
 0x13b   : > { %v1875_v15 = vld [vmem:[#allocation2 + $0xe0] sm:$0xff]  ;;  %v1878_v36 = vld [vmem:[#allocation2 + $0xf8] sm:$0xff]  ;;  %16933 = vst [vmem:[#allocation27_spill] sm:$0xff] %v11663_v33  ;;  %v2017_v37 = vsel %vm1356_vm5, %v1921_v2, 0.0  ;;  %v3060_v32 = vld [vmem:[#allocation3 + $0x90] sm:$0xff]  ;;  %vm1364_vm12 = vcmp.ge.s32.totalorder %v11653_v49, 0  ;;  %v2492_v6 = vpack.c.bf16 %v11534_v46, %v2463_v5 }
 0x13c   : > { %1907 = vst.msk [vmem:[#allocation3 + $0x130] sm:$0xff] %vm16860_vm1, %v1875_v15  ;;  %1910 = vst.msk [vmem:[#allocation3 + $0x148] sm:$0xff] %vm16860_vm1, %v1878_v36  ;;  %v11677_v15 = vld [vmem:[#allocation3 + $0x99] sm:$0xff]  ;;  %vm16631_vm11 = vcmp.ge.s32.totalorder %v11656_v54, 0  ;;  %v2044_v12 = vpack.c.bf16 %v1922_v8, %v2017_v37  ;;  %v1925_v2 = vld [vmem:[#allocation3 + $0xaf] sm:$0xff]  ;;  %v11685_v28 = vadd.s32 4294967295, %v11663_v33  ;;  %v11722_v43 = vpop.permute.xlu0 %4959 }
 0x13d   : > { %v1876_v47 = vld [vmem:[#allocation2 + $0xe8] sm:$0xff]  ;;  %v1020_v36 = vadd.s32 208, %v11047_v7  ;;  %v1005_v37 = vadd.s32 88, %v11047_v7  ;;  %v3222_v5 = vsel %vm1513_vm0, %v11677_v15, 0.0  ;;  %v1022_v34 = vadd.s32 224, %v11047_v7  ;;  %v11823_v50 = vld [vmem:[#allocation3 + $0x11f] sm:$0xff] }
 0x13e   : > { %2654 = vrot.lane.b32.xlu0 %v11473_v45, %s16800_s23  ;;  %2817 = vrot.lane.b32.xlu1 %v2782_v62, %s16922_s26  ;;  %1908 = vst.msk [vmem:[#allocation3 + $0x138] sm:$0xff] %vm16860_vm1, %v1876_v47  ;;  %v1927_v62 = vld [vmem:[#allocation3 + $0xbf] sm:$0xff]  ;;  %v1929_v47 = vld [vmem:[#allocation3 + $0xcf] sm:$0xff]  ;;  %2060 = vst.msk [vmem:[#allocation4 + $0xc8] sm:$0xff] %vm16860_vm1, %v2044_v12  ;;  %vm16630_vm0 = vcmp.ge.s32.totalorder %v11685_v28, 0  ;;  %v3250_v33 = vpack.c.bf16 %v3222_v5, %v11700_v19 }
 0x13f   : > { %v2023_v42 = vsel %vm1362_vm2, %v1927_v62, 0.0  ;;  %v11703_v62 = vadd.s32 4294967295, %v11687_v31  ;;  %v11705_v59 = vand.u32 15, %v1020_v36  ;;  %v1932_v46 = vld [vmem:[#allocation3 + $0xe7] sm:$0xff]  ;;  %v1930_v12 = vld [vmem:[#allocation3 + $0xd7] sm:$0xff]  ;;  %v11754_v5 = vld [vmem:[#allocation3 + $0x9f] sm:$0xff] }
 0x140   : > { %v2047_v8 = vpack.c.bf16 %v1928_v53, %v2023_v42  ;;  %v11710_v53 = vld [vmem:[#allocation3 + $0xff] sm:$0xff]  ;;  %v11724_v36 = vld [vmem:[#allocation3 + $0x107] sm:$0xff]  ;;  %v11727_v42 = vld [vmem:[#allocation3 + $0x10f] sm:$0xff] }
 0x141   : > { %16935 = vst [vmem:[#allocation29_spill] sm:$0xff] %v11705_v59  ;;  %vm16627_vm10 = vcmp.ge.s32.totalorder %v11703_v62, 0  ;;  %v3069_v60 = vld [vmem:[#allocation3 + $0xd8] sm:$0xff] }
 0x142   : > { %2141 = vrot.lane.b32.xlu0 %v11473_v45, %s16826_s30  ;;  %3126 = vrot.lane.b32.xlu1 %v11633_v56, %s16701_s17  ;;  %v2960_v45 = vpack.c.bf16 %v11646_v27, %v2931_v44  ;;  %v1931_v44 = vld [vmem:[#allocation3 + $0xdf] sm:$0xff]  ;;  %2063 = vst.msk [vmem:[#allocation4 + $0x140] sm:$0xff] %vm16860_vm1, %v2047_v8  ;;  %v11734_v8 = vld [vmem:[#allocation3 + $0x117] sm:$0xff] }
 0x143   : > { %v2027_v52 = vsel %vm16631_vm11, %v1931_v44, 0.0 }
 0x144   : > { %v2049_v31 = vpack.c.bf16 %v1932_v46, %v2027_v52 }
 0x146   : > { %2366 = vrot.lane.b32.xlu0 %v2331_v26, %s16703_s19  ;;  %2995 = vrot.lane.b32.xlu1 %v2960_v45, %s16784_s18  ;;  %v1926_v26 = vld [vmem:[#allocation3 + $0xb7] sm:$0xff]  ;;  %v11695_v45 = vpack.c.bf16 %v3061_v22, %v3060_v32  ;;  %v2021_v32 = vsel %vm1360_vm4, %v1925_v2, 0.0  ;;  %v2025_v22 = vsel %vm1364_vm12, %v1929_v47, 0.0  ;;  %v11731_v2 = vadd.s32 4294967295, %v11705_v59  ;;  %v1933_v47 = vld [vmem:[#allocation3 + $0xef] sm:$0xff]  ;;  %2065 = vst.msk [vmem:[#allocation4 + $0x190] sm:$0xff] %vm16860_vm1, %v2049_v31 }
 0x147   : > { %v2046_v44 = vpack.c.bf16 %v1926_v26, %v2021_v32  ;;  %v2048_v10 = vpack.c.bf16 %v1930_v12, %v2025_v22  ;;  %v2031_v59 = vsel %vm16627_vm10, %v11710_v53, 0.0  ;;  %v2756_v26 = vsel %vm1515_vm8, %v11677_v15, 0.0  ;;  %v11762_v22 = vpop.permute.xlu1 %3148  ;;  %v11764_v12 = vpop.permute.xlu0 %5121 }
 0x148   : > { %vm16626_vm6 = vcmp.ge.s32.totalorder %v11731_v2, 0  ;;  %v11756_v32 = vand.u32 15, %v1005_v37  ;;  %v2783_v52 = vpack.c.bf16 %v2756_v26, %v11700_v19  ;;  %16937 = vst [vmem:[#allocation31_spill] sm:$0xff] %v11762_v22  ;;  %v3068_v22 = vld [vmem:[#allocation3 + $0xd0] sm:$0xff]  ;;  %vm16636_vm10 = vcmask 523584  }
 0x149   : > { %2062 = vst.msk [vmem:[#allocation4 + $0x118] sm:$0xff] %vm16860_vm1, %v2046_v44  ;;  %v2033_v46 = vsel %vm16626_vm6, %v11727_v42, 0.0  ;;  %2064 = vst.msk [vmem:[#allocation4 + $0x168] sm:$0xff] %vm16860_vm1, %v2048_v10  ;;  %v11776_v10 = vld [vmem:[#allocation3 + $0xa9] sm:$0xff]  ;;  %vm16640_vm6 = vcmask 326784  }
 0x14a   : > { %2527 = vrot.lane.b32.xlu0 %v2492_v6, %s16920_s28  ;;  %3124 = vrot.lane.b32.xlu1 %v11695_v45, %s16701_s17  ;;  %v2332_v6 = vpack.c.bf16 %v2305_v61, %v11576_v18  ;;  %v2051_v18 = vpack.c.bf16 %v11724_v36, %v2031_v59  ;;  %v2029_v61 = vsel %vm16630_vm0, %v1933_v47, 0.0  ;;  %16936 = vst [vmem:[#allocation30_spill] sm:$0xff] %v11756_v32  ;;  %v11779_v37 = vadd.s32 1, %v11756_v32  ;;  %v3194_v32 = vld [vmem:[#allocation3 + $0xb9] sm:$0xff] }
 0x14b   : > { %v2050_v31 = vpack.c.bf16 %v1934_v29, %v2029_v61  ;;  %v2052_v59 = vpack.c.bf16 %v11734_v8, %v2033_v46  ;;  %v2933_v29 = vsel %vm1354_vm14, %v11754_v5, 0.0  ;;  %v2465_v47 = vsel %vm1354_vm14, %v11623_v16, 0.0  ;;  %v11796_v61 = vpop.permute.xlu0 %4385 }
 0x14c   : > { %2067 = vst.msk [vmem:[#allocation4 + $0x1e0] sm:$0xff] %vm16860_vm1, %v2051_v18  ;;  %v3224_v26 = vsel %vm1515_vm8, %v11776_v10, 0.0  ;;  %vm1517_vm9 = vcmp.lt.s32.totalorder %v11779_v37, 16  ;;  %v11794_v18 = vpop.permute.xlu1 %5295  ;;  %v1024_v16 = vadd.s32 240, %v11047_v7  ;;  %v2493_v46 = vpack.c.bf16 %v11646_v27, %v2465_v47  ;;  %v3066_v47 = vld [vmem:[#allocation3 + $0xc0] sm:$0xff] }
 0x14d   : > { %2066 = vst.msk [vmem:[#allocation4 + $0x1b8] sm:$0xff] %vm16860_vm1, %v2050_v31  ;;  %2068 = vst.msk [vmem:[#allocation4 + $0x208] sm:$0xff] %vm16860_vm1, %v2052_v59  ;;  %v11802_v31 = vand.u32 15, %v1022_v34  ;;  %v3226_v55 = vsel %vm1517_vm9, %v3194_v32, 0.0  ;;  %vm16710_vm0 = vcmask 720384  }
 0x14e   : > { %2368 = vrot.lane.b32.xlu0 %v2332_v6, %s16703_s19  ;;  %3285 = vrot.lane.b32.xlu1 %v3250_v33, %s16921_s25  ;;  %v11768_v33 = vld [vmem:[#allocation3 + $0xa7] sm:$0xff]  ;;  %v11807_v59 = vand.u32 15, %v1024_v16 }
 0x14f   : > { %v2961_v44 = vpack.c.bf16 %v11768_v33, %v2933_v29  ;;  %v11785_v6 = vld [vmem:[#allocation3 + $0xa1] sm:$0xff]  ;;  %16938 = vst [vmem:[#allocation32_spill] sm:$0xff] %v11802_v31  ;;  %v11813_v29 = vadd.s32 4294967295, %v11802_v31  ;;  %v11821_v34 = vpop.permute.xlu0 %4513  ;;  %v11835_v31 = vld [vmem:[#allocation3 + $0x137] sm:$0xff] }
 0x150   : > { %v3251_v14 = vpack.c.bf16 %v3224_v26, %v11785_v6  ;;  %16939 = vst [vmem:[#allocation33_spill] sm:$0xff] %v11807_v59  ;;  %v11816_v27 = vadd.s32 4294967295, %v11807_v59  ;;  %v11819_v26 = vpop.permute.xlu1 %3309  ;;  %v3067_v16 = vld [vmem:[#allocation3 + $0xc8] sm:$0xff] }
 0x151   : > { %16940 = vst [vmem:[#allocation34_spill] sm:$0xff] %v11819_v26  ;;  %vm16625_vm8 = vcmp.ge.s32.totalorder %v11813_v29, 0  ;;  %v3092_v38 = vpack.c.bf16 %v3067_v16, %v3066_v47 }
 0x152   : > { %2660 = vrot.lane.b32.xlu0 %v11633_v56, %s16800_s23  ;;  %2819 = vrot.lane.b32.xlu1 %v2783_v52, %s16922_s26  ;;  %v1007_v52 = vadd.s32 104, %v11047_v7  ;;  %vm16605_vm14 = vcmp.ge.s32.totalorder %v11816_v27, 0  ;;  %v2035_v25 = vsel %vm16625_vm8, %v11823_v50, 0.0  ;;  %vm16695_vm8 = vcmask 1048512  }
 0x153   : > { %v11856_v39 = vpop.permute.xlu0 %4737 }
 0x154   : > { %v11831_v59 = vand.u32 15, %v1007_v52  ;;  %v2307_v52 = vsel %vm1517_vm9, %v11677_v15, 0.0  ;;  %v11854_v16 = vpop.permute.xlu1 %5423 }
 0x155   : > { %v2333_v15 = vpack.c.bf16 %v2307_v52, %v11700_v19  ;;  %v11874_v19 = vld [vmem:[#allocation3 + $0xb1] sm:$0xff] }
 0x156   : > { %2147 = vrot.lane.b32.xlu0 %v11633_v56, %s16826_s30  ;;  %2997 = vrot.lane.b32.xlu1 %v2961_v44, %s16784_s18  ;;  %v2758_v56 = vsel %vm1517_vm9, %v11776_v10, 0.0  ;;  %16941 = vst [vmem:[#allocation35_spill] sm:$0xff] %v11831_v59  ;;  %v1455_v40 = vadd.s32 1, %v11831_v59 }
 0x157   : > { %v2784_v44 = vpack.c.bf16 %v2758_v56, %v11785_v6  ;;  %v11833_v56 = vld [vmem:[#allocation3 + $0x127] sm:$0xff] }
 0x158   : > { %v2053_v51 = vpack.c.bf16 %v11833_v56, %v2035_v25  ;;  %v11868_v20 = vpop.permute.xlu1 %5583 }
 0x15a   : > { %2529 = vrot.lane.b32.xlu0 %v2493_v46, %s16920_s28  ;;  %3287 = vrot.lane.b32.xlu1 %v3251_v14, %s16921_s25  ;;  %v11825_v46 = vld [vmem:[#allocation3 + $0x12f] sm:$0xff]  ;;  %2069 = vst.msk [vmem:[#allocation4 + $0x230] sm:$0xff] %vm16860_vm1, %v2053_v51 }
 0x15b   : > { %v2903_v14 = vld [vmem:[#allocation3 + $0xaf] sm:$0xff]  ;;  %v2037_v0 = vsel %vm16605_vm14, %v11825_v46, 0.0  ;;  %vm1519_vm14 = vcmp.lt.s32.totalorder %v1455_v40, 16  ;;  %v1011_v40 = vadd.s32 136, %v11047_v7 }
 0x15c   : > { %v2935_v17 = vsel %vm1356_vm5, %v2903_v14, 0.0  ;;  %v2054_v47 = vpack.c.bf16 %v11835_v31, %v2037_v0  ;;  %v2467_v0 = vsel %vm1356_vm5, %v11754_v5, 0.0  ;;  %v1009_v5 = vadd.s32 120, %v11047_v7 }
 0x15d   : > { %v2494_v59 = vpack.c.bf16 %v11768_v33, %v2467_v0  ;;  %v3252_v33 = vpack.c.bf16 %v3226_v55, %v11874_v19  ;;  %v2760_v52 = vsel %vm1519_vm14, %v3194_v32, 0.0  ;;  %v2906_v0 = vld [vmem:[#allocation3 + $0xc7] sm:$0xff]  ;;  %vm16714_vm5 = vcmask 785984  }
 0x15e   : > { %2658 = vrot.lane.b32.xlu0 %v11695_v45, %s16800_s23  ;;  %2821 = vrot.lane.b32.xlu1 %v2784_v44, %s16922_s26  ;;  %v2904_v44 = vld [vmem:[#allocation3 + $0xb7] sm:$0xff]  ;;  %2070 = vst.msk [vmem:[#allocation4 + $0x258] sm:$0xff] %vm16860_vm1, %v2054_v47  ;;  %v11870_v47 = vpop.permute.xlu0 %4961 }
 0x15f   : > { %v2962_v25 = vpack.c.bf16 %v2904_v44, %v2935_v17  ;;  %v2309_v17 = vsel %vm1519_vm14, %v11776_v10, 0.0  ;;  %v11886_v10 = vpop.permute.xlu1 %5743 }
 0x162   : > { %2145 = vrot.lane.b32.xlu0 %v11695_v45, %s16826_s30  ;;  %3130 = vrot.lane.b32.xlu1 %v3092_v38, %s16701_s17  ;;  %v3064_v45 = vld [vmem:[#allocation3 + $0xb0] sm:$0xff]  ;;  %v11888_v37 = vpop.permute.xlu0 %4387 }
 0x163   : > { %v3091_v51 = vpack.c.bf16 %v3065_v3, %v3064_v45  ;;  %v2334_v3 = vpack.c.bf16 %v2309_v17, %v11785_v6  ;;  %v3196_v45 = vld [vmem:[#allocation3 + $0xc9] sm:$0xff] }
 0x164   : > { %v3228_v21 = vsel %vm1519_vm14, %v3196_v45, 0.0 }
 0x166   : > { %2370 = vrot.lane.b32.xlu0 %v2333_v15, %s16703_s19  ;;  %2999 = vrot.lane.b32.xlu1 %v2962_v25, %s16784_s18  ;;  %v2905_v15 = vld [vmem:[#allocation3 + $0xbf] sm:$0xff]  ;;  %v2785_v25 = vpack.c.bf16 %v2760_v52, %v11874_v19 }
 0x167   : > { %v2937_v6 = vsel %vm1358_vm13, %v2905_v15, 0.0  ;;  %v3195_v52 = vld [vmem:[#allocation3 + $0xc1] sm:$0xff] }
 0x168   : > { %v2963_v55 = vpack.c.bf16 %v2906_v0, %v2937_v6  ;;  %v3253_v63 = vpack.c.bf16 %v3228_v21, %v3195_v52  ;;  %v11917_v21 = vld [vmem:[#allocation3 + $0xcf] sm:$0xff] }
 0x16a   : > { %2531 = vrot.lane.b32.xlu0 %v2494_v59, %s16920_s28  ;;  %3128 = vrot.lane.b32.xlu1 %v3091_v51, %s16701_s17  ;;  %v11890_v59 = vand.u32 15, %v1009_v5  ;;  %v2469_v5 = vsel %vm1358_vm13, %v2903_v14, 0.0  ;;  %vm16639_vm13 = vcmask 589184  }
 0x16c   : > { %16942 = vst [vmem:[#allocation36_spill] sm:$0xff] %v11890_v59  ;;  %v1457_v17 = vadd.s32 1, %v11890_v59 }
 0x16e   : > { %2372 = vrot.lane.b32.xlu0 %v2334_v3, %s16703_s19  ;;  %3289 = vrot.lane.b32.xlu1 %v3252_v33, %s16921_s25  ;;  %v11898_v3 = vpop.permute.xlu1 %5297  ;;  %v11900_v33 = vpop.permute.xlu0 %4515  ;;  %vm1521_vm9 = vcmp.lt.s32.totalorder %v1457_v17, 16  ;;  %v11965_v17 = vld [vmem:[#allocation3 + $0xdf] sm:$0xff] }
 0x16f   : > { %v2762_v59 = vsel %vm1521_vm9, %v3196_v45, 0.0 }
 0x170   : > { %v2786_v14 = vpack.c.bf16 %v2762_v59, %v3195_v52  ;;  %v2311_v59 = vsel %vm1521_vm9, %v3194_v32, 0.0 }
 0x172   : > { %2664 = vrot.lane.b32.xlu0 %v3092_v38, %s16800_s23  ;;  %2823 = vrot.lane.b32.xlu1 %v2785_v25, %s16922_s26  ;;  %v2495_v25 = vpack.c.bf16 %v2904_v44, %v2469_v5  ;;  %v11910_v6 = vpop.permute.xlu1 %5425  ;;  %v11912_v4 = vpop.permute.xlu0 %4739  ;;  %v11919_v44 = vand.u32 15, %v1011_v40 }
 0x174   : > { %16943 = vst [vmem:[#allocation37_spill] sm:$0xff] %v11919_v44  ;;  %v1459_v40 = vadd.s32 1, %v11919_v44 }
 0x176   : > { %2151 = vrot.lane.b32.xlu0 %v3092_v38, %s16826_s30  ;;  %3001 = vrot.lane.b32.xlu1 %v2963_v55, %s16784_s18  ;;  %v3071_v38 = vld [vmem:[#allocation3 + $0xe8] sm:$0xff]  ;;  %vm1523_vm14 = vcmp.lt.s32.totalorder %v1459_v40, 16 }
 0x177   : > { %v11923_v5 = vpack.c.bf16 %v3071_v38, %v3070_v41  ;;  %v2335_v38 = vpack.c.bf16 %v2311_v59, %v11874_v19  ;;  %v11947_v59 = vpack.c.bf16 %v3069_v60, %v3068_v22  ;;  %v2313_v35 = vsel %vm1523_vm14, %v3196_v45, 0.0 }
 0x178   : > { %v2336_v22 = vpack.c.bf16 %v2313_v35, %v3195_v52  ;;  %v2941_v35 = vsel %vm1362_vm2, %v11965_v17, 0.0 }
 0x17a   : > { %2533 = vrot.lane.b32.xlu0 %v2495_v25, %s16920_s28  ;;  %3291 = vrot.lane.b32.xlu1 %v3253_v63, %s16921_s25  ;;  %v11927_v25 = vld [vmem:[#allocation3 + $0xd7] sm:$0xff] }
 0x17e   : > { %2662 = vrot.lane.b32.xlu0 %v3091_v51, %s16800_s23  ;;  %2825 = vrot.lane.b32.xlu1 %v2786_v14, %s16922_s26  ;;  %v2939_v14 = vsel %vm1360_vm4, %v11917_v21, 0.0 }
 0x17f   : > { %v2964_v32 = vpack.c.bf16 %v11927_v25, %v2939_v14 }
 0x180   : > { %v2361_v55 = vpop.permute.xlu1 %2360  ;;  %v11921_v63 = vpop.permute.xlu0 %2652 }
 0x181   : > { %2409 = vst.msk [vmem:[#allocation4] sm:$0xff] %vm16639_vm13, %v2361_v55  ;;  %v2471_v55 = vsel %vm1360_vm4, %v2905_v15, 0.0  ;;  %v11951_v15 = vld [vmem:[#allocation3 + $0xd1] sm:$0xff]  ;;  %vm16709_vm4 = vcmask 982784  }
 0x182   : > { %2149 = vrot.lane.b32.xlu0 %v3091_v51, %s16826_s30  ;;  %3134 = vrot.lane.b32.xlu1 %v11923_v5, %s16701_s17  ;;  %v11945_v51 = vld [vmem:[#allocation3 + $0xd9] sm:$0xff]  ;;  %v2496_v19 = vpack.c.bf16 %v2906_v0, %v2471_v55 }
 0x183   : > { %v3230_v14 = vsel %vm1521_vm9, %v11945_v51, 0.0  ;;  %v2764_v45 = vsel %vm1523_vm14, %v11945_v51, 0.0  ;;  %vm16660_vm9 = vcmask 130048  }
 0x184   : > { %v11936_v26 = vpop.permute.xlu1 %3118  ;;  %v2140_v41 = vpop.permute.xlu0 %2139  ;;  %v2787_v52 = vpack.c.bf16 %v2764_v45, %v11951_v15 }
 0x185   : > { %2186 = vst.msk [vmem:[#allocation4 + $0x50] sm:$0xff] %vm16650_vm15, %v2140_v41  ;;  %v1013_v41 = vadd.s32 152, %v11047_v7 }
 0x186   : > { %2374 = vrot.lane.b32.xlu0 %v2335_v38, %s16703_s19  ;;  %3003 = vrot.lane.b32.xlu1 %v2964_v32, %s16784_s18 }
 0x187   : > { %v11967_v38 = vand.u32 15, %v1013_v41 }
 0x188   : > { %v2990_v44 = vpop.permute.xlu1 %2989  ;;  %v2522_v57 = vpop.permute.xlu0 %2521 }
 0x189   : > { %2570 = vst.msk [vmem:[#allocation4] sm:$0xff] %vm16714_vm5, %v2522_v57  ;;  %v3254_v57 = vpack.c.bf16 %v3230_v14, %v11951_v15  ;;  %16944 = vst [vmem:[#allocation38_spill] sm:$0xff] %v11967_v38  ;;  %v11980_v14 = vld [vmem:[#allocation3 + $0xe9] sm:$0xff]  ;;  %v11983_v41 = vadd.s32 1, %v11967_v38 }
 0x18a   : > { %2535 = vrot.lane.b32.xlu0 %v2496_v19, %s16920_s28  ;;  %3132 = vrot.lane.b32.xlu1 %v11947_v59, %s16701_s17  ;;  %v11972_v19 = vld [vmem:[#allocation3 + $0xe7] sm:$0xff]  ;;  %v3232_v38 = vsel %vm1523_vm14, %v11980_v14, 0.0  ;;  %vm16633_vm14 = vcmask 917184  }
 0x18b   : > { %v2965_v45 = vpack.c.bf16 %v11972_v19, %v2941_v35  ;;  %vm1525_vm11 = vcmp.lt.s32.totalorder %v11983_v41, 16  ;;  %v4064_v35 = vld [vmem:[#allocation3 + $0x14] sm:$0xff]  ;;  %v12125_v41 = vadd.s32 4294967292, %v11184_v48  ;;  %v4067_v48 = vld [vmem:[#allocation3 + $0x2c] sm:$0xff] }
 0x18c   : > { %v2651_v0 = vpop.permute.xlu0 %2650  ;;  %v3280_v60 = vpop.permute.xlu1 %3279 }
 0x18d   : > { %2699 = vst.msk [vmem:[#allocation4] sm:$0xff] %vm16709_vm4, %v2651_v0  ;;  %v4063_v0 = vld [vmem:[#allocation3 + $0xc] sm:$0xff]  ;;  %16945 = vst [vmem:[#allocation39_spill] sm:$0xff] %v12125_v41 }
 0x18e   : > { %2376 = vrot.lane.b32.xlu0 %v2336_v22, %s16703_s19  ;;  %3293 = vrot.lane.b32.xlu1 %v3254_v57, %s16921_s25  ;;  %v4159_v30 = vsel %vm16634_vm3, %v4063_v0, 0.0  ;;  %vm16958_vm3 = vcmp.ge.s32.totalorder %v11813_v29, 0 }
 0x18f   : > { %v4191_v0 = vpack.c.bf16 %v4064_v35, %v4159_v30  ;;  %v3075_v35 = vld [vmem:[#allocation3 + $0x108] sm:$0xff]  ;;  %v4065_v30 = vld [vmem:[#allocation3 + $0x1c] sm:$0xff] }
 0x190   : > { %v2138_v32 = vpop.permute.xlu0 %2137  ;;  %v2814_v55 = vpop.permute.xlu1 %2813 }
 0x191   : > { %2185 = vst.msk [vmem:[#allocation4 + $0x28] sm:$0xff] %vm16650_vm15, %v2138_v32  ;;  %v2473_v32 = vsel %vm1362_vm2, %v11917_v21, 0.0  ;;  %vm16635_vm2 = vcmask 719872  }
 0x192   : > { %2864 = vst.msk [vmem:[#allocation4 + $0x30] sm:$0xff] %vm16660_vm9, %v2814_v55  ;;  %2668 = vrot.lane.b32.xlu0 %v11923_v5, %s16800_s23  ;;  %2827 = vrot.lane.b32.xlu1 %v2787_v52, %s16922_s26  ;;  %v11993_v52 = vld [vmem:[#allocation3 + $0xe1] sm:$0xff] }
 0x194   : > { %v2812_v22 = vpop.permute.xlu0 %2811  ;;  %v11985_v57 = vpop.permute.xlu1 %3122 }
 0x195   : > { %2860 = vst.msk [vmem:[#allocation4] sm:$0xff] %vm16695_vm8, %v2812_v22 }
 0x196   : > { %2862 = vst.msk [vmem:[#allocation4 + $0x8] sm:$0xff] %vm16660_vm9, %v2812_v22  ;;  %2155 = vrot.lane.b32.xlu0 %v11923_v5, %s16826_s30  ;;  %3005 = vrot.lane.b32.xlu1 %v2965_v45, %s16784_s18  ;;  %v2497_v22 = vpack.c.bf16 %v11927_v25, %v2473_v32  ;;  %v2766_v5 = vsel %vm1525_vm11, %v11980_v14, 0.0  ;;  %v3074_v32 = vld [vmem:[#allocation3 + $0x100] sm:$0xff] }
 0x197   : > { %3038 = vst.msk [vmem:[#allocation4 + $0x8] sm:$0xff] %vm16640_vm6, %v2990_v44  ;;  %v3255_v44 = vpack.c.bf16 %v3232_v38, %v11993_v52  ;;  %v2788_v38 = vpack.c.bf16 %v2766_v5, %v11993_v52  ;;  %v4066_v5 = vld [vmem:[#allocation3 + $0x24] sm:$0xff] }
 0x198   : > { %3167 = vst.msk [vmem:[#allocation4 + $0x8] sm:$0xff] %vm16636_vm10, %v11936_v26  ;;  %v2363_v21 = vpop.permute.xlu0 %2362  ;;  %v2992_v40 = vpop.permute.xlu1 %2991  ;;  %v1015_v26 = vadd.s32 168, %v11047_v7 }
 0x199   : > { %3328 = vst.msk [vmem:[#allocation4 + $0x8] sm:$0xff] %vm16710_vm0, %v3280_v60 }
 0x19a   : > { %2410 = vst.msk [vmem:[#allocation4 + $0x28] sm:$0xff] %vm16639_vm13, %v2363_v21  ;;  %2537 = vrot.lane.b32.xlu0 %v2497_v22, %s16920_s28  ;;  %3295 = vrot.lane.b32.xlu1 %v3255_v44, %s16921_s25  ;;  %v12028_v21 = vld [vmem:[#allocation3 + $0xef] sm:$0xff] }
 0x19b   : > { %3039 = vst.msk [vmem:[#allocation4 + $0x30] sm:$0xff] %vm16640_vm6, %v2992_v40  ;;  %v12030_v40 = vand.u32 15, %v1015_v26 }
 0x19c   : > { %v2524_v25 = vpop.permute.xlu0 %2523  ;;  %v3121_v45 = vpop.permute.xlu1 %3120  ;;  %v3344_v60 = vld [vmem:[#allocation4] sm:$0xff] }
 0x19d   : > { %2571 = vst.msk [vmem:[#allocation4 + $0x28] sm:$0xff] %vm16714_vm5, %v2524_v25  ;;  %v3072_v25 = vld [vmem:[#allocation3 + $0xf0] sm:$0xff] }
 0x19e   : > { %3168 = vst.msk [vmem:[#allocation4 + $0x30] sm:$0xff] %vm16636_vm10, %v3121_v45  ;;  %2666 = vrot.lane.b32.xlu0 %v11947_v59, %s16800_s23  ;;  %2829 = vrot.lane.b32.xlu1 %v2788_v38, %s16922_s26  ;;  %v3073_v45 = vld [vmem:[#allocation3 + $0xf8] sm:$0xff] }
 0x19f   : > { %4207 = vst.msk [vmem:[#allocation4] sm:$0xff] %vm16860_vm1, %v4191_v0  ;;  %v2943_v0 = vsel %vm1364_vm12, %v12028_v21, 0.0 }
 0x1a0   : > { %2700 = vst.msk [vmem:[#allocation4 + $0x28] sm:$0xff] %vm16709_vm4, %v11921_v63  ;;  %v3345_v22 = vld [vmem:[#allocation4 + $0x8] sm:$0xff]  ;;  %v2365_v63 = vpop.permute.xlu0 %2364  ;;  %v3282_v44 = vpop.permute.xlu1 %3281 }
 0x1a1   : > { %4431 = vst.msk [vmem:[#allocation4] sm:$0xff] %vm16650_vm15, %v11584_v11  ;;  %10243 = vmatprep.mubr.msk.bf16.mxu1 %vm16635_vm2, %v3345_v22  ;;  %v12040_v11 = vpack.c.bf16 %v3075_v35, %v3074_v32  ;;  %v4068_v22 = vld [vmem:[#allocation3 + $0x34] sm:$0xff] }
 0x1a2   : > { %2863 = vst.msk [vmem:[#allocation4 + $0x28] sm:$0xff] %vm16695_vm8, %v2814_v55  ;;  %v4161_v55 = vsel %vm16632_vm7, %v4065_v30, 0.0  ;;  %3569 = vmatmul.mubr.bf16.vlgmr.msra.gmra.mrb[0].mxu1 %v3344_v60  ;;  %2153 = vrot.lane.b32.xlu0 %v11947_v59, %s16826_s30  ;;  %v2475_v59 = vsel %vm1364_vm12, %v11965_v17, 0.0  ;;  %v12097_v17 = vpack.c.bf16 %v3073_v45, %v3072_v25  ;;  %vm16947_vm12 = vcmp.ge.s32.totalorder %v11656_v54, 0 }
 0x1a3   : > { %4559 = vst.msk [vmem:[#allocation4] sm:$0xff] %vm16639_vm13, %v11625_v1  ;;  %2411 = vst.msk [vmem:[#allocation4 + $0x50] sm:$0xff] %vm16639_vm13, %v2365_v63  ;;  %v2315_v1 = vsel %vm1525_vm11, %v11945_v51, 0.0  ;;  %3138 = vrot.lane.b32.xlu1 %v12040_v11, %s16701_s17  ;;  %v2498_v49 = vpack.c.bf16 %v11972_v19, %v2475_v59  ;;  %v12109_v19 = vld [vmem:[#allocation3 + $0xf1] sm:$0xff]  ;;  %v2945_v30 = vsel %vm16947_vm12, %v11710_v53, 0.0 }
 0x1a4   : > { %5168 = vst.msk [vmem:[#allocation4 + $0x8] sm:$0xff] %vm16660_vm9, %v11544_v23  ;;  %v12071_v51 = vpop.permute.xlu0 %2656  ;;  %v2816_v26 = vpop.permute.xlu1 %2815 }
 0x1a5   : > { %4783 = vst.msk [vmem:[#allocation4] sm:$0xff] %vm16714_vm5, %v11675_v58  ;;  %v12053_v58 = vld [vmem:[#allocation3 + $0xf7] sm:$0xff] }
 0x1a6   : > { %5343 = vst.msk [vmem:[#allocation4 + $0x8] sm:$0xff] %vm16640_vm6, %v11794_v18  ;;  %v4192_v18 = vpack.c.bf16 %v4066_v5, %v4161_v55 }
 0x1a7   : > { %3329 = vst.msk [vmem:[#allocation4 + $0x30] sm:$0xff] %vm16710_vm0, %v3282_v44  ;;  %v12150_v44 = vld [vmem:[#allocation3 + $0x109] sm:$0xff] }
 0x1a8   : > { %5007 = vst.msk [vmem:[#allocation4] sm:$0xff] %vm16709_vm4, %v11722_v43  ;;  %v12067_v43 = vadd.s32 1, %v12030_v40  ;;  %v2994_v38 = vpop.permute.xlu1 %2993 }
 0x1a9   : > { %5471 = vst.msk [vmem:[#allocation4 + $0x8] sm:$0xff] %vm16636_vm10, %v11854_v16  ;;  %v2337_v16 = vpack.c.bf16 %v2315_v1, %v11951_v15  ;;  %v12085_v15 = vld [vmem:[#allocation3 + $0xf9] sm:$0xff] }
 0x1aa   : > { %5167 = vst.msk [vmem:[#allocation4] sm:$0xff] %vm16695_vm8, %v11544_v23  ;;  %v2966_v23 = vpack.c.bf16 %v12053_v58, %v2943_v0  ;;  %vm1527_vm7 = vcmp.lt.s32.totalorder %v12067_v43, 16  ;;  %v1019_v43 = vadd.s32 200, %v11047_v7 }
 0x1ab   : > { %5631 = vst.msk [vmem:[#allocation4 + $0x8] sm:$0xff] %vm16710_vm0, %v11868_v20  ;;  %2378 = vrot.lane.b32.xlu0 %v2337_v16, %s16703_s19  ;;  %v3346_v20 = vld [vmem:[#allocation4 + $0x28] sm:$0xff]  ;;  %v3236_v59 = vsel %vm1527_vm7, %v12150_v44, 0.0 }
 0x1ac   : > { %5792 = vst.msk [vmem:[#allocation4 + $0x8] sm:$0xff] %vm16633_vm14, %v11886_v10  ;;  %3007 = vrot.lane.b32.xlu1 %v2966_v23, %s16784_s18  ;;  %v2144_v10 = vpop.permute.xlu0 %2143  ;;  %v12165_v23 = vld [vmem:[#allocation3 + $0x101] sm:$0xff] }
 0x1ad   : > { %2866 = vst.msk [vmem:[#allocation4 + $0x58] sm:$0xff] %vm16660_vm9, %v2816_v26 }
 0x1ae   : > { %4208 = vst.msk [vmem:[#allocation4 + $0x28] sm:$0xff] %vm16860_vm1, %v4192_v18  ;;  %v3347_v60 = vld [vmem:[#allocation4 + $0x30] sm:$0xff]  ;;  %v2967_v18 = vpack.c.bf16 %v11724_v36, %v2945_v30 }
 0x1af   : > { %4432 = vst.msk [vmem:[#allocation4 + $0x28] sm:$0xff] %vm16650_vm15, %v11796_v61  ;;  %2188 = vst.msk [vmem:[#allocation4 + $0xa0] sm:$0xff] %vm16650_vm15, %v2144_v10  ;;  %10244 = vmatprep.mubr.msk.bf16.mxu1 %vm16635_vm2, %v3347_v60  ;;  %v2317_v61 = vsel %vm1527_vm7, %v11980_v14, 0.0  ;;  %2539 = vrot.lane.b32.xlu0 %v2498_v49, %s16920_s28  ;;  %v3284_v14 = vpop.permute.xlu1 %3283  ;;  %v3079_v60 = vld [vmem:[#allocation3 + $0x128] sm:$0xff] }
 0x1b0   : > { %3040 = vst.msk [vmem:[#allocation4 + $0x58] sm:$0xff] %vm16640_vm6, %v2994_v38  ;;  %3577 = vmatmul.mubr.bf16.gmra.mrb[4].mxu1 %v3346_v20  ;;  %3136 = vrot.lane.b32.xlu1 %v12097_v17, %s16701_s17 }
 0x1b1   : > { %5170 = vst.msk [vmem:[#allocation4 + $0x30] sm:$0xff] %vm16660_vm9, %v11764_v12 }
 0x1b2   : > { %4560 = vst.msk [vmem:[#allocation4 + $0x28] sm:$0xff] %vm16639_vm13, %v11821_v34  ;;  %v3234_v34 = vsel %vm1525_vm11, %v12085_v15, 0.0  ;;  %vm16675_vm11 = vcmp.ge.s32.totalorder %v12125_v41, 0 }
 0x1b3   : > { %3169 = vst.msk [vmem:[#allocation4 + $0x58] sm:$0xff] %vm16636_vm10, %v11985_v57  ;;  %v2338_v57 = vpack.c.bf16 %v2317_v61, %v11993_v52  ;;  %v2818_v32 = vpop.permute.xlu1 %2817  ;;  %v4163_v63 = vsel %vm16675_vm11, %v4067_v48, 0.0 }
 0x1b4   : > { %5344 = vst.msk [vmem:[#allocation4 + $0x30] sm:$0xff] %vm16640_vm6, %v11898_v3  ;;  %v1017_v3 = vadd.s32 184, %v11047_v7  ;;  %v4193_v16 = vpack.c.bf16 %v4068_v22, %v4163_v63  ;;  %v12238_v22 = vld [vmem:[#allocation3 + $0x111] sm:$0xff]  ;;  %v1021_v63 = vadd.s32 216, %v11047_v7 }
 0x1b5   : > { %4784 = vst.msk [vmem:[#allocation4 + $0x28] sm:$0xff] %vm16714_vm5, %v11856_v39  ;;  %v2526_v39 = vpop.permute.xlu0 %2525  ;;  %2380 = vrot.lane.b32.xlu0 %v2338_v57, %s16703_s19 }
 0x1b6   : > { %5008 = vst.msk [vmem:[#allocation4 + $0x28] sm:$0xff] %vm16709_vm4, %v11870_v47  ;;  %v3256_v47 = vpack.c.bf16 %v3234_v34, %v12109_v19 }
 0x1b7   : > { %5472 = vst.msk [vmem:[#allocation4 + $0x30] sm:$0xff] %vm16636_vm10, %v11910_v6  ;;  %v2768_v6 = vsel %vm1527_vm7, %v12085_v15, 0.0  ;;  %v12155_v1 = vpop.permute.xlu1 %3126  ;;  %vm16949_vm7 = vcmp.ge.s32.totalorder %v11685_v28, 0 }
 0x1b8   : > { %5169 = vst.msk [vmem:[#allocation4 + $0x28] sm:$0xff] %vm16695_vm8, %v11764_v12  ;;  %3297 = vrot.lane.b32.xlu1 %v3256_v47, %s16921_s25  ;;  %v12135_v12 = vand.u32 15, %v1017_v3  ;;  %v2789_v35 = vpack.c.bf16 %v2768_v6, %v12109_v19  ;;  %v2947_v34 = vsel %vm16949_vm7, %v11727_v42, 0.0  ;;  %v3076_v47 = vld [vmem:[#allocation3 + $0x110] sm:$0xff]  ;;  %v3077_v6 = vld [vmem:[#allocation3 + $0x118] sm:$0xff] }
 0x1b9   : > { %2572 = vst.msk [vmem:[#allocation4 + $0x50] sm:$0xff] %vm16714_vm5, %v2526_v39  ;;  %v2655_v52 = vpop.permute.xlu0 %2654  ;;  %2672 = vrot.lane.b32.xlu0 %v12040_v11, %s16800_s23 }
 0x1ba   : > { %3330 = vst.msk [vmem:[#allocation4 + $0x58] sm:$0xff] %vm16710_vm0, %v3284_v14  ;;  %16946 = vst [vmem:[#allocation40_spill] sm:$0xff] %v12135_v12  ;;  %v12153_v5 = vadd.s32 1, %v12135_v12  ;;  %v16994_v12 = vld [vmem:[#allocation14_spill] sm:$0xff] }
 0x1bb   : > { %2701 = vst.msk [vmem:[#allocation4 + $0x50] sm:$0xff] %vm16709_vm4, %v2655_v52  ;;  %v2996_v25 = vpop.permute.xlu1 %2995  ;;  %v12225_v52 = vld [vmem:[#allocation3 + $0x119] sm:$0xff] }
 0x1bc   : > { %2868 = vst.msk [vmem:[#allocation4 + $0x80] sm:$0xff] %vm16660_vm9, %v2818_v32  ;;  %2831 = vrot.lane.b32.xlu1 %v2789_v35, %s16922_s26  ;;  %vm1529_vm14 = vcmp.lt.s32.totalorder %v12153_v5, 16 }
 0x1bd   : > { %2865 = vst.msk [vmem:[#allocation4 + $0x50] sm:$0xff] %vm16695_vm8, %v2816_v26  ;;  %v2142_v55 = vpop.permute.xlu0 %2141  ;;  %v2477_v26 = vsel %vm16947_vm12, %v12028_v21, 0.0  ;;  %2159 = vrot.lane.b32.xlu0 %v12040_v11, %s16826_s30  ;;  %v3257_v21 = vpack.c.bf16 %v3236_v59, %v12165_v23  ;;  %v2770_v11 = vsel %vm1529_vm14, %v12150_v44, 0.0  ;;  %vm16950_vm12 = vmmov %vm16949_vm7 }
 0x1be   : > { %2187 = vst.msk [vmem:[#allocation4 + $0x78] sm:$0xff] %vm16650_vm15, %v2142_v55  ;;  %v2499_v45 = vpack.c.bf16 %v12053_v58, %v2477_v26  ;;  %v2790_v38 = vpack.c.bf16 %v2770_v11, %v12165_v23 }
 0x1bf   : > { %3041 = vst.msk [vmem:[#allocation4 + $0x80] sm:$0xff] %vm16640_vm6, %v2996_v25  ;;  %v3125_v10 = vpop.permute.xlu1 %3124 }
 0x1c0   : > { %3009 = vrot.lane.b32.xlu1 %v2967_v18, %s16784_s18  ;;  %3170 = vst.msk [vmem:[#allocation4 + $0x80] sm:$0xff] %vm16636_vm10, %v3125_v10  ;;  %v12254_v18 = vand.u32 15, %v1021_v63 }
 0x1c1   : > { %v3349_v0 = vld [vmem:[#allocation4 + $0x58] sm:$0xff]  ;;  %v2367_v20 = vpop.permute.xlu0 %2366  ;;  %2541 = vrot.lane.b32.xlu0 %v2499_v45, %s16920_s28 }
 0x1c2   : > { %10245 = vmatprep.mubr.msk.bf16.mxu1 %vm16635_vm2, %v3349_v0  ;;  %2412 = vst.msk [vmem:[#allocation4 + $0x78] sm:$0xff] %vm16639_vm13, %v2367_v20  ;;  %16951 = vst [vmem:[#allocation42_spill] sm:$0xff] %v12254_v18  ;;  %v12266_v20 = vld [vmem:[#allocation3 + $0x129] sm:$0xff]  ;;  %v12269_v25 = vadd.s32 1, %v12254_v18  ;;  %v16987_v18 = vld [vmem:[#allocation13_spill] sm:$0xff] }
 0x1c3   : > { %v3286_v49 = vpop.permute.xlu1 %3285 }
 0x1c4   : > { %v3348_v54 = vld [vmem:[#allocation4 + $0x50] sm:$0xff]  ;;  %3299 = vrot.lane.b32.xlu1 %v3257_v21, %s16921_s25  ;;  %3331 = vst.msk [vmem:[#allocation4 + $0x80] sm:$0xff] %vm16710_vm0, %v3286_v49  ;;  %v1023_v49 = vadd.s32 232, %v11047_v7 }
 0x1c5   : > { %3585 = vmatmul.mubr.bf16.gmra.mrb[8].mxu1 %v3348_v54  ;;  %4209 = vst.msk [vmem:[#allocation4 + $0x50] sm:$0xff] %vm16860_vm1, %v4193_v16  ;;  %v2528_v58 = vpop.permute.xlu0 %2527  ;;  %2670 = vrot.lane.b32.xlu0 %v12097_v17, %s16800_s23 }
 0x1c6   : > { %4433 = vst.msk [vmem:[#allocation4 + $0x50] sm:$0xff] %vm16650_vm15, %v11888_v37  ;;  %v3078_v37 = vld [vmem:[#allocation3 + $0x120] sm:$0xff] }
 0x1c7   : > { %4561 = vst.msk [vmem:[#allocation4 + $0x50] sm:$0xff] %vm16639_vm13, %v11900_v33  ;;  %v12196_v33 = vand.u32 15, %v1019_v43  ;;  %v12202_v61 = vpack.c.bf16 %v3079_v60, %v3078_v37  ;;  %v2820_v14 = vpop.permute.xlu1 %2819 }
 0x1c8   : > { %4785 = vst.msk [vmem:[#allocation4 + $0x50] sm:$0xff] %vm16714_vm5, %v11912_v4  ;;  %2573 = vst.msk [vmem:[#allocation4 + $0x78] sm:$0xff] %vm16714_vm5, %v2528_v58  ;;  %2833 = vrot.lane.b32.xlu1 %v2790_v38, %s16922_s26  ;;  %v12281_v58 = vld [vmem:[#allocation3 + $0x121] sm:$0xff] }
 0x1c9   : > { %2702 = vst.msk [vmem:[#allocation4 + $0x78] sm:$0xff] %vm16709_vm4, %v12071_v51  ;;  %16948 = vst [vmem:[#allocation41_spill] sm:$0xff] %v12196_v33  ;;  %v2369_v4 = vpop.permute.xlu0 %2368  ;;  %v2319_v51 = vsel %vm1529_vm14, %v12085_v15, 0.0  ;;  %2157 = vrot.lane.b32.xlu0 %v12097_v17, %s16826_s30  ;;  %v1467_v3 = vadd.s32 1, %v12196_v33  ;;  %v2968_v15 = vpack.c.bf16 %v11734_v8, %v2947_v34  ;;  %v2479_v17 = vsel %vm16950_vm12, %v11710_v53, 0.0  ;;  %v3082_v34 = vld [vmem:[#allocation3 + $0x140] sm:$0xff] }
 0x1ca   : > { %2867 = vst.msk [vmem:[#allocation4 + $0x78] sm:$0xff] %vm16695_vm8, %v2818_v32  ;;  %v2339_v57 = vpack.c.bf16 %v2319_v51, %v12109_v19  ;;  %v2500_v35 = vpack.c.bf16 %v11724_v36, %v2479_v17  ;;  %v12231_v53 = vpack.c.bf16 %v3077_v6, %v3076_v47  ;;  %v3238_v36 = vsel %vm1529_vm14, %v12225_v52, 0.0 }
 0x1cb   : > { %2413 = vst.msk [vmem:[#allocation4 + $0xa0] sm:$0xff] %vm16639_vm13, %v2369_v4  ;;  %vm1531_vm7 = vcmp.lt.s32.totalorder %v1467_v3, 16  ;;  %v2998_v48 = vpop.permute.xlu1 %2997  ;;  %v3351_v19 = vld [vmem:[#allocation4 + $0x80] sm:$0xff]  ;;  %vm16952_vm14 = vcmp.ge.s32.totalorder %v11703_v62, 0  ;;  %v3083_v3 = vld [vmem:[#allocation3 + $0x148] sm:$0xff] }
 0x1cc   : > { %3142 = vrot.lane.b32.xlu1 %v12202_v61, %s16701_s17  ;;  %2870 = vst.msk [vmem:[#allocation4 + $0xa8] sm:$0xff] %vm16660_vm9, %v2820_v14  ;;  %10246 = vmatprep.mubr.msk.bf16.mxu1 %vm16635_vm2, %v3351_v19  ;;  %v2321_v30 = vsel %vm1531_vm7, %v12150_v44, 0.0  ;;  %v2772_v5 = vsel %vm1531_vm7, %v12225_v52, 0.0  ;;  %v2949_v59 = vsel %vm16952_vm14, %v11823_v50, 0.0  ;;  %vm16953_vm12 = vmmov %vm16952_vm14  ;;  %v3240_v10 = vsel %vm1531_vm7, %v12266_v20, 0.0 }
 0x1cd   : > { %v12215_v39 = vpop.permute.xlu0 %2660  ;;  %2382 = vrot.lane.b32.xlu0 %v2339_v57, %s16703_s19  ;;  %3042 = vst.msk [vmem:[#allocation4 + $0xa8] sm:$0xff] %vm16640_vm6, %v2998_v48  ;;  %v2340_v44 = vpack.c.bf16 %v2321_v30, %v12165_v23  ;;  %v2791_v23 = vpack.c.bf16 %v2772_v5, %v12238_v22  ;;  %v2969_v11 = vpack.c.bf16 %v11833_v56, %v2949_v59  ;;  %v2481_v43 = vsel %vm16953_vm12, %v11727_v42, 0.0 }
 0x1ce   : > { %3171 = vst.msk [vmem:[#allocation4 + $0xa8] sm:$0xff] %vm16636_vm10, %v12155_v1  ;;  %v3258_v1 = vpack.c.bf16 %v3238_v36, %v12238_v22  ;;  %vm1533_vm14 = vcmp.lt.s32.totalorder %v12269_v25, 16  ;;  %v2501_v60 = vpack.c.bf16 %v11734_v8, %v2481_v43  ;;  %v3259_v42 = vpack.c.bf16 %v3240_v10, %v12281_v58  ;;  %v3210_v43 = vld [vmem:[#allocation3 + $0x139] sm:$0xff] }
 0x1cf   : > { %v3288_v0 = vpop.permute.xlu1 %3287  ;;  %v2774_v4 = vsel %vm1533_vm14, %v12266_v20, 0.0  ;;  %vm16955_vm7 = vcmp.ge.s32.totalorder %v11731_v2, 0  ;;  %v2921_v25 = vld [vmem:[#allocation3 + $0x13f] sm:$0xff] }
 0x1d0   : > { %3011 = vrot.lane.b32.xlu1 %v2968_v15, %s16784_s18  ;;  %3332 = vst.msk [vmem:[#allocation4 + $0xa8] sm:$0xff] %vm16710_vm0, %v3288_v0  ;;  %v2792_v51 = vpack.c.bf16 %v2774_v4, %v12281_v58  ;;  %v3100_v15 = vpack.c.bf16 %v3083_v3, %v3082_v34  ;;  %v2951_v17 = vsel %vm16955_vm7, %v11825_v46, 0.0  ;;  %vm16956_vm12 = vmmov %vm16955_vm7  ;;  %v3211_v0 = vld [vmem:[#allocation3 + $0x141] sm:$0xff] }
 0x1d1   : > { %v2148_v32 = vpop.permute.xlu0 %2147  ;;  %v3350_v28 = vld [vmem:[#allocation4 + $0x78] sm:$0xff]  ;;  %2543 = vrot.lane.b32.xlu0 %v2500_v35, %s16920_s28  ;;  %v2483_v19 = vsel %vm16956_vm12, %v11823_v50, 0.0  ;;  %v3080_v35 = vld [vmem:[#allocation3 + $0x130] sm:$0xff]  ;;  %vm16957_vm12 = vcmp.lt.s32.totalorder %v11156_v9, 16 }
 0x1d2   : > { %2190 = vst.msk [vmem:[#allocation4 + $0xf0] sm:$0xff] %vm16650_vm15, %v2148_v32  ;;  %3593 = vmatmul.mubr.bf16.gmra.mrb[12].mxu1 %v3350_v28  ;;  %v3081_v28 = vld [vmem:[#allocation3 + $0x138] sm:$0xff]  ;;  %v2502_v63 = vpack.c.bf16 %v11833_v56, %v2483_v19 }
 0x1d3   : > { %v2822_v16 = vpop.permute.xlu1 %2821  ;;  %v3099_v2 = vpack.c.bf16 %v3081_v28, %v3080_v35  ;;  %v4803_v19 = vld [vmem:[#allocation3 + $0x34] sm:$0xff] }
 0x1d4   : > { %3140 = vrot.lane.b32.xlu1 %v12231_v53, %s16701_s17  ;;  %2872 = vst.msk [vmem:[#allocation4 + $0xd0] sm:$0xff] %vm16660_vm9, %v2822_v16 }
 0x1d5   : > { %v2530_v55 = vpop.permute.xlu0 %2529  ;;  %2384 = vrot.lane.b32.xlu0 %v2340_v44, %s16703_s19 }
 0x1d6   : > { %2574 = vst.msk [vmem:[#allocation4 + $0xa0] sm:$0xff] %vm16714_vm5, %v2530_v55 }
 0x1d7   : > { %v12271_v54 = vpop.permute.xlu1 %3130  ;;  %v3353_v21 = vld [vmem:[#allocation4 + $0xa8] sm:$0xff] }
 0x1d8   : > { %3301 = vrot.lane.b32.xlu1 %v3258_v1, %s16921_s25  ;;  %10247 = vmatprep.mubr.msk.bf16.mxu1 %vm16635_vm2, %v3353_v21  ;;  %v2924_v21 = vld [vmem:[#allocation3 + $0x157] sm:$0xff] }
 0x1d9   : > { %v2659_v26 = vpop.permute.xlu0 %2658  ;;  %2676 = vrot.lane.b32.xlu0 %v12202_v61, %s16800_s23 }
 0x1da   : > { %2703 = vst.msk [vmem:[#allocation4 + $0xa0] sm:$0xff] %vm16709_vm4, %v2659_v26 }
 0x1db   : > { %2869 = vst.msk [vmem:[#allocation4 + $0xa0] sm:$0xff] %vm16695_vm8, %v2820_v14  ;;  %v3000_v37 = vpop.permute.xlu1 %2999  ;;  %v12304_v14 = vand.u32 15, %v1023_v49 }
 0x1dc   : > { %2835 = vrot.lane.b32.xlu1 %v2791_v23, %s16922_s26  ;;  %3043 = vst.msk [vmem:[#allocation4 + $0xd0] sm:$0xff] %vm16640_vm6, %v3000_v37  ;;  %v2923_v23 = vld [vmem:[#allocation3 + $0x14f] sm:$0xff] }
 0x1dd   : > { %v2146_v45 = vpop.permute.xlu0 %2145  ;;  %2163 = vrot.lane.b32.xlu0 %v12202_v61, %s16826_s30  ;;  %16954 = vst [vmem:[#allocation43_spill] sm:$0xff] %v12304_v14  ;;  %v12319_v47 = vadd.s32 1, %v12304_v14 }
 0x1de   : > { %2189 = vst.msk [vmem:[#allocation4 + $0xc8] sm:$0xff] %vm16650_vm15, %v2146_v45 }
 0x1df   : > { %v3129_v8 = vpop.permute.xlu1 %3128  ;;  %vm1535_vm7 = vcmp.lt.s32.totalorder %v12319_v47, 16 }
 0x1e0   : > { %3013 = vrot.lane.b32.xlu1 %v2969_v11, %s16784_s18  ;;  %3172 = vst.msk [vmem:[#allocation4 + $0xd0] sm:$0xff] %vm16636_vm10, %v3129_v8  ;;  %v2325_v55 = vsel %vm1535_vm7, %v12266_v20, 0.0 }
 0x1e1   : > { %v2371_v38 = vpop.permute.xlu0 %2370  ;;  %2545 = vrot.lane.b32.xlu0 %v2501_v60, %s16920_s28  ;;  %v2342_v5 = vpack.c.bf16 %v2325_v55, %v12281_v58  ;;  %v3209_v60 = vld [vmem:[#allocation3 + $0x131] sm:$0xff] }
 0x1e2   : > { %2414 = vst.msk [vmem:[#allocation4 + $0xc8] sm:$0xff] %vm16639_vm13, %v2371_v38  ;;  %v3352_v62 = vld [vmem:[#allocation4 + $0xa0] sm:$0xff] }
 0x1e3   : > { %3601 = vmatmul.mubr.bf16.gmra.mrb[16].mxu1 %v3352_v62  ;;  %v3290_v57 = vpop.permute.xlu1 %3289  ;;  %v3242_v62 = vsel %vm1533_vm14, %v3210_v43, 0.0 }
 0x1e4   : > { %3303 = vrot.lane.b32.xlu1 %v3259_v42, %s16921_s25  ;;  %3333 = vst.msk [vmem:[#allocation4 + $0xd0] sm:$0xff] %vm16710_vm0, %v3290_v57  ;;  %v3260_v49 = vpack.c.bf16 %v3242_v62, %v3209_v60 }
 0x1e5   : > { %v2532_v61 = vpop.permute.xlu0 %2531  ;;  %2674 = vrot.lane.b32.xlu0 %v12231_v53, %s16800_s23 }
 0x1e6   : > { %2575 = vst.msk [vmem:[#allocation4 + $0xc8] sm:$0xff] %vm16714_vm5, %v2532_v61  ;;  %v2776_v61 = vsel %vm1535_vm7, %v3210_v43, 0.0 }
 0x1e7   : > { %2704 = vst.msk [vmem:[#allocation4 + $0xc8] sm:$0xff] %vm16709_vm4, %v12215_v39  ;;  %v2323_v39 = vsel %vm1533_vm14, %v12225_v52, 0.0  ;;  %v2824_v32 = vpop.permute.xlu1 %2823  ;;  %v2970_v52 = vpack.c.bf16 %v11835_v31, %v2951_v17  ;;  %v2793_v34 = vpack.c.bf16 %v2776_v61, %v3209_v60  ;;  %vm16963_vm14 = vcmp.ge.s32.totalorder %v11813_v29, 0 }
 0x1e8   : > { %2871 = vst.msk [vmem:[#allocation4 + $0xc8] sm:$0xff] %vm16695_vm8, %v2822_v16  ;;  %2837 = vrot.lane.b32.xlu1 %v2792_v51, %s16922_s26  ;;  %v2341_v48 = vpack.c.bf16 %v2323_v39, %v12238_v22  ;;  %v2953_v39 = vsel %vm16963_vm14, %v2921_v25, 0.0 }
 0x1e9   : > { %v2373_v7 = vpop.permute.xlu0 %2372  ;;  %2161 = vrot.lane.b32.xlu0 %v12231_v53, %s16826_s30  ;;  %2874 = vst.msk [vmem:[#allocation4 + $0xf8] sm:$0xff] %vm16660_vm9, %v2824_v32  ;;  %v3212_v53 = vld [vmem:[#allocation3 + $0x149] sm:$0xff] }
 0x1ea   : > { %2415 = vst.msk [vmem:[#allocation4 + $0xf0] sm:$0xff] %vm16639_vm13, %v2373_v7  ;;  %v3244_v56 = vsel %vm1535_vm7, %v3212_v53, 0.0  ;;  %v2778_v16 = vsel %vm16957_vm12, %v3212_v53, 0.0  ;;  %vm16959_vm12 = vcmp.ge.s32.totalorder %v11816_v27, 0  ;;  %v16961_v7 = vld [vmem:[#allocation15_spill] sm:$0xff] }
 0x1eb   : > { %v3002_v36 = vpop.permute.xlu1 %3001  ;;  %v3355_v22 = vld [vmem:[#allocation4 + $0xd0] sm:$0xff]  ;;  %v3261_v26 = vpack.c.bf16 %v3244_v56, %v3211_v0  ;;  %v2794_v45 = vpack.c.bf16 %v2778_v16, %v3211_v0  ;;  %v2955_v11 = vsel %vm16959_vm12, %v2923_v23, 0.0  ;;  %v12383_v57 = vadd.s32 4, %v16961_v7 }
 0x1ec   : > { %3146 = vrot.lane.b32.xlu1 %v3100_v15, %s16701_s17  ;;  %3044 = vst.msk [vmem:[#allocation4 + $0xf8] sm:$0xff] %vm16640_vm6, %v3002_v36  ;;  %10248 = vmatprep.mubr.msk.bf16.mxu1 %vm16635_vm2, %v3355_v22  ;;  %v4229_v36 = vld [vmem:[#allocation3 + $0x3e] sm:$0xff]  ;;  %v4230_v22 = vld [vmem:[#allocation3 + $0x46] sm:$0xff] }
 0x1ed   : > { %v12322_v6 = vpop.permute.xlu0 %2664  ;;  %2386 = vrot.lane.b32.xlu0 %v2341_v48, %s16703_s19  ;;  %3173 = vst.msk [vmem:[#allocation4 + $0xf8] sm:$0xff] %vm16636_vm10, %v12271_v54  ;;  %v2485_v54 = vsel %vm16958_vm3, %v11825_v46, 0.0  ;;  %v2972_v46 = vpack.c.bf16 %v2924_v21, %v2955_v11  ;;  %vm16960_vm3 = vcmp.lt.s32.totalorder %v11156_v9, 16  ;;  %16962 = vst [vmem:[#allocation15_spill] sm:$0xff] %v12383_v57  ;;  %vm16718_vm7 = vcmp.lt.s32.totalorder %v12383_v57, 16  ;;  %v16964_v48 = vld [vmem:[#allocation17_spill] sm:$0xff] }
 0x1ee   : > { %v2503_v37 = vpack.c.bf16 %v11835_v31, %v2485_v54  ;;  %v2327_v3 = vsel %vm16960_vm3, %v3210_v43, 0.0 }
 0x1ef   : > { %v3354_v50 = vld [vmem:[#allocation4 + $0xc8] sm:$0xff]  ;;  %v3292_v1 = vpop.permute.xlu1 %3291  ;;  %v2343_v9 = vpack.c.bf16 %v2327_v3, %v3209_v60 }
 0x1f0   : > { %3015 = vrot.lane.b32.xlu1 %v2970_v52, %s16784_s18  ;;  %3609 = vmatmul.mubr.bf16.gmra.mrb[20].mxu1 %v3354_v50  ;;  %3334 = vst.msk [vmem:[#allocation4 + $0xf8] sm:$0xff] %vm16710_vm0, %v3292_v1  ;;  %v12396_v52 = vadd.s32 4294967294, %v16964_v48  ;;  %v4454_v1 = vld [vmem:[#allocation3 + $0x48] sm:$0xff] }
 0x1f1   : > { %v2152_v30 = vpop.permute.xlu0 %2151  ;;  %2547 = vrot.lane.b32.xlu0 %v2502_v63, %s16920_s28 }
 0x1f2   : > { %2192 = vst.msk [vmem:[#allocation4 + $0x140] sm:$0xff] %vm16650_vm15, %v2152_v30  ;;  %vm1224_vm3 = vcmp.ge.s32.totalorder %v12396_v52, 0  ;;  %v17197_v52 = vld [vmem:[#allocation5_spill] sm:$0xff] }
 0x1f3   : > { %v2826_v20 = vpop.permute.xlu1 %2825  ;;  %v4325_v63 = vsel %vm1224_vm3, %v4229_v36, 0.0 }
 0x1f4   : > { %3144 = vrot.lane.b32.xlu1 %v3099_v2, %s16701_s17  ;;  %2876 = vst.msk [vmem:[#allocation4 + $0x120] sm:$0xff] %vm16660_vm9, %v2826_v20  ;;  %v4354_v56 = vpack.c.bf16 %v4230_v22, %v4325_v63  ;;  %s17043_s17 = smov 48  }
 0x1f5   : > { %v2534_v44 = vpop.permute.xlu0 %2533  ;;  %2388 = vrot.lane.b32.xlu0 %v2342_v5, %s16703_s19 }
 0x1f6   : > { %2576 = vst.msk [vmem:[#allocation4 + $0xf0] sm:$0xff] %vm16714_vm5, %v2534_v44  ;;  %v4453_v44 = vld [vmem:[#allocation3 + $0x40] sm:$0xff] }
 0x1f7   : > { %v12363_v10 = vpop.permute.xlu1 %3134  ;;  %v3357_v38 = vld [vmem:[#allocation4 + $0xf8] sm:$0xff]  ;;  %v4482_v16 = vpack.c.bf16 %v4454_v1, %v4453_v44 }
 0x1f8   : > { %3307 = vrot.lane.b32.xlu1 %v3261_v26, %s16921_s25  ;;  %10249 = vmatprep.mubr.msk.bf16.mxu1 %vm16635_vm2, %v3357_v38 }
 0x1f9   : > { %v2663_v59 = vpop.permute.xlu0 %2662  ;;  %2680 = vrot.lane.b32.xlu0 %v3100_v15, %s16800_s23  ;;  %v2922_v15 = vld [vmem:[#allocation3 + $0x147] sm:$0xff] }
 0x1fa   : > { %2705 = vst.msk [vmem:[#allocation4 + $0xf0] sm:$0xff] %vm16709_vm4, %v2663_v59  ;;  %v2971_v29 = vpack.c.bf16 %v2922_v15, %v2953_v39 }
 0x1fb   : > { %2873 = vst.msk [vmem:[#allocation4 + $0xf0] sm:$0xff] %vm16695_vm8, %v2824_v32  ;;  %v3004_v4 = vpop.permute.xlu1 %3003  ;;  %v12393_v32 = vld [vmem:[#allocation3 + $0x3c] sm:$0xff] }
 0x1fc   : > { %2841 = vrot.lane.b32.xlu1 %v2794_v45, %s16922_s26  ;;  %3045 = vst.msk [vmem:[#allocation4 + $0x120] sm:$0xff] %vm16640_vm6, %v3004_v4  ;;  %v4900_v35 = vsel %vm16718_vm7, %v12393_v32, 0.0 }
 0x1fd   : > { %v2150_v58 = vpop.permute.xlu0 %2149  ;;  %2549 = vrot.lane.b32.xlu0 %v2503_v37, %s16920_s28  ;;  %v4929_v27 = vpack.c.bf16 %v4900_v35, %v4803_v19 }
 0x1fe   : > { %2191 = vst.msk [vmem:[#allocation4 + $0x118] sm:$0xff] %vm16650_vm15, %v2150_v58 }
 0x1ff   : > { %v3133_v51 = vpop.permute.xlu1 %3132 }
 0x200   : > { %3019 = vrot.lane.b32.xlu1 %v2972_v46, %s16784_s18  ;;  %3174 = vst.msk [vmem:[#allocation4 + $0x120] sm:$0xff] %vm16636_vm10, %v3133_v51 }
 0x201   : > { %v2375_v42 = vpop.permute.xlu0 %2374  ;;  %2678 = vrot.lane.b32.xlu0 %v3099_v2, %s16800_s23 }
 0x202   : > { %2416 = vst.msk [vmem:[#allocation4 + $0x118] sm:$0xff] %vm16639_vm13, %v2375_v42  ;;  %v3356_v31 = vld [vmem:[#allocation4 + $0xf0] sm:$0xff] }
 0x203   : > { %3617 = vmatmul.mubr.bf16.gmra.mrb[24].mxu1 %v3356_v31  ;;  %v3294_v47 = vpop.permute.xlu1 %3293 }
 0x204   : > { %3305 = vrot.lane.b32.xlu1 %v3260_v49, %s16921_s25  ;;  %3335 = vst.msk [vmem:[#allocation4 + $0x120] sm:$0xff] %vm16710_vm0, %v3294_v47 }
 0x205   : > { %v2536_v8 = vpop.permute.xlu0 %2535  ;;  %2165 = vrot.lane.b32.xlu0 %v3099_v2, %s16826_s30 }
 0x206   : > { %2577 = vst.msk [vmem:[#allocation4 + $0x118] sm:$0xff] %vm16714_vm5, %v2536_v8 }
 0x207   : > { %2706 = vst.msk [vmem:[#allocation4 + $0x118] sm:$0xff] %vm16709_vm4, %v12322_v6  ;;  %v2487_v6 = vsel %vm16959_vm12, %v2921_v25, 0.0  ;;  %v2828_v53 = vpop.permute.xlu1 %2827 }
 0x208   : > { %2875 = vst.msk [vmem:[#allocation4 + $0x118] sm:$0xff] %vm16695_vm8, %v2826_v20  ;;  %2839 = vrot.lane.b32.xlu1 %v2793_v34, %s16922_s26  ;;  %v2504_v30 = vpack.c.bf16 %v2922_v15, %v2487_v6 }
 0x209   : > { %v2377_v17 = vpop.permute.xlu0 %2376  ;;  %2390 = vrot.lane.b32.xlu0 %v2343_v9, %s16703_s19  ;;  %2878 = vst.msk [vmem:[#allocation4 + $0x148] sm:$0xff] %vm16660_vm9, %v2828_v53 }
 0x20a   : > { %2417 = vst.msk [vmem:[#allocation4 + $0x140] sm:$0xff] %vm16639_vm13, %v2377_v17 }
 0x20b   : > { %v3006_v2 = vpop.permute.xlu1 %3005  ;;  %v3359_v55 = vld [vmem:[#allocation4 + $0x120] sm:$0xff] }
 0x20c   : > { %3017 = vrot.lane.b32.xlu1 %v2971_v29, %s16784_s18  ;;  %3046 = vst.msk [vmem:[#allocation4 + $0x148] sm:$0xff] %vm16640_vm6, %v3006_v2  ;;  %10250 = vmatprep.mubr.msk.bf16.mxu1 %vm16635_vm2, %v3359_v55 }
 0x20d   : > { %v2669_v28 = vpop.permute.xlu0 %2668  ;;  %2551 = vrot.lane.b32.xlu0 %v2504_v30, %s16920_s28  ;;  %3175 = vst.msk [vmem:[#allocation4 + $0x148] sm:$0xff] %vm16636_vm10, %v12363_v10 }
 0x20f   : > { %v3358_v0 = vld [vmem:[#allocation4 + $0x118] sm:$0xff]  ;;  %v3296_v26 = vpop.permute.xlu1 %3295 }
 0x210   : > { %3625 = vmatmul.mubr.bf16.gmra.mrb[28].mxu1 %v3358_v0  ;;  %3336 = vst.msk [vmem:[#allocation4 + $0x148] sm:$0xff] %vm16710_vm0, %v3296_v26 }
 0x211   : > { %v2156_v50 = vpop.permute.xlu0 %2155  ;;  %4963 = vrot.lane.b32.xlu0 %v4929_v27, %s16800_s23 }
 0x212   : > { %2194 = vst.msk [vmem:[#allocation4 + $0x190] sm:$0xff] %vm16650_vm15, %v2156_v50 }
 0x213   : > { %v2830_v59 = vpop.permute.xlu1 %2829 }
 0x214   : > { %2880 = vst.msk [vmem:[#allocation4 + $0x170] sm:$0xff] %vm16660_vm9, %v2830_v59 }
 0x215   : > { %v2538_v5 = vpop.permute.xlu0 %2537  ;;  %4389 = vrot.lane.b32.xlu0 %v4354_v56, %s16826_s30 }
 0x216   : > { %2578 = vst.msk [vmem:[#allocation4 + $0x140] sm:$0xff] %vm16714_vm5, %v2538_v5 }
 0x217   : > { %v3139_v45 = vpop.permute.xlu1 %3138  ;;  %v3361_v54 = vld [vmem:[#allocation4 + $0x148] sm:$0xff] }
 0x218   : > { %10251 = vmatprep.mubr.msk.bf16.mxu1 %vm16635_vm2, %v3361_v54  ;;  %v16965_v54 = vld [vmem:[#allocation31_spill] sm:$0xff] }
 0x219   : > { %v2667_v23 = vpop.permute.xlu0 %2666  ;;  %4517 = vrot.lane.b32.xlu0 %v4482_v16, %s16703_s19  ;;  %s17049_s19 = smov 40  }
 0x21a   : > { %2707 = vst.msk [vmem:[#allocation4 + $0x140] sm:$0xff] %vm16709_vm4, %v2667_v23 }
 0x21b   : > { %2877 = vst.msk [vmem:[#allocation4 + $0x140] sm:$0xff] %vm16695_vm8, %v2828_v53 }
 0x21d   : > { %v2154_v20 = vpop.permute.xlu0 %2153 }
 0x21e   : > { %2193 = vst.msk [vmem:[#allocation4 + $0x168] sm:$0xff] %vm16650_vm15, %v2154_v20  ;;  %v3008_v11 = vpop.permute.xlu1 %3007 }
 0x21f   : > { %3047 = vst.msk [vmem:[#allocation4 + $0x170] sm:$0xff] %vm16640_vm6, %v3008_v11 }
 0x221   : > { %v2379_v21 = vpop.permute.xlu0 %2378 }
 0x222   : > { %2418 = vst.msk [vmem:[#allocation4 + $0x168] sm:$0xff] %vm16639_vm13, %v2379_v21  ;;  %v3360_v43 = vld [vmem:[#allocation4 + $0x140] sm:$0xff]  ;;  %v3137_v10 = vpop.permute.xlu1 %3136  ;;  %v16966_v21 = vld [vmem:[#allocation34_spill] sm:$0xff] }
 0x223   : > { %3633 = vmatmul.mubr.bf16.gmra.mrb[32].mxu1 %v3360_v43  ;;  %3176 = vst.msk [vmem:[#allocation4 + $0x170] sm:$0xff] %vm16636_vm10, %v3137_v10 }
 0x225   : > { %v2540_v58 = vpop.permute.xlu0 %2539 }
 0x226   : > { %2579 = vst.msk [vmem:[#allocation4 + $0x168] sm:$0xff] %vm16714_vm5, %v2540_v58  ;;  %v12484_v58 = vadd.s32 4294967292, %v16964_v48  ;;  %v12498_v48 = vld [vmem:[%s16969_s6] ss:$0 sm:$0xff] }
 0x227   : > { %2708 = vst.msk [vmem:[#allocation4 + $0x168] sm:$0xff] %vm16709_vm4, %v2669_v28 }
 0x228   : > { %2879 = vst.msk [vmem:[#allocation4 + $0x168] sm:$0xff] %vm16695_vm8, %v2830_v59  ;;  %16967 = vst [vmem:[#allocation17_spill] sm:$0xff] %v12484_v58  ;;  %vm16717_vm14 = vcmp.ge.s32.totalorder %v12484_v58, 0 }
 0x229   : > { %v2381_v38 = vpop.permute.xlu0 %2380 }
 0x22a   : > { %2419 = vst.msk [vmem:[#allocation4 + $0x190] sm:$0xff] %vm16639_vm13, %v2381_v38  ;;  %v3298_v37 = vpop.permute.xlu1 %3297 }
 0x22b   : > { %3337 = vst.msk [vmem:[#allocation4 + $0x170] sm:$0xff] %vm16710_vm0, %v3298_v37  ;;  %v12492_v37 = vld [vmem:[%s16968_s5] ss:$0 sm:$0xff] }
 0x22d   : > { %v2673_v46 = vpop.permute.xlu0 %2672 }
 0x22e   : > { %v2832_v60 = vpop.permute.xlu1 %2831 }
 0x22f   : > { %2882 = vst.msk [vmem:[#allocation4 + $0x198] sm:$0xff] %vm16660_vm9, %v2832_v60  ;;  %v3362_v31 = vld [vmem:[#allocation4 + $0x168] sm:$0xff] }
 0x231   : > { %v2160_v62 = vpop.permute.xlu0 %2159 }
 0x232   : > { %2196 = vst.msk [vmem:[#allocation4 + $0x1e0] sm:$0xff] %vm16650_vm15, %v2160_v62  ;;  %v3010_v42 = vpop.permute.xlu1 %3009  ;;  %v3363_v4 = vld [vmem:[#allocation4 + $0x170] sm:$0xff]  ;;  %v4070_v62 = vld [vmem:[#allocation3 + $0x44] sm:$0xff] }
 0x233   : > { %3048 = vst.msk [vmem:[#allocation4 + $0x198] sm:$0xff] %vm16640_vm6, %v3010_v42  ;;  %10252 = vmatprep.mubr.msk.bf16.mxu1 %vm16635_vm2, %v3363_v4  ;;  %v4165_v42 = vsel %vm16717_vm14, %v12393_v32, 0.0 }
 0x234   : > { %3177 = vst.msk [vmem:[#allocation4 + $0x198] sm:$0xff] %vm16636_vm10, %v3139_v45  ;;  %3641 = vmatmul.mubr.bf16.gmra.mrb[36].mxu1 %v3362_v31 }
 0x235   : > { %v2542_v49 = vpop.permute.xlu0 %2541 }
 0x236   : > { %2580 = vst.msk [vmem:[#allocation4 + $0x190] sm:$0xff] %vm16714_vm5, %v2542_v49  ;;  %v3300_v61 = vpop.permute.xlu1 %3299 }
 0x237   : > { %3338 = vst.msk [vmem:[#allocation4 + $0x198] sm:$0xff] %vm16710_vm0, %v3300_v61 }
 0x239   : > { %v2671_v25 = vpop.permute.xlu0 %2670 }
 0x23a   : > { %2709 = vst.msk [vmem:[#allocation4 + $0x190] sm:$0xff] %vm16709_vm4, %v2671_v25  ;;  %v2834_v8 = vpop.permute.xlu1 %2833  ;;  %v4194_v25 = vpack.c.bf16 %v4070_v62, %v4165_v42 }
 0x23b   : > { %2881 = vst.msk [vmem:[#allocation4 + $0x190] sm:$0xff] %vm16695_vm8, %v2832_v60 }
 0x23c   : > { %2884 = vst.msk [vmem:[#allocation4 + $0x1c0] sm:$0xff] %vm16660_vm9, %v2834_v8 }
 0x23d   : > { %v2158_v51 = vpop.permute.xlu0 %2157  ;;  %4210 = vst.msk [vmem:[#allocation4 + $0x78] sm:$0xff] %vm16860_vm1, %v4194_v25 }
 0x23e   : > { %2195 = vst.msk [vmem:[#allocation4 + $0x1b8] sm:$0xff] %vm16650_vm15, %v2158_v51  ;;  %v3143_v34 = vpop.permute.xlu1 %3142  ;;  %v3365_v3 = vld [vmem:[#allocation4 + $0x198] sm:$0xff] }
 0x23f   : > { %10253 = vmatprep.mubr.msk.bf16.mxu1 %vm16635_vm2, %v3365_v3 }
 0x241   : > { %v2383_v7 = vpop.permute.xlu0 %2382 }
 0x242   : > { %2420 = vst.msk [vmem:[#allocation4 + $0x1b8] sm:$0xff] %vm16639_vm13, %v2383_v7  ;;  %v3012_v15 = vpop.permute.xlu1 %3011  ;;  %v3364_v39 = vld [vmem:[#allocation4 + $0x190] sm:$0xff] }
 0x243   : > { %3049 = vst.msk [vmem:[#allocation4 + $0x1c0] sm:$0xff] %vm16640_vm6, %v3012_v15  ;;  %3649 = vmatmul.mubr.bf16.gmra.mrb[40].mxu1 %v3364_v39 }
 0x245   : > { %v2544_v17 = vpop.permute.xlu0 %2543 }
 0x246   : > { %2581 = vst.msk [vmem:[#allocation4 + $0x1b8] sm:$0xff] %vm16714_vm5, %v2544_v17  ;;  %v3141_v47 = vpop.permute.xlu1 %3140 }
 0x247   : > { %2710 = vst.msk [vmem:[#allocation4 + $0x1b8] sm:$0xff] %vm16709_vm4, %v2673_v46 }
 0x248   : > { %3178 = vst.msk [vmem:[#allocation4 + $0x1c0] sm:$0xff] %vm16636_vm10, %v3141_v47 }
 0x249   : > { %2883 = vst.msk [vmem:[#allocation4 + $0x1b8] sm:$0xff] %vm16695_vm8, %v2834_v8  ;;  %v2385_v9 = vpop.permute.xlu0 %2384 }
 0x24a   : > { %2421 = vst.msk [vmem:[#allocation4 + $0x1e0] sm:$0xff] %vm16639_vm13, %v2385_v9  ;;  %v3302_v29 = vpop.permute.xlu1 %3301 }
 0x24b   : > { %3339 = vst.msk [vmem:[#allocation4 + $0x1c0] sm:$0xff] %vm16710_vm0, %v3302_v29 }
 0x24d   : > { %v2677_v6 = vpop.permute.xlu0 %2676 }
 0x24e   : > { %v2836_v19 = vpop.permute.xlu1 %2835 }
 0x24f   : > { %2886 = vst.msk [vmem:[#allocation4 + $0x1e8] sm:$0xff] %vm16660_vm9, %v2836_v19 }
 0x250   : > { %v3366_v30 = vld [vmem:[#allocation4 + $0x1b8] sm:$0xff] }
 0x251   : > { %v2164_v35 = vpop.permute.xlu0 %2163 }
 0x252   : > { %2198 = vst.msk [vmem:[#allocation4 + $0x230] sm:$0xff] %vm16650_vm15, %v2164_v35  ;;  %v3014_v28 = vpop.permute.xlu1 %3013  ;;  %v3367_v53 = vld [vmem:[#allocation4 + $0x1c0] sm:$0xff] }
 0x253   : > { %3050 = vst.msk [vmem:[#allocation4 + $0x1e8] sm:$0xff] %vm16640_vm6, %v3014_v28  ;;  %10254 = vmatprep.mubr.msk.bf16.mxu1 %vm16635_vm2, %v3367_v53 }
 0x254   : > { %3179 = vst.msk [vmem:[#allocation4 + $0x1e8] sm:$0xff] %vm16636_vm10, %v3143_v34  ;;  %3657 = vmatmul.mubr.bf16.gmra.mrb[44].mxu1 %v3366_v30 }
 0x255   : > { %v2546_v36 = vpop.permute.xlu0 %2545 }
 0x256   : > { %2582 = vst.msk [vmem:[#allocation4 + $0x1e0] sm:$0xff] %vm16714_vm5, %v2546_v36  ;;  %v3304_v27 = vpop.permute.xlu1 %3303 }
 0x257   : > { %3340 = vst.msk [vmem:[#allocation4 + $0x1e8] sm:$0xff] %vm16710_vm0, %v3304_v27 }
 0x259   : > { %v2675_v22 = vpop.permute.xlu0 %2674 }
 0x25a   : > { %2711 = vst.msk [vmem:[#allocation4 + $0x1e0] sm:$0xff] %vm16709_vm4, %v2675_v22  ;;  %v2838_v63 = vpop.permute.xlu1 %2837 }
 0x25b   : > { %2885 = vst.msk [vmem:[#allocation4 + $0x1e0] sm:$0xff] %vm16695_vm8, %v2836_v19 }
 0x25c   : > { %2888 = vst.msk [vmem:[#allocation4 + $0x210] sm:$0xff] %vm16660_vm9, %v2838_v63 }
 0x25d   : > { %v2162_v50 = vpop.permute.xlu0 %2161 }
 0x25e   : > { %2197 = vst.msk [vmem:[#allocation4 + $0x208] sm:$0xff] %vm16650_vm15, %v2162_v50  ;;  %v3147_v2 = vpop.permute.xlu1 %3146  ;;  %v3369_v55 = vld [vmem:[#allocation4 + $0x1e8] sm:$0xff] }
 0x25f   : > { %10255 = vmatprep.mubr.msk.bf16.mxu1 %vm16635_vm2, %v3369_v55 }
 0x261   : > { %v2387_v0 = vpop.permute.xlu0 %2386 }
 0x262   : > { %2422 = vst.msk [vmem:[#allocation4 + $0x208] sm:$0xff] %vm16639_vm13, %v2387_v0  ;;  %v3016_v56 = vpop.permute.xlu1 %3015  ;;  %v3368_v44 = vld [vmem:[#allocation4 + $0x1e0] sm:$0xff] }
 0x263   : > { %3051 = vst.msk [vmem:[#allocation4 + $0x210] sm:$0xff] %vm16640_vm6, %v3016_v56  ;;  %3665 = vmatmul.mubr.bf16.gmra.mrb[48].mxu1 %v3368_v44 }
 0x265   : > { %v2548_v1 = vpop.permute.xlu0 %2547 }
 0x266   : > { %2583 = vst.msk [vmem:[#allocation4 + $0x208] sm:$0xff] %vm16714_vm5, %v2548_v1  ;;  %v3145_v5 = vpop.permute.xlu1 %3144 }
 0x267   : > { %2712 = vst.msk [vmem:[#allocation4 + $0x208] sm:$0xff] %vm16709_vm4, %v2677_v6 }
 0x268   : > { %3180 = vst.msk [vmem:[#allocation4 + $0x210] sm:$0xff] %vm16636_vm10, %v3145_v5 }
 0x269   : > { %2887 = vst.msk [vmem:[#allocation4 + $0x208] sm:$0xff] %vm16695_vm8, %v2838_v63  ;;  %v2389_v26 = vpop.permute.xlu0 %2388 }
 0x26a   : > { %2423 = vst.msk [vmem:[#allocation4 + $0x230] sm:$0xff] %vm16639_vm13, %v2389_v26  ;;  %v3308_v16 = vpop.permute.xlu1 %3307 }
 0x26d   : > { %v2681_v23 = vpop.permute.xlu0 %2680 }
 0x26e   : > { %v2842_v59 = vpop.permute.xlu1 %2841 }
 0x26f   : > { %2892 = vst.msk [vmem:[#allocation4 + $0x260] sm:$0xff] %vm16660_vm9, %v2842_v59 }
 0x270   : > { %v3370_v51 = vld [vmem:[#allocation4 + $0x208] sm:$0xff] }
 0x271   : > { %v2550_v20 = vpop.permute.xlu0 %2549 }
 0x272   : > { %v3020_v45 = vpop.permute.xlu1 %3019  ;;  %2584 = vst.msk [vmem:[#allocation4 + $0x230] sm:$0xff] %vm16714_vm5, %v2550_v20 }
 0x273   : > { %3053 = vst.msk [vmem:[#allocation4 + $0x260] sm:$0xff] %vm16640_vm6, %v3020_v45 }
 0x274   : > { %3182 = vst.msk [vmem:[#allocation4 + $0x260] sm:$0xff] %vm16636_vm10, %v16965_v54 }
 0x275   : > { %3343 = vst.msk [vmem:[#allocation4 + $0x260] sm:$0xff] %vm16710_vm0, %v16966_v21  ;;  %v2679_v11 = vpop.permute.xlu0 %2678  ;;  %v3570_v46 = vpop.f32.mrb[0].mxu1 }
 0x276   : > { %v3306_v43 = vpop.permute.xlu1 %3305  ;;  %2713 = vst.msk [vmem:[#allocation4 + $0x230] sm:$0xff] %vm16709_vm4, %v2679_v11  ;;  %v3704_v4 = vmul.f32 %v12492_v37, %v3570_v46  ;;  %v3572_v49 = vpop.f32.mrb[1].mxu1 }
 0x277   : > { %3341 = vst.msk [vmem:[#allocation4 + $0x210] sm:$0xff] %vm16710_vm0, %v3306_v43  ;;  %v3573_v8 = vpop.f32.mrb[2].mxu1 }
 0x278   : > { %v12508_v34 = vadd.f32 %v12498_v48, %v3704_v4  ;;  %v3705_v32 = vmul.f32 %v12492_v37, %v3573_v8  ;;  %v3575_v3 = vpop.f32.mrb[3].mxu1 }
 0x279   : > { %v2166_v10 = vpop.permute.xlu0 %2165 }
 0x27a   : > { %v2840_v38 = vpop.permute.xlu1 %2839  ;;  %2199 = vst.msk [vmem:[#allocation4 + $0x258] sm:$0xff] %vm16650_vm15, %v2166_v10  ;;  %v3775_v15 = vmax.f32 %v12508_v34, 0.0  ;;  %v12516_v39 = vadd.f32 %v12498_v48, %v3705_v32 }
 0x27b   : > { %2889 = vst.msk [vmem:[#allocation4 + $0x230] sm:$0xff] %vm16695_vm8, %v2840_v38 }
 0x27c   : > { %2890 = vst.msk [vmem:[#allocation4 + $0x238] sm:$0xff] %vm16660_vm9, %v2840_v38  ;;  %v3776_v17 = vmax.f32 %v12516_v39, 0.0  ;;  %v3375_v22 = vld [vmem:[#allocation4 + $0x260] sm:$0xff]  ;;  %vm16988_vm9 = vcmp.lt.s32.totalorder %v16987_v18, 16 }
 0x27d   : > { %v2391_v60 = vpop.permute.xlu0 %2390  ;;  %3807 = vst.msk [vmem:[#allocation2] sm:$0xff] %vm16860_vm1, %v3775_v15 }
 0x27e   : > { %v3018_v31 = vpop.permute.xlu1 %3017  ;;  %2424 = vst.msk [vmem:[#allocation4 + $0x258] sm:$0xff] %vm16639_vm13, %v2391_v60  ;;  %v3371_v61 = vld [vmem:[#allocation4 + $0x210] sm:$0xff] }
 0x27f   : > { %3052 = vst.msk [vmem:[#allocation4 + $0x238] sm:$0xff] %vm16640_vm6, %v3018_v31  ;;  %10256 = vmatprep.mubr.msk.bf16.mxu1 %vm16635_vm2, %v3371_v61  ;;  %vm16979_vm6 = vcmp.ge.s32.totalorder %v11082_v24, 0 }
 0x280   : > { %3181 = vst.msk [vmem:[#allocation4 + $0x238] sm:$0xff] %vm16636_vm10, %v3147_v2  ;;  %3673 = vmatmul.mubr.bf16.gmra.mrb[52].mxu1 %v3370_v51 }
 0x281   : > { %3342 = vst.msk [vmem:[#allocation4 + $0x238] sm:$0xff] %vm16710_vm0, %v3308_v16  ;;  %v2552_v7 = vpop.permute.xlu0 %2551 }
 0x282   : > { %2585 = vst.msk [vmem:[#allocation4 + $0x258] sm:$0xff] %vm16714_vm5, %v2552_v7  ;;  %v3372_v36 = vld [vmem:[#allocation4 + $0x230] sm:$0xff] }
 0x283   : > { %2714 = vst.msk [vmem:[#allocation4 + $0x258] sm:$0xff] %vm16709_vm4, %v2681_v23  ;;  %v3578_v9 = vpop.f32.mrb[4].mxu1 }
 0x284   : > { %2891 = vst.msk [vmem:[#allocation4 + $0x258] sm:$0xff] %vm16695_vm8, %v2842_v59  ;;  %v3706_v29 = vmul.f32 %v12492_v37, %v3578_v9  ;;  %v3580_v6 = vpop.f32.mrb[5].mxu1  ;;  %v3839_v2 = vld [vmem:[#allocation2] sm:$0xff]  ;;  %vm17009_vm8 = vcmp.ge.s32.totalorder %v16994_v12, 0 }
 0x285   : > { %v4964_v47 = vpop.permute.xlu0 %4963  ;;  %3808 = vst.msk [vmem:[#allocation2 + $0x8] sm:$0xff] %vm16860_vm1, %v3776_v17  ;;  %v3581_v19 = vpop.f32.mrb[6].mxu1  ;;  %3903 = vrot.lane.b32.xlu0 %v3839_v2, %s16742_s29 }
 0x286   : > { %5009 = vst.msk [vmem:[#allocation4 + $0x50] sm:$0xff] %vm16709_vm4, %v4964_v47  ;;  %v12531_v28 = vadd.f32 %v12498_v48, %v3706_v29  ;;  %v3707_v53 = vmul.f32 %v12492_v37, %v3581_v19  ;;  %v3583_v30 = vpop.f32.mrb[7].mxu1 }
 0x288   : > { %v3373_v35 = vld [vmem:[#allocation4 + $0x238] sm:$0xff]  ;;  %v3777_v63 = vmax.f32 %v12531_v28, 0.0  ;;  %v12538_v50 = vadd.f32 %v12498_v48, %v3707_v53 }
 0x289   : > { %10257 = vmatprep.mubr.msk.bf16.mxu1 %vm16635_vm2, %v3373_v35  ;;  %v4390_v27 = vpop.permute.xlu0 %4389 }
 0x28a   : > { %3681 = vmatmul.mubr.bf16.gmra.mrb[56].mxu1 %v3372_v36  ;;  %4434 = vst.msk [vmem:[#allocation4 + $0x78] sm:$0xff] %vm16650_vm15, %v4390_v27  ;;  %v3778_v55 = vmax.f32 %v12538_v50, 0.0 }
 0x28b   : > { %10258 = vmatprep.mubr.msk.bf16.mxu1 %vm16635_vm2, %v3375_v22  ;;  %3809 = vst.msk [vmem:[#allocation2 + $0x10] sm:$0xff] %vm16860_vm1, %v3777_v63  ;;  %v3374_v44 = vld [vmem:[#allocation4 + $0x258] sm:$0xff]  ;;  %vm16974_vm2 = vcmp.ge.s32.totalorder %v11059_v13, 0 }
 0x28c   : > { %v3840_v0 = vld [vmem:[#allocation2 + $0x8] sm:$0xff]  ;;  %3810 = vst.msk [vmem:[#allocation2 + $0x18] sm:$0xff] %vm16860_vm1, %v3778_v55 }
 0x28d   : > { %v4518_v56 = vpop.permute.xlu0 %4517  ;;  %3905 = vrot.lane.b32.xlu1 %v3840_v0, %s16742_s29 }
 0x28e   : > { %4562 = vst.msk [vmem:[#allocation4 + $0x78] sm:$0xff] %vm16639_vm13, %v4518_v56 }
 0x292   : > { %3689 = vmatmul.mubr.bf16.gmra.mrb[60].mxu1 %v3374_v44  ;;  %v3841_v1 = vld [vmem:[#allocation2 + $0x10] sm:$0xff] }
 0x293   : > { %3907 = vrot.lane.b32.xlu0 %v3841_v1, %s16742_s29  ;;  %v3842_v26 = vld [vmem:[#allocation2 + $0x18] sm:$0xff] }
 0x294   : > { %3909 = vrot.lane.b32.xlu1 %v3842_v26, %s16742_s29 }
 0x298   : > { %v3586_v5 = vpop.f32.mrb[8].mxu1 }
 0x299   : > { %v3708_v16 = vmul.f32 %v12492_v37, %v3586_v5  ;;  %v3588_v23 = vpop.f32.mrb[9].mxu1 }
 0x29a   : > { %v3589_v59 = vpop.f32.mrb[10].mxu1 }
 0x29b   : > { %v12555_v20 = vadd.f32 %v12498_v48, %v3708_v16  ;;  %v3709_v45 = vmul.f32 %v12492_v37, %v3589_v59  ;;  %v3591_v54 = vpop.f32.mrb[11].mxu1 }
 0x29d   : > { %v3779_v21 = vmax.f32 %v12555_v20, 0.0  ;;  %v12560_v11 = vadd.f32 %v12498_v48, %v3709_v45 }
 0x29f   : > { %3811 = vst.msk [vmem:[#allocation2 + $0x20] sm:$0xff] %vm16860_vm1, %v3779_v21  ;;  %v3780_v43 = vmax.f32 %v12560_v11, 0.0 }
 0x2a1   : > { %3812 = vst.msk [vmem:[#allocation2 + $0x28] sm:$0xff] %vm16860_vm1, %v3780_v43 }
 0x2a5   : > { %v3594_v38 = vpop.f32.mrb[12].mxu1 }
 0x2a6   : > { %v3843_v10 = vld [vmem:[#allocation2 + $0x20] sm:$0xff]  ;;  %v3710_v60 = vmul.f32 %v12492_v37, %v3594_v38  ;;  %v3596_v62 = vpop.f32.mrb[13].mxu1 }
 0x2a7   : > { %3911 = vrot.lane.b32.xlu0 %v3843_v10, %s16742_s29  ;;  %v3597_v42 = vpop.f32.mrb[14].mxu1 }
 0x2a8   : > { %v3844_v46 = vld [vmem:[#allocation2 + $0x28] sm:$0xff]  ;;  %v12573_v4 = vadd.f32 %v12498_v48, %v3710_v60  ;;  %v3711_v31 = vmul.f32 %v12492_v37, %v3597_v42  ;;  %v3599_v49 = vpop.f32.mrb[15].mxu1 }
 0x2a9   : > { %3913 = vrot.lane.b32.xlu1 %v3844_v46, %s16742_s29 }
 0x2aa   : > { %v16655_v61 = vmax.f32 %v12573_v4, 0.0  ;;  %v12578_v25 = vadd.f32 %v12498_v48, %v3711_v31 }
 0x2ac   : > { %3813 = vst.msk [vmem:[#allocation2 + $0x30] sm:$0xff] %vm16860_vm1, %v16655_v61  ;;  %v16654_v8 = vmax.f32 %v12578_v25, 0.0 }
 0x2ae   : > { %3814 = vst.msk [vmem:[#allocation2 + $0x38] sm:$0xff] %vm16860_vm1, %v16654_v8 }
 0x2b3   : > { %v3845_v51 = vld [vmem:[#allocation2 + $0x30] sm:$0xff] }
 0x2b4   : > { %3915 = vrot.lane.b32.xlu0 %v3845_v51, %s16742_s29 }
 0x2b5   : > { %v3846_v3 = vld [vmem:[#allocation2 + $0x38] sm:$0xff] }
 0x2b6   : > { %v3602_v32 = vpop.f32.mrb[16].mxu1  ;;  %3917 = vrot.lane.b32.xlu1 %v3846_v3, %s16742_s29 }
 0x2b7   : > { %v3712_v7 = vmul.f32 %v12492_v37, %v3602_v32  ;;  %v3604_v47 = vpop.f32.mrb[17].mxu1 }
 0x2b8   : > { %v3605_v9 = vpop.f32.mrb[18].mxu1 }
 0x2b9   : > { %v12591_v29 = vadd.f32 %v12498_v48, %v3712_v7  ;;  %v3713_v6 = vmul.f32 %v12492_v37, %v3605_v9  ;;  %v3607_v19 = vpop.f32.mrb[19].mxu1 }
 0x2bb   : > { %v16653_v35 = vmax.f32 %v12591_v29, 0.0  ;;  %v12596_v53 = vadd.f32 %v12498_v48, %v3713_v6 }
 0x2bd   : > { %3815 = vst.msk [vmem:[#allocation2 + $0x40] sm:$0xff] %vm16860_vm1, %v16653_v35  ;;  %v16649_v30 = vmax.f32 %v12596_v53, 0.0 }
 0x2bf   : > { %3816 = vst.msk [vmem:[#allocation2 + $0x48] sm:$0xff] %vm16860_vm1, %v16649_v30 }
 0x2c3   : > { %v3610_v27 = vpop.f32.mrb[20].mxu1 }
 0x2c4   : > { %v3847_v36 = vld [vmem:[#allocation2 + $0x40] sm:$0xff]  ;;  %v3714_v2 = vmul.f32 %v12492_v37, %v3610_v27  ;;  %v3612_v0 = vpop.f32.mrb[21].mxu1 }
 0x2c5   : > { %3919 = vrot.lane.b32.xlu0 %v3847_v36, %s16742_s29  ;;  %v3613_v56 = vpop.f32.mrb[22].mxu1 }
 0x2c6   : > { %v3848_v22 = vld [vmem:[#allocation2 + $0x48] sm:$0xff]  ;;  %v12609_v44 = vadd.f32 %v12498_v48, %v3714_v2  ;;  %v3715_v1 = vmul.f32 %v12492_v37, %v3613_v56  ;;  %v3615_v5 = vpop.f32.mrb[23].mxu1 }
 0x2c7   : > { %3921 = vrot.lane.b32.xlu1 %v3848_v22, %s16742_s29 }
 0x2c8   : > { %v16648_v26 = vmax.f32 %v12609_v44, 0.0  ;;  %v12614_v16 = vadd.f32 %v12498_v48, %v3715_v1 }
 0x2ca   : > { %3817 = vst.msk [vmem:[#allocation2 + $0x50] sm:$0xff] %vm16860_vm1, %v16648_v26  ;;  %v16647_v23 = vmax.f32 %v12614_v16, 0.0 }
 0x2cc   : > { %3818 = vst.msk [vmem:[#allocation2 + $0x58] sm:$0xff] %vm16860_vm1, %v16647_v23 }
 0x2d1   : > { %v3849_v59 = vld [vmem:[#allocation2 + $0x50] sm:$0xff] }
 0x2d2   : > { %3923 = vrot.lane.b32.xlu0 %v3849_v59, %s16742_s29 }
 0x2d3   : > { %v3850_v54 = vld [vmem:[#allocation2 + $0x58] sm:$0xff] }
 0x2d4   : > { %3925 = vrot.lane.b32.xlu1 %v3850_v54, %s16742_s29 }
 0x2d6   : > { %v3618_v45 = vpop.f32.mrb[24].mxu1 }
 0x2d7   : > { %v3716_v10 = vmul.f32 %v12492_v37, %v3618_v45  ;;  %v3620_v38 = vpop.f32.mrb[25].mxu1 }
 0x2d8   : > { %v3621_v46 = vpop.f32.mrb[26].mxu1 }
 0x2d9   : > { %v12627_v60 = vadd.f32 %v12498_v48, %v3716_v10  ;;  %v3717_v62 = vmul.f32 %v12492_v37, %v3621_v46  ;;  %v3623_v42 = vpop.f32.mrb[27].mxu1 }
 0x2db   : > { %v16646_v31 = vmax.f32 %v12627_v60, 0.0  ;;  %v12632_v49 = vadd.f32 %v12498_v48, %v3717_v62 }
 0x2dd   : > { %3819 = vst.msk [vmem:[#allocation2 + $0x60] sm:$0xff] %vm16860_vm1, %v16646_v31  ;;  %v16645_v51 = vmax.f32 %v12632_v49, 0.0 }
 0x2df   : > { %3820 = vst.msk [vmem:[#allocation2 + $0x68] sm:$0xff] %vm16860_vm1, %v16645_v51 }
 0x2e3   : > { %v3626_v3 = vpop.f32.mrb[28].mxu1 }
 0x2e4   : > { %v3851_v32 = vld [vmem:[#allocation2 + $0x60] sm:$0xff]  ;;  %v3718_v47 = vmul.f32 %v12492_v37, %v3626_v3  ;;  %v3628_v9 = vpop.f32.mrb[29].mxu1 }
 0x2e5   : > { %3927 = vrot.lane.b32.xlu0 %v3851_v32, %s16742_s29  ;;  %v3629_v6 = vpop.f32.mrb[30].mxu1 }
 0x2e6   : > { %v3852_v7 = vld [vmem:[#allocation2 + $0x68] sm:$0xff]  ;;  %v12645_v19 = vadd.f32 %v12498_v48, %v3718_v47  ;;  %v3719_v36 = vmul.f32 %v12492_v37, %v3629_v6  ;;  %v3631_v27 = vpop.f32.mrb[31].mxu1 }
 0x2e7   : > { %3929 = vrot.lane.b32.xlu1 %v3852_v7, %s16742_s29 }
 0x2e8   : > { %v16644_v22 = vmax.f32 %v12645_v19, 0.0  ;;  %v12650_v2 = vadd.f32 %v12498_v48, %v3719_v36 }
 0x2ea   : > { %3821 = vst.msk [vmem:[#allocation2 + $0x70] sm:$0xff] %vm16860_vm1, %v16644_v22  ;;  %v16643_v0 = vmax.f32 %v12650_v2, 0.0 }
 0x2ec   : > { %3822 = vst.msk [vmem:[#allocation2 + $0x78] sm:$0xff] %vm16860_vm1, %v16643_v0 }
 0x2f1   : > { %v3853_v56 = vld [vmem:[#allocation2 + $0x70] sm:$0xff] }
 0x2f2   : > { %3931 = vrot.lane.b32.xlu0 %v3853_v56, %s16742_s29 }
 0x2f3   : > { %v3854_v5 = vld [vmem:[#allocation2 + $0x78] sm:$0xff] }
 0x2f4   : > { %3933 = vrot.lane.b32.xlu1 %v3854_v5, %s16742_s29 }
 0x2f6   : > { %v3634_v1 = vpop.f32.mrb[32].mxu1 }
 0x2f7   : > { %v3720_v59 = vmul.f32 %v12492_v37, %v3634_v1  ;;  %v3636_v45 = vpop.f32.mrb[33].mxu1  ;;  %v3904_v3 = vpop.permute.xlu0 %3903  ;;  %v16970_v1 = vld [vmem:[#allocation19_spill] sm:$0xff] }
 0x2f8   : > { %v3637_v54 = vpop.f32.mrb[34].mxu1  ;;  %v3999_v7 = vadd.f32 %v3904_v3, %v3775_v15  ;;  %v12686_v5 = vadd.s32 4294967292, %v16970_v1 }
 0x2f9   : > { %v12663_v10 = vadd.f32 %v12498_v48, %v3720_v59  ;;  %v3721_v38 = vmul.f32 %v12492_v37, %v3637_v54  ;;  %v3639_v46 = vpop.f32.mrb[35].mxu1 }
 0x2fa   : > { %4031 = vst.msk [vmem:[#allocation3 + $0x50] sm:$0xff] %vm16860_vm1, %v3999_v7  ;;  %16971 = vst [vmem:[#allocation31_spill] sm:$0xff] %v12686_v5  ;;  %vm16656_vm12 = vcmp.ge.s32.totalorder %v12686_v5, 0 }
 0x2fb   : > { %v16642_v62 = vmax.f32 %v12663_v10, 0.0  ;;  %v12668_v42 = vadd.f32 %v12498_v48, %v3721_v38 }
 0x2fd   : > { %3823 = vst.msk [vmem:[#allocation2 + $0x80] sm:$0xff] %vm16860_vm1, %v16642_v62  ;;  %v16641_v32 = vmax.f32 %v12668_v42, 0.0 }
 0x2ff   : > { %3824 = vst.msk [vmem:[#allocation2 + $0x88] sm:$0xff] %vm16860_vm1, %v16641_v32  ;;  %v3906_v47 = vpop.permute.xlu1 %3905 }
 0x300   : > { %v4000_v9 = vadd.f32 %v3906_v47, %v3776_v17 }
 0x301   : > { %v12691_v17 = vld [vmem:[#allocation3 + $0x4c] sm:$0xff] }
 0x302   : > { %4032 = vst.msk [vmem:[#allocation3 + $0x58] sm:$0xff] %vm16860_vm1, %v4000_v9  ;;  %v12705_v28 = vsel %vm16675_vm11, %v12691_v17, 0.0 }
 0x304   : > { %v3855_v6 = vld [vmem:[#allocation2 + $0x80] sm:$0xff] }
 0x305   : > { %3935 = vrot.lane.b32.xlu0 %v3855_v6, %s16742_s29  ;;  %v3908_v56 = vpop.permute.xlu0 %3907 }
 0x306   : > { %v3856_v36 = vld [vmem:[#allocation2 + $0x88] sm:$0xff]  ;;  %v4001_v39 = vadd.f32 %v3908_v56, %v3777_v63  ;;  %v3910_v45 = vpop.permute.xlu1 %3909  ;;  %v16972_v63 = vld [vmem:[#allocation23_spill] sm:$0xff]  ;;  %v4167_v56 = vsel %vm16656_vm12, %v12691_v17, 0.0 }
 0x307   : > { %v3642_v27 = vpop.f32.mrb[36].mxu1  ;;  %3937 = vrot.lane.b32.xlu1 %v3856_v36, %s16742_s29  ;;  %v4002_v3 = vadd.f32 %v3910_v45, %v3778_v55  ;;  %v12708_v47 = vadd.s32 4, %v16972_v63  ;;  %v12721_v55 = vsel %vm16974_vm2, %v12691_v17, 0.0 }
 0x308   : > { %v3722_v34 = vmul.f32 %v12492_v37, %v3642_v27  ;;  %v3644_v15 = vpop.f32.mrb[37].mxu1  ;;  %4033 = vst.msk [vmem:[#allocation3 + $0x60] sm:$0xff] %vm16860_vm1, %v4001_v39  ;;  %v16975_v39 = vld [vmem:[#allocation21_spill] sm:$0xff] }
 0x309   : > { %v3645_v59 = vpop.f32.mrb[38].mxu1  ;;  %v12700_v7 = vld [vmem:[#allocation3 + $0x54] sm:$0xff]  ;;  %16973 = vst [vmem:[#allocation34_spill] sm:$0xff] %v12708_v47  ;;  %4034 = vst.msk [vmem:[#allocation3 + $0x68] sm:$0xff] %vm16860_vm1, %v4002_v3  ;;  %vm16723_vm10 = vcmp.lt.s32.totalorder %v12708_v47, 16 }
 0x30a   : > { %v12694_v54 = vadd.f32 %v12498_v48, %v3722_v34  ;;  %v3723_v38 = vmul.f32 %v12492_v37, %v3645_v59  ;;  %v3647_v46 = vpop.f32.mrb[39].mxu1  ;;  %v4195_v34 = vpack.c.bf16 %v12700_v7, %v4167_v56  ;;  %v12738_v59 = vadd.s32 4294967292, %v16975_v39 }
 0x30c   : > { %v16638_v9 = vmax.f32 %v12694_v54, 0.0  ;;  %v12713_v6 = vadd.f32 %v12498_v48, %v3723_v38  ;;  %16976 = vst [vmem:[#allocation19_spill] sm:$0xff] %v12738_v59  ;;  %4211 = vst.msk [vmem:[#allocation4 + $0xa0] sm:$0xff] %vm16860_vm1, %v4195_v34  ;;  %vm16729_vm13 = vcmp.ge.s32.totalorder %v12738_v59, 0 }
 0x30e   : > { %3825 = vst.msk [vmem:[#allocation2 + $0x90] sm:$0xff] %vm16860_vm1, %v16638_v9  ;;  %v16637_v27 = vmax.f32 %v12713_v6, 0.0  ;;  %v16977_v9 = vld [vmem:[#allocation8_spill] sm:$0xff] }
 0x30f   : > { %v4808_v15 = vld [vmem:[#allocation3 + $0x5c] sm:$0xff]  ;;  %vm16978_vm2 = vcmp.lt.s32.totalorder %v16977_v9, 16 }
 0x310   : > { %3826 = vst.msk [vmem:[#allocation2 + $0x98] sm:$0xff] %vm16860_vm1, %v16637_v27  ;;  %v12742_v45 = vsel %vm16723_vm10, %v4808_v15, 0.0  ;;  %v12746_v38 = vsel %vm16718_vm7, %v4808_v15, 0.0  ;;  %v12753_v56 = vld [vmem:[#allocation3 + $0x64] sm:$0xff]  ;;  %v12757_v27 = vsel %vm16717_vm14, %v4808_v15, 0.0  ;;  %v12761_v36 = vsel %vm16978_vm2, %v4808_v15, 0.0 }
 0x311   : > { %v12771_v32 = vsel %vm16979_vm6, %v4808_v15, 0.0 }
 0x315   : > { %v3857_v50 = vld [vmem:[#allocation2 + $0x90] sm:$0xff] }
 0x316   : > { %3939 = vrot.lane.b32.xlu0 %v3857_v50, %s16742_s29  ;;  %v3650_v3 = vpop.f32.mrb[40].mxu1  ;;  %v4169_v50 = vsel %vm16729_vm13, %v4808_v15, 0.0 }
 0x317   : > { %v3724_v62 = vmul.f32 %v12492_v37, %v3650_v3  ;;  %v3652_v0 = vpop.f32.mrb[41].mxu1  ;;  %v3858_v22 = vld [vmem:[#allocation2 + $0x98] sm:$0xff]  ;;  %v4196_v30 = vpack.c.bf16 %v12753_v56, %v4169_v50 }
 0x318   : > { %3941 = vrot.lane.b32.xlu1 %v3858_v22, %s16742_s29  ;;  %v3653_v31 = vpop.f32.mrb[42].mxu1 }
 0x319   : > { %v3912_v51 = vpop.permute.xlu0 %3911  ;;  %v12782_v23 = vadd.f32 %v12498_v48, %v3724_v62  ;;  %v3725_v3 = vmul.f32 %v12492_v37, %v3653_v31  ;;  %v3655_v0 = vpop.f32.mrb[43].mxu1  ;;  %4212 = vst.msk [vmem:[#allocation4 + $0xc8] sm:$0xff] %vm16860_vm1, %v4196_v30  ;;  %v16982_v31 = vld [vmem:[#allocation20_spill] sm:$0xff] }
 0x31a   : > { %v4003_v46 = vadd.f32 %v3912_v51, %v3779_v21  ;;  %v16980_v51 = vld [vmem:[#allocation30_spill] sm:$0xff]  ;;  %v12799_v62 = vadd.s32 4294967294, %v16982_v31  ;;  %v12814_v30 = vadd.s32 4294967292, %v16982_v31 }
 0x31b   : > { %v3914_v26 = vpop.permute.xlu1 %3913  ;;  %v16652_v20 = vmax.f32 %v12782_v23, 0.0  ;;  %v12791_v21 = vadd.f32 %v12498_v48, %v3725_v3  ;;  %v12794_v15 = vadd.s32 4, %v16980_v51 }
 0x31c   : > { %4035 = vst.msk [vmem:[#allocation3 + $0x70] sm:$0xff] %vm16860_vm1, %v4003_v46  ;;  %v4004_v22 = vadd.f32 %v3914_v26, %v3780_v43  ;;  %v16983_v43 = vld [vmem:[#allocation18_spill] sm:$0xff]  ;;  %vm16736_vm2 = vcmp.ge.s32.totalorder %v12799_v62, 0  ;;  %v12817_v46 = vadd.s32 4294967294, %v16970_v1 }
 0x31d   : > { %16981 = vst [vmem:[#allocation23_spill] sm:$0xff] %v12794_v15  ;;  %3827 = vst.msk [vmem:[#allocation2 + $0xa0] sm:$0xff] %vm16860_vm1, %v16652_v20  ;;  %v16651_v11 = vmax.f32 %v12791_v21, 0.0  ;;  %v12809_v26 = vadd.s32 4, %v16983_v43  ;;  %vm16657_vm6 = vcmp.lt.s32.totalorder %v12794_v15, 16 }
 0x31e   : > { %4036 = vst.msk [vmem:[#allocation3 + $0x78] sm:$0xff] %vm16860_vm1, %v4004_v22 }
 0x31f   : > { %3828 = vst.msk [vmem:[#allocation2 + $0xa8] sm:$0xff] %vm16860_vm1, %v16651_v11  ;;  %16984 = vst [vmem:[#allocation21_spill] sm:$0xff] %v12809_v26  ;;  %vm16722_vm15 = vcmp.lt.s32.totalorder %v12809_v26, 16 }
 0x323   : > { %v4810_v50 = vld [vmem:[#allocation3 + $0x6c] sm:$0xff] }
 0x324   : > { %v4235_v3 = vld [vmem:[#allocation3 + $0x6e] sm:$0xff]  ;;  %v12821_v0 = vsel %vm16657_vm6, %v4810_v50, 0.0  ;;  %v12825_v22 = vsel %vm16656_vm12, %v4810_v50, 0.0  ;;  %v3859_v20 = vld [vmem:[#allocation2 + $0xa0] sm:$0xff]  ;;  %v12844_v61 = vsel %vm16722_vm15, %v4810_v50, 0.0  ;;  %vm16744_vm12 = vcmp.ge.s32.totalorder %v12814_v30, 0 }
 0x325   : > { %v12830_v31 = vld [vmem:[#allocation3 + $0x74] sm:$0xff]  ;;  %v12836_v1 = vsel %vm16736_vm2, %v4235_v3, 0.0  ;;  %16986 = vst [vmem:[#allocation20_spill] sm:$0xff] %v12844_v61  ;;  %3943 = vrot.lane.b32.xlu0 %v3859_v20, %s16742_s29  ;;  %vm16727_vm6 = vcmp.ge.s32.totalorder %v12817_v46, 0  ;;  %v12853_v5 = vsel %vm16988_vm9, %v4810_v50, 0.0  ;;  %v12857_v8 = vsel %vm16675_vm11, %v4810_v50, 0.0 }
 0x326   : > { %v12832_v11 = vld [vmem:[#allocation3 + $0x76] sm:$0xff]  ;;  %16985 = vst [vmem:[#allocation30_spill] sm:$0xff] %v12836_v1  ;;  %16989 = vst [vmem:[#allocation18_spill] sm:$0xff] %v12853_v5  ;;  %v3860_v35 = vld [vmem:[#allocation2 + $0xa8] sm:$0xff]  ;;  %v12865_v14 = vsel %vm16727_vm6, %v4235_v3, 0.0  ;;  %v3916_v24 = vpop.permute.xlu0 %3915  ;;  %vm16992_vm9 = vcmp.ge.s32.totalorder %v11059_v13, 0 }
 0x327   : > { %16990 = vst [vmem:[#allocation44_spill] sm:$0xff] %v12857_v8  ;;  %16991 = vst [vmem:[#allocation45_spill] sm:$0xff] %v12865_v14  ;;  %v3658_v34 = vpop.f32.mrb[44].mxu1  ;;  %3945 = vrot.lane.b32.xlu1 %v3860_v35, %s16742_s29  ;;  %v12872_v33 = vsel %vm16992_vm9, %v4810_v50, 0.0  ;;  %vm16995_vm11 = vcmp.ge.s32.totalorder %v16994_v12, 0  ;;  %v4171_v20 = vsel %vm16744_vm12, %v4810_v50, 0.0 }
 0x328   : > { %16993 = vst [vmem:[#allocation46_spill] sm:$0xff] %v12872_v33  ;;  %v12876_v15 = vsel %vm16995_vm11, %v4235_v3, 0.0  ;;  %v3726_v58 = vmul.f32 %v12492_v37, %v3658_v34  ;;  %v3660_v57 = vpop.f32.mrb[45].mxu1  ;;  %v16997_v35 = vmax.f32 %v12573_v4, 0.0  ;;  %v3918_v59 = vpop.permute.xlu1 %3917  ;;  %v4197_v14 = vpack.c.bf16 %v12830_v31, %v4171_v20  ;;  %v16998_v8 = vld [vmem:[#allocation6_spill] sm:$0xff] }
 0x329   : > { %16996 = vst [vmem:[#allocation47_spill] sm:$0xff] %v12876_v15  ;;  %v3661_v47 = vpop.f32.mrb[46].mxu1  ;;  %vm16999_vm11 = vcmp.ge.s32.totalorder %v16998_v8, 0  ;;  %v17000_v4 = vmax.f32 %v12578_v25, 0.0  ;;  %v17003_v33 = vmax.f32 %v12596_v53, 0.0  ;;  %v17006_v53 = vld [vmem:[#allocation22_spill] sm:$0xff] }
 0x32a   : > { %v4005_v9 = vadd.f32 %v3916_v24, %v16997_v35  ;;  %v6790_v5 = vsel %vm16999_vm11, %v4235_v3, 0.0  ;;  %v12891_v50 = vadd.f32 %v12498_v48, %v3726_v58  ;;  %v3727_v24 = vmul.f32 %v12492_v37, %v3661_v47  ;;  %v3663_v57 = vpop.f32.mrb[47].mxu1  ;;  %4213 = vst.msk [vmem:[#allocation4 + $0xf0] sm:$0xff] %vm16860_vm1, %v4197_v14  ;;  %v17001_v14 = vld [vmem:[#allocation24_spill] sm:$0xff] }
 0x32b   : > { %v4006_v34 = vadd.f32 %v3918_v59, %v17000_v4  ;;  %v6822_v35 = vpack.c.bf16 %v12832_v11, %v6790_v5  ;;  %v12913_v25 = vadd.s32 4294967292, %v17001_v14 }
 0x32c   : > { %4037 = vst.msk [vmem:[#allocation3 + $0x80] sm:$0xff] %vm16860_vm1, %v4005_v9  ;;  %v16689_v20 = vmax.f32 %v12891_v50, 0.0  ;;  %v12901_v13 = vadd.f32 %v12498_v48, %v3727_v24 }
 0x32d   : > { %4038 = vst.msk [vmem:[#allocation3 + $0x88] sm:$0xff] %vm16860_vm1, %v4006_v34  ;;  %6838 = vst.msk [vmem:[#allocation4 + $0x18] sm:$0xff] %vm16860_vm1, %v6822_v35  ;;  %vm16753_vm9 = vcmp.ge.s32.totalorder %v12913_v25, 0  ;;  %v17002_v34 = vmax.f32 %v12591_v29, 0.0  ;;  %v17004_v29 = vld [vmem:[#allocation10_spill] sm:$0xff] }
 0x32e   : > { %3829 = vst.msk [vmem:[#allocation2 + $0xb0] sm:$0xff] %vm16860_vm1, %v16689_v20  ;;  %v16688_v58 = vmax.f32 %v12901_v13, 0.0  ;;  %vm17005_vm11 = vcmp.ge.s32.totalorder %v17004_v29, 0 }
 0x330   : > { %3830 = vst.msk [vmem:[#allocation2 + $0xb8] sm:$0xff] %vm16860_vm1, %v16688_v58 }
 0x333   : > { %v4077_v57 = vld [vmem:[#allocation3 + $0x7c] sm:$0xff] }
 0x334   : > { %v6760_v4 = vld [vmem:[#allocation3 + $0x7e] sm:$0xff]  ;;  %v6761_v20 = vld [vmem:[#allocation3 + $0x86] sm:$0xff] }
 0x335   : > { %v3861_v5 = vld [vmem:[#allocation2 + $0xb0] sm:$0xff]  ;;  %v4078_v58 = vld [vmem:[#allocation3 + $0x84] sm:$0xff] }
 0x336   : > { %3947 = vrot.lane.b32.xlu0 %v3861_v5, %s16742_s29  ;;  %v3666_v47 = vpop.f32.mrb[48].mxu1 }
 0x337   : > { %v3728_v9 = vmul.f32 %v12492_v37, %v3666_v47  ;;  %v3668_v59 = vpop.f32.mrb[49].mxu1  ;;  %v3862_v3 = vld [vmem:[#allocation2 + $0xb8] sm:$0xff]  ;;  %v3920_v24 = vpop.permute.xlu0 %3919 }
 0x338   : > { %3949 = vrot.lane.b32.xlu1 %v3862_v3, %s16742_s29  ;;  %v4007_v35 = vadd.f32 %v3920_v24, %v17002_v34  ;;  %v3669_v41 = vpop.f32.mrb[50].mxu1  ;;  %v4173_v3 = vsel %vm16753_vm9, %v4077_v57, 0.0  ;;  %v6792_v24 = vsel %vm17005_vm11, %v6760_v4, 0.0 }
 0x339   : > { %v12922_v5 = vadd.f32 %v12498_v48, %v3728_v9  ;;  %v3729_v47 = vmul.f32 %v12492_v37, %v3669_v41  ;;  %v3671_v59 = vpop.f32.mrb[51].mxu1  ;;  %v3922_v15 = vpop.permute.xlu1 %3921  ;;  %v4198_v1 = vpack.c.bf16 %v4078_v58, %v4173_v3  ;;  %v6823_v41 = vpack.c.bf16 %v6761_v20, %v6792_v24 }
 0x33a   : > { %4039 = vst.msk [vmem:[#allocation3 + $0x90] sm:$0xff] %vm16860_vm1, %v4007_v35  ;;  %v4008_v61 = vadd.f32 %v3922_v15, %v17003_v33  ;;  %v12947_v15 = vadd.s32 4294967292, %v17006_v53 }
 0x33b   : > { %v16696_v34 = vmax.f32 %v12922_v5, 0.0  ;;  %v12934_v9 = vadd.f32 %v12498_v48, %v3729_v47  ;;  %4214 = vst.msk [vmem:[#allocation4 + $0x118] sm:$0xff] %vm16860_vm1, %v4198_v1  ;;  %6839 = vst.msk [vmem:[#allocation4 + $0x40] sm:$0xff] %vm16860_vm1, %v6823_v41  ;;  %v17007_v1 = vmax.f32 %v12609_v44, 0.0  ;;  %v17008_v41 = vmax.f32 %v12614_v16, 0.0 }
 0x33c   : > { %4040 = vst.msk [vmem:[#allocation3 + $0x98] sm:$0xff] %vm16860_vm1, %v4008_v61  ;;  %vm16766_vm11 = vcmp.ge.s32.totalorder %v12947_v15, 0 }
 0x33d   : > { %3831 = vst.msk [vmem:[#allocation2 + $0xc0] sm:$0xff] %vm16860_vm1, %v16696_v34  ;;  %v16694_v33 = vmax.f32 %v12934_v9, 0.0 }
 0x33f   : > { %3832 = vst.msk [vmem:[#allocation2 + $0xc8] sm:$0xff] %vm16860_vm1, %v16694_v33 }
 0x341   : > { %v4079_v58 = vld [vmem:[#allocation3 + $0x8c] sm:$0xff] }
 0x342   : > { %v6762_v47 = vld [vmem:[#allocation3 + $0x8e] sm:$0xff]  ;;  %v4175_v3 = vsel %vm16766_vm11, %v4079_v58, 0.0 }
 0x343   : > { %v4080_v35 = vld [vmem:[#allocation3 + $0x94] sm:$0xff] }
 0x344   : > { %v3863_v20 = vld [vmem:[#allocation2 + $0xc0] sm:$0xff]  ;;  %v3924_v57 = vpop.permute.xlu0 %3923  ;;  %v6763_v24 = vld [vmem:[#allocation3 + $0x96] sm:$0xff]  ;;  %v4199_v33 = vpack.c.bf16 %v4080_v35, %v4175_v3 }
 0x345   : > { %3951 = vrot.lane.b32.xlu0 %v3863_v20, %s16742_s29  ;;  %v4009_v4 = vadd.f32 %v3924_v57, %v17007_v1 }
 0x346   : > { %v3864_v61 = vld [vmem:[#allocation2 + $0xc8] sm:$0xff]  ;;  %v3926_v59 = vpop.permute.xlu1 %3925  ;;  %4215 = vst.msk [vmem:[#allocation4 + $0x140] sm:$0xff] %vm16860_vm1, %v4199_v33 }
 0x347   : > { %3953 = vrot.lane.b32.xlu1 %v3864_v61, %s16742_s29  ;;  %4041 = vst.msk [vmem:[#allocation3 + $0xa0] sm:$0xff] %vm16860_vm1, %v4009_v4  ;;  %v4010_v20 = vadd.f32 %v3926_v59, %v17008_v41  ;;  %v6794_v61 = vsel %vm17009_vm8, %v6762_v47, 0.0  ;;  %v17011_v59 = vld [vmem:[#allocation25_spill] sm:$0xff]  ;;  %v17014_v41 = vmax.f32 %v12627_v60, 0.0 }
 0x348   : > { %v6824_v44 = vpack.c.bf16 %v6763_v24, %v6794_v61  ;;  %v12970_v47 = vadd.s32 4294967292, %v17011_v59  ;;  %v10823_v60 = vld [vmem:[%s16537_s7 + $0x40] sm:$0xff]  }
 0x349   : > { %4042 = vst.msk [vmem:[#allocation3 + $0xa8] sm:$0xff] %vm16860_vm1, %v4010_v20  ;;  %10359 = vmatprep.subr.bf16.mxu0 %v10823_v60 }
 0x34a   : > { %6840 = vst.msk [vmem:[#allocation4 + $0x68] sm:$0xff] %vm16860_vm1, %v6824_v44  ;;  %17012 = vst [vmem:[#allocation24_spill] sm:$0xff] %v12970_v47  ;;  %v17015_v44 = vmax.f32 %v12632_v49, 0.0  ;;  %vm16777_vm8 = vcmp.ge.s32.totalorder %v12970_v47, 0 }
 0x353   : > { %v3674_v57 = vpop.f32.mrb[52].mxu1 }
 0x354   : > { %v3730_v58 = vmul.f32 %v12492_v37, %v3674_v57  ;;  %v3676_v1 = vpop.f32.mrb[53].mxu1 }
 0x355   : > { %v3677_v34 = vpop.f32.mrb[54].mxu1  ;;  %v6764_v1 = vld [vmem:[#allocation3 + $0x9e] sm:$0xff] }
 0x356   : > { %v12966_v4 = vadd.f32 %v12498_v48, %v3730_v58  ;;  %v3731_v16 = vmul.f32 %v12492_v37, %v3677_v34  ;;  %v3679_v35 = vpop.f32.mrb[55].mxu1  ;;  %v4081_v58 = vld [vmem:[#allocation3 + $0x9c] sm:$0xff] }
 0x357   : > { %v3928_v3 = vpop.permute.xlu0 %3927  ;;  %v6765_v35 = vld [vmem:[#allocation3 + $0xa6] sm:$0xff]  ;;  %v4177_v49 = vsel %vm16777_vm8, %v4081_v58, 0.0 }
 0x358   : > { %17010 = vst [vmem:[#allocation6_spill] sm:$0xff] %v12966_v4  ;;  %v16697_v24 = vmax.f32 %v12966_v4, 0.0  ;;  %v12974_v33 = vadd.f32 %v12498_v48, %v3731_v16  ;;  %v4011_v20 = vadd.f32 %v3928_v3, %v17014_v41  ;;  %v4082_v16 = vld [vmem:[#allocation3 + $0xa4] sm:$0xff]  ;;  %v6796_v41 = vsel %vm1224_vm3, %v6764_v1, 0.0 }
 0x359   : > { %v3930_v61 = vpop.permute.xlu1 %3929  ;;  %v10824_v1 = vld [vmem:[%s16537_s7] sm:$0xff]  }
 0x35a   : > { %17013 = vst [vmem:[#allocation10_spill] sm:$0xff] %v12974_v33  ;;  %3833 = vst.msk [vmem:[#allocation2 + $0xd0] sm:$0xff] %vm16860_vm1, %v16697_v24  ;;  %v16698_v34 = vmax.f32 %v12974_v33, 0.0  ;;  %v4012_v57 = vadd.f32 %v3930_v61, %v17015_v44  ;;  %v4200_v44 = vpack.c.bf16 %v4082_v16, %v4177_v49  ;;  %v6825_v24 = vpack.c.bf16 %v6765_v35, %v6796_v41 }
 0x35b   : > { %4043 = vst.msk [vmem:[#allocation3 + $0xb0] sm:$0xff] %vm16860_vm1, %v4011_v20  ;;  %10360 = vmatpush3.bf16.msra.mxu0 %v10824_v1 }
 0x35c   : > { %3834 = vst.msk [vmem:[#allocation2 + $0xd8] sm:$0xff] %vm16860_vm1, %v16698_v34  ;;  %4044 = vst.msk [vmem:[#allocation3 + $0xb8] sm:$0xff] %vm16860_vm1, %v4012_v57 }
 0x35d   : > { %v3682_v3 = vpop.f32.mrb[56].mxu1  ;;  %4216 = vst.msk [vmem:[#allocation4 + $0x168] sm:$0xff] %vm16860_vm1, %v4200_v44  ;;  %6841 = vst.msk [vmem:[#allocation4 + $0x90] sm:$0xff] %vm16860_vm1, %v6825_v24  ;;  %v10826_v24 = vld [vmem:[%s16537_s7 + $0x8] sm:$0xff]  }
 0x35e   : > { %v3732_v20 = vmul.f32 %v12492_v37, %v3682_v3  ;;  %v3684_v61 = vpop.f32.mrb[57].mxu1 }
 0x35f   : > { %v3685_v34 = vpop.f32.mrb[58].mxu1 }
 0x360   : > { %v12999_v57 = vadd.f32 %v12498_v48, %v3732_v20  ;;  %v3733_v33 = vmul.f32 %v12492_v37, %v3685_v34  ;;  %v3687_v4 = vpop.f32.mrb[59].mxu1  ;;  %v17018_v20 = vld [vmem:[#allocation26_spill] sm:$0xff] }
 0x361   : > { %v3865_v58 = vld [vmem:[#allocation2 + $0xd0] sm:$0xff]  ;;  %v10825_v4 = vld [vmem:[%s16537_s7 + $0x48] sm:$0xff]   ;;  %v13031_v61 = vadd.s32 4294967292, %v17018_v20 }
 0x362   : > { %17016 = vst [vmem:[#allocation22_spill] sm:$0xff] %v12999_v57  ;;  %v16705_v60 = vmax.f32 %v12999_v57, 0.0  ;;  %v13009_v16 = vadd.f32 %v12498_v48, %v3733_v33  ;;  %3955 = vrot.lane.b32.xlu0 %v3865_v58, %s16742_s29  ;;  %v10827_v33 = vld [vmem:[%s16537_s7 + $0x50] sm:$0xff]   ;;  %10361 = vmatprep.subr.bf16.mxu0 %v10825_v4  ;;  %v17021_v4 = vmax.f32 %v12645_v19, 0.0 }
 0x363   : > { %v3866_v35 = vld [vmem:[#allocation2 + $0xd8] sm:$0xff]  ;;  %17019 = vst [vmem:[#allocation26_spill] sm:$0xff] %v13031_v61  ;;  %10362 = vmatpush3.bf16.msra.mxu0 %v10826_v24  ;;  %vm16713_vm4 = vcmp.ge.s32.totalorder %v13031_v61, 0  ;;  %v10836_v61 = vld [vmem:[%s16537_s7 + $0x30] sm:$0xff]  }
 0x364   : > { %17017 = vst [vmem:[#allocation25_spill] sm:$0xff] %v13009_v16  ;;  %3835 = vst.msk [vmem:[#allocation2 + $0xe0] sm:$0xff] %vm16860_vm1, %v16705_v60  ;;  %v16707_v34 = vmax.f32 %v13009_v16, 0.0  ;;  %3957 = vrot.lane.b32.xlu1 %v3866_v35, %s16742_s29  ;;  %v3932_v58 = vpop.permute.xlu0 %3931  ;;  %10363 = vmatprep.subr.bf16.mxu0 %v10827_v33  ;;  %v4084_v19 = vld [vmem:[#allocation3 + $0xb4] sm:$0xff] }
 0x365   : > { %v3690_v3 = vpop.f32.mrb[60].mxu1  ;;  %v4013_v60 = vadd.f32 %v3932_v58, %v17021_v4  ;;  %v6767_v33 = vld [vmem:[#allocation3 + $0xb6] sm:$0xff] }
 0x366   : > { %3836 = vst.msk [vmem:[#allocation2 + $0xe8] sm:$0xff] %vm16860_vm1, %v16707_v34  ;;  %v3734_v49 = vmul.f32 %v12492_v37, %v3690_v3  ;;  %v3692_v41 = vpop.f32.mrb[61].mxu1  ;;  %v3934_v34 = vpop.permute.xlu1 %3933  ;;  %v10828_v3 = vld [vmem:[%s16537_s7 + $0x10] sm:$0xff]   ;;  %v10829_v58 = vld [vmem:[%s16537_s7 + $0x58] sm:$0xff]  }
 0x367   : > { %v3693_v44 = vpop.f32.mrb[62].mxu1  ;;  %v4083_v41 = vld [vmem:[#allocation3 + $0xac] sm:$0xff]  ;;  %4045 = vst.msk [vmem:[#allocation3 + $0xc0] sm:$0xff] %vm16860_vm1, %v4013_v60  ;;  %10364 = vmatpush3.bf16.msra.mxu0 %v10828_v3  ;;  %v13063_v60 = vadd.s32 2, %v16983_v43 }
 0x368   : > { %v13034_v1 = vadd.f32 %v12498_v48, %v3734_v49  ;;  %v3735_v35 = vmul.f32 %v12492_v37, %v3693_v44  ;;  %v3695_v16 = vpop.f32.mrb[63].mxu1  ;;  %v17023_v37 = vmax.f32 %v12650_v2, 0.0  ;;  %10365 = vmatprep.subr.bf16.mxu0 %v10829_v58  ;;  %v4179_v4 = vsel %vm16713_vm4, %v4083_v41, 0.0  ;;  %v10833_v41 = vld [vmem:[%s16537_s7 + $0x68] sm:$0xff]  }
 0x369   : > { %v6766_v16 = vld [vmem:[#allocation3 + $0xae] sm:$0xff]  ;;  %v4201_v43 = vpack.c.bf16 %v4084_v19, %v4179_v4  ;;  %vm1641_vm0 = vcmp.lt.s32.totalorder %v13063_v60, 16  ;;  %v13091_v4 = vadd.s32 4294967294, %v16975_v39 }
 0x36a   : > { %17020 = vst [vmem:[#allocation48_spill] sm:$0xff] %v13034_v1  ;;  %v16712_v57 = vmax.f32 %v13034_v1, 0.0  ;;  %v13044_v24 = vadd.f32 %v12498_v48, %v3735_v35  ;;  %v4014_v49 = vadd.f32 %v3934_v34, %v17023_v37  ;;  %v10830_v48 = vld [vmem:[%s16537_s7 + $0x18] sm:$0xff]   ;;  %v10831_v35 = vld [vmem:[%s16537_s7 + $0x60] sm:$0xff]   ;;  %v6798_v3 = vsel %vm16727_vm6, %v6766_v16, 0.0  ;;  %v17024_v19 = vld [vmem:[#allocation27_spill] sm:$0xff] }
 0x36b   : > { %v3867_v44 = vld [vmem:[#allocation2 + $0xe0] sm:$0xff]  ;;  %v6826_v37 = vpack.c.bf16 %v6767_v33, %v6798_v3  ;;  %10366 = vmatpush3.bf16.msra.mxu0 %v10830_v48  ;;  %4217 = vst.msk [vmem:[#allocation4 + $0x190] sm:$0xff] %vm16860_vm1, %v4201_v43  ;;  %v13086_v33 = vadd.s32 4294967294, %v17024_v19  ;;  %v13098_v3 = vadd.s32 4294967294, %v17011_v59  ;;  %v10838_v1 = vld [vmem:[%s16537_s7 + $0x38] sm:$0xff]  }
 0x36c   : > { %17022 = vst [vmem:[#allocation49_spill] sm:$0xff] %v13044_v24  ;;  %3837 = vst.msk [vmem:[#allocation2 + $0xf0] sm:$0xff] %vm16860_vm1, %v16712_v57  ;;  %v16711_v2 = vmax.f32 %v13044_v24, 0.0  ;;  %3959 = vrot.lane.b32.xlu0 %v3867_v44, %s16742_s29  ;;  %v4582_v44 = vld [vmem:[#allocation3 + $0x4a] sm:$0xff]  ;;  %10367 = vmatprep.subr.bf16.mxu0 %v10831_v35  ;;  %v4581_v48 = vld [vmem:[#allocation3 + $0x42] sm:$0xff] }
 0x36d   : > { %4046 = vst.msk [vmem:[#allocation3 + $0xc8] sm:$0xff] %vm16860_vm1, %v4014_v49  ;;  %v3868_v34 = vld [vmem:[#allocation2 + $0xe8] sm:$0xff]  ;;  %v10832_v49 = vld [vmem:[%s16537_s7 + $0x20] sm:$0xff]   ;;  %6842 = vst.msk [vmem:[#allocation4 + $0xb8] sm:$0xff] %vm16860_vm1, %v6826_v37  ;;  %v13103_v37 = vadd.s32 4294967292, %v17024_v19  ;;  %vm16830_vm5 = vcmp.ge.s32.totalorder %v13086_v33, 0 }
 0x36e   : > { %3838 = vst.msk [vmem:[#allocation2 + $0xf8] sm:$0xff] %vm16860_vm1, %v16711_v2  ;;  %3961 = vrot.lane.b32.xlu1 %v3868_v34, %s16742_s29  ;;  %v7468_v16 = vld [vmem:[#allocation3 + $0xbe] sm:$0xff]  ;;  %17025 = vst [vmem:[#allocation27_spill] sm:$0xff] %v13086_v33  ;;  %v4678_v34 = vsel %vm1641_vm0, %v4582_v44, 0.0  ;;  %v10834_v35 = vld [vmem:[%s16537_s7 + $0x28] sm:$0xff]   ;;  %vm16864_vm14 = vcmp.ge.s32.totalorder %v13098_v3, 0 }
 0x36f   : > { %10368 = vmatpush3.bf16.msra.mxu0 %v10832_v49  ;;  %17027 = vst [vmem:[#allocation51_spill] sm:$0xff] %v13103_v37  ;;  %v17028_v57 = vld [vmem:[#allocation12_spill] sm:$0xff]  ;;  %v13108_v49 = vadd.s32 4294967294, %v17001_v14  ;;  %v13115_v59 = vsel %vm1224_vm3, %v7468_v16, 0.0  ;;  %v4902_v14 = vsel %vm16722_vm15, %v12691_v17, 0.0  ;;  %vm16728_vm7 = vcmp.ge.s32.totalorder %v13103_v37, 0 }
 0x370   : > { %10369 = vmatprep.subr.bf16.mxu0 %v10833_v41  ;;  %vm17029_vm4 = vcmp.lt.s32.totalorder %v17028_v57, 16  ;;  %17030 = vst [vmem:[#allocation12_spill] sm:$0xff] %v13115_v59  ;;  %v4706_v41 = vpack.c.bf16 %v4678_v34, %v4581_v48  ;;  %v4085_v59 = vld [vmem:[#allocation3 + $0xbc] sm:$0xff]  ;;  %vm17032_vm15 = vcmp.lt.s32.totalorder %v16987_v18, 16  ;;  %v10850_v33 = vld [vmem:[%s16537_s7 + $0xa8] sm:$0xff]  }
 0x371   : > { %v5522_v39 = vsel %vm17029_vm4, %v4582_v44, 0.0  ;;  %vm16841_vm4 = vcmp.ge.s32.totalorder %v13091_v4, 0  ;;  %vm16850_vm10 = vcmp.ge.s32.totalorder %v13108_v49, 0 }
 0x372   : > { %v5552_v19 = vpack.c.bf16 %v5522_v39, %v4581_v48  ;;  %v13142_v48 = vsel %vm16864_vm14, %v7468_v16, 0.0  ;;  %v13146_v39 = vsel %vm16830_vm5, %v7468_v16, 0.0 }
 0x373   : > { %v3869_v58 = vld [vmem:[#allocation2 + $0xf0] sm:$0xff]  ;;  %10370 = vmatpush3.bf16.msra.mxu0 %v10834_v35  ;;  %v5682_v35 = vsel %vm17032_vm15, %v12691_v17, 0.0  ;;  %17033 = vst [vmem:[#allocation52_spill] sm:$0xff] %v13142_v48  ;;  %17034 = vst [vmem:[#allocation53_spill] sm:$0xff] %v13146_v39  ;;  %v10863_v17 = vld [vmem:[#allocation3 + $0x44] sm:$0xff]  ;;  %vm17039_vm15 = vcmp.ge.s32.totalorder %v16994_v12, 0 }
 0x374   : > { %3963 = vrot.lane.b32.xlu0 %v3869_v58, %s16742_s29  ;;  %v13100_v43 = vld [vmem:[#allocation3 + $0xc6] sm:$0xff]  ;;  %v10835_v58 = vld [vmem:[%s16537_s7 + $0x70] sm:$0xff]  }
 0x375   : > { %17026 = vst [vmem:[#allocation50_spill] sm:$0xff] %v13100_v43  ;;  %v3870_v2 = vld [vmem:[#allocation2 + $0xf8] sm:$0xff]  ;;  %10371 = vmatprep.subr.bf16.mxu0 %v10835_v58  ;;  %v17035_v58 = vmax.f32 %v12668_v42, 0.0  ;;  %v4086_v24 = vld [vmem:[#allocation3 + $0xc4] sm:$0xff]  ;;  %v13161_v42 = vsel %vm16850_vm10, %v7468_v16, 0.0 }
 0x376   : > { %3965 = vrot.lane.b32.xlu1 %v3870_v2, %s16742_s29  ;;  %v17031_v2 = vmax.f32 %v12663_v10, 0.0  ;;  %v10837_v10 = vld [vmem:[%s16537_s7 + $0x78] sm:$0xff]   ;;  %17036 = vst [vmem:[#allocation54_spill] sm:$0xff] %v13161_v42  ;;  %s16747_s29 = smov 56  }
 0x377   : > { %v3936_v44 = vpop.permute.xlu0 %3935  ;;  %10372 = vmatpush3.bf16.msra.mxu0 %v10836_v61  ;;  %v4231_v61 = vld [vmem:[#allocation3 + $0x4e] sm:$0xff] }
 0x378   : > { %v4015_v34 = vadd.f32 %v3936_v44, %v17031_v2  ;;  %4741 = vrot.lane.b32.xlu0 %v4706_v41, %s16920_s28  ;;  %v4930_v44 = vpack.c.bf16 %v4902_v14, %v10863_v17  ;;  %v5712_v14 = vpack.c.bf16 %v5682_v35, %v10863_v17  ;;  %10373 = vmatprep.subr.bf16.mxu0 %v10837_v10  ;;  %v5235_v10 = vsel %vm17039_vm15, %v4231_v61, 0.0  ;;  %v4456_v17 = vld [vmem:[#allocation3 + $0x58] sm:$0xff] }
 0x379   : > { %v3938_v26 = vpop.permute.xlu1 %3937  ;;  %v17038_v35 = vpack.c.bf16 %v12700_v7, %v12705_v28  ;;  %v13192_v28 = vadd.s32 2, %v16972_v63 }
 0x37a   : > { %4047 = vst.msk [vmem:[#allocation3 + $0xd0] sm:$0xff] %vm16860_vm1, %v4015_v34  ;;  %v4016_v41 = vadd.f32 %v3938_v26, %v17035_v58  ;;  %5585 = vrot.lane.b32.xlu1 %v5552_v19, %s16921_s25  ;;  %v6800_v26 = vsel %vm16841_vm4, %v7468_v16, 0.0  ;;  %v4181_v19 = vsel %vm16728_vm7, %v4085_v59, 0.0  ;;  %v4232_v16 = vld [vmem:[#allocation3 + $0x56] sm:$0xff]  ;;  %v4327_v59 = vsel %vm16727_vm6, %v4231_v61, 0.0 }
 0x37b   : > { %v6827_v58 = vpack.c.bf16 %v13100_v43, %v6800_v26  ;;  %v4202_v18 = vpack.c.bf16 %v4086_v24, %v4181_v19  ;;  %10374 = vmatpush3.bf16.msra.mxu0 %v10838_v1  ;;  %v17040_v24 = vpack.c.bf16 %v12700_v7, %v12721_v55  ;;  %v4455_v26 = vld [vmem:[#allocation3 + $0x50] sm:$0xff]  ;;  %v13195_v19 = vadd.s32 4294967294, %v17006_v53 }
 0x37c   : > { %4048 = vst.msk [vmem:[#allocation3 + $0xd8] sm:$0xff] %vm16860_vm1, %v4016_v41  ;;  %4965 = vrot.lane.b32.xlu0 %v4930_v44, %s16800_s23  ;;  %v4355_v41 = vpack.c.bf16 %v4232_v16, %v4327_v59  ;;  %v17041_v44 = vld [vmem:[#allocation28_spill] sm:$0xff]  ;;  %vm1643_vm6 = vcmp.lt.s32.totalorder %v13192_v28, 16  ;;  %v17046_v53 = vmax.f32 %v12694_v54, 0.0  ;;  %vm17047_vm7 = vcmp.ge.s32.totalorder %v16998_v8, 0 }
 0x37d   : > { %6843 = vst.msk [vmem:[#allocation4 + $0xe0] sm:$0xff] %vm16860_vm1, %v6827_v58  ;;  %4218 = vst.msk [vmem:[#allocation4 + $0x1b8] sm:$0xff] %vm16860_vm1, %v4202_v18  ;;  %v13188_v1 = vadd.s32 4294967292, %v17041_v44  ;;  %v5265_v18 = vpack.c.bf16 %v4232_v16, %v5235_v10  ;;  %v4584_v10 = vld [vmem:[#allocation3 + $0x5a] sm:$0xff]  ;;  %vm16840_vm13 = vcmp.ge.s32.totalorder %v13195_v19, 0 }
 0x37e   : > { %5745 = vrot.lane.b32.xlu1 %v5712_v14, %s17037_s24  ;;  %v4483_v14 = vpack.c.bf16 %v4456_v17, %v4455_v26  ;;  %v6017_v17 = vsel %vm17047_vm7, %v4231_v61, 0.0  ;;  %v4680_v39 = vsel %vm1643_vm6, %v4584_v10, 0.0 }
 0x37f   : > { %17042 = vst [vmem:[#allocation28_spill] sm:$0xff] %v13188_v1  ;;  %vm16735_vm15 = vcmp.ge.s32.totalorder %v13188_v1, 0 }
 0x380   : > { %5123 = vrot.lane.b32.xlu0 %v17038_v35, %s16922_s26 }
 0x381   : > { %v4822_v55 = vld [vmem:[#allocation3 + $0xcc] sm:$0xff] }
 0x382   : > { %5904 = vrot.lane.b32.xlu1 %v17040_v24, %s16790_s27  ;;  %v7470_v58 = vld [vmem:[#allocation3 + $0xce] sm:$0xff]  ;;  %v13215_v2 = vsel %vm16744_vm12, %v4822_v55, 0.0  ;;  %v17066_v55 = vmax.f32 %v12782_v23, 0.0 }
 0x383   : > { %v4087_v59 = vld [vmem:[#allocation3 + $0xcc] sm:$0xff]  ;;  %v13201_v63 = vld [vmem:[#allocation3 + $0xd4] sm:$0xff]  ;;  %17050 = vst [vmem:[#allocation58_spill] sm:$0xff] %v13215_v2  ;;  %v13219_v42 = vsel %vm16840_vm13, %v7470_v58, 0.0  ;;  %v6049_v58 = vpack.c.bf16 %v4232_v16, %v6017_v17  ;;  %v13248_v17 = vadd.s32 4, %v12030_v40 }
 0x384   : > { %4391 = vrot.lane.b32.xlu0 %v4355_v41, %s16826_s30  ;;  %17044 = vst [vmem:[#allocation55_spill] sm:$0xff] %v13201_v63  ;;  %v13203_v24 = vld [vmem:[#allocation3 + $0xd6] sm:$0xff]  ;;  %v6770_v26 = vld [vmem:[#allocation3 + $0xce] sm:$0xff]  ;;  %17051 = vst [vmem:[#allocation59_spill] sm:$0xff] %v13219_v42  ;;  %v4183_v54 = vsel %vm16735_vm15, %v4087_v59, 0.0 }
 0x385   : > { %17045 = vst [vmem:[#allocation56_spill] sm:$0xff] %v13203_v24  ;;  %v6771_v61 = vld [vmem:[#allocation3 + $0xd6] sm:$0xff] }
 0x386   : > { %5299 = vrot.lane.b32.xlu1 %v5265_v18, %s16784_s18  ;;  %v13210_v18 = vld [vmem:[#allocation3 + $0xd4] sm:$0xff] }
 0x387   : > { %17048 = vst [vmem:[#allocation57_spill] sm:$0xff] %v13210_v18  ;;  %v4203_v59 = vpack.c.bf16 %v13210_v18, %v4183_v54  ;;  %v17161_v63 = vld [vmem:[#allocation40_spill] sm:$0xff] }
 0x388   : > { %v3940_v35 = vpop.permute.xlu0 %3939  ;;  %4519 = vrot.lane.b32.xlu0 %v4483_v14, %s17043_s17 }
 0x389   : > { %v4017_v41 = vadd.f32 %v3940_v35, %v17046_v53  ;;  %v17052_v35 = vmax.f32 %v12713_v6, 0.0  ;;  %v4583_v6 = vld [vmem:[#allocation3 + $0x52] sm:$0xff]  ;;  %4219 = vst.msk [vmem:[#allocation4 + $0x1e0] sm:$0xff] %vm16860_vm1, %v4203_v59  ;;  %v17062_v59 = vld [vmem:[#allocation37_spill] sm:$0xff] }
 0x38a   : > { %v3942_v34 = vpop.permute.xlu1 %3941  ;;  %5427 = vrot.lane.b32.xlu1 %v4483_v14, %s17049_s19  ;;  %v4707_v48 = vpack.c.bf16 %v4680_v39, %v4583_v6  ;;  %v17057_v39 = vld [vmem:[#allocation7_spill] sm:$0xff] }
 0x38b   : > { %4049 = vst.msk [vmem:[#allocation3 + $0xe0] sm:$0xff] %vm16860_vm1, %v4017_v41  ;;  %v4018_v53 = vadd.f32 %v3942_v34, %v17052_v35  ;;  %v6802_v41 = vsel %vm16736_vm2, %v6770_v26, 0.0  ;;  %v17053_v34 = vld [vmem:[#allocation16_spill] sm:$0xff]  ;;  %v17056_v26 = vpack.c.bf16 %v12742_v45, %v12700_v7  ;;  %vm16778_vm2 = vcmp.lt.s32.totalorder %v13248_v17, 16 }
 0x38c   : > { %6210 = vrot.lane.b32.xlu0 %v4483_v14, %s16805_s0  ;;  %vm17054_vm7 = vcmp.lt.s32.totalorder %v17053_v34, 16  ;;  %v6828_v1 = vpack.c.bf16 %v6771_v61, %v6802_v41  ;;  %v13245_v14 = vadd.s32 2, %v12030_v40  ;;  %17055 = vst [vmem:[#allocation16_spill] sm:$0xff] %v13248_v17  ;;  %v17061_v40 = vpack.c.bf16 %v12746_v38, %v12700_v7  ;;  %v17156_v17 = vld [vmem:[#allocation17_spill] sm:$0xff] }
 0x38d   : > { %4050 = vst.msk [vmem:[#allocation3 + $0xe8] sm:$0xff] %vm16860_vm1, %v4018_v53  ;;  %v5524_v35 = vsel %vm17054_vm7, %v4584_v10, 0.0  ;;  %vm17058_vm7 = vcmp.lt.s32.totalorder %v17057_v39, 16  ;;  %v17059_v53 = vld [vmem:[#allocation29_spill] sm:$0xff]  ;;  %v13266_v41 = vadd.s32 4, %v17062_v59 }
 0x38e   : > { %6081 = vrot.lane.b32.xlu1 %v6049_v58, %s16768_s20  ;;  %6844 = vst.msk [vmem:[#allocation4 + $0x108] sm:$0xff] %vm16860_vm1, %v6828_v1  ;;  %v5553_v16 = vpack.c.bf16 %v5524_v35, %v4583_v6  ;;  %v6308_v54 = vsel %vm17058_vm7, %v4584_v10, 0.0  ;;  %v13256_v1 = vld [vmem:[#allocation3 + $0x5e] sm:$0xff]  ;;  %v13259_v58 = vadd.s32 4294967292, %v17059_v53  ;;  %vm16818_vm15 = vcmp.lt.s32.totalorder %v13245_v14, 16  ;;  %v13270_v35 = vld [vmem:[#allocation3 + $0x66] sm:$0xff] }
 0x38f   : > { %v6339_v10 = vpack.c.bf16 %v6308_v54, %v4583_v6  ;;  %v17067_v6 = vpack.c.bf16 %v12753_v56, %v12757_v27  ;;  %vm16758_vm12 = vcmp.lt.s32.totalorder %v13266_v41, 16 }
 0x390   : > { %4743 = vrot.lane.b32.xlu0 %v4707_v48, %s16920_s28  ;;  %17060 = vst [vmem:[#allocation7_spill] sm:$0xff] %v13259_v58  ;;  %vm16749_vm7 = vcmp.ge.s32.totalorder %v13259_v58, 0 }
 0x392   : > { %5587 = vrot.lane.b32.xlu1 %v5553_v16, %s16921_s25  ;;  %v4600_v48 = vld [vmem:[#allocation3 + $0xda] sm:$0xff]  ;;  %v4329_v16 = vsel %vm16841_vm4, %v13256_v1, 0.0 }
 0x393   : > { %v4824_v61 = vld [vmem:[#allocation3 + $0xdc] sm:$0xff]  ;;  %v13279_v38 = vsel %vm16818_vm15, %v4600_v48, 0.0  ;;  %v4356_v48 = vpack.c.bf16 %v13270_v35, %v4329_v16 }
 0x394   : > { %4967 = vrot.lane.b32.xlu0 %v17056_v26, %s16800_s23  ;;  %v13275_v26 = vld [vmem:[#allocation3 + $0xd2] sm:$0xff]  ;;  %17064 = vst [vmem:[#allocation37_spill] sm:$0xff] %v13279_v38  ;;  %v13291_v54 = vld [vmem:[#allocation3 + $0xe4] sm:$0xff]  ;;  %v6453_v2 = vld [vmem:[#allocation3 + $0xdc] sm:$0xff]  ;;  %v13300_v23 = vsel %vm16753_vm9, %v4824_v61, 0.0 }
 0x395   : > { %17063 = vst [vmem:[#allocation29_spill] sm:$0xff] %v13275_v26  ;;  %17068 = vst [vmem:[#allocation61_spill] sm:$0xff] %v13291_v54  ;;  %v6772_v27 = vld [vmem:[#allocation3 + $0xde] sm:$0xff]  ;;  %v13310_v24 = vld [vmem:[#allocation3 + $0xe6] sm:$0xff]  ;;  %v13316_v26 = vsel %vm16758_vm12, %v6453_v2, 0.0  ;;  %vm17086_vm12 = vcmp.ge.s32.totalorder %v17004_v29, 0 }
 0x396   : > { %5747 = vrot.lane.b32.xlu1 %v17061_v40, %s17037_s24  ;;  %v13283_v40 = vsel %vm16778_vm2, %v4824_v61, 0.0  ;;  %17069 = vst [vmem:[#allocation62_spill] sm:$0xff] %v13300_v23  ;;  %17072 = vst [vmem:[#allocation64_spill] sm:$0xff] %v13310_v24  ;;  %v6804_v16 = vsel %vm16850_vm10, %v6772_v27, 0.0 }
 0x397   : > { %v3944_v45 = vpop.permute.xlu0 %3943  ;;  %17065 = vst [vmem:[#allocation60_spill] sm:$0xff] %v13283_v40  ;;  %v4458_v40 = vld [vmem:[#allocation3 + $0x68] sm:$0xff]  ;;  %17073 = vst [vmem:[#allocation65_spill] sm:$0xff] %v13316_v26  ;;  %v6829_v61 = vpack.c.bf16 %v13310_v24, %v6804_v16 }
 0x398   : > { %v4019_v42 = vadd.f32 %v3944_v45, %v17066_v55  ;;  %5125 = vrot.lane.b32.xlu0 %v17067_v6, %s16922_s26  ;;  %v13302_v55 = vld [vmem:[#allocation3 + $0xe4] sm:$0xff]  ;;  %v17071_v45 = vmax.f32 %v12791_v21, 0.0  ;;  %v4185_v21 = vsel %vm16749_vm7, %v6453_v2, 0.0  ;;  %v13333_v2 = vsel %vm16864_vm14, %v6772_v27, 0.0 }
 0x399   : > { %v3946_v43 = vpop.permute.xlu1 %3945  ;;  %17070 = vst [vmem:[#allocation63_spill] sm:$0xff] %v13302_v55  ;;  %17074 = vst [vmem:[#allocation66_spill] sm:$0xff] %v13333_v2  ;;  %v4586_v27 = vld [vmem:[#allocation3 + $0x6a] sm:$0xff] }
 0x39a   : > { %4051 = vst.msk [vmem:[#allocation3 + $0xf0] sm:$0xff] %vm16860_vm1, %v4019_v42  ;;  %v4020_v6 = vadd.f32 %v3946_v43, %v17071_v45  ;;  %6371 = vrot.lane.b32.xlu1 %v6339_v10, %s16747_s29  ;;  %v13323_v43 = vadd.s32 2, %v16980_v51  ;;  %v4204_v10 = vpack.c.bf16 %v13302_v55, %v4185_v21  ;;  %v4457_v45 = vld [vmem:[#allocation3 + $0x60] sm:$0xff]  ;;  %s16802_s29 = smov 80   ;;  %v17075_v51 = vpack.c.bf16 %v12761_v36, %v12700_v7 }
 0x39b   : > { %6845 = vst.msk [vmem:[#allocation4 + $0x130] sm:$0xff] %vm16860_vm1, %v6829_v61  ;;  %v5237_v21 = vsel %vm1224_vm3, %v13256_v1, 0.0  ;;  %v17076_v7 = vpack.c.bf16 %v12753_v56, %v12771_v32 }
 0x39c   : > { %4052 = vst.msk [vmem:[#allocation3 + $0xf8] sm:$0xff] %vm16860_vm1, %v4020_v6  ;;  %4393 = vrot.lane.b32.xlu0 %v4356_v48, %s16826_s30  ;;  %v4484_v48 = vpack.c.bf16 %v4458_v40, %v4457_v45  ;;  %4220 = vst.msk [vmem:[#allocation4 + $0x208] sm:$0xff] %vm16860_vm1, %v4204_v10  ;;  %vm16759_vm7 = vcmp.lt.s32.totalorder %v13323_v43, 16  ;;  %v17077_v10 = vld [vmem:[#allocation32_spill] sm:$0xff]  ;;  %v5266_v16 = vpack.c.bf16 %v13270_v35, %v5237_v21  ;;  %v13359_v45 = vld [vmem:[#allocation3 + $0x62] sm:$0xff]  ;;  %v13375_v21 = vadd.s32 4294967294, %v17018_v20 }
 0x39d   : > { %v4682_v36 = vsel %vm16759_vm7, %v4586_v27, 0.0  ;;  %v13355_v61 = vadd.s32 4294967292, %v17077_v10  ;;  %v6019_v20 = vsel %vm17086_vm12, %v13256_v1, 0.0 }
 0x39e   : > { %6532 = vrot.lane.b32.xlu1 %v17075_v51, %s16802_s29  ;;  %v17079_v51 = vld [vmem:[#allocation38_spill] sm:$0xff]  ;;  %v4708_v32 = vpack.c.bf16 %v4682_v36, %v13359_v45  ;;  %vm16804_vm12 = vcmp.ge.s32.totalorder %v13375_v21, 0 }
 0x39f   : > { %17078 = vst [vmem:[#allocation32_spill] sm:$0xff] %v13355_v61  ;;  %v13362_v6 = vadd.s32 4, %v17079_v51  ;;  %vm16765_vm9 = vcmp.ge.s32.totalorder %v13355_v61, 0 }
 0x3a0   : > { %4521 = vrot.lane.b32.xlu0 %v4484_v48, %s17043_s17 }
 0x3a1   : > { %v5510_v40 = vld [vmem:[#allocation3 + $0xea] sm:$0xff] }
 0x3a2   : > { %5906 = vrot.lane.b32.xlu1 %v17076_v7, %s16790_s27  ;;  %v6613_v42 = vld [vmem:[#allocation3 + $0xec] sm:$0xff]  ;;  %v13366_v7 = vld [vmem:[#allocation3 + $0xe2] sm:$0xff]  ;;  %v13372_v24 = vsel %vm16759_vm7, %v5510_v40, 0.0  ;;  %v17085_v40 = vmax.f32 %v12891_v50, 0.0  ;;  %vm16767_vm7 = vcmp.lt.s32.totalorder %v13362_v6, 16 }
 0x3a3   : > { %17080 = vst [vmem:[#allocation38_spill] sm:$0xff] %v13366_v7  ;;  %v13368_v2 = vld [vmem:[#allocation3 + $0xf4] sm:$0xff]  ;;  %17082 = vst [vmem:[#allocation68_spill] sm:$0xff] %v13372_v24  ;;  %v13383_v36 = vsel %vm16766_vm11, %v6613_v42, 0.0  ;;  %v13400_v24 = vsel %vm16767_vm7, %v6613_v42, 0.0  ;;  %v4187_v50 = vsel %vm16765_vm9, %v6613_v42, 0.0  ;;  %v6050_v42 = vpack.c.bf16 %v13270_v35, %v6019_v20 }
 0x3a4   : > { %6212 = vrot.lane.b32.xlu0 %v4484_v48, %s16805_s0  ;;  %17081 = vst [vmem:[#allocation67_spill] sm:$0xff] %v13368_v2  ;;  %v6774_v26 = vld [vmem:[#allocation3 + $0xee] sm:$0xff]  ;;  %17083 = vst [vmem:[#allocation69_spill] sm:$0xff] %v13383_v36  ;;  %v13395_v7 = vld [vmem:[#allocation3 + $0xf6] sm:$0xff]  ;;  %v17090_v36 = vpack.c.bf16 %v12821_v0, %v12753_v56  ;;  %v17092_v0 = vpack.c.bf16 %v12830_v31, %v12825_v22  ;;  %vm17098_vm9 = vcmp.lt.s32.totalorder %v17028_v57, 16 }
 0x3a5   : > { %v13385_v58 = vld [vmem:[#allocation3 + $0xf4] sm:$0xff]  ;;  %17087 = vst [vmem:[#allocation71_spill] sm:$0xff] %v13395_v7  ;;  %17088 = vst [vmem:[#allocation72_spill] sm:$0xff] %v13400_v24  ;;  %v6806_v1 = vsel %vm16840_vm13, %v6774_v26, 0.0  ;;  %v17136_v2 = vld [vmem:[#allocation34_spill] sm:$0xff] }
 0x3a6   : > { %5301 = vrot.lane.b32.xlu1 %v5266_v16, %s16784_s18  ;;  %17084 = vst [vmem:[#allocation70_spill] sm:$0xff] %v13385_v58  ;;  %v4205_v18 = vpack.c.bf16 %v13385_v58, %v4187_v50  ;;  %v6830_v61 = vpack.c.bf16 %v13395_v7, %v6806_v1  ;;  %v17096_v1 = vld [vmem:[#allocation33_spill] sm:$0xff]  ;;  %v4459_v22 = vld [vmem:[#allocation3 + $0x70] sm:$0xff] }
 0x3a7   : > { %v13527_v7 = vld [vmem:[#allocation3 + $0x7c] sm:$0xff] }
 0x3a8   : > { %v3948_v16 = vpop.permute.xlu0 %3947  ;;  %4745 = vrot.lane.b32.xlu0 %v4708_v32, %s16920_s28  ;;  %4221 = vst.msk [vmem:[#allocation4 + $0x230] sm:$0xff] %vm16860_vm1, %v4205_v18  ;;  %6846 = vst.msk [vmem:[#allocation4 + $0x158] sm:$0xff] %vm16860_vm1, %v6830_v61  ;;  %v17094_v18 = vld [vmem:[#allocation30_spill] sm:$0xff] }
 0x3a9   : > { %v4021_v23 = vadd.f32 %v3948_v16, %v17085_v40  ;;  %v17089_v16 = vmax.f32 %v12901_v13, 0.0  ;;  %v13421_v13 = vsel %vm16804_vm12, %v6774_v26, 0.0  ;;  %v4460_v26 = vld [vmem:[#allocation3 + $0x78] sm:$0xff]  ;;  %v17095_v50 = vpack.c.bf16 %v12832_v11, %v17094_v18 }
 0x3aa   : > { %v3950_v32 = vpop.permute.xlu1 %3949  ;;  %5429 = vrot.lane.b32.xlu1 %v4484_v48, %s17049_s19  ;;  %17091 = vst [vmem:[#allocation73_spill] sm:$0xff] %v13421_v13 }
 0x3ab   : > { %4053 = vst.msk [vmem:[#allocation3 + $0x100] sm:$0xff] %vm16860_vm1, %v4021_v23  ;;  %v4022_v40 = vadd.f32 %v3950_v32, %v17089_v16  ;;  %v5526_v23 = vsel %vm1641_vm0, %v4586_v27, 0.0  ;;  %v13448_v16 = vadd.s32 4294967292, %v17096_v1 }
 0x3ac   : > { %4969 = vrot.lane.b32.xlu0 %v17090_v36, %s16800_s23  ;;  %v5554_v35 = vpack.c.bf16 %v5526_v23, %v13359_v45  ;;  %v17093_v36 = vld [vmem:[#allocation35_spill] sm:$0xff] }
 0x3ad   : > { %4054 = vst.msk [vmem:[#allocation3 + $0x108] sm:$0xff] %vm16860_vm1, %v4022_v40  ;;  %v13438_v20 = vadd.s32 2, %v17093_v36  ;;  %v13445_v61 = vadd.s32 4, %v17093_v36  ;;  %17097 = vst [vmem:[#allocation35_spill] sm:$0xff] %v13448_v16  ;;  %v6310_v40 = vsel %vm17098_vm9, %v4586_v27, 0.0  ;;  %v17101_v36 = vmax.f32 %v12922_v5, 0.0 }
 0x3ae   : > { %6083 = vrot.lane.b32.xlu1 %v6050_v42, %s16768_s20  ;;  %v17099_v42 = vld [vmem:[#allocation20_spill] sm:$0xff]  ;;  %v6340_v27 = vpack.c.bf16 %v6310_v40, %v13359_v45  ;;  %vm16774_vm7 = vcmp.ge.s32.totalorder %v13448_v16, 0  ;;  %v17107_v40 = vmax.f32 %v12934_v9, 0.0  ;;  %s17108_s20 = smov 56   ;;  %v4461_v16 = vld [vmem:[#allocation3 + $0x80] sm:$0xff] }
 0x3af   : > { %v17100_v23 = vpack.c.bf16 %v17099_v42, %v12753_v56  ;;  %vm1647_vm11 = vcmp.lt.s32.totalorder %v13438_v20, 16  ;;  %vm16780_vm9 = vcmp.lt.s32.totalorder %v13445_v61, 16  ;;  %v13468_v42 = vld [vmem:[#allocation3 + $0xf2] sm:$0xff] }
 0x3b0   : > { %5127 = vrot.lane.b32.xlu0 %v17092_v0, %s16922_s26  ;;  %v13456_v0 = vpack.c.bf16 %v4460_v26, %v4459_v22  ;;  %17103 = vst [vmem:[#allocation33_spill] sm:$0xff] %v13468_v42 }
 0x3b2   : > { %5589 = vrot.lane.b32.xlu1 %v5554_v35, %s16921_s25  ;;  %v5512_v35 = vld [vmem:[#allocation3 + $0xfa] sm:$0xff] }
 0x3b3   : > { %v4828_v18 = vld [vmem:[#allocation3 + $0xfc] sm:$0xff] }
 0x3b4   : > { %4395 = vrot.lane.b32.xlu0 %v17095_v50, %s16826_s30  ;;  %v6615_v50 = vld [vmem:[#allocation3 + $0xfc] sm:$0xff]  ;;  %v13466_v26 = vld [vmem:[#allocation3 + $0x104] sm:$0xff]  ;;  %v13476_v5 = vsel %vm16780_vm9, %v4828_v18, 0.0 }
 0x3b5   : > { %17102 = vst [vmem:[#allocation30_spill] sm:$0xff] %v13466_v26  ;;  %17105 = vst [vmem:[#allocation74_spill] sm:$0xff] %v13476_v5  ;;  %v13480_v45 = vsel %vm16777_vm8, %v6615_v50, 0.0  ;;  %v13490_v18 = vld [vmem:[#allocation3 + $0x106] sm:$0xff]  ;;  %v13496_v55 = vsel %vm16778_vm2, %v6615_v50, 0.0  ;;  %v4189_v9 = vsel %vm16774_vm7, %v6615_v50, 0.0 }
 0x3b6   : > { %5749 = vrot.lane.b32.xlu1 %v17100_v23, %s17037_s24  ;;  %v13472_v23 = vsel %vm1647_vm11, %v5512_v35, 0.0  ;;  %17106 = vst [vmem:[#allocation75_spill] sm:$0xff] %v13480_v45  ;;  %17109 = vst [vmem:[#allocation76_spill] sm:$0xff] %v13490_v18  ;;  %v17116_v35 = vld [vmem:[#allocation36_spill] sm:$0xff]  ;;  %vm17122_vm8 = vcmp.lt.s32.totalorder %v17057_v39, 16 }
 0x3b7   : > { %v3952_v32 = vpop.permute.xlu0 %3951  ;;  %17104 = vst [vmem:[#allocation20_spill] sm:$0xff] %v13472_v23  ;;  %17110 = vst [vmem:[#allocation77_spill] sm:$0xff] %v13496_v55  ;;  %v17148_v23 = vld [vmem:[#allocation15_spill] sm:$0xff] }
 0x3b8   : > { %v4023_v48 = vadd.f32 %v3952_v32, %v17101_v36  ;;  %4523 = vrot.lane.b32.xlu0 %v13456_v0, %s17043_s17  ;;  %v6007_v32 = vld [vmem:[#allocation3 + $0xfe] sm:$0xff] }
 0x3b9   : > { %v3954_v22 = vpop.permute.xlu1 %3953  ;;  %v6808_v50 = vsel %vm16864_vm14, %v6007_v32, 0.0 }
 0x3ba   : > { %4055 = vst.msk [vmem:[#allocation3 + $0x110] sm:$0xff] %vm16860_vm1, %v4023_v48  ;;  %v4024_v36 = vadd.f32 %v3954_v22, %v17107_v40  ;;  %6373 = vrot.lane.b32.xlu1 %v6340_v27, %s17108_s20  ;;  %v13503_v48 = vld [vmem:[#allocation3 + $0x7a] sm:$0xff]  ;;  %v4206_v22 = vpack.c.bf16 %v13466_v26, %v4189_v9  ;;  %v13510_v40 = vsel %vm16830_vm5, %v6007_v32, 0.0  ;;  %v6831_v27 = vpack.c.bf16 %v13490_v18, %v6808_v50  ;;  %v13530_v32 = vld [vmem:[#allocation3 + $0x72] sm:$0xff]  ;;  %v13556_v18 = vld [vmem:[#allocation3 + $0x102] sm:$0xff] }
 0x3bb   : > { %17111 = vst [vmem:[#allocation78_spill] sm:$0xff] %v13510_v40  ;;  %v4684_v9 = vsel %vm1647_vm11, %v13503_v48, 0.0  ;;  %v13544_v40 = vadd.s32 2, %v17116_v35  ;;  %v17126_v26 = vld [vmem:[#allocation19_spill] sm:$0xff] }
 0x3bc   : > { %4056 = vst.msk [vmem:[#allocation3 + $0x118] sm:$0xff] %vm16860_vm1, %v4024_v36  ;;  %6918 = vrot.lane.b32.xlu0 %v13456_v0, %s16826_s30  ;;  %v17112_v36 = vld [vmem:[#allocation18_spill] sm:$0xff]  ;;  %4222 = vst.msk [vmem:[#allocation4 + $0x258] sm:$0xff] %vm16860_vm1, %v4206_v22  ;;  %v4709_v50 = vpack.c.bf16 %v4684_v9, %v13530_v32 }
 0x3bd   : > { %v17113_v13 = vpack.c.bf16 %v17112_v36, %v12753_v56  ;;  %6847 = vst.msk [vmem:[#allocation4 + $0x180] sm:$0xff] %vm16860_vm1, %v6831_v27  ;;  %v13533_v56 = vadd.s32 2, %v17079_v51  ;;  %v4908_v36 = vsel %vm16780_vm9, %v13527_v7, 0.0  ;;  %v13549_v51 = vadd.s32 4294967294, %v17041_v44 }
 0x3be   : > { %v4933_v9 = vpack.c.bf16 %v4908_v36, %v12830_v31  ;;  %vm16809_vm2 = vcmp.lt.s32.totalorder %v13544_v40, 16 }
 0x3bf   : > { %6534 = vrot.lane.b32.xlu1 %v17113_v13, %s16802_s29  ;;  %v17114_v13 = vld [vmem:[#allocation44_spill] sm:$0xff]  ;;  %vm1653_vm7 = vcmp.lt.s32.totalorder %v13533_v56, 16  ;;  %17117 = vst [vmem:[#allocation18_spill] sm:$0xff] %v13549_v51  ;;  %vm16865_vm9 = vcmp.ge.s32.totalorder %v13549_v51, 0 }
 0x3c0   : > { %6214 = vrot.lane.b32.xlu0 %v13456_v0, %s16805_s0  ;;  %v17115_v22 = vpack.c.bf16 %v12830_v31, %v17114_v13  ;;  %v17118_v13 = vld [vmem:[#allocation45_spill] sm:$0xff]  ;;  %17120 = vst [vmem:[#allocation44_spill] sm:$0xff] %v13556_v18  ;;  %s17160_s0 = smov 80  }
 0x3c1   : > { %v5514_v27 = vld [vmem:[#allocation3 + $0x10a] sm:$0xff] }
 0x3c2   : > { %v13560_v58 = vsel %vm1653_vm7, %v5514_v27, 0.0  ;;  %v6009_v55 = vld [vmem:[#allocation3 + $0x10e] sm:$0xff]  ;;  %v13571_v36 = vsel %vm16809_vm2, %v5514_v27, 0.0 }
 0x3c3   : > { %5908 = vrot.lane.b32.xlu1 %v17115_v22, %s16790_s27  ;;  %v17119_v22 = vpack.c.bf16 %v12832_v11, %v17118_v13  ;;  %17121 = vst [vmem:[#allocation36_spill] sm:$0xff] %v13560_v58  ;;  %17123 = vst [vmem:[#allocation45_spill] sm:$0xff] %v13571_v36  ;;  %v13573_v13 = vld [vmem:[#allocation3 + $0x116] sm:$0xff]  ;;  %v13583_v44 = vsel %vm16865_vm9, %v6009_v55, 0.0  ;;  %v6810_v27 = vsel %vm16804_vm12, %v6009_v55, 0.0  ;;  %v17129_v55 = vld [vmem:[#allocation46_spill] sm:$0xff] }
 0x3c4   : > { %4747 = vrot.lane.b32.xlu0 %v4709_v50, %s16920_s28  ;;  %v7015_v50 = vsel %vm17122_vm8, %v13503_v48, 0.0  ;;  %17124 = vst [vmem:[#allocation79_spill] sm:$0xff] %v13573_v13  ;;  %17125 = vst [vmem:[#allocation80_spill] sm:$0xff] %v13583_v44  ;;  %vm17127_vm8 = vcmp.ge.s32.totalorder %v17126_v26, 0  ;;  %v17130_v36 = vpack.c.bf16 %v12830_v31, %v17129_v55  ;;  %v13604_v58 = vld [vmem:[#allocation3 + $0x86] sm:$0xff]  ;;  %s17131_s27 = smov 8  }
 0x3c5   : > { %v7046_v45 = vpack.c.bf16 %v7015_v50, %v13530_v32  ;;  %v5065_v24 = vsel %vm17127_vm8, %v13527_v7, 0.0  ;;  %v13596_v50 = vld [vmem:[#allocation3 + $0x7e] sm:$0xff]  ;;  %v17134_v44 = vld [vmem:[#allocation6_spill] sm:$0xff]  ;;  %vm17137_vm8 = vcmp.lt.s32.totalorder %v17136_v2, 16  ;;  %vm17142_vm12 = vcmp.lt.s32.totalorder %v17053_v34, 16 }
 0x3c6   : > { %v5688_v5 = vsel %vm17137_vm8, %v13527_v7, 0.0 }
 0x3c7   : > { %5303 = vrot.lane.b32.xlu1 %v17119_v22, %s16784_s18  ;;  %s17128_s18 = smov 104   ;;  %v4333_v22 = vsel %vm16850_vm10, %v13596_v50, 0.0 }
 0x3c8   : > { %4971 = vrot.lane.b32.xlu0 %v4933_v9, %s16800_s23  ;;  %v13587_v9 = vld [vmem:[#allocation3 + $0x84] sm:$0xff]  ;;  %v4358_v31 = vpack.c.bf16 %v13604_v58, %v4333_v22  ;;  %s17181_s23 = smov 16  }
 0x3c9   : > { %v5092_v18 = vpack.c.bf16 %v13587_v9, %v5065_v24  ;;  %v4462_v24 = vld [vmem:[#allocation3 + $0x88] sm:$0xff] }
 0x3ca   : > { %v17138_v22 = vld [vmem:[#allocation10_spill] sm:$0xff] }
 0x3cb   : > { %5431 = vrot.lane.b32.xlu1 %v13456_v0, %s17049_s19  ;;  %v6832_v0 = vpack.c.bf16 %v13573_v13, %v6810_v27  ;;  %v17132_v27 = vld [vmem:[#allocation47_spill] sm:$0xff]  ;;  %v17135_v13 = vmax.f32 %v17134_v44, 0.0 }
 0x3cc   : > { %7078 = vrot.lane.b32.xlu0 %v7046_v45, %s17043_s17  ;;  %v5528_v45 = vsel %vm1643_vm6, %v13503_v48, 0.0  ;;  %v10864_v44 = vld [vmem:[#allocation3 + $0x74] sm:$0xff] }
 0x3cd   : > { %6848 = vst.msk [vmem:[#allocation4 + $0x1a8] sm:$0xff] %vm16860_vm1, %v6832_v0  ;;  %v17133_v0 = vpack.c.bf16 %v12832_v11, %v17132_v27  ;;  %v5555_v55 = vpack.c.bf16 %v5528_v45, %v13530_v32  ;;  %v13626_v11 = vpack.c.bf16 %v4462_v24, %v4461_v16  ;;  %v17139_v27 = vmax.f32 %v17138_v22, 0.0  ;;  %v17140_v45 = vld [vmem:[#allocation8_spill] sm:$0xff]  ;;  %v10839_v16 = vld [vmem:[%s16537_s7 + $0xc0] sm:$0xff]   ;;  %v13643_v24 = vld [vmem:[#allocation3 + $0x8a] sm:$0xff] }
 0x3ce   : > { %vm17141_vm8 = vcmp.lt.s32.totalorder %v17140_v45, 16  ;;  %10471 = vmatprep.subr.bf16.mxu1 %v10839_v16  ;;  %v13656_v22 = vadd.s32 2, %v17062_v59  ;;  %v13670_v59 = vld [vmem:[#allocation3 + $0x8c] sm:$0xff] }
 0x3cf   : > { %6693 = vrot.lane.b32.xlu1 %v17130_v36, %s17128_s18 }
 0x3d0   : > { %5129 = vrot.lane.b32.xlu0 %v5092_v18, %s16922_s26 }
 0x3d3   : > { %6085 = vrot.lane.b32.xlu1 %v17133_v0, %s17131_s27 }
 0x3d4   : > { %v3956_v36 = vpop.permute.xlu0 %3955  ;;  %4397 = vrot.lane.b32.xlu0 %v4358_v31, %s16826_s30  ;;  %v7175_v31 = vsel %vm17141_vm8, %v13527_v7, 0.0  ;;  %vm17149_vm8 = vcmp.lt.s32.totalorder %v17148_v23, 16 }
 0x3d5   : > { %v4025_v18 = vadd.f32 %v3956_v36, %v17135_v13  ;;  %v5715_v13 = vpack.c.bf16 %v5688_v5, %v10864_v44  ;;  %v13646_v5 = vadd.s32 4, %v17116_v35  ;;  %v6312_v36 = vsel %vm17142_vm12, %v13503_v48, 0.0  ;;  %v10841_v48 = vld [vmem:[%s16537_s7 + $0xc8] sm:$0xff]  }
 0x3d6   : > { %v3958_v42 = vpop.permute.xlu1 %3957  ;;  %v4686_v35 = vsel %vm16809_vm2, %v13643_v24, 0.0  ;;  %v6341_v16 = vpack.c.bf16 %v6312_v36, %v13530_v32  ;;  %v6473_v54 = vsel %vm17149_vm8, %v13527_v7, 0.0  ;;  %v10842_v32 = vld [vmem:[%s16537_s7 + $0x88] sm:$0xff]   ;;  %v13684_v36 = vadd.s32 4294967294, %v17059_v53  ;;  %v10843_v53 = vld [vmem:[%s16537_s7 + $0xd0] sm:$0xff]  }
 0x3d7   : > { %5591 = vrot.lane.b32.xlu1 %v5555_v55, %s16921_s25  ;;  %4057 = vst.msk [vmem:[#allocation3 + $0x120] sm:$0xff] %vm16860_vm1, %v4025_v18  ;;  %v4026_v0 = vadd.f32 %v3958_v42, %v17139_v27  ;;  %v7206_v42 = vpack.c.bf16 %v7175_v31, %v10864_v44  ;;  %v10840_v55 = vld [vmem:[%s16537_s7 + $0x80] sm:$0xff]   ;;  %v17143_v27 = vld [vmem:[#allocation22_spill] sm:$0xff]  ;;  %vm16819_vm12 = vcmp.lt.s32.totalorder %v13646_v5, 16  ;;  %vm1651_vm2 = vcmp.lt.s32.totalorder %v13656_v22, 16 }
 0x3d8   : > { %4525 = vrot.lane.b32.xlu0 %v13626_v11, %s17043_s17  ;;  %10472 = vmatpush3.bf16.msra.mxu1 %v10840_v55  ;;  %17150 = vst [vmem:[#allocation19_spill] sm:$0xff] %v13684_v36  ;;  %v6502_v38 = vpack.c.bf16 %v6473_v54, %v10864_v44  ;;  %vm17157_vm8 = vcmp.ge.s32.totalorder %v17156_v17, 0 }
 0x3d9   : > { %4058 = vst.msk [vmem:[#allocation3 + $0x128] sm:$0xff] %vm16860_vm1, %v4026_v0  ;;  %v17144_v0 = vmax.f32 %v17143_v27, 0.0  ;;  %10473 = vmatprep.subr.bf16.mxu1 %v10841_v48  ;;  %v4910_v48 = vsel %vm16819_vm12, %v13670_v59, 0.0  ;;  %v5846_v12 = vsel %vm17157_vm8, %v13527_v7, 0.0  ;;  %vm17158_vm12 = vcmp.ge.s32.totalorder %v13103_v37, 0 }
 0x3da   : > { %vm17172_vm8 = vcmask 785984  }
 0x3db   : > { %5751 = vrot.lane.b32.xlu1 %v5715_v13, %s17037_s24 }
 0x3dc   : > { %6920 = vrot.lane.b32.xlu0 %v13626_v11, %s16826_s30  ;;  %10474 = vmatpush3.bf16.msra.mxu1 %v10842_v32  ;;  %v13729_v32 = vadd.s32 2, %v17161_v63  ;;  %s17167_s30 = smov 96   ;;  %v5241_v63 = vsel %vm16841_vm4, %v13596_v50, 0.0  ;;  %vm5952_vm4 = vcmask 1048448  }
 0x3dd   : > { %10475 = vmatprep.subr.bf16.mxu1 %v10843_v53 }
 0x3de   : > { %v3960_v18 = vpop.permute.xlu0 %3959  ;;  %17162 = vst [vmem:[#allocation22_spill] sm:$0xff] %v13729_v32 }
 0x3df   : > { %7238 = vrot.lane.b32.xlu1 %v7206_v42, %s16920_s28  ;;  %v4027_v13 = vadd.f32 %v3960_v18, %v17144_v0  ;;  %v5516_v42 = vld [vmem:[#allocation3 + $0x11a] sm:$0xff]  ;;  %v13675_v0 = vld [vmem:[#allocation3 + $0x82] sm:$0xff] }
 0x3e0   : > { %v3962_v31 = vpop.permute.xlu1 %3961  ;;  %6216 = vrot.lane.b32.xlu0 %v13626_v11, %s17145_s1  ;;  %v17146_v18 = vld [vmem:[#allocation25_spill] sm:$0xff] }
 0x3e1   : > { %4059 = vst.msk [vmem:[#allocation3 + $0x130] sm:$0xff] %vm16860_vm1, %v4027_v13  ;;  %v17147_v27 = vmax.f32 %v17146_v18, 0.0  ;;  %v4710_v13 = vpack.c.bf16 %v4686_v35, %v13675_v0  ;;  %v5676_v18 = vld [vmem:[#allocation3 + $0x11c] sm:$0xff]  ;;  %v13702_v35 = vsel %vm1651_vm2, %v5516_v42, 0.0  ;;  %v13713_v47 = vld [vmem:[#allocation3 + $0x126] sm:$0xff] }
 0x3e2   : > { %17153 = vst [vmem:[#allocation6_spill] sm:$0xff] %v13702_v35  ;;  %17155 = vst [vmem:[#allocation10_spill] sm:$0xff] %v13713_v47  ;;  %v13724_v54 = vsel %vm17158_vm12, %v5676_v18, 0.0  ;;  %vm17166_vm12 = vcmp.lt.s32.totalorder %v17028_v57, 16 }
 0x3e3   : > { %v4028_v55 = vadd.f32 %v3962_v31, %v17147_v27  ;;  %6375 = vrot.lane.b32.xlu1 %v6341_v16, %s17108_s20  ;;  %v13689_v31 = vld [vmem:[#allocation3 + $0x112] sm:$0xff]  ;;  %v13698_v27 = vld [vmem:[#allocation3 + $0x124] sm:$0xff]  ;;  %v13706_v16 = vsel %vm16818_vm15, %v5516_v42, 0.0  ;;  %vm16862_vm15 = vcmp.ge.s32.totalorder %v13684_v36, 0  ;;  %17159 = vst [vmem:[#allocation8_spill] sm:$0xff] %v13724_v54  ;;  %v7017_v18 = vsel %vm17166_vm12, %v13643_v24, 0.0 }
 0x3e4   : > { %17151 = vst [vmem:[#allocation46_spill] sm:$0xff] %v13689_v31  ;;  %17152 = vst [vmem:[#allocation47_spill] sm:$0xff] %v13698_v27  ;;  %4749 = vrot.lane.b32.xlu0 %v4710_v13, %s16920_s28  ;;  %v10844_v42 = vld [vmem:[%s16537_s7 + $0x90] sm:$0xff]   ;;  %v4934_v13 = vpack.c.bf16 %v4910_v48, %v13587_v9  ;;  %v17164_v31 = vld [vmem:[#allocation48_spill] sm:$0xff]  ;;  %vm17173_vm12 = vcmp.ge.s32.totalorder %v12814_v30, 0 }
 0x3e5   : > { %4060 = vst.msk [vmem:[#allocation3 + $0x138] sm:$0xff] %vm16860_vm1, %v4028_v55  ;;  %17154 = vst [vmem:[#allocation34_spill] sm:$0xff] %v13706_v16  ;;  %v6011_v55 = vld [vmem:[#allocation3 + $0x11e] sm:$0xff]  ;;  %v17165_v35 = vmax.f32 %v17164_v31, 0.0  ;;  %10476 = vmatpush3.bf16.msra.mxu1 %v10844_v42  ;;  %v5875_v31 = vpack.c.bf16 %v13587_v9, %v5846_v12 }
 0x3e6   : > { %v3964_v44 = vpop.permute.xlu0 %3963  ;;  %v13735_v16 = vsel %vm16862_vm15, %v6011_v55, 0.0  ;;  %v6812_v53 = vsel %vm16830_vm5, %v6011_v55, 0.0  ;;  %v17168_v42 = vld [vmem:[#allocation49_spill] sm:$0xff]  ;;  %v10846_v55 = vld [vmem:[%s16537_s7 + $0x98] sm:$0xff]   ;;  %vm16836_vm5 = vcmp.lt.s32.totalorder %v13729_v32, 16 }
 0x3e7   : > { %6536 = vrot.lane.b32.xlu1 %v6502_v38, %s17160_s0  ;;  %17163 = vst [vmem:[#allocation25_spill] sm:$0xff] %v13735_v16  ;;  %v4029_v37 = vadd.f32 %v3964_v44, %v17165_v35  ;;  %v10845_v38 = vld [vmem:[%s16537_s7 + $0xd8] sm:$0xff]   ;;  %v6833_v35 = vpack.c.bf16 %v13713_v47, %v6812_v53  ;;  %v17169_v44 = vmax.f32 %v17168_v42, 0.0  ;;  %v5067_v53 = vsel %vm17173_vm12, %v13670_v59, 0.0 }
 0x3e8   : > { %4973 = vrot.lane.b32.xlu0 %v4934_v13, %s17167_s30  ;;  %v3966_v54 = vpop.permute.xlu1 %3965  ;;  %10477 = vmatprep.subr.bf16.mxu1 %v10845_v38  ;;  %v13762_v13 = vadd.s32 4294967294, %v17077_v10  ;;  %v5518_v12 = vld [vmem:[#allocation3 + $0x12a] sm:$0xff]  ;;  %v10847_v38 = vld [vmem:[%s16537_s7 + $0xe0] sm:$0xff]  }
 0x3e9   : > { %4061 = vst.msk [vmem:[#allocation3 + $0x140] sm:$0xff] %vm16860_vm1, %v4029_v37  ;;  %v4030_v27 = vadd.f32 %v3966_v54, %v17169_v44  ;;  %v7047_v37 = vpack.c.bf16 %v7017_v18, %v13675_v0  ;;  %6849 = vst.msk [vmem:[#allocation4 + $0x1d0] sm:$0xff] %vm16860_vm1, %v6833_v35  ;;  %v13769_v54 = vld [vmem:[#allocation3 + $0x94] sm:$0xff]  ;;  %10478 = vmatpush3.bf16.msra.mxu1 %v10846_v55  ;;  %v5268_v18 = vpack.c.bf16 %v13604_v58, %v5241_v63  ;;  %v17179_v55 = vld [vmem:[#allocation41_spill] sm:$0xff] }
 0x3ea   : > { %17170 = vst [vmem:[#allocation15_spill] sm:$0xff] %v13762_v13  ;;  %v4742_v48 = vpop.permute.xlu0 %4741  ;;  %v13774_v10 = vld [vmem:[#allocation3 + $0x8e] sm:$0xff]  ;;  %v13790_v35 = vsel %vm1653_vm7, %v5518_v12, 0.0  ;;  %10479 = vmatprep.subr.bf16.mxu1 %v10847_v38  ;;  %vm16859_vm12 = vcmp.ge.s32.totalorder %v13762_v13, 0  ;;  %v5093_v47 = vpack.c.bf16 %v13769_v54, %v5067_v53  ;;  %v10848_v38 = vld [vmem:[%s16537_s7 + $0xa0] sm:$0xff]   ;;  %v13816_v63 = vld [vmem:[#allocation3 + $0x96] sm:$0xff] }
 0x3eb   : > { %5910 = vrot.lane.b32.xlu1 %v5875_v31, %s17171_s2  ;;  %4062 = vst.msk [vmem:[#allocation3 + $0x148] sm:$0xff] %vm16860_vm1, %v4030_v27  ;;  %v13786_v31 = vsel %vm16836_vm5, %v5518_v12, 0.0  ;;  %17176 = vst [vmem:[#allocation49_spill] sm:$0xff] %v13790_v35  ;;  %v13792_v42 = vld [vmem:[#allocation3 + $0x12e] sm:$0xff]  ;;  %v4335_v16 = vsel %vm16840_vm13, %v13774_v10, 0.0  ;;  %vm17184_vm5 = vcmask 917184  }
 0x3ec   : > { %4786 = vst.msk [vmem:[#allocation4 + $0x78] sm:$0xff] %vm17172_vm8, %v4742_v48  ;;  %7080 = vrot.lane.b32.xlu0 %v7047_v37, %s17043_s17  ;;  %v5586_v27 = vpop.permute.xlu1 %5585  ;;  %v13782_v48 = vld [vmem:[#allocation3 + $0x122] sm:$0xff]  ;;  %17175 = vst [vmem:[#allocation48_spill] sm:$0xff] %v13786_v31  ;;  %v13794_v44 = vld [vmem:[#allocation3 + $0x136] sm:$0xff]  ;;  %vm17178_vm8 = vcmask 720384   ;;  %v13798_v37 = vadd.s32 4, %v17179_v55 }
 0x3ed   : > { %17174 = vst [vmem:[#allocation17_spill] sm:$0xff] %v13782_v48  ;;  %17177 = vst [vmem:[#allocation81_spill] sm:$0xff] %v13794_v44  ;;  %v10849_v53 = vld [vmem:[%s16537_s7 + $0xe8] sm:$0xff]   ;;  %10480 = vmatpush3.bf16.msra.mxu1 %v10848_v38  ;;  %v10851_v38 = vld [vmem:[%s16537_s7 + $0xf0] sm:$0xff]  }
 0x3ee   : > { %5632 = vst.msk [vmem:[#allocation4 + $0x30] sm:$0xff] %vm17178_vm8, %v5586_v27  ;;  %17180 = vst [vmem:[#allocation82_spill] sm:$0xff] %v13798_v37  ;;  %v4966_v12 = vpop.permute.xlu0 %4965  ;;  %v13813_v27 = vsel %vm16859_vm12, %v13792_v42, 0.0  ;;  %vm17183_vm8 = vcmask 982784   ;;  %10481 = vmatprep.subr.bf16.mxu1 %v10849_v53  ;;  %vm16849_vm13 = vcmp.lt.s32.totalorder %v13798_v37, 16  ;;  %v17190_v53 = vld [vmem:[#allocation43_spill] sm:$0xff] }
 0x3ef   : > { %5305 = vrot.lane.b32.xlu1 %v5268_v18, %s17181_s23  ;;  %17182 = vst [vmem:[#allocation83_spill] sm:$0xff] %v13813_v27  ;;  %5010 = vst.msk [vmem:[#allocation4 + $0x78] sm:$0xff] %vm17183_vm8, %v4966_v12  ;;  %v17185_v12 = vld [vmem:[#allocation9_spill] sm:$0xff]  ;;  %v13848_v18 = vadd.s32 2, %v17190_v53  ;;  %v13855_v27 = vadd.s32 4294967294, %v17096_v1  ;;  %v4463_v53 = vld [vmem:[#allocation3 + $0x90] sm:$0xff] }
 0x3f0   : > { %5131 = vrot.lane.b32.xlu0 %v5093_v47, %s16922_s26  ;;  %v5746_v35 = vpop.permute.xlu1 %5745  ;;  %v5838_v48 = vld [vmem:[#allocation3 + $0x13c] sm:$0xff]  ;;  %vm17186_vm8 = vcmp.ge.s32.totalorder %v17185_v12, 0  ;;  %v4359_v47 = vpack.c.bf16 %v13816_v63, %v4335_v16  ;;  %v6023_v37 = vsel %vm1224_vm3, %v13596_v50, 0.0  ;;  %vm17198_vm3 = vcmp.ge.s32.totalorder %v17197_v52, 0 }
 0x3f1   : > { %5793 = vst.msk [vmem:[#allocation4 + $0x30] sm:$0xff] %vm17184_vm5, %v5746_v35  ;;  %v6631_v31 = vsel %vm17186_vm8, %v13527_v7, 0.0  ;;  %v13840_v35 = vsel %vm16849_vm13, %v5838_v48, 0.0  ;;  %vm17188_vm5 = vcmask 1048512   ;;  %vm17189_vm8 = vcmask 130048   ;;  %v4464_v7 = vld [vmem:[#allocation3 + $0x98] sm:$0xff]  ;;  %10482 = vmatpush3.bf16.msra.mxu1 %v10850_v33 }
 0x3f2   : > { %v5124_v55 = vpop.permute.xlu0 %5123  ;;  %17187 = vst [vmem:[#allocation9_spill] sm:$0xff] %v13840_v35  ;;  %17191 = vst [vmem:[#allocation84_spill] sm:$0xff] %v13848_v18  ;;  %v6662_v48 = vpack.c.bf16 %v13587_v9, %v6631_v31  ;;  %10483 = vmatprep.subr.bf16.mxu1 %v10851_v38  ;;  %v10852_v33 = vld [vmem:[%s16537_s7 + $0xb0] sm:$0xff]   ;;  %v7334_v50 = vsel %vm17198_vm3, %v13670_v59, 0.0  ;;  %v10853_v38 = vld [vmem:[%s16537_s7 + $0xf8] sm:$0xff]   ;;  %vm17203_vm3 = vcmask 326784  }
 0x3f3   : > { %5433 = vrot.lane.b32.xlu1 %v13626_v11, %s17049_s19  ;;  %5171 = vst.msk [vmem:[#allocation4 + $0x50] sm:$0xff] %vm17188_vm5, %v5124_v55  ;;  %v13850_v11 = vld [vmem:[#allocation3 + $0x134] sm:$0xff]  ;;  %vm17194_vm5 = vcmask 64512   ;;  %v13881_v35 = vld [vmem:[#allocation3 + $0x146] sm:$0xff]  ;;  %vm17204_vm13 = vcmp.lt.s32.totalorder %v13323_v43, 16 }
 0x3f4   : > { %5172 = vst.msk [vmem:[#allocation4 + $0x58] sm:$0xff] %vm17189_vm8, %v5124_v55  ;;  %17192 = vst [vmem:[#allocation85_spill] sm:$0xff] %v13850_v11  ;;  %4399 = vrot.lane.b32.xlu0 %v4359_v47, %s17193_s3  ;;  %v5905_v16 = vpop.permute.xlu1 %5904  ;;  %v17195_v31 = vld [vmem:[#allocation11_spill] sm:$0xff]  ;;  %v7787_v47 = vld [vmem:[#allocation3 + $0x13a] sm:$0xff]  ;;  %v13871_v55 = vpack.c.bf16 %v4464_v7, %v4463_v53  ;;  %vm17196_vm8 = vcmask 392384   ;;  %v6052_v53 = vpack.c.bf16 %v13604_v58, %v6023_v37  ;;  %v5530_v58 = vsel %vm17204_vm13, %v13643_v24, 0.0 }
 0x3f5   : > { %5953 = vst.msk [vmem:[#allocation4 + $0x8] sm:$0xff] %vm5952_vm4, %v5905_v16  ;;  %v13868_v1 = vadd.s32 2, %v17195_v31  ;;  %v7009_v11 = vld [vmem:[#allocation3 + $0x14a] sm:$0xff]  ;;  %17199 = vst [vmem:[#allocation5_spill] sm:$0xff] %v13881_v35  ;;  %10484 = vmatpush3.bf16.msra.mxu1 %v10852_v33  ;;  %v6814_v31 = vsel %vm16865_vm9, %v13792_v42, 0.0  ;;  %v10854_v37 = vld [vmem:[%s16537_s7 + $0xb8] sm:$0xff]  }
 0x3f6   : > { %5954 = vst.msk [vmem:[#allocation4 + $0x10] sm:$0xff] %vm17194_vm5, %v5905_v16  ;;  %v4392_v32 = vpop.permute.xlu0 %4391  ;;  %v6015_v16 = vld [vmem:[#allocation3 + $0x13e] sm:$0xff]  ;;  %vm16863_vm5 = vcmp.lt.s32.totalorder %v13848_v18, 16  ;;  %10485 = vmatprep.subr.bf16.mxu1 %v10853_v38  ;;  %v6786_v42 = vld [vmem:[#allocation3 + $0x14e] sm:$0xff]  ;;  %v7366_v18 = vpack.c.bf16 %v13769_v54, %v7334_v50  ;;  %vm17207_vm13 = vcmask 589184   ;;  %v6834_v38 = vpack.c.bf16 %v13794_v44, %v6814_v31 }
 0x3f7   : > { %6695 = vrot.lane.b32.xlu1 %v6662_v48, %s17128_s18  ;;  %4435 = vst.msk [vmem:[#allocation4 + $0xa0] sm:$0xff] %vm17196_vm8, %v4392_v32  ;;  %vm16858_vm8 = vcmp.ge.s32.totalorder %v13855_v27, 0  ;;  %v13887_v32 = vld [vmem:[#allocation3 + $0x132] sm:$0xff]  ;;  %v13889_v48 = vld [vmem:[#allocation3 + $0x142] sm:$0xff]  ;;  %v13893_v52 = vsel %vm16863_vm5, %v7787_v47, 0.0  ;;  %vm16861_vm10 = vcmp.lt.s32.totalorder %v13868_v1, 16 }
 0x3f8   : > { %4527 = vrot.lane.b32.xlu0 %v13871_v55, %s17043_s17  ;;  %v5300_v7 = vpop.permute.xlu1 %5299  ;;  %17200 = vst [vmem:[#allocation86_spill] sm:$0xff] %v13887_v32  ;;  %17201 = vst [vmem:[#allocation87_spill] sm:$0xff] %v13889_v48  ;;  %v13910_v47 = vsel %vm16858_vm8, %v6015_v16, 0.0  ;;  %v13918_v51 = vsel %vm16861_vm10, %v7009_v11, 0.0  ;;  %v6816_v33 = vsel %vm16862_vm15, %v6015_v16, 0.0  ;;  %v6787_v32 = vld [vmem:[#allocation3 + $0x156] sm:$0xff]  ;;  %v5556_v16 = vpack.c.bf16 %v5530_v58, %v13675_v0 }
 0x3f9   : > { %17202 = vst [vmem:[#allocation88_spill] sm:$0xff] %v13893_v52  ;;  %5345 = vst.msk [vmem:[#allocation4 + $0x58] sm:$0xff] %vm17203_vm3, %v5300_v7  ;;  %vm17208_vm3 = vcmp.ge.s32.totalorder %v16998_v8, 0  ;;  %10486 = vmatpush3.bf16.msra.mxu1 %v10854_v37  ;;  %v8086_v8 = vld [vmem:[#allocation4] sm:$0xff]  ;;  %v17210_v50 = vld [vmem:[#allocation23_spill] sm:$0xff]  ;;  %vm6129_vm8 = vcmask 261184  }
 0x3fa   : > { %17205 = vst [vmem:[#allocation89_spill] sm:$0xff] %v13910_v47  ;;  %v4520_v7 = vpop.permute.xlu0 %4519  ;;  %17206 = vst [vmem:[#allocation90_spill] sm:$0xff] %v13918_v51  ;;  %v7494_v52 = vsel %vm17208_vm3, %v13774_v10, 0.0  ;;  %vm17211_vm3 = vcmp.lt.s32.totalorder %v17210_v50, 16  ;;  %vm6419_vm10 = vcmask 654784   ;;  %vm17220_vm15 = vcmask 1048512  }
 0x3fb   : > { %6087 = vrot.lane.b32.xlu1 %v6052_v53, %s17131_s27  ;;  %4563 = vst.msk [vmem:[#allocation4 + $0xa0] sm:$0xff] %vm17207_vm13, %v4520_v7  ;;  %v6835_v53 = vpack.c.bf16 %v13881_v35, %v6816_v33  ;;  %v6818_v7 = vsel %vm16859_vm12, %v6786_v42, 0.0  ;;  %vm17209_vm13 = vcmask 523584   ;;  %v5690_v33 = vsel %vm17211_vm3, %v13670_v59, 0.0  ;;  %v17212_v42 = vld [vmem:[#allocation13_spill] sm:$0xff] }
 0x3fc   : > { %7398 = vrot.lane.b32.xlu0 %v7366_v18, %s17167_s30  ;;  %v5428_v11 = vpop.permute.xlu1 %5427  ;;  %v8087_v47 = vld [vmem:[#allocation4 + $0x8] sm:$0xff]  ;;  %6850 = vst.msk [vmem:[#allocation4 + $0x1f8] sm:$0xff] %vm16860_vm1, %v6834_v38  ;;  %v6836_v18 = vpack.c.bf16 %v6787_v32, %v6818_v7  ;;  %v7526_v58 = vpack.c.bf16 %v13816_v63, %v7494_v52  ;;  %vm6258_vm12 = vcmask 457984   ;;  %vm17214_vm3 = vcmask 785984  }
 0x3fd   : > { %5473 = vst.msk [vmem:[#allocation4 + $0x58] sm:$0xff] %vm17209_vm13, %v5428_v11  ;;  %8549 = vmatprep.mubr.bf16.mxu0 %v8087_v47  ;;  %v5716_v47 = vpack.c.bf16 %v5690_v33, %v13587_v9  ;;  %vm17213_vm13 = vcmp.lt.s32.totalorder %v17212_v42, 16  ;;  %v6314_v11 = vsel %vm1641_vm0, %v13643_v24, 0.0  ;;  %v13964_v33 = vld [vmem:[#allocation3 + $0x9a] sm:$0xff]  ;;  %vm17229_vm5 = vcmask 64512  }
 0x3fe   : > { %6851 = vst.msk [vmem:[#allocation4 + $0x220] sm:$0xff] %vm16860_vm1, %v6835_v53  ;;  %v6211_v31 = vpop.permute.xlu0 %6210  ;;  %8550 = vmatmul.mubr.bf16.vlgmr.msra.gmra.mrb[32].mxu0 %v8086_v8  ;;  %6852 = vst.msk [vmem:[#allocation4 + $0x248] sm:$0xff] %vm16860_vm1, %v6836_v18  ;;  %v7177_v32 = vsel %vm17213_vm13, %v13670_v59, 0.0  ;;  %vm17215_vm1 = vcmask 720384   ;;  %vm17216_vm13 = vcmask 982784   ;;  %v6342_v8 = vpack.c.bf16 %v6314_v11, %v13675_v0  ;;  %v17218_v18 = vld [vmem:[#allocation21_spill] sm:$0xff] }
 0x3ff   : > { %5593 = vrot.lane.b32.xlu1 %v5556_v16, %s16921_s25  ;;  %v7207_v53 = vpack.c.bf16 %v7177_v32, %v13587_v9  ;;  %v4688_v0 = vsel %vm1651_vm2, %v13964_v33, 0.0  ;;  %v13982_v32 = vld [vmem:[#allocation3 + $0x92] sm:$0xff]  ;;  %vm17288_vm9 = vcmp.lt.s32.totalorder %v13245_v14, 16 }
 0x400   : > { %7558 = vrot.lane.b32.xlu0 %v7526_v58, %s16922_s26  ;;  %v6082_v37 = vpop.permute.xlu1 %6081  ;;  %v4711_v11 = vpack.c.bf16 %v4688_v0, %v13982_v32 }
 0x401   : > { %6130 = vst.msk [vmem:[#allocation4 + $0x10] sm:$0xff] %vm6129_vm8, %v6082_v37 }
 0x402   : > { %v4744_v38 = vpop.permute.xlu0 %4743  ;;  %6259 = vst.msk [vmem:[#allocation4 + $0x10] sm:$0xff] %vm6258_vm12, %v6211_v31 }
 0x403   : > { %5753 = vrot.lane.b32.xlu1 %v5716_v47, %s17037_s24  ;;  %4787 = vst.msk [vmem:[#allocation4 + $0xa0] sm:$0xff] %vm17214_vm3, %v4744_v38  ;;  %vm17217_vm3 = vcmask 917184   ;;  %v13979_v47 = vld [vmem:[#allocation3 + $0x9c] sm:$0xff]  ;;  %v17222_v38 = vld [vmem:[#allocation31_spill] sm:$0xff] }
 0x404   : > { %6922 = vrot.lane.b32.xlu0 %v13871_v55, %s17193_s3  ;;  %v5588_v52 = vpop.permute.xlu1 %5587 }
 0x405   : > { %5633 = vst.msk [vmem:[#allocation4 + $0x58] sm:$0xff] %vm17215_vm1, %v5588_v52  ;;  %vm17219_vm1 = vcmp.lt.s32.totalorder %v17218_v18, 16 }
 0x406   : > { %v4968_v16 = vpop.permute.xlu0 %4967  ;;  %v6475_v31 = vsel %vm17219_vm1, %v13670_v59, 0.0  ;;  %vm17224_vm1 = vcmask 392384  }
 0x407   : > { %7240 = vrot.lane.b32.xlu1 %v7207_v53, %s16920_s28  ;;  %5011 = vst.msk [vmem:[#allocation4 + $0xa0] sm:$0xff] %vm17216_vm13, %v4968_v16  ;;  %vm17221_vm13 = vcmask 130048   ;;  %v6503_v37 = vpack.c.bf16 %v6475_v31, %v13587_v9 }
 0x408   : > { %6218 = vrot.lane.b32.xlu0 %v13871_v55, %s17145_s1  ;;  %v5748_v7 = vpop.permute.xlu1 %5747 }
 0x409   : > { %5794 = vst.msk [vmem:[#allocation4 + $0x58] sm:$0xff] %vm17217_vm3, %v5748_v7  ;;  %vm16878_vm3 = vcmask 851584  }
 0x40a   : > { %v5126_v24 = vpop.permute.xlu0 %5125 }
 0x40b   : > { %6377 = vrot.lane.b32.xlu1 %v6342_v8, %s17108_s20  ;;  %5173 = vst.msk [vmem:[#allocation4 + $0x78] sm:$0xff] %vm17220_vm15, %v5126_v24  ;;  %vm17223_vm15 = vcmp.ge.s32.totalorder %v17222_v38, 0 }
 0x40c   : > { %5174 = vst.msk [vmem:[#allocation4 + $0x80] sm:$0xff] %vm17221_vm13, %v5126_v24  ;;  %7702 = vrot.lane.b32.xlu0 %v13871_v55, %s17181_s23  ;;  %v6372_v58 = vpop.permute.xlu1 %6371  ;;  %v5848_v52 = vsel %vm17223_vm15, %v13670_v59, 0.0  ;;  %vm17225_vm13 = vcmp.lt.s32.totalorder %v13266_v41, 16  ;;  %vm17226_vm15 = vcmp.ge.s32.totalorder %v12799_v62, 0 }
 0x40d   : > { %6420 = vst.msk [vmem:[#allocation4 + $0x10] sm:$0xff] %vm6419_vm10, %v6372_v58  ;;  %v4912_v9 = vsel %vm17225_vm13, %v13979_v47, 0.0  ;;  %v5876_v7 = vpack.c.bf16 %v13769_v54, %v5848_v52  ;;  %v5243_v8 = vsel %vm17226_vm15, %v13774_v10, 0.0  ;;  %vm17228_vm13 = vcmp.lt.s32.totalorder %v17053_v34, 16 }
 0x40e   : > { %v4394_v53 = vpop.permute.xlu0 %4393  ;;  %v4935_v24 = vpack.c.bf16 %v4912_v9, %v13769_v54  ;;  %v7019_v0 = vsel %vm17228_vm13, %v13964_v33, 0.0  ;;  %vm17230_vm15 = vcmp.lt.s32.totalorder %v17057_v39, 16 }
 0x40f   : > { %6538 = vrot.lane.b32.xlu1 %v6503_v37, %s17160_s0  ;;  %4436 = vst.msk [vmem:[#allocation4 + $0xc8] sm:$0xff] %vm17224_vm1, %v4394_v53  ;;  %vm17227_vm1 = vcmask 589184   ;;  %v5269_v37 = vpack.c.bf16 %v13816_v63, %v5243_v8  ;;  %v7048_v53 = vpack.c.bf16 %v7019_v0, %v13982_v32 }
 0x410   : > { %4751 = vrot.lane.b32.xlu0 %v4711_v11, %s16920_s28  ;;  %v6533_v16 = vpop.permute.xlu1 %6532  ;;  %v7799_v11 = vsel %vm17230_vm15, %v13964_v33, 0.0  ;;  %vm17235_vm15 = vcmp.lt.s32.totalorder %v17140_v45, 16 }
 0x411   : > { %6581 = vst.msk [vmem:[#allocation4 + $0x10] sm:$0xff] %vm16878_vm3, %v6533_v16  ;;  %v17232_v16 = vld [vmem:[#allocation39_spill] sm:$0xff]  ;;  %v7959_v39 = vsel %vm17235_vm15, %v13979_v47, 0.0  ;;  %vm17239_vm15 = vcmp.ge.s32.totalorder %v12913_v25, 0 }
 0x412   : > { %v4522_v31 = vpop.permute.xlu0 %4521  ;;  %vm17233_vm13 = vcmp.ge.s32.totalorder %v17232_v16, 0  ;;  %v7990_v45 = vpack.c.bf16 %v7959_v39, %v13769_v54 }
 0x413   : > { %5912 = vrot.lane.b32.xlu1 %v5876_v7, %s17171_s2  ;;  %4564 = vst.msk [vmem:[#allocation4 + $0xc8] sm:$0xff] %vm17227_vm1, %v4522_v31  ;;  %vm17231_vm1 = vcmask 326784   ;;  %v6633_v7 = vsel %vm17233_vm13, %v13670_v59, 0.0  ;;  %v7830_v31 = vpack.c.bf16 %v7799_v11, %v13982_v32  ;;  %v8091_v59 = vld [vmem:[#allocation4 + $0x28] sm:$0xff]  ;;  %vm17237_vm13 = vcmp.ge.s32.totalorder %v12817_v46, 0 }
 0x414   : > { %4975 = vrot.lane.b32.xlu0 %v4935_v24, %s17167_s30  ;;  %v5907_v58 = vpop.permute.xlu1 %5906  ;;  %v5069_v11 = vsel %vm17239_vm15, %v13979_v47, 0.0  ;;  %vm17243_vm15 = vcmp.lt.s32.totalorder %v13445_v61, 16 }
 0x415   : > { %5955 = vst.msk [vmem:[#allocation4 + $0x30] sm:$0xff] %vm5952_vm4, %v5907_v58 }
 0x416   : > { %5956 = vst.msk [vmem:[#allocation4 + $0x38] sm:$0xff] %vm17229_vm5, %v5907_v58  ;;  %v6213_v52 = vpop.permute.xlu0 %6212  ;;  %vm17234_vm5 = vcmask 785984   ;;  %v6663_v58 = vpack.c.bf16 %v13769_v54, %v6633_v7 }
 0x417   : > { %5307 = vrot.lane.b32.xlu1 %v5269_v37, %s17181_s23 }
 0x418   : > { %7082 = vrot.lane.b32.xlu0 %v7048_v53, %s17043_s17  ;;  %v5302_v9 = vpop.permute.xlu1 %5301  ;;  %v14035_v53 = vld [vmem:[#allocation3 + $0xa4] sm:$0xff] }
 0x419   : > { %5346 = vst.msk [vmem:[#allocation4 + $0x80] sm:$0xff] %vm17231_vm1, %v5302_v9  ;;  %vm17236_vm1 = vcmask 523584   ;;  %v5094_v39 = vpack.c.bf16 %v14035_v53, %v5069_v11 }
 0x41a   : > { %v4746_v8 = vpop.permute.xlu0 %4745 }
 0x41b   : > { %5435 = vrot.lane.b32.xlu1 %v13871_v55, %s17049_s19  ;;  %4788 = vst.msk [vmem:[#allocation4 + $0xc8] sm:$0xff] %vm17234_vm5, %v4746_v8  ;;  %v6025_v55 = vsel %vm17237_vm13, %v13774_v10, 0.0  ;;  %vm17238_vm5 = vcmask 982784   ;;  %v14042_v10 = vld [vmem:[#allocation3 + $0x9e] sm:$0xff]  ;;  %v5532_v8 = vsel %vm1647_vm11, %v13964_v33, 0.0  ;;  %vm17241_vm13 = vcmask 130048  }
 0x41c   : > { %7862 = vrot.lane.b32.xlu0 %v7830_v31, %s17049_s19  ;;  %v5430_v24 = vpop.permute.xlu1 %5429  ;;  %v8092_v0 = vld [vmem:[#allocation4 + $0x30] sm:$0xff]  ;;  %v6053_v7 = vpack.c.bf16 %v13816_v63, %v6025_v55  ;;  %v14053_v63 = vld [vmem:[#allocation3 + $0xa6] sm:$0xff] }
 0x41d   : > { %5474 = vst.msk [vmem:[#allocation4 + $0x80] sm:$0xff] %vm17236_vm1, %v5430_v24  ;;  %8557 = vmatprep.mubr.bf16.mxu0 %v8092_v0  ;;  %vm17240_vm1 = vcmask 1048512   ;;  %v4337_v24 = vsel %vm16864_vm14, %v14042_v10, 0.0  ;;  %vm17264_vm14 = vcmp.lt.s32.totalorder %v17212_v42, 16  ;;  %v14164_v42 = vld [vmem:[#allocation3 + $0xb4] sm:$0xff] }
 0x41e   : > { %v4970_v37 = vpop.permute.xlu0 %4969  ;;  %8558 = vmatmul.mubr.bf16.gmra.mrb[36].mxu0 %v8091_v59  ;;  %v4360_v55 = vpack.c.bf16 %v14053_v63, %v4337_v24 }
 0x41f   : > { %6697 = vrot.lane.b32.xlu1 %v6663_v58, %s17128_s18  ;;  %5012 = vst.msk [vmem:[#allocation4 + $0xc8] sm:$0xff] %vm17238_vm5, %v4970_v37  ;;  %vm17242_vm5 = vcmask 720384   ;;  %v5692_v58 = vsel %vm17243_vm15, %v13979_v47, 0.0  ;;  %v4466_v37 = vld [vmem:[#allocation3 + $0xa8] sm:$0xff]  ;;  %vm17247_vm15 = vcmask 589184  }
 0x420   : > { %8022 = vrot.lane.b32.xlu0 %v7990_v45, %s16921_s25  ;;  %v6084_v9 = vpop.permute.xlu1 %6083  ;;  %v5717_v11 = vpack.c.bf16 %v5692_v58, %v13769_v54 }
 0x421   : > { %6131 = vst.msk [vmem:[#allocation4 + $0x38] sm:$0xff] %vm6129_vm8, %v6084_v9  ;;  %v4465_v9 = vld [vmem:[#allocation3 + $0xa0] sm:$0xff] }
 0x422   : > { %6260 = vst.msk [vmem:[#allocation4 + $0x38] sm:$0xff] %vm6258_vm12, %v6213_v52  ;;  %v5128_v31 = vpop.permute.xlu0 %5127  ;;  %v5557_v52 = vpack.c.bf16 %v5532_v8, %v13982_v32 }
 0x423   : > { %6089 = vrot.lane.b32.xlu1 %v6053_v7, %s17131_s27  ;;  %5175 = vst.msk [vmem:[#allocation4 + $0xa0] sm:$0xff] %vm17240_vm1, %v5128_v31  ;;  %vm17244_vm1 = vcmask 392384  }
 0x424   : > { %5176 = vst.msk [vmem:[#allocation4 + $0xa8] sm:$0xff] %vm17241_vm13, %v5128_v31  ;;  %5133 = vrot.lane.b32.xlu0 %v5094_v39, %s16922_s26  ;;  %v5590_v0 = vpop.permute.xlu1 %5589  ;;  %vm17245_vm13 = vcmask 917184   ;;  %v14074_v31 = vpack.c.bf16 %v4466_v37, %v4465_v9 }
 0x425   : > { %5634 = vst.msk [vmem:[#allocation4 + $0x80] sm:$0xff] %vm17242_vm5, %v5590_v0  ;;  %vm17246_vm5 = vcmp.lt.s32.totalorder %v17148_v23, 16 }
 0x426   : > { %v4396_v59 = vpop.permute.xlu0 %4395  ;;  %v7179_v7 = vsel %vm17246_vm5, %v13979_v47, 0.0  ;;  %vm17250_vm5 = vcmp.ge.s32.totalorder %v17004_v29, 0 }
 0x427   : > { %5595 = vrot.lane.b32.xlu1 %v5557_v52, %s16921_s25  ;;  %4437 = vst.msk [vmem:[#allocation4 + $0xf0] sm:$0xff] %vm17244_vm1, %v4396_v59  ;;  %vm17248_vm1 = vcmp.ge.s32.totalorder %v17185_v12, 0  ;;  %v7208_v0 = vpack.c.bf16 %v7179_v7, %v13769_v54  ;;  %v6316_v52 = vsel %vm1643_vm6, %v13964_v33, 0.0  ;;  %v7496_v12 = vsel %vm17250_vm5, %v14042_v10, 0.0  ;;  %v14103_v7 = vld [vmem:[#allocation3 + $0xaa] sm:$0xff] }
 0x428   : > { %4401 = vrot.lane.b32.xlu0 %v4360_v55, %s17193_s3  ;;  %v5750_v45 = vpop.permute.xlu1 %5749  ;;  %v7336_v39 = vsel %vm17248_vm1, %v13979_v47, 0.0  ;;  %v6343_v37 = vpack.c.bf16 %v6316_v52, %v13982_v32  ;;  %vm17252_vm1 = vcmask 64512   ;;  %vm17254_vm5 = vcmask 785984   ;;  %v14121_v52 = vld [vmem:[#allocation3 + $0xa2] sm:$0xff] }
 0x429   : > { %5795 = vst.msk [vmem:[#allocation4 + $0x80] sm:$0xff] %vm17245_vm13, %v5750_v45  ;;  %v7367_v59 = vpack.c.bf16 %v14035_v53, %v7336_v39  ;;  %vm17249_vm13 = vcmask 392384   ;;  %v4690_v39 = vsel %vm1653_vm7, %v14103_v7, 0.0 }
 0x42a   : > { %v4524_v8 = vpop.permute.xlu0 %4523 }
 0x42b   : > { %5755 = vrot.lane.b32.xlu1 %v5717_v11, %s17037_s24  ;;  %4565 = vst.msk [vmem:[#allocation4 + $0xf0] sm:$0xff] %vm17247_vm15, %v4524_v8  ;;  %vm17251_vm15 = vcmp.lt.s32.totalorder %v17136_v2, 16  ;;  %v7527_v11 = vpack.c.bf16 %v14053_v63, %v7496_v12  ;;  %v4712_v12 = vpack.c.bf16 %v4690_v39, %v14121_v52 }
 0x42c   : > { %4529 = vrot.lane.b32.xlu0 %v14074_v31, %s17043_s17  ;;  %v6374_v24 = vpop.permute.xlu1 %6373  ;;  %v6477_v33 = vsel %vm17251_vm15, %v13979_v47, 0.0  ;;  %vm17255_vm15 = vcmask 326784  }
 0x42d   : > { %6421 = vst.msk [vmem:[#allocation4 + $0x38] sm:$0xff] %vm6419_vm10, %v6374_v24  ;;  %v6504_v9 = vpack.c.bf16 %v6477_v33, %v13769_v54 }
 0x42e   : > { %v6919_v58 = vpop.permute.xlu0 %6918 }
 0x42f   : > { %7242 = vrot.lane.b32.xlu1 %v7208_v0, %s16920_s28  ;;  %6966 = vst.msk [vmem:[#allocation4 + $0x18] sm:$0xff] %vm17249_vm13, %v6919_v58  ;;  %vm17253_vm13 = vcmp.ge.s32.totalorder %v17126_v26, 0  ;;  %v14118_v0 = vld [vmem:[#allocation3 + $0xac] sm:$0xff] }
 0x430   : > { %7400 = vrot.lane.b32.xlu0 %v7367_v59, %s17167_s30  ;;  %v5850_v32 = vsel %vm17253_vm13, %v13979_v47, 0.0  ;;  %vm17257_vm13 = vcmask 982784  }
 0x431   : > { %v6535_v55 = vpop.permute.xlu1 %6534  ;;  %v5877_v24 = vpack.c.bf16 %v14035_v53, %v5850_v32 }
 0x432   : > { %6582 = vst.msk [vmem:[#allocation4 + $0x38] sm:$0xff] %vm16878_vm3, %v6535_v55  ;;  %v6215_v45 = vpop.permute.xlu0 %6214 }
 0x433   : > { %6379 = vrot.lane.b32.xlu1 %v6343_v37, %s17108_s20 }
 0x434   : > { %7560 = vrot.lane.b32.xlu0 %v7527_v11, %s16922_s26 }
 0x435   : > { %v5909_v29 = vpop.permute.xlu1 %5908 }
 0x436   : > { %5957 = vst.msk [vmem:[#allocation4 + $0x58] sm:$0xff] %vm5952_vm4, %v5909_v29  ;;  %v4748_v8 = vpop.permute.xlu0 %4747 }
 0x437   : > { %5958 = vst.msk [vmem:[#allocation4 + $0x60] sm:$0xff] %vm17252_vm1, %v5909_v29  ;;  %6540 = vrot.lane.b32.xlu1 %v6504_v9, %s17160_s0  ;;  %vm17256_vm1 = vcmp.ge.s32.totalorder %v13108_v49, 0  ;;  %v8096_v29 = vld [vmem:[#allocation4 + $0x50] sm:$0xff] }
 0x438   : > { %4789 = vst.msk [vmem:[#allocation4 + $0xf0] sm:$0xff] %vm17254_vm5, %v4748_v8  ;;  %6924 = vrot.lane.b32.xlu0 %v14074_v31, %s17193_s3  ;;  %v5245_v58 = vsel %vm17256_vm1, %v14042_v10, 0.0  ;;  %vm17258_vm5 = vcmp.lt.s32.totalorder %v13362_v6, 16  ;;  %vm6741_vm1 = vcmask 1048384   ;;  %v7021_v8 = vsel %vm1641_vm0, %v14103_v7, 0.0 }
 0x439   : > { %v5304_v54 = vpop.permute.xlu1 %5303  ;;  %v4914_v55 = vsel %vm17258_vm5, %v14118_v0, 0.0  ;;  %v5270_v11 = vpack.c.bf16 %v14053_v63, %v5245_v58  ;;  %vm17261_vm5 = vcmp.ge.s32.totalorder %v17156_v17, 0  ;;  %v7049_v58 = vpack.c.bf16 %v7021_v8, %v14121_v52  ;;  %v14177_v8 = vld [vmem:[#allocation3 + $0xb6] sm:$0xff] }
 0x43a   : > { %5347 = vst.msk [vmem:[#allocation4 + $0xa8] sm:$0xff] %vm17255_vm15, %v5304_v54  ;;  %v4972_v59 = vpop.permute.xlu0 %4971  ;;  %vm17259_vm15 = vcmask 523584   ;;  %v4936_v32 = vpack.c.bf16 %v4914_v55, %v14035_v53  ;;  %v6635_v54 = vsel %vm17261_vm5, %v13979_v47, 0.0  ;;  %vm17265_vm5 = vcmp.ge.s32.totalorder %v13091_v4, 0 }
 0x43b   : > { %5914 = vrot.lane.b32.xlu1 %v5877_v24, %s17171_s2  ;;  %5013 = vst.msk [vmem:[#allocation4 + $0xf0] sm:$0xff] %vm17257_vm13, %v4972_v59  ;;  %vm17260_vm13 = vcmask 589184   ;;  %v7961_v59 = vsel %vm17264_vm14, %v14118_v0, 0.0  ;;  %v6664_v55 = vpack.c.bf16 %v14035_v53, %v6635_v54  ;;  %v6027_v47 = vsel %vm17265_vm5, %v14042_v10, 0.0 }
 0x43c   : > { %4753 = vrot.lane.b32.xlu0 %v4712_v12, %s16920_s28  ;;  %vm17267_vm14 = vcmp.ge.s32.totalorder %v12947_v15, 0  ;;  %v6054_v10 = vpack.c.bf16 %v14053_v63, %v6027_v47  ;;  %vm17269_vm5 = vcmask 589184  }
 0x43d   : > { %v5432_v37 = vpop.permute.xlu1 %5431  ;;  %v8097_v33 = vld [vmem:[#allocation4 + $0x58] sm:$0xff] }
 0x43e   : > { %5475 = vst.msk [vmem:[#allocation4 + $0xa8] sm:$0xff] %vm17259_vm15, %v5432_v37  ;;  %8565 = vmatprep.mubr.bf16.mxu0 %v8097_v33  ;;  %v7079_v9 = vpop.permute.xlu0 %7078  ;;  %vm17262_vm15 = vcmask 1048512   ;;  %v7991_v33 = vpack.c.bf16 %v7961_v59, %v14035_v53 }
 0x43f   : > { %5309 = vrot.lane.b32.xlu1 %v5270_v11, %s17181_s23  ;;  %8566 = vmatmul.mubr.bf16.gmra.mrb[40].mxu0 %v8096_v29  ;;  %7126 = vst.msk [vmem:[#allocation4 + $0x18] sm:$0xff] %vm17260_vm13, %v7079_v9  ;;  %vm17263_vm13 = vcmask 130048   ;;  %v5071_v11 = vsel %vm17267_vm14, %v14118_v0, 0.0  ;;  %v14171_v9 = vld [vmem:[#allocation3 + $0xae] sm:$0xff]  ;;  %vm17271_vm14 = vcmask 917184  }
 0x440   : > { %4977 = vrot.lane.b32.xlu0 %v4936_v32, %s17167_s30  ;;  %v5095_v32 = vpack.c.bf16 %v14164_v42, %v5071_v11 }
 0x441   : > { %v6694_v39 = vpop.permute.xlu1 %6693 }
 0x442   : > { %6742 = vst.msk [vmem:[#allocation4 + $0x10] sm:$0xff] %vm6741_vm1, %v6694_v39  ;;  %v5130_v24 = vpop.permute.xlu0 %5129 }
 0x443   : > { %5437 = vrot.lane.b32.xlu1 %v14074_v31, %s17049_s19  ;;  %5177 = vst.msk [vmem:[#allocation4 + $0xc8] sm:$0xff] %vm17262_vm15, %v5130_v24  ;;  %vm17266_vm15 = vcmask 392384  }
 0x444   : > { %5178 = vst.msk [vmem:[#allocation4 + $0xd0] sm:$0xff] %vm17263_vm13, %v5130_v24  ;;  %7084 = vrot.lane.b32.xlu0 %v7049_v58, %s17043_s17  ;;  %vm17268_vm13 = vcmask 720384   ;;  %v4468_v58 = vld [vmem:[#allocation3 + $0xb8] sm:$0xff] }
 0x445   : > { %v6086_v12 = vpop.permute.xlu1 %6085 }
 0x446   : > { %6132 = vst.msk [vmem:[#allocation4 + $0x60] sm:$0xff] %vm6129_vm8, %v6086_v12  ;;  %v4398_v37 = vpop.permute.xlu0 %4397  ;;  %v4467_v12 = vld [vmem:[#allocation3 + $0xb0] sm:$0xff] }
 0x447   : > { %6261 = vst.msk [vmem:[#allocation4 + $0x60] sm:$0xff] %vm6258_vm12, %v6215_v45  ;;  %6699 = vrot.lane.b32.xlu1 %v6664_v55, %s17128_s18 }
 0x448   : > { %4438 = vst.msk [vmem:[#allocation4 + $0x118] sm:$0xff] %vm17266_vm15, %v4398_v37  ;;  %8024 = vrot.lane.b32.xlu0 %v7991_v33, %s16921_s25  ;;  %vm17270_vm15 = vcmp.ge.s32.totalorder %v13375_v21, 0  ;;  %v14197_v37 = vpack.c.bf16 %v4468_v58, %v4467_v12 }
 0x449   : > { %v5592_v29 = vpop.permute.xlu1 %5591  ;;  %v4339_v39 = vsel %vm17270_vm15, %v14171_v9, 0.0  ;;  %vm17274_vm15 = vcmp.lt.s32.totalorder %v13544_v40, 16 }
 0x44a   : > { %5635 = vst.msk [vmem:[#allocation4 + $0xa8] sm:$0xff] %vm17268_vm13, %v5592_v29  ;;  %v4526_v45 = vpop.permute.xlu0 %4525  ;;  %v4361_v24 = vpack.c.bf16 %v14177_v8, %v4339_v39  ;;  %vm17272_vm13 = vcmask 392384   ;;  %v5534_v55 = vsel %vm17274_vm15, %v14103_v7, 0.0 }
 0x44b   : > { %6091 = vrot.lane.b32.xlu1 %v6054_v10, %s17131_s27  ;;  %4566 = vst.msk [vmem:[#allocation4 + $0x118] sm:$0xff] %vm17269_vm5, %v4526_v45  ;;  %vm17273_vm5 = vcmask 785984   ;;  %v5558_v29 = vpack.c.bf16 %v5534_v55, %v14121_v52 }
 0x44c   : > { %5135 = vrot.lane.b32.xlu0 %v5095_v32, %s16922_s26 }
 0x44d   : > { %v5752_v63 = vpop.permute.xlu1 %5751 }
 0x44e   : > { %5796 = vst.msk [vmem:[#allocation4 + $0xa8] sm:$0xff] %vm17271_vm14, %v5752_v63  ;;  %v6921_v54 = vpop.permute.xlu0 %6920  ;;  %vm17275_vm14 = vcmp.ge.s32.totalorder %v17232_v16, 0  ;;  %v17277_v16 = vld [vmem:[#allocation14_spill] sm:$0xff] }
 0x44f   : > { %6220 = vrot.lane.b32.xlu1 %v14074_v31, %s17145_s1  ;;  %6967 = vst.msk [vmem:[#allocation4 + $0x40] sm:$0xff] %vm17272_vm13, %v6921_v54  ;;  %v7338_v33 = vsel %vm17275_vm14, %v14118_v0, 0.0  ;;  %vm17276_vm13 = vcmp.lt.s32.totalorder %v13646_v5, 16  ;;  %vm17278_vm15 = vcmp.ge.s32.totalorder %v17277_v16, 0  ;;  %vm17279_vm14 = vcmp.lt.s32.totalorder %v17218_v18, 16 }
 0x450   : > { %4403 = vrot.lane.b32.xlu0 %v4361_v24, %s17193_s3  ;;  %v5694_v10 = vsel %vm17276_vm13, %v14118_v0, 0.0  ;;  %v7498_v32 = vsel %vm17278_vm15, %v14171_v9, 0.0  ;;  %v7181_v54 = vsel %vm17279_vm14, %v14118_v0, 0.0  ;;  %vm17280_vm13 = vcmask 982784  }
 0x451   : > { %v7239_v59 = vpop.permute.xlu1 %7238  ;;  %v5718_v63 = vpack.c.bf16 %v5694_v10, %v14035_v53  ;;  %v7528_v58 = vpack.c.bf16 %v14177_v8, %v7498_v32  ;;  %v7209_v12 = vpack.c.bf16 %v7181_v54, %v14035_v53  ;;  %vm17282_vm15 = vcmp.lt.s32.totalorder %v13323_v43, 16  ;;  %v14236_v10 = vld [vmem:[#allocation3 + $0xba] sm:$0xff] }
 0x452   : > { %7286 = vst.msk [vmem:[#allocation4 + $0x18] sm:$0xff] %vm17273_vm5, %v7239_v59  ;;  %v14193_v47 = vpop.permute.xlu0 %6216  ;;  %v6318_v55 = vsel %vm17282_vm15, %v14103_v7, 0.0  ;;  %vm17283_vm14 = vcmask 589184   ;;  %vm17286_vm15 = vcmask 1048512   ;;  %v4692_v16 = vsel %vm17288_vm9, %v14236_v10, 0.0  ;;  %v14251_v54 = vld [vmem:[#allocation3 + $0xbc] sm:$0xff] }
 0x453   : > { %7704 = vrot.lane.b32.xlu1 %v14074_v31, %s17181_s23  ;;  %v7368_v31 = vpack.c.bf16 %v14164_v42, %v7338_v33  ;;  %vm17291_vm9 = vcmask 392384  }
 0x454   : > { %4531 = vrot.lane.b32.xlu0 %v14197_v37, %s17043_s17 }
 0x455   : > { %v6376_v11 = vpop.permute.xlu1 %6375 }
 0x456   : > { %6422 = vst.msk [vmem:[#allocation4 + $0x60] sm:$0xff] %vm6419_vm10, %v6376_v11  ;;  %v4750_v45 = vpop.permute.xlu0 %4749 }
 0x457   : > { %5597 = vrot.lane.b32.xlu1 %v5558_v29, %s16921_s25  ;;  %4790 = vst.msk [vmem:[#allocation4 + $0x118] sm:$0xff] %vm17273_vm5, %v4750_v45  ;;  %vm17281_vm5 = vcmask 64512   ;;  %v6344_v29 = vpack.c.bf16 %v6318_v55, %v14121_v52 }
 0x458   : > { %7402 = vrot.lane.b32.xlu0 %v7368_v31, %s17167_s30 }
 0x459   : > { %v6537_v39 = vpop.permute.xlu1 %6536 }
 0x45a   : > { %6583 = vst.msk [vmem:[#allocation4 + $0x60] sm:$0xff] %vm16878_vm3, %v6537_v39  ;;  %v4974_v24 = vpop.permute.xlu0 %4973 }
 0x45b   : > { %5757 = vrot.lane.b32.xlu1 %v5718_v63, %s17037_s24  ;;  %5014 = vst.msk [vmem:[#allocation4 + $0x118] sm:$0xff] %vm17280_vm13, %v4974_v24  ;;  %vm17284_vm13 = vcmask 326784   ;;  %v8101_v24 = vld [vmem:[#allocation4 + $0x78] sm:$0xff] }
 0x45c   : > { %7562 = vrot.lane.b32.xlu0 %v7528_v58, %s16922_s26  ;;  %v14254_v58 = vld [vmem:[#allocation3 + $0xb2] sm:$0xff] }
 0x45d   : > { %v5911_v59 = vpop.permute.xlu1 %5910  ;;  %v4713_v55 = vpack.c.bf16 %v4692_v16, %v14254_v58 }
 0x45e   : > { %5959 = vst.msk [vmem:[#allocation4 + $0x80] sm:$0xff] %vm5952_vm4, %v5911_v59  ;;  %v7081_v33 = vpop.permute.xlu0 %7080 }
 0x45f   : > { %5960 = vst.msk [vmem:[#allocation4 + $0x88] sm:$0xff] %vm17281_vm5, %v5911_v59  ;;  %7244 = vrot.lane.b32.xlu1 %v7209_v12, %s16920_s28  ;;  %vm17285_vm5 = vcmp.lt.s32.totalorder %v17210_v50, 16 }
 0x460   : > { %7127 = vst.msk [vmem:[#allocation4 + $0x40] sm:$0xff] %vm17283_vm14, %v7081_v33  ;;  %6926 = vrot.lane.b32.xlu0 %v14197_v37, %s17193_s3  ;;  %v6479_v45 = vsel %vm17285_vm5, %v14118_v0, 0.0  ;;  %vm17287_vm14 = vcmask 130048   ;;  %vm17290_vm5 = vcmp.lt.s32.totalorder %v17028_v57, 16 }
 0x461   : > { %v5306_v11 = vpop.permute.xlu1 %5305  ;;  %v6505_v63 = vpack.c.bf16 %v6479_v45, %v14035_v53  ;;  %v7801_v59 = vsel %vm17290_vm5, %v14103_v7, 0.0  ;;  %v17292_v53 = vld [vmem:[#allocation16_spill] sm:$0xff]  ;;  %vm17296_vm5 = vcmp.ge.s32.totalorder %v13195_v19, 0 }
 0x462   : > { %5348 = vst.msk [vmem:[#allocation4 + $0xd0] sm:$0xff] %vm17284_vm13, %v5306_v11  ;;  %v5132_v31 = vpop.permute.xlu0 %5131  ;;  %vm17289_vm13 = vcmask 523584  }
 0x463   : > { %6381 = vrot.lane.b32.xlu1 %v6344_v29, %s17108_s20  ;;  %5179 = vst.msk [vmem:[#allocation4 + $0xf0] sm:$0xff] %vm17286_vm15, %v5132_v31  ;;  %vm17293_vm15 = vcmp.lt.s32.totalorder %v17292_v53, 16  ;;  %v7831_v29 = vpack.c.bf16 %v7801_v59, %v14121_v52 }
 0x464   : > { %5180 = vst.msk [vmem:[#allocation4 + $0xf8] sm:$0xff] %vm17287_vm14, %v5132_v31  ;;  %7706 = vrot.lane.b32.xlu0 %v14197_v37, %s17181_s23  ;;  %v4916_v33 = vsel %vm17293_vm15, %v14251_v54, 0.0  ;;  %vm17294_vm14 = vcmp.ge.s32.totalorder %v12814_v30, 0  ;;  %v7023_v31 = vsel %vm1643_vm6, %v14236_v10, 0.0  ;;  %vm17298_vm15 = vcmp.lt.s32.totalorder %v17053_v34, 16 }
 0x465   : > { %v5434_v32 = vpop.permute.xlu1 %5433  ;;  %v8102_v39 = vld [vmem:[#allocation4 + $0x80] sm:$0xff]  ;;  %v5852_v57 = vsel %vm17294_vm14, %v14118_v0, 0.0  ;;  %v4937_v45 = vpack.c.bf16 %v4916_v33, %v14164_v42  ;;  %vm17299_vm14 = vcmask 720384  }
 0x466   : > { %5476 = vst.msk [vmem:[#allocation4 + $0xd0] sm:$0xff] %vm17289_vm13, %v5434_v32  ;;  %8573 = vmatprep.mubr.bf16.mxu0 %v8102_v39  ;;  %v4400_v12 = vpop.permute.xlu0 %4399  ;;  %vm17295_vm13 = vcmask 589184   ;;  %v5878_v16 = vpack.c.bf16 %v14164_v42, %v5852_v57  ;;  %v5247_v32 = vsel %vm17296_vm5, %v14171_v9, 0.0  ;;  %vm17301_vm5 = vcmask 130048  }
 0x467   : > { %6542 = vrot.lane.b32.xlu1 %v6505_v63, %s17160_s0  ;;  %8574 = vmatmul.mubr.bf16.gmra.mrb[44].mxu0 %v8101_v24  ;;  %4439 = vst.msk [vmem:[#allocation4 + $0x140] sm:$0xff] %vm17291_vm9, %v4400_v12  ;;  %v7050_v63 = vpack.c.bf16 %v7023_v31, %v14254_v58  ;;  %vm17297_vm9 = vcmask 982784   ;;  %v7803_v24 = vsel %vm17298_vm15, %v14236_v10, 0.0  ;;  %v5271_v12 = vpack.c.bf16 %v14177_v8, %v5247_v32 }
 0x468   : > { %4755 = vrot.lane.b32.xlu0 %v4713_v55, %s16920_s28  ;;  %vm17303_vm15 = vcmask 917184  }
 0x469   : > { %v6696_v11 = vpop.permute.xlu1 %6695 }
 0x46a   : > { %6743 = vst.msk [vmem:[#allocation4 + $0x38] sm:$0xff] %vm6741_vm1, %v6696_v11  ;;  %v4528_v7 = vpop.permute.xlu0 %4527 }
 0x46b   : > { %7864 = vrot.lane.b32.xlu1 %v7831_v29, %s17049_s19  ;;  %4567 = vst.msk [vmem:[#allocation4 + $0x140] sm:$0xff] %vm17295_vm13, %v4528_v7  ;;  %vm17300_vm13 = vcmask 1048512   ;;  %v14310_v7 = vld [vmem:[#allocation3 + $0xc4] sm:$0xff] }
 0x46c   : > { %4979 = vrot.lane.b32.xlu0 %v4937_v45, %s17167_s30 }
 0x46d   : > { %v6088_v52 = vpop.permute.xlu1 %6087 }
 0x46e   : > { %6133 = vst.msk [vmem:[#allocation4 + $0x88] sm:$0xff] %vm6129_vm8, %v6088_v52  ;;  %v7399_v39 = vpop.permute.xlu0 %7398 }
 0x46f   : > { %6262 = vst.msk [vmem:[#allocation4 + $0x88] sm:$0xff] %vm6258_vm12, %v14193_v47  ;;  %5916 = vrot.lane.b32.xlu1 %v5878_v16, %s17171_s2  ;;  %v7832_v47 = vpack.c.bf16 %v7803_v24, %v14254_v58 }
 0x470   : > { %7446 = vst.msk [vmem:[#allocation4 + $0x18] sm:$0xff] %vm17297_vm9, %v7399_v39  ;;  %7086 = vrot.lane.b32.xlu0 %v7050_v63, %s17043_s17  ;;  %vm17302_vm9 = vcmp.lt.s32.totalorder %v17148_v23, 16  ;;  %v17306_v23 = vld [vmem:[#allocation24_spill] sm:$0xff]  ;;  %v8088_v63 = vld [vmem:[#allocation4 + $0x10] sm:$0xff] }
 0x471   : > { %v5594_v59 = vpop.permute.xlu1 %5593  ;;  %v7963_v34 = vsel %vm17302_vm9, %v14251_v54, 0.0  ;;  %vm17308_vm9 = vcmask 785984  }
 0x472   : > { %5636 = vst.msk [vmem:[#allocation4 + $0xd0] sm:$0xff] %vm17299_vm14, %v5594_v59  ;;  %v7559_v55 = vpop.permute.xlu0 %7558  ;;  %vm17304_vm14 = vcmp.ge.s32.totalorder %v17222_v38, 0  ;;  %v7992_v57 = vpack.c.bf16 %v7963_v34, %v14164_v42 }
 0x473   : > { %5311 = vrot.lane.b32.xlu1 %v5271_v12, %s17181_s23  ;;  %7606 = vst.msk [vmem:[#allocation4 + $0x18] sm:$0xff] %vm17300_vm13, %v7559_v55  ;;  %v6637_v11 = vsel %vm17304_vm14, %v14118_v0, 0.0  ;;  %vm17305_vm13 = vcmask 392384   ;;  %vm17310_vm14 = vcmp.ge.s32.totalorder %v17156_v17, 0  ;;  %v5536_v17 = vsel %vm1651_vm2, %v14236_v10, 0.0 }
 0x474   : > { %7607 = vst.msk [vmem:[#allocation4 + $0x20] sm:$0xff] %vm17301_vm5, %v7559_v55  ;;  %7866 = vrot.lane.b32.xlu0 %v7832_v47, %s17049_s19  ;;  %vm17307_vm5 = vcmp.ge.s32.totalorder %v17306_v23, 0  ;;  %v6665_v52 = vpack.c.bf16 %v14164_v42, %v6637_v11  ;;  %v7340_v24 = vsel %vm17310_vm14, %v14251_v54, 0.0  ;;  %v17314_v11 = vld [vmem:[#allocation12_spill] sm:$0xff]  ;;  %vm17319_vm14 = vcmask 982784  }
 0x475   : > { %v5754_v33 = vpop.permute.xlu1 %5753  ;;  %v5073_v45 = vsel %vm17307_vm5, %v14251_v54, 0.0  ;;  %v7369_v55 = vpack.c.bf16 %v14310_v7, %v7340_v24  ;;  %vm17312_vm5 = vmmov %vm17308_vm9  ;;  %v17320_v24 = vld [vmem:[#allocation22_spill] sm:$0xff] }
 0x476   : > { %5797 = vst.msk [vmem:[#allocation4 + $0xd0] sm:$0xff] %vm17303_vm15, %v5754_v33  ;;  %v6923_v29 = vpop.permute.xlu0 %6922  ;;  %vm17309_vm15 = vcmp.ge.s32.totalorder %v12799_v62, 0  ;;  %v5096_v39 = vpack.c.bf16 %v14310_v7, %v5073_v45  ;;  %v17313_v33 = vld [vmem:[#allocation50_spill] sm:$0xff]  ;;  %v5559_v45 = vpack.c.bf16 %v5536_v17, %v14254_v58 }
 0x477   : > { %5439 = vrot.lane.b32.xlu1 %v14197_v37, %s17049_s19  ;;  %6968 = vst.msk [vmem:[#allocation4 + $0x68] sm:$0xff] %vm17305_vm13, %v6923_v29  ;;  %v6029_v0 = vsel %vm17309_vm15, %v14171_v9, 0.0  ;;  %vm17311_vm13 = vcmask 326784   ;;  %v17315_v29 = vpack.c.bf16 %v17313_v33, %v17314_v11  ;;  %vm17318_vm15 = vcmp.lt.s32.totalorder %v13266_v41, 16 }
 0x478   : > { %8026 = vrot.lane.b32.xlu0 %v7992_v57, %s16921_s25  ;;  %v6055_v12 = vpack.c.bf16 %v14177_v8, %v6029_v0  ;;  %v6865_v8 = vld [vmem:[#allocation3 + $0xc8] sm:$0xff] }
 0x479   : > { %v7241_v31 = vpop.permute.xlu1 %7240 }
 0x47a   : > { %7287 = vst.msk [vmem:[#allocation4 + $0x40] sm:$0xff] %vm17308_vm9, %v7241_v31  ;;  %v14321_v16 = vpop.permute.xlu0 %6218  ;;  %v8089_v32 = vld [vmem:[#allocation4 + $0x18] sm:$0xff]  ;;  %v14347_v31 = vld [vmem:[#allocation3 + $0xca] sm:$0xff]  ;;  %vm17317_vm9 = vcmask 64512  }
 0x47b   : > { %6701 = vrot.lane.b32.xlu1 %v6665_v52, %s17128_s18  ;;  %8710 = vmatprep.mubr.bf16.mxu1 %v8089_v32  ;;  %v17316_v52 = vld [vmem:[#allocation40_spill] sm:$0xff]  ;;  %v5696_v32 = vsel %vm17318_vm15, %v14251_v54, 0.0  ;;  %vm17323_vm15 = vcmp.lt.s32.totalorder %v17136_v2, 16 }
 0x47c   : > { %5137 = vrot.lane.b32.xlu0 %v5096_v39, %s16922_s26  ;;  %8711 = vmatmul.mubr.bf16.vlgmr.msra.gmra.mrb[64].mxu1 %v8088_v63  ;;  %v14350_v0 = vadd.s32 4, %v17316_v52  ;;  %v8106_v52 = vld [vmem:[#allocation4 + $0xa0] sm:$0xff] }
 0x47d   : > { %v6378_v59 = vpop.permute.xlu1 %6377 }
 0x47e   : > { %6423 = vst.msk [vmem:[#allocation4 + $0x88] sm:$0xff] %vm6419_vm10, %v6378_v59  ;;  %v7703_v9 = vpop.permute.xlu0 %7702 }
 0x47f   : > { %6093 = vrot.lane.b32.xlu1 %v6055_v12, %s17131_s27  ;;  %7750 = vst.msk [vmem:[#allocation4 + $0x20] sm:$0xff] %vm17311_vm13, %v7703_v9  ;;  %vm17321_vm13 = vcmp.lt.s32.totalorder %v17320_v24, 16  ;;  %v5719_v9 = vpack.c.bf16 %v5696_v32, %v14164_v42 }
 0x480   : > { %7404 = vrot.lane.b32.xlu0 %v7369_v55, %s17167_s30  ;;  %v4694_v59 = vsel %vm17321_vm13, %v14347_v31, 0.0  ;;  %v14369_v55 = vld [vmem:[#allocation3 + $0xc2] sm:$0xff]  ;;  %vm17325_vm13 = vcmask 523584  }
 0x481   : > { %v6539_v47 = vpop.permute.xlu1 %6538 }
 0x482   : > { %6584 = vst.msk [vmem:[#allocation4 + $0x88] sm:$0xff] %vm16878_vm3, %v6539_v47  ;;  %v4752_v34 = vpop.permute.xlu0 %4751  ;;  %v7183_v47 = vsel %vm17323_vm15, %v14251_v54, 0.0  ;;  %vm17327_vm15 = vcmp.lt.s32.totalorder %v13323_v43, 16 }
 0x483   : > { %6222 = vrot.lane.b32.xlu1 %v14197_v37, %s17145_s1  ;;  %4791 = vst.msk [vmem:[#allocation4 + $0x140] sm:$0xff] %vm17312_vm5, %v4752_v34  ;;  %v6864_v37 = vld [vmem:[#allocation3 + $0xc0] sm:$0xff]  ;;  %vm16866_vm5 = vcmp.lt.s32.totalorder %v14350_v0, 16  ;;  %v4714_v34 = vpack.c.bf16 %v4694_v59, %v14369_v55  ;;  %v7025_v59 = vsel %vm17327_vm15, %v14347_v31, 0.0  ;;  %vm17331_vm15 = vcmp.ge.s32.totalorder %v12913_v25, 0 }
 0x484   : > { %7564 = vrot.lane.b32.xlu0 %v17315_v29, %s16922_s26  ;;  %v14358_v63 = vpack.c.bf16 %v6865_v8, %v6864_v37  ;;  %v14377_v8 = vld [vmem:[#allocation3 + $0xcc] sm:$0xff]  ;;  %v6320_v37 = vsel %vm1647_vm11, %v14236_v10, 0.0 }
 0x485   : > { %v5913_v57 = vpop.permute.xlu1 %5912  ;;  %v4918_v11 = vsel %vm16866_vm5, %v14377_v8, 0.0  ;;  %vm17336_vm5 = vcmask 392384  }
 0x486   : > { %5961 = vst.msk [vmem:[#allocation4 + $0xa8] sm:$0xff] %vm5952_vm4, %v5913_v57  ;;  %v4976_v39 = vpop.permute.xlu0 %4975 }
 0x487   : > { %5962 = vst.msk [vmem:[#allocation4 + $0xb0] sm:$0xff] %vm17317_vm9, %v5913_v57  ;;  %5599 = vrot.lane.b32.xlu1 %v5559_v45, %s16921_s25  ;;  %vm17322_vm9 = vcmask 326784   ;;  %v7210_v45 = vpack.c.bf16 %v7183_v47, %v14164_v42 }
 0x488   : > { %5015 = vst.msk [vmem:[#allocation4 + $0x140] sm:$0xff] %vm17319_vm14, %v4976_v39  ;;  %6928 = vrot.lane.b32.xlu0 %v14358_v63, %s17193_s3  ;;  %vm17324_vm14 = vcmask 589184   ;;  %v4938_v39 = vpack.c.bf16 %v4918_v11, %v14310_v7  ;;  %v5854_v11 = vsel %vm17331_vm15, %v14251_v54, 0.0  ;;  %vm17335_vm15 = vcmask 720384  }
 0x489   : > { %v5308_v12 = vpop.permute.xlu1 %5307 }
 0x48a   : > { %5349 = vst.msk [vmem:[#allocation4 + $0xf8] sm:$0xff] %vm17322_vm9, %v5308_v12  ;;  %v7083_v17 = vpop.permute.xlu0 %7082  ;;  %vm17326_vm9 = vmmov %vm17325_vm13 }
 0x48b   : > { %5759 = vrot.lane.b32.xlu1 %v5719_v9, %s17037_s24  ;;  %7128 = vst.msk [vmem:[#allocation4 + $0x68] sm:$0xff] %vm17324_vm14, %v7083_v17  ;;  %v6345_v9 = vpack.c.bf16 %v6320_v37, %v14254_v58  ;;  %vm17328_vm14 = vcmp.lt.s32.totalorder %v13445_v61, 16  ;;  %v7051_v17 = vpack.c.bf16 %v7025_v59, %v14369_v55 }
 0x48c   : > { %4757 = vrot.lane.b32.xlu0 %v4714_v34, %s16920_s28  ;;  %v6481_v10 = vsel %vm17328_vm14, %v14251_v54, 0.0  ;;  %vm17332_vm14 = vcmask 1048512  }
 0x48d   : > { %v5436_v29 = vpop.permute.xlu1 %5435  ;;  %v8107_v57 = vld [vmem:[#allocation4 + $0xa8] sm:$0xff]  ;;  %v6506_v34 = vpack.c.bf16 %v6481_v10, %v14164_v42  ;;  %v14436_v10 = vld [vmem:[#allocation3 + $0xd4] sm:$0xff] }
 0x48e   : > { %5477 = vst.msk [vmem:[#allocation4 + $0xf8] sm:$0xff] %vm17325_vm13, %v5436_v29  ;;  %8581 = vmatprep.mubr.bf16.mxu0 %v8107_v57  ;;  %v7863_v32 = vpop.permute.xlu0 %7862  ;;  %vm17329_vm13 = vcmask 720384  }
 0x48f   : > { %7246 = vrot.lane.b32.xlu1 %v7210_v45, %s16920_s28  ;;  %8582 = vmatmul.mubr.bf16.gmra.mrb[48].mxu0 %v8106_v52  ;;  %7910 = vst.msk [vmem:[#allocation4 + $0x20] sm:$0xff] %vm17326_vm9, %v7863_v32  ;;  %vm17330_vm9 = vcmp.lt.s32.totalorder %v17210_v50, 16  ;;  %v5879_v52 = vpack.c.bf16 %v14310_v7, %v5854_v11  ;;  %v17337_v32 = vld [vmem:[#allocation26_spill] sm:$0xff] }
 0x490   : > { %4981 = vrot.lane.b32.xlu0 %v4938_v39, %s17167_s30  ;;  %v7185_v43 = vsel %vm17330_vm9, %v14377_v8, 0.0  ;;  %vm17334_vm9 = vcmp.lt.s32.totalorder %v17218_v18, 16  ;;  %v14449_v11 = vld [vmem:[#allocation3 + $0xce] sm:$0xff] }
 0x491   : > { %v6698_v12 = vpop.permute.xlu1 %6697  ;;  %v7211_v57 = vpack.c.bf16 %v7185_v43, %v14310_v7  ;;  %v7965_v42 = vsel %vm17334_vm9, %v14377_v8, 0.0  ;;  %vm17343_vm9 = vcmp.ge.s32.totalorder %v17222_v38, 0 }
 0x492   : > { %6744 = vst.msk [vmem:[#allocation4 + $0x60] sm:$0xff] %vm6741_vm1, %v6698_v12  ;;  %v8023_v47 = vpop.permute.xlu0 %8022  ;;  %v7993_v37 = vpack.c.bf16 %v7965_v42, %v14310_v7  ;;  %v17340_v12 = vld [vmem:[#allocation52_spill] sm:$0xff] }
 0x493   : > { %6383 = vrot.lane.b32.xlu1 %v6345_v9, %s17108_s20  ;;  %8070 = vst.msk [vmem:[#allocation4 + $0x20] sm:$0xff] %vm17329_vm13, %v8023_v47  ;;  %vm17333_vm13 = vcmask 130048   ;;  %v17341_v9 = vpack.c.bf16 %v17313_v33, %v17340_v12 }
 0x494   : > { %7088 = vrot.lane.b32.xlu0 %v7051_v17, %s17043_s17  ;;  %v7342_v17 = vsel %vm17343_vm9, %v14377_v8, 0.0  ;;  %vm17351_vm9 = vcmask 130048  }
 0x495   : > { %v6090_v58 = vpop.permute.xlu1 %6089 }
 0x496   : > { %6134 = vst.msk [vmem:[#allocation4 + $0xb0] sm:$0xff] %vm6129_vm8, %v6090_v58  ;;  %v5134_v29 = vpop.permute.xlu0 %5133 }
 0x497   : > { %6263 = vst.msk [vmem:[#allocation4 + $0xb0] sm:$0xff] %vm6258_vm12, %v14321_v16  ;;  %6544 = vrot.lane.b32.xlu1 %v6506_v34, %s17160_s0  ;;  %v7370_v34 = vpack.c.bf16 %v14436_v10, %v7342_v17  ;;  %v10869_v17 = vld [vmem:[#allocation3 + $0xda] sm:$0xff] }
 0x498   : > { %5181 = vst.msk [vmem:[#allocation4 + $0x118] sm:$0xff] %vm17332_vm14, %v5134_v29  ;;  %7248 = vrot.lane.b32.xlu0 %v7211_v57, %s16920_s28  ;;  %vm17338_vm14 = vcmp.ge.s32.totalorder %v17337_v32, 0  ;;  %v17347_v57 = vld [vmem:[#allocation41_spill] sm:$0xff] }
 0x499   : > { %5182 = vst.msk [vmem:[#allocation4 + $0x120] sm:$0xff] %vm17333_vm13, %v5134_v29  ;;  %v5596_v45 = vpop.permute.xlu1 %5595  ;;  %v5075_v39 = vsel %vm17338_vm14, %v14377_v8, 0.0  ;;  %vm17339_vm13 = vcmask 917184   ;;  %vm17345_vm14 = vcmask 982784   ;;  %v14456_v42 = vadd.s32 2, %v17347_v57 }
 0x49a   : > { %5637 = vst.msk [vmem:[#allocation4 + $0xf8] sm:$0xff] %vm17335_vm15, %v5596_v45  ;;  %v4402_v16 = vpop.permute.xlu0 %4401  ;;  %v5097_v47 = vpack.c.bf16 %v14436_v10, %v5075_v39  ;;  %vm17344_vm15 = vcmask 785984  }
 0x49b   : > { %5918 = vrot.lane.b32.xlu1 %v5879_v52, %s17171_s2  ;;  %4440 = vst.msk [vmem:[#allocation4 + $0x168] sm:$0xff] %vm17336_vm5, %v4402_v16  ;;  %vm17342_vm5 = vcmask 589184   ;;  %v17348_v52 = vld [vmem:[#allocation53_spill] sm:$0xff] }
 0x49c   : > { %8028 = vrot.lane.b32.xlu0 %v7993_v37, %s16921_s25  ;;  %v17349_v16 = vpack.c.bf16 %v17313_v33, %v17348_v52  ;;  %v14463_v37 = vld [vmem:[#allocation3 + $0xd6] sm:$0xff] }
 0x49d   : > { %v5756_v18 = vpop.permute.xlu1 %5755  ;;  %v14488_v52 = vld [vmem:[#allocation3 + $0xdc] sm:$0xff] }
 0x49e   : > { %5798 = vst.msk [vmem:[#allocation4 + $0xf8] sm:$0xff] %vm17339_vm13, %v5756_v18  ;;  %v4530_v59 = vpop.permute.xlu0 %4529  ;;  %vm17346_vm13 = vcmp.ge.s32.totalorder %v12817_v46, 0  ;;  %v7647_v46 = vld [vmem:[#allocation3 + $0xd8] sm:$0xff] }
 0x49f   : > { %5313 = vrot.lane.b32.xlu1 %v17341_v9, %s17181_s23  ;;  %4568 = vst.msk [vmem:[#allocation4 + $0x168] sm:$0xff] %vm17342_vm5, %v4530_v59  ;;  %v7502_v38 = vsel %vm17346_vm13, %v14449_v11, 0.0  ;;  %vm17350_vm5 = vcmask 1048512   ;;  %v7646_v59 = vld [vmem:[#allocation3 + $0xd0] sm:$0xff]  ;;  %vm17353_vm13 = vcmask 392384  }
 0x4a0   : > { %5139 = vrot.lane.b32.xlu0 %v5097_v47, %s16922_s26  ;;  %v7530_v39 = vpack.c.bf16 %v14463_v37, %v7502_v38  ;;  %v14476_v47 = vpack.c.bf16 %v7647_v46, %v7646_v59 }
 0x4a1   : > { %v7243_v43 = vpop.permute.xlu1 %7242 }
 0x4a2   : > { %7288 = vst.msk [vmem:[#allocation4 + $0x68] sm:$0xff] %vm17344_vm15, %v7243_v43  ;;  %v7401_v58 = vpop.permute.xlu0 %7400  ;;  %vm16867_vm15 = vcmp.lt.s32.totalorder %v14456_v42, 16 }
 0x4a3   : > { %5441 = vrot.lane.b32.xlu1 %v14358_v63, %s17049_s19  ;;  %7447 = vst.msk [vmem:[#allocation4 + $0x40] sm:$0xff] %vm17345_vm14, %v7401_v58  ;;  %vm17352_vm14 = vcmp.ge.s32.totalorder %v17126_v26, 0  ;;  %v4696_v43 = vsel %vm16867_vm15, %v10869_v17, 0.0 }
 0x4a4   : > { %7406 = vrot.lane.b32.xlu0 %v7370_v34, %s17167_s30  ;;  %v6639_v12 = vsel %vm17352_vm14, %v14251_v54, 0.0 }
 0x4a5   : > { %v6380_v29 = vpop.permute.xlu1 %6379  ;;  %v6666_v34 = vpack.c.bf16 %v14310_v7, %v6639_v12  ;;  %v7027_v12 = vsel %vm1647_vm11, %v10869_v17, 0.0  ;;  %vm17364_vm11 = vcmp.lt.s32.totalorder %v13445_v61, 16  ;;  %v7807_v61 = vsel %vm1643_vm6, %v10869_v17, 0.0 }
 0x4a6   : > { %6424 = vst.msk [vmem:[#allocation4 + $0xb0] sm:$0xff] %vm6419_vm10, %v6380_v29  ;;  %v7561_v45 = vpop.permute.xlu0 %7560  ;;  %v10870_v29 = vld [vmem:[#allocation3 + $0xd2] sm:$0xff]  ;;  %v7187_v20 = vsel %vm17364_vm11, %v14488_v52, 0.0  ;;  %vm17368_vm6 = vcmp.lt.s32.totalorder %v17136_v2, 16  ;;  %v14546_v2 = vld [vmem:[#allocation3 + $0xe6] sm:$0xff] }
 0x4a7   : > { %4405 = vrot.lane.b32.xlu1 %v17349_v16, %s17193_s3  ;;  %7608 = vst.msk [vmem:[#allocation4 + $0x40] sm:$0xff] %vm17350_vm5, %v7561_v45  ;;  %vm17354_vm5 = vcmask 64512   ;;  %v4715_v57 = vpack.c.bf16 %v4696_v43, %v10870_v29  ;;  %v17356_v16 = vld [vmem:[#allocation82_spill] sm:$0xff]  ;;  %v7967_v28 = vsel %vm17368_vm6, %v14488_v52, 0.0  ;;  %vm17376_vm6 = vcmp.lt.s32.totalorder %v13646_v5, 16 }
 0x4a8   : > { %7609 = vst.msk [vmem:[#allocation4 + $0x48] sm:$0xff] %vm17351_vm9, %v7561_v45  ;;  %7566 = vrot.lane.b32.xlu0 %v7530_v39, %s16922_s26  ;;  %vm17355_vm9 = vcmask 785984   ;;  %v8093_v45 = vld [vmem:[#allocation4 + $0x38] sm:$0xff]  ;;  %vm17357_vm14 = vcmp.lt.s32.totalorder %v17356_v16, 16 }
 0x4a9   : > { %v6541_v18 = vpop.permute.xlu1 %6540  ;;  %v4920_v39 = vsel %vm17357_vm14, %v14488_v52, 0.0  ;;  %vm17363_vm14 = vcmask 589184  }
 0x4aa   : > { %6585 = vst.msk [vmem:[#allocation4 + $0xb0] sm:$0xff] %vm16878_vm3, %v6541_v18  ;;  %v6925_v9 = vpop.permute.xlu0 %6924  ;;  %v4939_v59 = vpack.c.bf16 %v4920_v39, %v14436_v10  ;;  %v5538_v39 = vsel %vm1653_vm7, %v14347_v31, 0.0 }
 0x4ab   : > { %4533 = vrot.lane.b32.xlu1 %v14358_v63, %s17043_s17  ;;  %6969 = vst.msk [vmem:[#allocation4 + $0x90] sm:$0xff] %vm17353_vm13, %v6925_v9  ;;  %vm17358_vm13 = vcmask 326784  }
 0x4ac   : > { %7710 = vrot.lane.b32.xlu0 %v14476_v47, %s17181_s23 }
 0x4ad   : > { %v5915_v58 = vpop.permute.xlu1 %5914 }
 0x4ae   : > { %5963 = vst.msk [vmem:[#allocation4 + $0xd0] sm:$0xff] %vm5952_vm4, %v5915_v58  ;;  %v4754_v54 = vpop.permute.xlu0 %4753  ;;  %v8094_v38 = vld [vmem:[#allocation4 + $0x40] sm:$0xff] }
 0x4af   : > { %5964 = vst.msk [vmem:[#allocation4 + $0xd8] sm:$0xff] %vm17354_vm5, %v5915_v58  ;;  %6703 = vrot.lane.b32.xlu1 %v6666_v34, %s17128_s18  ;;  %8718 = vmatprep.mubr.bf16.mxu1 %v8094_v38  ;;  %vm17359_vm5 = vcmask 982784   ;;  %v8111_v58 = vld [vmem:[#allocation4 + $0xc8] sm:$0xff] }
 0x4b0   : > { %4792 = vst.msk [vmem:[#allocation4 + $0x168] sm:$0xff] %vm17355_vm9, %v4754_v54  ;;  %4759 = vrot.lane.b32.xlu0 %v4715_v57, %s16920_s28  ;;  %8719 = vmatmul.mubr.bf16.gmra.mrb[68].mxu1 %v8093_v45  ;;  %vm17360_vm9 = vcmask 523584   ;;  %v17361_v54 = vld [vmem:[#allocation54_spill] sm:$0xff]  ;;  %v7052_v57 = vpack.c.bf16 %v7027_v12, %v10870_v29 }
 0x4b1   : > { %v5310_v46 = vpop.permute.xlu1 %5309  ;;  %v17362_v38 = vpack.c.bf16 %v17313_v33, %v17361_v54  ;;  %v7212_v33 = vpack.c.bf16 %v7187_v20, %v14436_v10  ;;  %v7994_v54 = vpack.c.bf16 %v7967_v28, %v14436_v10 }
 0x4b2   : > { %5350 = vst.msk [vmem:[#allocation4 + $0x120] sm:$0xff] %vm17358_vm13, %v5310_v46  ;;  %v4978_v18 = vpop.permute.xlu0 %4977  ;;  %vm17365_vm13 = vcmp.lt.s32.totalorder %v13362_v6, 16 }
 0x4b3   : > { %7708 = vrot.lane.b32.xlu1 %v14358_v63, %s17181_s23  ;;  %5016 = vst.msk [vmem:[#allocation4 + $0x168] sm:$0xff] %vm17359_vm5, %v4978_v18  ;;  %v5698_v12 = vsel %vm17365_vm13, %v14377_v8, 0.0  ;;  %vm17366_vm5 = vcmask 1048512   ;;  %vm17372_vm13 = vcmask 326784  }
 0x4b4   : > { %4983 = vrot.lane.b32.xlu0 %v4939_v59, %s17167_s30  ;;  %v5560_v59 = vpack.c.bf16 %v5538_v39, %v14369_v55 }
 0x4b5   : > { %v5438_v9 = vpop.permute.xlu1 %5437  ;;  %v8112_v43 = vld [vmem:[#allocation4 + $0xd0] sm:$0xff] }
 0x4b6   : > { %5478 = vst.msk [vmem:[#allocation4 + $0x120] sm:$0xff] %vm17360_vm9, %v5438_v9  ;;  %8589 = vmatprep.mubr.bf16.mxu0 %v8112_v43  ;;  %v7085_v34 = vpop.permute.xlu0 %7084  ;;  %vm17367_vm9 = vcmask 130048   ;;  %v5720_v43 = vpack.c.bf16 %v5698_v12, %v14310_v7  ;;  %v5381_v12 = vld [vmem:[#allocation3 + $0xe0] sm:$0xff] }
 0x4b7   : > { %6095 = vrot.lane.b32.xlu1 %v17362_v38, %s17131_s27  ;;  %8590 = vmatmul.mubr.bf16.gmra.mrb[52].mxu0 %v8111_v58  ;;  %7129 = vst.msk [vmem:[#allocation4 + $0x90] sm:$0xff] %vm17363_vm14, %v7085_v34  ;;  %v14537_v58 = vld [vmem:[#allocation3 + $0xde] sm:$0xff]  ;;  %vm17369_vm14 = vcmask 392384   ;;  %v17370_v38 = vld [vmem:[#allocation27_spill] sm:$0xff] }
 0x4b8   : > { %7090 = vrot.lane.b32.xlu0 %v7052_v57, %s17043_s17  ;;  %vm17371_vm11 = vcmp.ge.s32.totalorder %v17370_v38, 0 }
 0x4b9   : > { %v6700_v45 = vpop.permute.xlu1 %6699  ;;  %v5253_v57 = vsel %vm17371_vm11, %v14537_v58, 0.0  ;;  %vm17378_vm11 = vcmp.ge.s32.totalorder %v17126_v26, 0 }
 0x4ba   : > { %6745 = vst.msk [vmem:[#allocation4 + $0x88] sm:$0xff] %vm6741_vm1, %v6700_v45  ;;  %v14516_v46 = vpop.permute.xlu0 %8024  ;;  %v7344_v28 = vsel %vm17378_vm11, %v14488_v52, 0.0  ;;  %vm17387_vm11 = vcmp.ge.s32.totalorder %v13375_v21, 0 }
 0x4bb   : > { %6224 = vrot.lane.b32.xlu1 %v14358_v63, %s17145_s1  ;;  %v7834_v63 = vpack.c.bf16 %v7807_v61, %v10870_v29  ;;  %v7805_v29 = vsel %vm1641_vm0, %v14347_v31, 0.0  ;;  %vm17373_vm0 = vcmp.lt.s32.totalorder %v13544_v40, 16  ;;  %v5382_v61 = vld [vmem:[#allocation3 + $0xe8] sm:$0xff] }
 0x4bc   : > { %7250 = vrot.lane.b32.xlu0 %v7212_v33, %s16920_s28  ;;  %v7833_v45 = vpack.c.bf16 %v7805_v29, %v14369_v55  ;;  %v6322_v60 = vsel %vm17373_vm0, %v14347_v31, 0.0  ;;  %v5274_v33 = vpack.c.bf16 %v14546_v2, %v5253_v57  ;;  %v6483_v31 = vsel %vm17376_vm6, %v14377_v8, 0.0  ;;  %v17384_v57 = vld [vmem:[#allocation42_spill] sm:$0xff] }
 0x4bd   : > { %v6092_v18 = vpop.permute.xlu1 %6091  ;;  %vm17380_vm0 = vcmp.ge.s32.totalorder %v12947_v15, 0  ;;  %vm17383_vm6 = vcmp.ge.s32.totalorder %v13091_v4, 0 }
 0x4be   : > { %6135 = vst.msk [vmem:[#allocation4 + $0xd8] sm:$0xff] %vm6129_vm8, %v6092_v18  ;;  %v5136_v9 = vpop.permute.xlu0 %5135 }
 0x4bf   : > { %5601 = vrot.lane.b32.xlu1 %v5560_v59, %s16921_s25  ;;  %5183 = vst.msk [vmem:[#allocation4 + $0x140] sm:$0xff] %vm17366_vm5, %v5136_v9  ;;  %vm17374_vm5 = vcmask 589184   ;;  %v6346_v59 = vpack.c.bf16 %v6322_v60, %v14369_v55  ;;  %v5251_v60 = vsel %vm17387_vm11, %v14449_v11, 0.0  ;;  %vm17393_vm11 = vcmask 785984  }
 0x4c0   : > { %5184 = vst.msk [vmem:[#allocation4 + $0x148] sm:$0xff] %vm17367_vm9, %v5136_v9  ;;  %7870 = vrot.lane.b32.xlu0 %v7834_v63, %s17049_s19  ;;  %vm17375_vm9 = vcmask 720384   ;;  %v14567_v63 = vpack.c.bf16 %v5382_v61, %v5381_v12 }
 0x4c1   : > { %v6221_v17 = vpop.permute.xlu1 %6220 }
 0x4c2   : > { %6264 = vst.msk [vmem:[#allocation4 + $0xd8] sm:$0xff] %vm6258_vm12, %v6221_v17  ;;  %v4404_v34 = vpop.permute.xlu0 %4403  ;;  %v6507_v17 = vpack.c.bf16 %v6483_v31, %v14310_v7  ;;  %v7504_v7 = vsel %vm17383_vm6, %v14537_v58, 0.0 }
 0x4c3   : > { %5761 = vrot.lane.b32.xlu1 %v5720_v43, %s17037_s24  ;;  %4441 = vst.msk [vmem:[#allocation4 + $0x190] sm:$0xff] %vm17369_vm14, %v4404_v34  ;;  %vm17377_vm14 = vcmask 982784   ;;  %v5856_v43 = vsel %vm17380_vm0, %v14377_v8, 0.0  ;;  %v14581_v34 = vld [vmem:[#allocation3 + $0xe4] sm:$0xff]  ;;  %v7531_v4 = vpack.c.bf16 %v14546_v2, %v7504_v7  ;;  %vm17389_vm0 = vcmp.lt.s32.totalorder %v17320_v24, 16 }
 0x4c4   : > { %8030 = vrot.lane.b32.xlu0 %v7994_v54, %s16921_s25  ;;  %v7371_v26 = vpack.c.bf16 %v14581_v34, %v7344_v28  ;;  %v5880_v8 = vpack.c.bf16 %v14436_v10, %v5856_v43  ;;  %v14609_v28 = vadd.s32 4, %v17384_v57  ;;  %v8098_v7 = vld [vmem:[#allocation4 + $0x60] sm:$0xff] }
 0x4c5   : > { %v7705_v20 = vpop.permute.xlu1 %7704 }
 0x4c6   : > { %7751 = vst.msk [vmem:[#allocation4 + $0x48] sm:$0xff] %vm17372_vm13, %v7705_v20  ;;  %v4532_v39 = vpop.permute.xlu0 %4531  ;;  %vm17379_vm13 = vcmask 917184   ;;  %v14592_v20 = vadd.s32 2, %v17384_v57  ;;  %vm1789_vm6 = vcmp.lt.s32.totalorder %v14609_v28, 16  ;;  %v14620_v57 = vld [vmem:[#allocation3 + $0xec] sm:$0xff]  ;;  %v7792_v28 = vld [vmem:[#allocation3 + $0x162] sm:$0xff] }
 0x4c7   : > { %7868 = vrot.lane.b32.xlu1 %v7833_v45, %s17049_s19  ;;  %4569 = vst.msk [vmem:[#allocation4 + $0x190] sm:$0xff] %vm17374_vm5, %v4532_v39  ;;  %vm17381_vm5 = vcmask 1048512  }
 0x4c8   : > { %5317 = vrot.lane.b32.xlu0 %v5274_v33, %s17181_s23  ;;  %17385 = vst [vmem:[#allocation23_spill] sm:$0xff] %v14592_v20 }
 0x4c9   : > { %v5598_v18 = vpop.permute.xlu1 %5597 }
 0x4ca   : > { %5638 = vst.msk [vmem:[#allocation4 + $0x120] sm:$0xff] %vm17375_vm9, %v5598_v18  ;;  %v7403_v9 = vpop.permute.xlu0 %7402  ;;  %vm17382_vm9 = vcmask 130048   ;;  %v10873_v18 = vld [vmem:[#allocation3 + $0xea] sm:$0xff] }
 0x4cb   : > { %6385 = vrot.lane.b32.xlu1 %v6346_v59, %s17108_s20  ;;  %7448 = vst.msk [vmem:[#allocation4 + $0x68] sm:$0xff] %vm17377_vm14, %v7403_v9  ;;  %vm17386_vm14 = vcmask 785984   ;;  %v5542_v59 = vsel %vm17389_vm0, %v10873_v18, 0.0  ;;  %v5273_v9 = vpack.c.bf16 %v14463_v37, %v5251_v60  ;;  %vm17395_vm0 = vcmask 720384  }
 0x4cc   : > { %5445 = vrot.lane.b32.xlu0 %v14567_v63, %s17049_s19 }
 0x4cd   : > { %v5758_v55 = vpop.permute.xlu1 %5757 }
 0x4ce   : > { %5799 = vst.msk [vmem:[#allocation4 + $0x120] sm:$0xff] %vm17379_vm13, %v5758_v55  ;;  %v7563_v29 = vpop.permute.xlu0 %7562  ;;  %vm17388_vm13 = vcmask 392384  }
 0x4cf   : > { %6546 = vrot.lane.b32.xlu1 %v6507_v17, %s17160_s0  ;;  %7610 = vst.msk [vmem:[#allocation4 + $0x68] sm:$0xff] %vm17381_vm5, %v7563_v29  ;;  %vm1661_vm5 = vcmp.lt.s32.totalorder %v14592_v20, 16 }
 0x4d0   : > { %7611 = vst.msk [vmem:[#allocation4 + $0x70] sm:$0xff] %vm17382_vm9, %v7563_v29  ;;  %7408 = vrot.lane.b32.xlu0 %v7371_v26, %s17167_s30  ;;  %v10874_v29 = vld [vmem:[#allocation3 + $0xe2] sm:$0xff]  ;;  %vm17390_vm9 = vcmask 326784  }
 0x4d1   : > { %v7245_v54 = vpop.permute.xlu1 %7244  ;;  %v10375_v45 = vpop.f32.mrb[32].mxu0  ;;  %v5562_v26 = vpack.c.bf16 %v5542_v59, %v10874_v29 }
 0x4d2   : > { %7289 = vst.msk [vmem:[#allocation4 + $0x90] sm:$0xff] %vm17386_vm14, %v7245_v54  ;;  %v6927_v39 = vpop.permute.xlu0 %6926  ;;  %v10376_v33 = vpop.f32.mrb[33].mxu0  ;;  %v4698_v54 = vsel %vm1661_vm5, %v10873_v18, 0.0 }
 0x4d3   : > { %5920 = vrot.lane.b32.xlu1 %v5880_v8, %s17171_s2  ;;  %6970 = vst.msk [vmem:[#allocation4 + $0xb8] sm:$0xff] %vm17388_vm13, %v6927_v39  ;;  %v14601_v61 = vadd.f32 %v10376_v33, %v10375_v45  ;;  %v10378_v10 = vpop.f32.mrb[34].mxu0  ;;  %v17391_v45 = vld [vmem:[#allocation18_spill] sm:$0xff]  ;;  %v4716_v33 = vpack.c.bf16 %v4698_v54, %v10874_v29  ;;  %vm17394_vm13 = vcmask 523584  }
 0x4d4   : > { %7568 = vrot.lane.b32.xlu0 %v7531_v4, %s16922_s26  ;;  %v10379_v12 = vpop.f32.mrb[35].mxu0  ;;  %vm17392_vm14 = vcmp.ge.s32.totalorder %v17391_v45, 0  ;;  %v4922_v4 = vsel %vm1789_vm6, %v14620_v57, 0.0  ;;  %v14661_v54 = vld [vmem:[#allocation3 + $0xee] sm:$0xff] }
 0x4d5   : > { %v6382_v31 = vpop.permute.xlu1 %6381  ;;  %v14611_v55 = vadd.f32 %v10379_v12, %v10378_v10  ;;  %v4343_v60 = vsel %vm17392_vm14, %v14449_v11, 0.0  ;;  %v4940_v12 = vpack.c.bf16 %v4922_v4, %v14581_v34  ;;  %vm17397_vm14 = vcmp.lt.s32.totalorder %v13544_v40, 16 }
 0x4d6   : > { %6425 = vst.msk [vmem:[#allocation4 + $0xd8] sm:$0xff] %vm6419_vm10, %v6382_v31  ;;  %v7707_v17 = vpop.permute.xlu0 %7706  ;;  %v8099_v43 = vld [vmem:[#allocation4 + $0x68] sm:$0xff]  ;;  %v4363_v59 = vpack.c.bf16 %v14463_v37, %v4343_v60  ;;  %v7029_v31 = vsel %vm17397_vm14, %v10873_v18, 0.0  ;;  %vm17402_vm14 = vcmask 523584  }
 0x4d7   : > { %5315 = vrot.lane.b32.xlu1 %v5273_v9, %s17181_s23  ;;  %7752 = vst.msk [vmem:[#allocation4 + $0x70] sm:$0xff] %vm17390_vm9, %v7707_v17  ;;  %8726 = vmatprep.mubr.bf16.mxu1 %v8099_v43  ;;  %vm17396_vm9 = vcmask 982784  }
 0x4d8   : > { %5605 = vrot.lane.b32.xlu0 %v5562_v26, %s16921_s25  ;;  %8727 = vmatmul.mubr.bf16.gmra.mrb[72].mxu1 %v8098_v7 }
 0x4d9   : > { %v6543_v8 = vpop.permute.xlu1 %6542 }
 0x4da   : > { %6586 = vst.msk [vmem:[#allocation4 + $0xd8] sm:$0xff] %vm16878_vm3, %v6543_v8  ;;  %v4756_v39 = vpop.permute.xlu0 %4755  ;;  %v8116_v8 = vld [vmem:[#allocation4 + $0xf0] sm:$0xff] }
 0x4db   : > { %5443 = vrot.lane.b32.xlu1 %v14476_v47, %s17049_s19  ;;  %4793 = vst.msk [vmem:[#allocation4 + $0x190] sm:$0xff] %vm17393_vm11, %v4756_v39  ;;  %vm17398_vm11 = vcmask 64512   ;;  %v17405_v39 = vld [vmem:[#allocation55_spill] sm:$0xff] }
 0x4dc   : > { %4761 = vrot.lane.b32.xlu0 %v4716_v33, %s16920_s28  ;;  %v17406_v33 = vld [vmem:[#allocation58_spill] sm:$0xff] }
 0x4dd   : > { %v7865_v10 = vpop.permute.xlu1 %7864  ;;  %v17407_v4 = vpack.c.bf16 %v17405_v39, %v17406_v33 }
 0x4de   : > { %7911 = vst.msk [vmem:[#allocation4 + $0x48] sm:$0xff] %vm17394_vm13, %v7865_v10  ;;  %v4980_v11 = vpop.permute.xlu0 %4979  ;;  %vm17399_vm13 = vcmask 589184   ;;  %v14670_v10 = vld [vmem:[#allocation3 + $0xf6] sm:$0xff] }
 0x4df   : > { %8071 = vst.msk [vmem:[#allocation4 + $0x48] sm:$0xff] %vm17395_vm0, %v14516_v46  ;;  %4407 = vrot.lane.b32.xlu1 %v4363_v59, %s17193_s3  ;;  %v7053_v46 = vpack.c.bf16 %v7029_v31, %v10874_v29  ;;  %vm17400_vm0 = vcmp.lt.s32.totalorder %v13646_v5, 16  ;;  %v17410_v31 = vld [vmem:[#allocation56_spill] sm:$0xff] }
 0x4e0   : > { %5017 = vst.msk [vmem:[#allocation4 + $0x190] sm:$0xff] %vm17396_vm9, %v4980_v11  ;;  %4985 = vrot.lane.b32.xlu0 %v4940_v12, %s17167_s30  ;;  %v7189_v17 = vsel %vm17400_vm0, %v14620_v57, 0.0  ;;  %vm17401_vm9 = vcmask 326784   ;;  %vm17408_vm0 = vcmask 720384  }
 0x4e1   : > { %v5917_v9 = vpop.permute.xlu1 %5916  ;;  %v7213_v43 = vpack.c.bf16 %v7189_v17, %v14581_v34  ;;  %v5384_v17 = vld [vmem:[#allocation3 + $0xf8] sm:$0xff] }
 0x4e2   : > { %5965 = vst.msk [vmem:[#allocation4 + $0xf8] sm:$0xff] %vm5952_vm4, %v5917_v9  ;;  %v7087_v37 = vpop.permute.xlu0 %7086 }
 0x4e3   : > { %5966 = vst.msk [vmem:[#allocation4 + $0x100] sm:$0xff] %vm17398_vm11, %v5917_v9  ;;  %4535 = vrot.lane.b32.xlu1 %v14476_v47, %s17043_s17  ;;  %vm17403_vm11 = vcmp.lt.s32.totalorder %v17210_v50, 16  ;;  %v17411_v9 = vld [vmem:[#allocation59_spill] sm:$0xff] }
 0x4e4   : > { %7130 = vst.msk [vmem:[#allocation4 + $0xb8] sm:$0xff] %vm17399_vm13, %v7087_v37  ;;  %7092 = vrot.lane.b32.xlu0 %v7053_v46, %s17043_s17  ;;  %v7969_v29 = vsel %vm17403_vm11, %v14620_v57, 0.0  ;;  %vm17404_vm13 = vmmov %vm17402_vm14  ;;  %v17412_v37 = vpack.c.bf16 %v17410_v31, %v17411_v9  ;;  %vm17414_vm11 = vcmask 130048   ;;  %v14705_v9 = vld [vmem:[#allocation3 + $0xf4] sm:$0xff] }
 0x4e5   : > { %v5312_v40 = vpop.permute.xlu1 %5311  ;;  %v7995_v50 = vpack.c.bf16 %v7969_v29, %v14581_v34 }
 0x4e6   : > { %5351 = vst.msk [vmem:[#allocation4 + $0x148] sm:$0xff] %vm17401_vm9, %v5312_v40  ;;  %v7867_v18 = vpop.permute.xlu0 %7866  ;;  %vm17409_vm9 = vcmp.ge.s32.totalorder %v17391_v45, 0 }
 0x4e7   : > { %6930 = vrot.lane.b32.xlu1 %v14476_v47, %s17193_s3  ;;  %7912 = vst.msk [vmem:[#allocation4 + $0x70] sm:$0xff] %vm17402_vm14, %v7867_v18  ;;  %v5255_v59 = vsel %vm17409_vm9, %v14661_v54, 0.0  ;;  %vm17413_vm14 = vcmask 1048512  }
 0x4e8   : > { %7252 = vrot.lane.b32.xlu0 %v7213_v43, %s16920_s28  ;;  %v5275_v46 = vpack.c.bf16 %v14670_v10, %v5255_v59  ;;  %v5383_v43 = vld [vmem:[#allocation3 + $0xf0] sm:$0xff]  ;;  %vm17420_vm9 = vmmov %vm17413_vm14 }
 0x4e9   : > { %v5440_v26 = vpop.permute.xlu1 %5439  ;;  %v8117_v7 = vld [vmem:[#allocation4 + $0xf8] sm:$0xff] }
 0x4ea   : > { %5479 = vst.msk [vmem:[#allocation4 + $0x148] sm:$0xff] %vm17404_vm13, %v5440_v26  ;;  %8597 = vmatprep.mubr.bf16.mxu0 %v8117_v7  ;;  %v8027_v60 = vpop.permute.xlu0 %8026  ;;  %v14688_v7 = vpack.c.bf16 %v5384_v17, %v5383_v43  ;;  %vm17415_vm13 = vcmask 982784  }
 0x4eb   : > { %6705 = vrot.lane.b32.xlu1 %v17407_v4, %s17128_s18  ;;  %8598 = vmatmul.mubr.bf16.gmra.mrb[56].mxu0 %v8116_v8  ;;  %8072 = vst.msk [vmem:[#allocation4 + $0x70] sm:$0xff] %vm17408_vm0, %v8027_v60  ;;  %vm17416_vm0 = vcmp.ge.s32.totalorder %v12814_v30, 0 }
 0x4ec   : > { %8032 = vrot.lane.b32.xlu0 %v7995_v50, %s16921_s25  ;;  %v7346_v33 = vsel %vm17416_vm0, %v14620_v57, 0.0  ;;  %vm17424_vm0 = vcmp.ge.s32.totalorder %v17306_v23, 0 }
 0x4ed   : > { %v6702_v11 = vpop.permute.xlu1 %6701  ;;  %v7372_v30 = vpack.c.bf16 %v14705_v9, %v7346_v33  ;;  %v5858_v17 = vsel %vm17424_vm0, %v14488_v52, 0.0 }
 0x4ee   : > { %6746 = vst.msk [vmem:[#allocation4 + $0xb0] sm:$0xff] %vm6741_vm1, %v6702_v11  ;;  %v5138_v12 = vpop.permute.xlu0 %5137  ;;  %v17417_v11 = vld [vmem:[#allocation37_spill] sm:$0xff]  ;;  %v5881_v33 = vpack.c.bf16 %v14581_v34, %v5858_v17 }
 0x4ef   : > { %6097 = vrot.lane.b32.xlu1 %v17412_v37, %s17131_s27  ;;  %5185 = vst.msk [vmem:[#allocation4 + $0x168] sm:$0xff] %vm17413_vm14, %v5138_v12  ;;  %vm17421_vm14 = vmmov %vm17414_vm11 }
 0x4f0   : > { %5186 = vst.msk [vmem:[#allocation4 + $0x170] sm:$0xff] %vm17414_vm11, %v5138_v12  ;;  %5319 = vrot.lane.b32.xlu0 %v5275_v46, %s17181_s23  ;;  %v17418_v12 = vld [vmem:[#allocation29_spill] sm:$0xff]  ;;  %vm17422_vm11 = vcmp.ge.s32.totalorder %v12799_v62, 0 }
 0x4f1   : > { %v6094_v40 = vpop.permute.xlu1 %6093  ;;  %v10381_v18 = vpop.f32.mrb[36].mxu0  ;;  %v17419_v31 = vpack.c.bf16 %v17417_v11, %v17418_v12  ;;  %v7506_v37 = vsel %vm17422_vm11, %v14661_v54, 0.0  ;;  %v10876_v62 = vld [vmem:[#allocation3 + $0xfa] sm:$0xff] }
 0x4f2   : > { %6136 = vst.msk [vmem:[#allocation4 + $0x100] sm:$0xff] %vm6129_vm8, %v6094_v40  ;;  %v7405_v29 = vpop.permute.xlu0 %7404  ;;  %v10382_v26 = vpop.f32.mrb[37].mxu0 }
 0x4f3   : > { %6226 = vrot.lane.b32.xlu1 %v14476_v47, %s17145_s1  ;;  %7449 = vst.msk [vmem:[#allocation4 + $0x90] sm:$0xff] %vm17415_vm13, %v7405_v29  ;;  %v14691_v8 = vadd.f32 %v10382_v26, %v10381_v18  ;;  %v10384_v60 = vpop.f32.mrb[38].mxu0  ;;  %vm17423_vm13 = vcmask 720384   ;;  %v17425_v18 = vld [vmem:[#allocation60_spill] sm:$0xff]  ;;  %v7532_v29 = vpack.c.bf16 %v14670_v10, %v7506_v37  ;;  %v5544_v26 = vsel %vm16867_vm15, %v10876_v62, 0.0  ;;  %v8103_v37 = vld [vmem:[#allocation4 + $0x88] sm:$0xff] }
 0x4f4   : > { %5447 = vrot.lane.b32.xlu0 %v14688_v7, %s17049_s19  ;;  %v10385_v4 = vpop.f32.mrb[39].mxu0  ;;  %v17426_v43 = vpack.c.bf16 %v17425_v18, %v17405_v39  ;;  %v17430_v39 = vld [vmem:[#allocation51_spill] sm:$0xff]  ;;  %vm17453_vm15 = vcmask 130048  }
 0x4f5   : > { %v6223_v50 = vpop.permute.xlu1 %6222  ;;  %v14698_v59 = vadd.f32 %v10385_v4, %v10384_v60  ;;  %v17428_v4 = vld [vmem:[#allocation43_spill] sm:$0xff]  ;;  %vm17431_vm11 = vcmp.ge.s32.totalorder %v17430_v39, 0 }
 0x4f6   : > { %6265 = vst.msk [vmem:[#allocation4 + $0x100] sm:$0xff] %vm6258_vm12, %v6223_v50  ;;  %v7565_v47 = vpop.permute.xlu0 %7564  ;;  %v14729_v50 = vadd.s32 4, %v17428_v4 }
 0x4f7   : > { %5603 = vrot.lane.b32.xlu1 %v17419_v31, %s16921_s25  ;;  %7612 = vst.msk [vmem:[#allocation4 + $0x90] sm:$0xff] %vm17420_vm9, %v7565_v47  ;;  %vm17427_vm9 = vcmask 392384   ;;  %v10877_v31 = vld [vmem:[#allocation3 + $0xf2] sm:$0xff] }
 0x4f8   : > { %7613 = vst.msk [vmem:[#allocation4 + $0x98] sm:$0xff] %vm17421_vm14, %v7565_v47  ;;  %7410 = vrot.lane.b32.xlu0 %v7372_v30, %s17167_s30  ;;  %vm17429_vm14 = vcmask 917184   ;;  %v5077_v47 = vsel %vm17431_vm11, %v14488_v52, 0.0  ;;  %v5563_v30 = vpack.c.bf16 %v5544_v26, %v10877_v31  ;;  %vm1791_vm0 = vcmp.lt.s32.totalorder %v14729_v50, 16  ;;  %v14750_v26 = vld [vmem:[#allocation3 + $0xfc] sm:$0xff] }
 0x4f9   : > { %v5600_v46 = vpop.permute.xlu1 %5599  ;;  %v5098_v18 = vpack.c.bf16 %v14581_v34, %v5077_v47  ;;  %vm17436_vm11 = vcmask 589184  }
 0x4fa   : > { %5639 = vst.msk [vmem:[#allocation4 + $0x148] sm:$0xff] %vm17423_vm13, %v5600_v46  ;;  %v6929_v40 = vpop.permute.xlu0 %6928  ;;  %v17432_v46 = vld [vmem:[#allocation84_spill] sm:$0xff] }
 0x4fb   : > { %5763 = vrot.lane.b32.xlu1 %v17426_v43, %s17037_s24  ;;  %6971 = vst.msk [vmem:[#allocation4 + $0xe0] sm:$0xff] %vm17427_vm9, %v6929_v40  ;;  %vm17433_vm13 = vcmp.lt.s32.totalorder %v17432_v46, 16  ;;  %vm17434_vm9 = vcmask 785984  }
 0x4fc   : > { %7570 = vrot.lane.b32.xlu0 %v7532_v29, %s16922_s26  ;;  %v4700_v17 = vsel %vm17433_vm13, %v10876_v62, 0.0  ;;  %vm17437_vm13 = vmmov %vm17434_vm9 }
 0x4fd   : > { %v5760_v60 = vpop.permute.xlu1 %5759  ;;  %v4717_v29 = vpack.c.bf16 %v4700_v17, %v10877_v31 }
 0x4fe   : > { %5800 = vst.msk [vmem:[#allocation4 + $0x148] sm:$0xff] %vm17429_vm14, %v5760_v60  ;;  %v14735_v11 = vpop.permute.xlu0 %4757  ;;  %v8104_v12 = vld [vmem:[#allocation4 + $0x90] sm:$0xff]  ;;  %vm17435_vm14 = vcmp.ge.s32.totalorder %v13684_v36, 0  ;;  %v4924_v60 = vsel %vm1791_vm0, %v14750_v26, 0.0 }
 0x4ff   : > { %5922 = vrot.lane.b32.xlu1 %v5881_v33, %s17171_s2  ;;  %8734 = vmatprep.mubr.bf16.mxu1 %v8104_v12  ;;  %v4345_v52 = vsel %vm17435_vm14, %v14537_v58, 0.0  ;;  %v4941_v58 = vpack.c.bf16 %v4924_v60, %v14705_v9  ;;  %v7031_v12 = vsel %vm1651_vm2, %v10876_v62, 0.0 }
 0x500   : > { %5607 = vrot.lane.b32.xlu0 %v5563_v30, %s16921_s25  ;;  %8735 = vmatmul.mubr.bf16.gmra.mrb[76].mxu1 %v8103_v37  ;;  %v4364_v4 = vpack.c.bf16 %v14546_v2, %v4345_v52  ;;  %v14764_v37 = vld [vmem:[#allocation3 + $0xfe] sm:$0xff]  ;;  %v7054_v17 = vpack.c.bf16 %v7031_v12, %v10877_v31 }
 0x501   : > { %v7247_v40 = vpop.permute.xlu1 %7246  ;;  %v17441_v12 = vld [vmem:[#allocation61_spill] sm:$0xff] }
 0x502   : > { %7290 = vst.msk [vmem:[#allocation4 + $0xb8] sm:$0xff] %vm17434_vm9, %v7247_v40  ;;  %v14747_v43 = vpop.permute.xlu0 %4981  ;;  %v14770_v40 = vld [vmem:[#allocation3 + $0x106] sm:$0xff]  ;;  %vm17438_vm9 = vmmov %vm17435_vm14  ;;  %vm17439_vm14 = vcmask 64512  }
 0x503   : > { %5141 = vrot.lane.b32.xlu1 %v5098_v18, %s16922_s26  ;;  %v5257_v62 = vsel %vm17438_vm9, %v14764_v37, 0.0  ;;  %vm17445_vm9 = vcmask 130048  }
 0x504   : > { %4763 = vrot.lane.b32.xlu0 %v4717_v29, %s16920_s28  ;;  %v5276_v31 = vpack.c.bf16 %v14770_v40, %v5257_v62  ;;  %v5386_v29 = vld [vmem:[#allocation3 + $0x108] sm:$0xff] }
 0x505   : > { %v6384_v33 = vpop.permute.xlu1 %6383 }
 0x506   : > { %6426 = vst.msk [vmem:[#allocation4 + $0x100] sm:$0xff] %vm6419_vm10, %v6384_v33  ;;  %v7089_v47 = vpop.permute.xlu0 %7088 }
 0x507   : > { %4409 = vrot.lane.b32.xlu1 %v4364_v4, %s17193_s3  ;;  %7131 = vst.msk [vmem:[#allocation4 + $0xe0] sm:$0xff] %vm17436_vm11, %v7089_v47  ;;  %vm17440_vm11 = vcmask 326784   ;;  %v5385_v4 = vld [vmem:[#allocation3 + $0x100] sm:$0xff] }
 0x508   : > { %4987 = vrot.lane.b32.xlu0 %v4941_v58, %s17167_s30 }
 0x509   : > { %v6545_v30 = vpop.permute.xlu1 %6544 }
 0x50a   : > { %6587 = vst.msk [vmem:[#allocation4 + $0x100] sm:$0xff] %vm16878_vm3, %v6545_v30  ;;  %v7249_v2 = vpop.permute.xlu0 %7248  ;;  %v17442_v30 = vld [vmem:[#allocation62_spill] sm:$0xff] }
 0x50b   : > { %4537 = vrot.lane.b32.xlu1 %v14567_v63, %s17043_s17  ;;  %7291 = vst.msk [vmem:[#allocation4 + $0xe0] sm:$0xff] %vm17437_vm13, %v7249_v2  ;;  %v17443_v2 = vpack.c.bf16 %v17441_v12, %v17442_v30  ;;  %vm17444_vm13 = vcmask 1048512  }
 0x50c   : > { %7094 = vrot.lane.b32.xlu0 %v7054_v17, %s17043_s17  ;;  %v14789_v17 = vpack.c.bf16 %v5386_v29, %v5385_v4 }
 0x50d   : > { %v5919_v18 = vpop.permute.xlu1 %5918 }
 0x50e   : > { %5967 = vst.msk [vmem:[#allocation4 + $0x120] sm:$0xff] %vm5952_vm4, %v5919_v18  ;;  %v14778_v52 = vpop.permute.xlu0 %8028 }
 0x50f   : > { %5968 = vst.msk [vmem:[#allocation4 + $0x128] sm:$0xff] %vm17439_vm14, %v5919_v18  ;;  %6932 = vrot.lane.b32.xlu1 %v14567_v63, %s17193_s3  ;;  %vm17446_vm14 = vcmp.ge.s32.totalorder %v12913_v25, 0 }
 0x510   : > { %5321 = vrot.lane.b32.xlu0 %v5276_v31, %s17181_s23  ;;  %v14795_v31 = vld [vmem:[#allocation3 + $0x104] sm:$0xff] }
 0x511   : > { %v5314_v60 = vpop.permute.xlu1 %5313 }
 0x512   : > { %5352 = vst.msk [vmem:[#allocation4 + $0x170] sm:$0xff] %vm17440_vm11, %v5314_v60  ;;  %v10387_v33 = vpop.f32.mrb[40].mxu0  ;;  %v5140_v47 = vpop.permute.xlu0 %5139  ;;  %v7348_v60 = vsel %vm17446_vm14, %v14750_v26, 0.0  ;;  %vm17447_vm11 = vcmask 523584   ;;  %vm17450_vm14 = vcmp.ge.s32.totalorder %v13108_v49, 0 }
 0x513   : > { %v10388_v58 = vpop.f32.mrb[41].mxu0  ;;  %6707 = vrot.lane.b32.xlu1 %v17443_v2, %s17128_s18  ;;  %5187 = vst.msk [vmem:[#allocation4 + $0x190] sm:$0xff] %vm17444_vm13, %v5140_v47  ;;  %vm17448_vm13 = vcmp.lt.s32.totalorder %v14350_v0, 16  ;;  %v7373_v25 = vpack.c.bf16 %v14795_v31, %v7348_v60  ;;  %v7508_v2 = vsel %vm17450_vm14, %v14764_v37, 0.0  ;;  %v10879_v60 = vld [vmem:[#allocation3 + $0x10a] sm:$0xff]  ;;  %vm17456_vm14 = vcmp.ge.s32.totalorder %v17337_v32, 0 }
 0x514   : > { %5188 = vst.msk [vmem:[#allocation4 + $0x198] sm:$0xff] %vm17445_vm9, %v5140_v47  ;;  %v14793_v62 = vadd.f32 %v10388_v58, %v10387_v33  ;;  %v10390_v18 = vpop.f32.mrb[42].mxu0  ;;  %5449 = vrot.lane.b32.xlu0 %v14789_v17, %s17049_s19  ;;  %v8121_v33 = vld [vmem:[#allocation4 + $0x118] sm:$0xff]  ;;  %v5702_v47 = vsel %vm17448_vm13, %v14620_v57, 0.0  ;;  %vm17449_vm9 = vcmask 982784   ;;  %vm17452_vm13 = vcmask 1048512  }
 0x515   : > { %v10391_v12 = vpop.f32.mrb[43].mxu0  ;;  %v5442_v30 = vpop.permute.xlu1 %5441  ;;  %v8122_v29 = vld [vmem:[#allocation4 + $0x120] sm:$0xff]  ;;  %v5546_v49 = vsel %vm1661_vm5, %v10879_v60, 0.0 }
 0x516   : > { %v14802_v4 = vadd.f32 %v10391_v12, %v10390_v18  ;;  %5480 = vst.msk [vmem:[#allocation4 + $0x170] sm:$0xff] %vm17447_vm11, %v5442_v30  ;;  %8605 = vmatprep.mubr.bf16.mxu0 %v8122_v29  ;;  %v7407_v58 = vpop.permute.xlu0 %7406  ;;  %v5722_v12 = vpack.c.bf16 %v5702_v47, %v14581_v34  ;;  %vm17451_vm11 = vcmask 392384   ;;  %v5860_v47 = vsel %vm17456_vm14, %v14620_v57, 0.0 }
 0x517   : > { %7712 = vrot.lane.b32.xlu1 %v14567_v63, %s17181_s23  ;;  %8606 = vmatmul.mubr.bf16.gmra.mrb[60].mxu0 %v8121_v33  ;;  %7450 = vst.msk [vmem:[#allocation4 + $0xb8] sm:$0xff] %vm17449_vm9, %v7407_v58  ;;  %v7533_v63 = vpack.c.bf16 %v14770_v40, %v7508_v2  ;;  %v17454_v33 = vld [vmem:[#allocation11_spill] sm:$0xff]  ;;  %vm17455_vm9 = vcmask 589184   ;;  %v17459_v2 = vld [vmem:[#allocation38_spill] sm:$0xff] }
 0x518   : > { %7412 = vrot.lane.b32.xlu0 %v7373_v25, %s17167_s30  ;;  %v14826_v34 = vadd.s32 4, %v17454_v33  ;;  %v17458_v25 = vld [vmem:[#allocation68_spill] sm:$0xff]  ;;  %v14846_v33 = vld [vmem:[#allocation3 + $0x10c] sm:$0xff] }
 0x519   : > { %v4406_v18 = vpop.permute.xlu1 %4405 }
 0x51a   : > { %4442 = vst.msk [vmem:[#allocation4 + $0x1b8] sm:$0xff] %vm17451_vm11, %v4406_v18  ;;  %v7567_v30 = vpop.permute.xlu0 %7566  ;;  %vm17457_vm11 = vcmask 785984   ;;  %v17460_v18 = vpack.c.bf16 %v17458_v25, %v17459_v2  ;;  %vm1793_vm14 = vcmp.lt.s32.totalorder %v14826_v34, 16  ;;  %v8108_v2 = vld [vmem:[#allocation4 + $0xb0] sm:$0xff] }
 0x51b   : > { %5765 = vrot.lane.b32.xlu1 %v5722_v12, %s17037_s24  ;;  %7614 = vst.msk [vmem:[#allocation4 + $0xb8] sm:$0xff] %vm17452_vm13, %v7567_v30  ;;  %v10880_v12 = vld [vmem:[#allocation3 + $0x102] sm:$0xff]  ;;  %vm17462_vm13 = vcmask 326784  }
 0x51c   : > { %7615 = vst.msk [vmem:[#allocation4 + $0xc0] sm:$0xff] %vm17453_vm15, %v7567_v30  ;;  %7572 = vrot.lane.b32.xlu0 %v7533_v63, %s16922_s26  ;;  %v5564_v30 = vpack.c.bf16 %v5546_v49, %v10880_v12  ;;  %vm17461_vm15 = vcmask 982784   ;;  %v17464_v49 = vld [vmem:[#allocation28_spill] sm:$0xff] }
 0x51d   : > { %v4534_v29 = vpop.permute.xlu1 %4533 }
 0x51e   : > { %4570 = vst.msk [vmem:[#allocation4 + $0x1b8] sm:$0xff] %vm17455_vm9, %v4534_v29  ;;  %v7711_v58 = vpop.permute.xlu0 %7710  ;;  %vm17463_vm9 = vcmp.lt.s32.totalorder %v13868_v1, 16 }
 0x51f   : > { %4794 = vst.msk [vmem:[#allocation4 + $0x1b8] sm:$0xff] %vm17457_vm11, %v14735_v11  ;;  %7872 = vrot.lane.b32.xlu1 %v17460_v18, %s17049_s19  ;;  %v4702_v63 = vsel %vm17463_vm9, %v10879_v60, 0.0  ;;  %v5882_v11 = vpack.c.bf16 %v14705_v9, %v5860_v47  ;;  %vm17465_vm11 = vcmp.ge.s32.totalorder %v17464_v49, 0  ;;  %v4926_v47 = vsel %vm1793_vm14, %v14846_v33, 0.0 }
 0x520   : > { %5018 = vst.msk [vmem:[#allocation4 + $0x1b8] sm:$0xff] %vm17461_vm15, %v14747_v43  ;;  %5609 = vrot.lane.b32.xlu0 %v5564_v30, %s16921_s25  ;;  %v5079_v43 = vsel %vm17465_vm11, %v14620_v57, 0.0  ;;  %vm17466_vm15 = vmmov %vm17462_vm13  ;;  %vm17469_vm11 = vcmp.lt.s32.totalorder %v17432_v46, 16 }
 0x521   : > { %7754 = vst.msk [vmem:[#allocation4 + $0xc0] sm:$0xff] %vm17462_vm13, %v7711_v58  ;;  %v6704_v29 = vpop.permute.xlu1 %6703  ;;  %v4718_v58 = vpack.c.bf16 %v4702_v63, %v10880_v12  ;;  %v5099_v30 = vpack.c.bf16 %v14705_v9, %v5079_v43  ;;  %vm17467_vm13 = vcmp.ge.s32.totalorder %v13762_v13, 0  ;;  %v4942_v63 = vpack.c.bf16 %v4926_v47, %v14795_v31  ;;  %v5388_v47 = vld [vmem:[#allocation3 + $0x118] sm:$0xff]  ;;  %v17478_v13 = vld [vmem:[#allocation7_spill] sm:$0xff] }
 0x522   : > { %6747 = vst.msk [vmem:[#allocation4 + $0xd8] sm:$0xff] %vm6741_vm1, %v6704_v29  ;;  %v14852_v25 = vpop.permute.xlu0 %4759  ;;  %v8109_v60 = vld [vmem:[#allocation4 + $0xb8] sm:$0xff]  ;;  %v14860_v29 = vld [vmem:[#allocation3 + $0x10e] sm:$0xff]  ;;  %v4347_v57 = vsel %vm17467_vm13, %v14661_v54, 0.0  ;;  %vm17468_vm9 = vmmov %vm17467_vm13  ;;  %vm17471_vm13 = vcmp.lt.s32.totalorder %v17356_v16, 16 }
 0x523   : > { %5924 = vrot.lane.b32.xlu1 %v5882_v11, %s17171_s2  ;;  %8742 = vmatprep.mubr.bf16.mxu1 %v8109_v60  ;;  %v14870_v11 = vld [vmem:[#allocation3 + $0x116] sm:$0xff]  ;;  %v5259_v43 = vsel %vm17468_vm9, %v14860_v29, 0.0  ;;  %vm17472_vm9 = vcmask 523584  }
 0x524   : > { %4765 = vrot.lane.b32.xlu0 %v4718_v58, %s16920_s28  ;;  %8743 = vmatmul.mubr.bf16.gmra.mrb[80].mxu1 %v8108_v2  ;;  %v4365_v58 = vpack.c.bf16 %v14670_v10, %v4347_v57  ;;  %v5277_v2 = vpack.c.bf16 %v14870_v11, %v5259_v43  ;;  %v10881_v57 = vld [vmem:[#allocation3 + $0x11a] sm:$0xff] }
 0x525   : > { %v7709_v18 = vpop.permute.xlu1 %7708 }
 0x526   : > { %7753 = vst.msk [vmem:[#allocation4 + $0x98] sm:$0xff] %vm17466_vm15, %v7709_v18  ;;  %v14866_v12 = vpop.permute.xlu0 %4983  ;;  %vm17470_vm15 = vcmask 720384  }
 0x527   : > { %5143 = vrot.lane.b32.xlu1 %v5099_v30, %s16922_s26  ;;  %v5387_v30 = vld [vmem:[#allocation3 + $0x110] sm:$0xff] }
 0x528   : > { %4989 = vrot.lane.b32.xlu0 %v4942_v63, %s17167_s30  ;;  %v14888_v10 = vpack.c.bf16 %v5388_v47, %v5387_v30  ;;  %v5548_v63 = vsel %vm17469_vm11, %v10881_v57, 0.0  ;;  %v10882_v47 = vld [vmem:[#allocation3 + $0x112] sm:$0xff]  ;;  %v14903_v30 = vld [vmem:[#allocation3 + $0x126] sm:$0xff]  ;;  %vm17473_vm11 = vcmp.ge.s32.totalorder %v13855_v27, 0 }
 0x529   : > { %v6096_v60 = vpop.permute.xlu1 %6095 }
 0x52a   : > { %6137 = vst.msk [vmem:[#allocation4 + $0x128] sm:$0xff] %vm6129_vm8, %v6096_v60  ;;  %v14878_v54 = vpop.permute.xlu0 %7090  ;;  %v14894_v60 = vld [vmem:[#allocation3 + $0x11e] sm:$0xff] }
 0x52b   : > { %4411 = vrot.lane.b32.xlu1 %v4365_v58, %s17193_s3  ;;  %v5704_v58 = vsel %vm17471_vm13, %v14750_v26, 0.0  ;;  %v5261_v57 = vsel %vm17473_vm11, %v14894_v60, 0.0  ;;  %vm17475_vm13 = vcmp.ge.s32.totalorder %v17430_v39, 0  ;;  %vm17477_vm11 = vcmask 523584  }
 0x52c   : > { %5323 = vrot.lane.b32.xlu0 %v5277_v2, %s17181_s23  ;;  %v5723_v51 = vpack.c.bf16 %v5704_v58, %v14705_v9  ;;  %v5862_v35 = vsel %vm17475_vm13, %v14750_v26, 0.0 }
 0x52d   : > { %v6225_v18 = vpop.permute.xlu1 %6224  ;;  %v5883_v44 = vpack.c.bf16 %v14795_v31, %v5862_v35 }
 0x52e   : > { %6266 = vst.msk [vmem:[#allocation4 + $0x128] sm:$0xff] %vm6258_vm12, %v6225_v18  ;;  %v14884_v48 = vpop.permute.xlu0 %7250  ;;  %v5565_v18 = vpack.c.bf16 %v5548_v63, %v10882_v47  ;;  %v5390_v47 = vld [vmem:[#allocation3 + $0x128] sm:$0xff] }
 0x52f   : > { %4539 = vrot.lane.b32.xlu1 %v14688_v7, %s17043_s17 }
 0x530   : > { %5451 = vrot.lane.b32.xlu0 %v14888_v10, %s17049_s19 }
 0x531   : > { %v5602_v43 = vpop.permute.xlu1 %5601 }
 0x532   : > { %5640 = vst.msk [vmem:[#allocation4 + $0x170] sm:$0xff] %vm17470_vm15, %v5602_v43  ;;  %v7871_v2 = vpop.permute.xlu0 %7870  ;;  %vm17474_vm15 = vcmask 917184  }
 0x533   : > { %6934 = vrot.lane.b32.xlu1 %v14688_v7, %s17193_s3  ;;  %7914 = vst.msk [vmem:[#allocation4 + $0xc0] sm:$0xff] %vm17472_vm9, %v7871_v2  ;;  %v5278_v2 = vpack.c.bf16 %v14903_v30, %v5261_v57  ;;  %vm17476_vm9 = vcmask 720384  }
 0x534   : > { %5611 = vrot.lane.b32.xlu0 %v5565_v18, %s16921_s25  ;;  %vm17480_vm13 = vmmov %vm17476_vm9 }
 0x535   : > { %v5762_v43 = vpop.permute.xlu1 %5761 }
 0x536   : > { %5801 = vst.msk [vmem:[#allocation4 + $0x170] sm:$0xff] %vm17474_vm15, %v5762_v43  ;;  %v8031_v63 = vpop.permute.xlu0 %8030  ;;  %v5389_v43 = vld [vmem:[#allocation3 + $0x120] sm:$0xff]  ;;  %vm17479_vm15 = vcmp.ge.s32.totalorder %v17478_v13, 0 }
 0x537   : > { %5767 = vrot.lane.b32.xlu1 %v5723_v51, %s17037_s24  ;;  %8074 = vst.msk [vmem:[#allocation4 + $0xc0] sm:$0xff] %vm17476_vm9, %v8031_v63  ;;  %v5081_v46 = vsel %vm17479_vm15, %v14750_v26, 0.0  ;;  %v14928_v63 = vpack.c.bf16 %v5390_v47, %v5389_v43  ;;  %vm17481_vm9 = vcmp.lt.s32.totalorder %v13266_v41, 16  ;;  %vm17483_vm15 = vcmp.lt.s32.totalorder %v13868_v1, 16 }
 0x538   : > { %5325 = vrot.lane.b32.xlu0 %v5278_v2, %s17181_s23 }
 0x539   : > { %v7869_v18 = vpop.permute.xlu1 %7868 }
 0x53a   : > { %7913 = vst.msk [vmem:[#allocation4 + $0x98] sm:$0xff] %vm17477_vm11, %v7869_v18  ;;  %v10393_v58 = vpop.f32.mrb[44].mxu0  ;;  %v14925_v51 = vpop.permute.xlu0 %5317  ;;  %v7191_v18 = vsel %vm17481_vm9, %v14750_v26, 0.0  ;;  %vm17482_vm11 = vcmp.ge.s32.totalorder %v13855_v27, 0  ;;  %vm17485_vm9 = vcmp.ge.s32.totalorder %v12947_v15, 0 }
 0x53b   : > { %8073 = vst.msk [vmem:[#allocation4 + $0x98] sm:$0xff] %vm17480_vm13, %v14778_v52  ;;  %v10394_v57 = vpop.f32.mrb[45].mxu0  ;;  %5926 = vrot.lane.b32.xlu1 %v5883_v44, %s17171_s2  ;;  %v5100_v52 = vpack.c.bf16 %v14795_v31, %v5081_v46  ;;  %v4349_v44 = vsel %vm17482_vm11, %v14764_v37, 0.0  ;;  %v7214_v26 = vpack.c.bf16 %v7191_v18, %v14705_v9  ;;  %v10884_v37 = vld [vmem:[#allocation3 + $0x122] sm:$0xff]  ;;  %vm17484_vm13 = vcmask 982784  }
 0x53c   : > { %v14930_v2 = vadd.f32 %v10394_v57, %v10393_v58  ;;  %v10396_v35 = vpop.f32.mrb[46].mxu0  ;;  %5453 = vrot.lane.b32.xlu0 %v14928_v63, %s17049_s19  ;;  %v10883_v58 = vld [vmem:[#allocation3 + $0x12a] sm:$0xff]  ;;  %v4366_v46 = vpack.c.bf16 %v14770_v40, %v4349_v44  ;;  %v7350_v9 = vsel %vm17485_vm9, %v14846_v33, 0.0  ;;  %vm17486_vm11 = vcmask 64512  }
 0x53d   : > { %v10397_v16 = vpop.f32.mrb[47].mxu0  ;;  %v6386_v36 = vpop.permute.xlu1 %6385  ;;  %v5550_v43 = vsel %vm17483_vm15, %v10883_v58, 0.0  ;;  %v5706_v40 = vsel %vm1789_vm6, %v14846_v33, 0.0  ;;  %vm17487_vm15 = vcmask 1048512   ;;  %vm17489_vm9 = vcmp.ge.s32.totalorder %v13195_v19, 0 }
 0x53e   : > { %v14938_v20 = vadd.f32 %v10397_v16, %v10396_v35  ;;  %6427 = vst.msk [vmem:[#allocation4 + $0x128] sm:$0xff] %vm6419_vm10, %v6386_v36  ;;  %v14944_v47 = vpop.permute.xlu0 %5445  ;;  %v5566_v57 = vpack.c.bf16 %v5550_v43, %v10884_v37  ;;  %v14955_v35 = vld [vmem:[#allocation3 + $0x114] sm:$0xff]  ;;  %v7510_v15 = vsel %vm17489_vm9, %v14860_v29, 0.0  ;;  %v5724_v58 = vpack.c.bf16 %v5706_v40, %v14795_v31  ;;  %v8126_v37 = vld [vmem:[#allocation4 + $0x140] sm:$0xff] }
 0x53f   : > { %5145 = vrot.lane.b32.xlu1 %v5100_v52, %s16922_s26  ;;  %v7374_v44 = vpack.c.bf16 %v14955_v35, %v7350_v9  ;;  %vm17500_vm9 = vcmask 589184  }
 0x540   : > { %7254 = vrot.lane.b32.xlu0 %v7214_v26, %s16920_s28 }
 0x541   : > { %v6547_v16 = vpop.permute.xlu1 %6546 }
 0x542   : > { %6588 = vst.msk [vmem:[#allocation4 + $0x128] sm:$0xff] %vm16878_vm3, %v6547_v16  ;;  %v7409_v36 = vpop.permute.xlu0 %7408  ;;  %vm17491_vm3 = vcmp.ge.s32.totalorder %v17464_v49, 0 }
 0x543   : > { %4413 = vrot.lane.b32.xlu1 %v4366_v46, %s17193_s3  ;;  %7451 = vst.msk [vmem:[#allocation4 + $0xe0] sm:$0xff] %vm17484_vm13, %v7409_v36  ;;  %vm17488_vm13 = vcmask 130048   ;;  %v5864_v43 = vsel %vm17491_vm3, %v14846_v33, 0.0  ;;  %v7534_v46 = vpack.c.bf16 %v14870_v11, %v7510_v15  ;;  %vm17495_vm3 = vcmask 392384  }
 0x544   : > { %5613 = vrot.lane.b32.xlu0 %v5566_v57, %s16921_s25  ;;  %v5884_v36 = vpack.c.bf16 %v14955_v35, %v5864_v43  ;;  %v17493_v57 = vld [vmem:[#allocation32_spill] sm:$0xff] }
 0x545   : > { %v5921_v18 = vpop.permute.xlu1 %5920 }
 0x546   : > { %5969 = vst.msk [vmem:[#allocation4 + $0x148] sm:$0xff] %vm5952_vm4, %v5921_v18  ;;  %v7569_v52 = vpop.permute.xlu0 %7568 }
 0x547   : > { %5970 = vst.msk [vmem:[#allocation4 + $0x150] sm:$0xff] %vm17486_vm11, %v5921_v18  ;;  %4541 = vrot.lane.b32.xlu1 %v14789_v17, %s17043_s17  ;;  %vm17490_vm11 = vcmask 326784   ;;  %v10855_v18 = vld [vmem:[%s16537_s7 + $0x100] sm:$0xff]  }
 0x548   : > { %7616 = vst.msk [vmem:[#allocation4 + $0xe0] sm:$0xff] %vm17487_vm15, %v7569_v52  ;;  %7414 = vrot.lane.b32.xlu0 %v7374_v44, %s17167_s30  ;;  %vm17492_vm15 = vcmask 523584   ;;  %v8113_v44 = vld [vmem:[#allocation4 + $0xd8] sm:$0xff]  ;;  %10675 = vmatprep.subr.bf16.mxu0 %v10855_v18 }
 0x549   : > { %7617 = vst.msk [vmem:[#allocation4 + $0xe8] sm:$0xff] %vm17488_vm13, %v7569_v52  ;;  %v5316_v26 = vpop.permute.xlu1 %5315  ;;  %vm17494_vm13 = vcmp.ge.s32.totalorder %v17493_v57, 0  ;;  %10676 = vmatpush3.bf16.msra.mxu0 %v10855_v18 }
 0x54a   : > { %5353 = vst.msk [vmem:[#allocation4 + $0x198] sm:$0xff] %vm17490_vm11, %v5316_v26  ;;  %v14980_v16 = vpop.permute.xlu0 %5605  ;;  %v5083_v9 = vsel %vm17494_vm13, %v14846_v33, 0.0  ;;  %vm17501_vm11 = vcmp.ge.s32.totalorder %v17478_v13, 0  ;;  %vm17504_vm13 = vcmask 982784  }
 0x54b   : > { %5769 = vrot.lane.b32.xlu1 %v5724_v58, %s17037_s24  ;;  %v5101_v58 = vpack.c.bf16 %v14955_v35, %v5083_v9  ;;  %v17497_v9 = vld [vmem:[#allocation20_spill] sm:$0xff] }
 0x54c   : > { %7574 = vrot.lane.b32.xlu0 %v7534_v46, %s16922_s26 }
 0x54d   : > { %v5444_v19 = vpop.permute.xlu1 %5443  ;;  %v8127_v29 = vld [vmem:[#allocation4 + $0x148] sm:$0xff] }
 0x54e   : > { %5481 = vst.msk [vmem:[#allocation4 + $0x198] sm:$0xff] %vm17492_vm15, %v5444_v19  ;;  %8613 = vmatprep.mubr.bf16.mxu0 %v8127_v29  ;;  %v14993_v40 = vpop.permute.xlu0 %4761  ;;  %v15000_v19 = vld [vmem:[#allocation3 + $0x11c] sm:$0xff]  ;;  %vm17503_vm15 = vcmask 785984  }
 0x54f   : > { %5928 = vrot.lane.b32.xlu1 %v5884_v36, %s17171_s2  ;;  %8614 = vmatmul.mubr.bf16.gmra.mrb[64].mxu0 %v8126_v37  ;;  %v8114_v11 = vld [vmem:[#allocation4 + $0xe0] sm:$0xff]  ;;  %v10487_v52 = vpop.f32.mrb[64].mxu1  ;;  %v5708_v29 = vsel %vm1791_vm0, %v15000_v19, 0.0  ;;  %v5866_v18 = vsel %vm17501_vm11, %v15000_v19, 0.0 }
 0x550   : > { %8750 = vmatprep.mubr.bf16.mxu1 %v8114_v11  ;;  %7714 = vrot.lane.b32.xlu0 %v14688_v7, %s17181_s23  ;;  %v10488_v26 = vpop.f32.mrb[65].mxu1 }
 0x551   : > { %8751 = vmatmul.mubr.bf16.gmra.mrb[84].mxu1 %v8113_v44  ;;  %v4408_v15 = vpop.permute.xlu1 %4407  ;;  %v10489_v43 = vadd.f32 %v10488_v26, %v10487_v52  ;;  %v10490_v46 = vpop.f32.mrb[66].mxu1  ;;  %v17498_v52 = vld [vmem:[#allocation33_spill] sm:$0xff]  ;;  %v5725_v26 = vpack.c.bf16 %v5708_v29, %v14955_v35  ;;  %v17507_v29 = vld [vmem:[#allocation67_spill] sm:$0xff] }
 0x552   : > { %4443 = vst.msk [vmem:[#allocation4 + $0x1e0] sm:$0xff] %vm17495_vm3, %v4408_v15  ;;  %v15005_v36 = vpop.permute.xlu0 %4985  ;;  %v10491_v7 = vpop.f32.mrb[67].mxu1  ;;  %v17499_v44 = vpack.c.bf16 %v17497_v9, %v17498_v52  ;;  %vm17505_vm3 = vcmp.lt.s32.totalorder %v13646_v5, 16  ;;  %v17510_v9 = vld [vmem:[#allocation35_spill] sm:$0xff] }
 0x553   : > { %5147 = vrot.lane.b32.xlu1 %v5101_v58, %s16922_s26  ;;  %v10492_v37 = vadd.f32 %v10491_v7, %v10490_v46  ;;  %v15009_v11 = vadd.f32 %v10489_v43, %v14601_v61  ;;  %v7973_v43 = vsel %vm17505_vm3, %v14846_v33, 0.0  ;;  %v17506_v46 = vld [vmem:[#allocation74_spill] sm:$0xff]  ;;  %vm17511_vm11 = vcmp.ge.s32.totalorder %v17510_v9, 0 }
 0x554   : > { %7874 = vrot.lane.b32.xlu0 %v17499_v44, %s17049_s19  ;;  %v17508_v7 = vpack.c.bf16 %v17506_v46, %v17507_v29  ;;  %v7997_v52 = vpack.c.bf16 %v7973_v43, %v14795_v31  ;;  %v6292_v44 = vld [vmem:[#allocation3 + $0xda] sm:$0xff]  ;;  %v6291_v46 = vld [vmem:[#allocation3 + $0xd2] sm:$0xff]  ;;  %vm17514_vm3 = vcmp.lt.s32.totalorder %v13362_v6, 16 }
 0x555   : > { %17496 = vst [vmem:[#allocation13_spill] sm:$0xff] %v15009_v11  ;;  %v4536_v15 = vpop.permute.xlu1 %4535  ;;  %v15021_v58 = vadd.f32 %v10492_v37, %v14611_v55  ;;  %v15037_v37 = vld [vmem:[#allocation3 + $0x124] sm:$0xff]  ;;  %v7193_v43 = vsel %vm17514_vm3, %v14846_v33, 0.0  ;;  %vm17526_vm3 = vcmask 917184  }
 0x556   : > { %4571 = vst.msk [vmem:[#allocation4 + $0x1e0] sm:$0xff] %vm17500_vm9, %v4536_v15  ;;  %v15025_v61 = vpop.permute.xlu0 %7092  ;;  %vm17509_vm9 = vcmask 392384  }
 0x557   : > { %17502 = vst [vmem:[#allocation21_spill] sm:$0xff] %v15021_v58  ;;  %4795 = vst.msk [vmem:[#allocation4 + $0x1e0] sm:$0xff] %vm17503_vm15, %v14852_v25  ;;  %5771 = vrot.lane.b32.xlu1 %v5725_v26, %s17037_s24  ;;  %v5885_v25 = vpack.c.bf16 %v15037_v37, %v5866_v18  ;;  %vm17512_vm15 = vcmask 589184  }
 0x558   : > { %5019 = vst.msk [vmem:[#allocation4 + $0x1e0] sm:$0xff] %vm17504_vm13, %v14866_v12  ;;  %8034 = vrot.lane.b32.xlu0 %v17508_v7, %s16921_s25  ;;  %v5085_v12 = vsel %vm17511_vm11, %v15000_v19, 0.0  ;;  %vm17513_vm13 = vcmask 785984   ;;  %v17516_v7 = vld [vmem:[#allocation44_spill] sm:$0xff]  ;;  %vm17523_vm11 = vcmask 720384  }
 0x559   : > { %v6931_v55 = vpop.permute.xlu1 %6930  ;;  %v5102_v26 = vpack.c.bf16 %v15037_v37, %v5085_v12 }
 0x55a   : > { %6972 = vst.msk [vmem:[#allocation4 + $0x108] sm:$0xff] %vm17509_vm9, %v6931_v55  ;;  %v15046_v5 = vpop.permute.xlu0 %7252  ;;  %vm17522_vm9 = vcmp.ge.s32.totalorder %v13098_v3, 0  ;;  %v10857_v3 = vld [vmem:[%s16537_s7 + $0x110] sm:$0xff]  }
 0x55b   : > { %7132 = vst.msk [vmem:[#allocation4 + $0x108] sm:$0xff] %vm17512_vm15, %v14878_v54  ;;  %5930 = vrot.lane.b32.xlu1 %v5885_v25, %s17171_s2  ;;  %v6324_v54 = vsel %vm1651_vm2, %v6292_v44, 0.0  ;;  %vm17518_vm2 = vcmp.ge.s32.totalorder %v17306_v23, 0  ;;  %v17519_v23 = vld [vmem:[#allocation65_spill] sm:$0xff]  ;;  %vm17524_vm15 = vcmp.ge.s32.totalorder %v17493_v57, 0 }
 0x55c   : > { %7292 = vst.msk [vmem:[#allocation4 + $0x108] sm:$0xff] %vm17513_vm13, %v14884_v48  ;;  %8036 = vrot.lane.b32.xlu0 %v7997_v52, %s16921_s25  ;;  %v17515_v48 = vld [vmem:[#allocation36_spill] sm:$0xff]  ;;  %v6347_v12 = vpack.c.bf16 %v6324_v54, %v6291_v46  ;;  %v10856_v54 = vld [vmem:[%s16537_s7 + $0x108] sm:$0xff]   ;;  %vm17525_vm13 = vcmask 982784  }
 0x55d   : > { %v6706_v15 = vpop.permute.xlu1 %6705  ;;  %v17517_v55 = vpack.c.bf16 %v17515_v48, %v17516_v7  ;;  %v7352_v48 = vsel %vm17518_vm2, %v15000_v19, 0.0  ;;  %10677 = vmatprep.subr.bf16.mxu0 %v10856_v54  ;;  %vm17527_vm2 = vcmask 1048512  }
 0x55e   : > { %6748 = vst.msk [vmem:[#allocation4 + $0x100] sm:$0xff] %vm6741_vm1, %v6706_v15  ;;  %v15057_v18 = vpop.permute.xlu0 %8032  ;;  %v7215_v15 = vpack.c.bf16 %v7193_v43, %v14795_v31  ;;  %10678 = vmatpush3.bf16.msra.mxu0 %v10856_v54  ;;  %v15112_v54 = vld [vmem:[#allocation3 + $0x134] sm:$0xff] }
 0x55f   : > { %5149 = vrot.lane.b32.xlu1 %v5102_v26, %s16922_s26  ;;  %v15072_v26 = vld [vmem:[#allocation3 + $0x12c] sm:$0xff]  ;;  %10679 = vmatprep.subr.bf16.mxu0 %v10857_v3 }
 0x560   : > { %7096 = vrot.lane.b32.xlu0 %v17517_v55, %s17043_s17  ;;  %v5710_v31 = vsel %vm1793_vm14, %v15072_v26, 0.0 }
 0x561   : > { %v6098_v25 = vpop.permute.xlu1 %6097 }
 0x562   : > { %6138 = vst.msk [vmem:[#allocation4 + $0x150] sm:$0xff] %vm6129_vm8, %v6098_v25  ;;  %v10399_v22 = vpop.f32.mrb[48].mxu0  ;;  %v15068_v52 = vpop.permute.xlu0 %5319  ;;  %10680 = vmatpush3.bf16.msra.mxu0 %v10857_v3 }
 0x563   : > { %v10400_v44 = vpop.f32.mrb[49].mxu0  ;;  %6387 = vrot.lane.b32.xlu1 %v6347_v12, %s17108_s20  ;;  %v17520_v12 = vld [vmem:[#allocation57_spill] sm:$0xff] }
 0x564   : > { %v15074_v33 = vadd.f32 %v10400_v44, %v10399_v22  ;;  %v10402_v58 = vpop.f32.mrb[50].mxu0  ;;  %7256 = vrot.lane.b32.xlu0 %v7215_v15, %s16920_s28  ;;  %v17521_v22 = vpack.c.bf16 %v17519_v23, %v17520_v12  ;;  %v7375_v44 = vpack.c.bf16 %v15037_v37, %v7352_v48 }
 0x565   : > { %v10403_v46 = vpop.f32.mrb[51].mxu0  ;;  %v6227_v55 = vpop.permute.xlu1 %6226 }
 0x566   : > { %v15083_v25 = vadd.f32 %v10403_v46, %v10402_v58  ;;  %6267 = vst.msk [vmem:[#allocation4 + $0x150] sm:$0xff] %vm6258_vm12, %v6227_v55  ;;  %v15089_v43 = vpop.permute.xlu0 %5447  ;;  %v7512_v58 = vsel %vm17522_vm9, %v14894_v60, 0.0  ;;  %v5726_v46 = vpack.c.bf16 %v5710_v31, %v15037_v37  ;;  %v5868_v55 = vsel %vm17524_vm15, %v15072_v26, 0.0 }
 0x567   : > { %6548 = vrot.lane.b32.xlu1 %v17521_v22, %s17160_s0  ;;  %v7535_v48 = vpack.c.bf16 %v14903_v30, %v7512_v58  ;;  %v5886_v31 = vpack.c.bf16 %v15112_v54, %v5868_v55  ;;  %v10858_v30 = vld [vmem:[%s16537_s7 + $0x118] sm:$0xff]   ;;  %vm17528_vm9 = vcmask 130048   ;;  %vm17530_vm15 = vcmp.ge.s32.totalorder %v17510_v9, 0  ;;  %v17531_v55 = vld [vmem:[#allocation69_spill] sm:$0xff] }
 0x568   : > { %7416 = vrot.lane.b32.xlu0 %v7375_v44, %s17167_s30  ;;  %10681 = vmatprep.subr.bf16.mxu0 %v10858_v30  ;;  %v15126_v44 = vld [vmem:[#allocation3 + $0x144] sm:$0xff]  ;;  %v15128_v58 = vld [vmem:[#allocation3 + $0x13c] sm:$0xff] }
 0x569   : > { %v5604_v15 = vpop.permute.xlu1 %5603  ;;  %10682 = vmatpush3.bf16.msra.mxu0 %v10858_v30 }
 0x56a   : > { %5641 = vst.msk [vmem:[#allocation4 + $0x198] sm:$0xff] %vm17523_vm11, %v5604_v15  ;;  %v7411_v23 = vpop.permute.xlu0 %7410  ;;  %vm17529_vm11 = vcmask 64512   ;;  %v5870_v15 = vsel %vm17530_vm15, %v15128_v58, 0.0  ;;  %vm17541_vm15 = vcmp.lt.s32.totalorder %v13362_v6, 16 }
 0x56b   : > { %5773 = vrot.lane.b32.xlu1 %v5726_v46, %s17037_s24  ;;  %7452 = vst.msk [vmem:[#allocation4 + $0x108] sm:$0xff] %vm17525_vm13, %v7411_v23  ;;  %v17532_v23 = vpack.c.bf16 %v17507_v29, %v17531_v55  ;;  %vm17533_vm13 = vcmp.lt.s32.totalorder %v13266_v41, 16  ;;  %v5887_v11 = vpack.c.bf16 %v15126_v44, %v5870_v15  ;;  %v8118_v15 = vld [vmem:[#allocation4 + $0x100] sm:$0xff]  ;;  %v7977_v55 = vsel %vm17541_vm15, %v15072_v26, 0.0 }
 0x56c   : > { %7576 = vrot.lane.b32.xlu0 %v7535_v48, %s16922_s26  ;;  %v10859_v48 = vld [vmem:[%s16537_s7 + $0x120] sm:$0xff]   ;;  %v7975_v3 = vsel %vm17533_vm13, %v15000_v19, 0.0  ;;  %vm17542_vm13 = vcmask 720384   ;;  %v7999_v6 = vpack.c.bf16 %v7977_v55, %v15037_v37  ;;  %vm17547_vm15 = vcmask 785984  }
 0x56d   : > { %v5764_v60 = vpop.permute.xlu1 %5763  ;;  %10683 = vmatprep.subr.bf16.mxu0 %v10859_v48  ;;  %v7998_v30 = vpack.c.bf16 %v7975_v3, %v14955_v35 }
 0x56e   : > { %5802 = vst.msk [vmem:[#allocation4 + $0x198] sm:$0xff] %vm17526_vm3, %v5764_v60  ;;  %v7571_v12 = vpop.permute.xlu0 %7570  ;;  %v17534_v60 = vld [vmem:[#allocation6_spill] sm:$0xff]  ;;  %vm17537_vm3 = vmmov %vm17527_vm2  ;;  %10684 = vmatpush3.bf16.msra.mxu0 %v10859_v48 }
 0x56f   : > { %5932 = vrot.lane.b32.xlu1 %v5886_v31, %s17171_s2  ;;  %7618 = vst.msk [vmem:[#allocation4 + $0x108] sm:$0xff] %vm17527_vm2, %v7571_v12  ;;  %v17535_v31 = vld [vmem:[#allocation46_spill] sm:$0xff]  ;;  %vm17538_vm2 = vmmov %vm17528_vm9 }
 0x570   : > { %7619 = vst.msk [vmem:[#allocation4 + $0x110] sm:$0xff] %vm17528_vm9, %v7571_v12  ;;  %7718 = vrot.lane.b32.xlu0 %v14888_v10, %s17181_s23  ;;  %v17536_v12 = vpack.c.bf16 %v17534_v60, %v17535_v31  ;;  %vm17539_vm9 = vcmask 326784  }
 0x571   : > { %v5923_v22 = vpop.permute.xlu1 %5922 }
 0x572   : > { %5971 = vst.msk [vmem:[#allocation4 + $0x170] sm:$0xff] %vm5952_vm4, %v5923_v22  ;;  %v15133_v46 = vpop.permute.xlu0 %5607 }
 0x573   : > { %5972 = vst.msk [vmem:[#allocation4 + $0x178] sm:$0xff] %vm17529_vm11, %v5923_v22  ;;  %6709 = vrot.lane.b32.xlu1 %v17532_v23, %s17128_s18  ;;  %vm17540_vm11 = vcmask 523584   ;;  %v8131_v23 = vld [vmem:[#allocation4 + $0x168] sm:$0xff] }
 0x574   : > { %7878 = vrot.lane.b32.xlu0 %v17536_v12, %s17049_s19  ;;  %v17548_v12 = vld [vmem:[#allocation45_spill] sm:$0xff] }
 0x575   : > { %v5142_v22 = vpop.permute.xlu1 %5141 }
 0x576   : > { %5189 = vst.msk [vmem:[#allocation4 + $0x1b8] sm:$0xff] %vm17537_vm3, %v5142_v22  ;;  %v15154_v29 = vpop.permute.xlu0 %4763  ;;  %v8119_v41 = vld [vmem:[#allocation4 + $0x108] sm:$0xff]  ;;  %vm17543_vm3 = vcmask 392384  }
 0x577   : > { %5190 = vst.msk [vmem:[#allocation4 + $0x1c0] sm:$0xff] %vm17538_vm2, %v5142_v22  ;;  %5934 = vrot.lane.b32.xlu1 %v5887_v11, %s17171_s2  ;;  %8758 = vmatprep.mubr.bf16.mxu1 %v8119_v41  ;;  %vm17544_vm2 = vcmask 1043456   ;;  %v17549_v22 = vpack.c.bf16 %v17548_v12, %v17516_v7 }
 0x578   : > { %5354 = vst.msk [vmem:[#allocation4 + $0x1c0] sm:$0xff] %vm17539_vm9, %v14925_v51  ;;  %8038 = vrot.lane.b32.xlu0 %v7998_v30, %s16921_s25  ;;  %8759 = vmatmul.mubr.bf16.gmra.mrb[88].mxu1 %v8118_v15  ;;  %vm17545_vm9 = vmmov %vm17544_vm2  ;;  %v17552_v30 = vld [vmem:[#allocation34_spill] sm:$0xff] }
 0x579   : > { %5482 = vst.msk [vmem:[#allocation4 + $0x1c0] sm:$0xff] %vm17540_vm11, %v14944_v47  ;;  %v4410_v51 = vpop.permute.xlu1 %4409  ;;  %v8132_v11 = vld [vmem:[#allocation4 + $0x170] sm:$0xff]  ;;  %v10860_v47 = vld [vmem:[%s16537_s7 + $0x128] ss:$0 sps:$4 sm:$0xff]   ;;  %vm17546_vm11 = vcmask 589184   ;;  %v17553_v15 = vpack.c.bf16 %v17552_v30, %v17535_v31  ;;  %v6164_v30 = vld [vmem:[#allocation3 + $0xe0] sm:$0xff] }
 0x57a   : > { %5642 = vst.msk [vmem:[#allocation4 + $0x1c0] sm:$0xff] %vm17542_vm13, %v14980_v16  ;;  %8621 = vmatprep.mubr.bf16.mxu0 %v8132_v11  ;;  %v15170_v48 = vpop.permute.xlu0 %4987  ;;  %10756 = vmatprep.subr.msk.bf16.mxu0 %vm17544_vm2, %v10860_v47  ;;  %v8515_v16 = vsel %vm17545_vm9, %v10860_v47, 0  ;;  %vm17550_vm13 = vcmask 982784   ;;  %vm17554_vm2 = vcmask 392384   ;;  %vm17555_vm9 = vmmov %vm17546_vm11 }
 0x57b   : > { %4444 = vst.msk [vmem:[#allocation4 + $0x208] sm:$0xff] %vm17543_vm3, %v4410_v51  ;;  %7716 = vrot.lane.b32.xlu1 %v14789_v17, %s17181_s23  ;;  %8622 = vmatmul.mubr.bf16.gmra.mrb[68].mxu0 %v8131_v23  ;;  %vm17551_vm3 = vcmp.lt.s32.totalorder %v17292_v53, 16 }
 0x57c   : > { %8040 = vrot.lane.b32.xlu0 %v7999_v6, %s16921_s25  ;;  %10686 = vmatpush3.bf16.msra.mxu0 %v8515_v16  ;;  %v7195_v41 = vsel %vm17551_vm3, %v15000_v19, 0.0  ;;  %v17558_v6 = vld [vmem:[#allocation64_spill] sm:$0xff]  ;;  %vm17562_vm3 = vcmask 326784  }
 0x57d   : > { %v4538_v3 = vpop.permute.xlu1 %4537 }
 0x57e   : > { %4572 = vst.msk [vmem:[#allocation4 + $0x208] sm:$0xff] %vm17546_vm11, %v4538_v3  ;;  %v15181_v60 = vpop.permute.xlu0 %7094  ;;  %vm17556_vm11 = vmmov %vm17547_vm15 }
 0x57f   : > { %4796 = vst.msk [vmem:[#allocation4 + $0x208] sm:$0xff] %vm17547_vm15, %v14993_v40  ;;  %7876 = vrot.lane.b32.xlu1 %v17549_v22, %s17049_s19  ;;  %vm17557_vm15 = vcmp.ge.s32.totalorder %v17337_v32, 0  ;;  %v6294_v22 = vld [vmem:[#allocation3 + $0xea] sm:$0xff] }
 0x580   : > { %5020 = vst.msk [vmem:[#allocation4 + $0x208] sm:$0xff] %vm17550_vm13, %v15005_v36  ;;  %7098 = vrot.lane.b32.xlu0 %v17553_v15, %s17043_s17  ;;  %v7216_v36 = vpack.c.bf16 %v7195_v41, %v14955_v35  ;;  %v7354_v31 = vsel %vm17557_vm15, %v15072_v26, 0.0  ;;  %v7483_v15 = vld [vmem:[#allocation3 + $0x136] sm:$0xff]  ;;  %vm17561_vm13 = vcmp.ge.s32.totalorder %v13375_v21, 0  ;;  %vm17567_vm15 = vcmask 523584  }
 0x581   : > { %v6933_v40 = vpop.permute.xlu1 %6932  ;;  %v7376_v12 = vpack.c.bf16 %v15112_v54, %v7354_v31  ;;  %v6326_v31 = vsel %vm1653_vm7, %v6294_v22, 0.0  ;;  %vm17564_vm7 = vcmask 917184  }
 0x582   : > { %6973 = vst.msk [vmem:[#allocation4 + $0x130] sm:$0xff] %vm17554_vm2, %v6933_v40  ;;  %v15199_v7 = vpop.permute.xlu0 %5321  ;;  %vm17563_vm2 = vcmask 982784  }
 0x583   : > { %7133 = vst.msk [vmem:[#allocation4 + $0x130] sm:$0xff] %vm17555_vm9, %v15025_v61  ;;  %6936 = vrot.lane.b32.xlu1 %v14789_v17, %s17193_s3  ;;  %v10493_v19 = vpop.f32.mrb[68].mxu1  ;;  %v7482_v61 = vld [vmem:[#allocation3 + $0x12e] sm:$0xff]  ;;  %vm17565_vm9 = vcmask 1048512  }
 0x584   : > { %7293 = vst.msk [vmem:[#allocation4 + $0x130] sm:$0xff] %vm17556_vm11, %v15046_v5  ;;  %7258 = vrot.lane.b32.xlu0 %v7216_v36, %s16920_s28  ;;  %v10494_v51 = vpop.f32.mrb[69].mxu1  ;;  %v6165_v17 = vld [vmem:[#allocation3 + $0xe8] sm:$0xff]  ;;  %v7514_v40 = vsel %vm17561_vm13, %v7482_v61, 0.0  ;;  %vm17566_vm11 = vcmask 130048   ;;  %vm17568_vm13 = vcmask 720384  }
 0x585   : > { %v6708_v55 = vpop.permute.xlu1 %6707  ;;  %v10495_v11 = vadd.f32 %v10494_v51, %v10493_v19  ;;  %v10496_v23 = vpop.f32.mrb[70].mxu1  ;;  %v17559_v5 = vld [vmem:[#allocation66_spill] sm:$0xff]  ;;  %v7536_v21 = vpack.c.bf16 %v7483_v15, %v7514_v40 }
 0x586   : > { %6749 = vst.msk [vmem:[#allocation4 + $0x128] sm:$0xff] %vm6741_vm1, %v6708_v55  ;;  %v15211_v47 = vpop.permute.xlu0 %5449  ;;  %v17560_v16 = vpack.c.bf16 %v17558_v6, %v17559_v5  ;;  %v10497_v3 = vpop.f32.mrb[71].mxu1  ;;  %v6187_v55 = vpack.c.bf16 %v6165_v17, %v6164_v30  ;;  %v17570_v30 = vld [vmem:[#allocation63_spill] sm:$0xff] }
 0x587   : > { %v10498_v41 = vadd.f32 %v10497_v3, %v10496_v23  ;;  %v15221_v36 = vadd.f32 %v10495_v11, %v14691_v8  ;;  %v6293_v11 = vld [vmem:[#allocation3 + $0xe2] sm:$0xff] }
 0x588   : > { %6099 = vrot.lane.b32.xlu1 %v17560_v16, %s17131_s27  ;;  %7418 = vrot.lane.b32.xlu0 %v7376_v12, %s17167_s30  ;;  %v6348_v56 = vpack.c.bf16 %v6326_v31, %v6293_v11 }
 0x589   : > { %v7713_v19 = vpop.permute.xlu1 %7712  ;;  %v15228_v23 = vadd.f32 %v10498_v41, %v14698_v59  ;;  %v17569_v41 = vld [vmem:[#allocation72_spill] sm:$0xff] }
 0x58a   : > { %7755 = vst.msk [vmem:[#allocation4 + $0xe8] sm:$0xff] %vm17562_vm3, %v7713_v19  ;;  %v10405_v51 = vpop.f32.mrb[52].mxu0  ;;  %v7413_v6 = vpop.permute.xlu0 %7412  ;;  %v17571_v15 = vpack.c.bf16 %v17569_v41, %v17570_v30  ;;  %vm17572_vm3 = vcmp.lt.s32.totalorder %v14350_v0, 16  ;;  %v17573_v19 = vld [vmem:[#allocation48_spill] sm:$0xff] }
 0x58b   : > { %v10406_v5 = vpop.f32.mrb[53].mxu0  ;;  %7453 = vst.msk [vmem:[#allocation4 + $0x130] sm:$0xff] %vm17563_vm2, %v7413_v6  ;;  %v7197_v40 = vsel %vm17572_vm3, %v15072_v26, 0.0  ;;  %vm17576_vm2 = vcmask 64512   ;;  %v17577_v6 = vld [vmem:[#allocation30_spill] sm:$0xff]  ;;  %vm17583_vm3 = vcmp.ge.s32.totalorder %v17370_v38, 0 }
 0x58c   : > { %6228 = vrot.lane.b32.xlu1 %v6187_v55, %s17145_s1  ;;  %v15232_v8 = vadd.f32 %v10406_v5, %v10405_v51  ;;  %v10408_v61 = vpop.f32.mrb[54].mxu0  ;;  %7578 = vrot.lane.b32.xlu0 %v7536_v21, %s16922_s26  ;;  %v17574_v55 = vld [vmem:[#allocation17_spill] sm:$0xff]  ;;  %v17578_v5 = vld [vmem:[#allocation75_spill] sm:$0xff]  ;;  %v7217_v26 = vpack.c.bf16 %v7197_v40, %v15037_v37  ;;  %v7659_v40 = vld [vmem:[#allocation3 + $0x138] sm:$0xff] }
 0x58d   : > { %v10409_v17 = vpop.f32.mrb[55].mxu0  ;;  %v5766_v16 = vpop.permute.xlu1 %5765  ;;  %v17575_v51 = vpack.c.bf16 %v17573_v19, %v17574_v55  ;;  %v17579_v21 = vpack.c.bf16 %v17577_v6, %v17578_v5  ;;  %v8123_v11 = vld [vmem:[#allocation4 + $0x128] sm:$0xff]  ;;  %v7658_v19 = vld [vmem:[#allocation3 + $0x130] sm:$0xff] }
 0x58e   : > { %v15235_v3 = vadd.f32 %v10409_v17, %v10408_v61  ;;  %5803 = vst.msk [vmem:[#allocation4 + $0x1c0] sm:$0xff] %vm17564_vm7, %v5766_v16  ;;  %v7573_v59 = vpop.permute.xlu0 %7572  ;;  %vm17580_vm7 = vcmp.ge.s32.totalorder %v17430_v39, 0  ;;  %v7485_v37 = vld [vmem:[#allocation3 + $0x146] sm:$0xff] }
 0x58f   : > { %7620 = vst.msk [vmem:[#allocation4 + $0x130] sm:$0xff] %vm17565_vm9, %v7573_v59  ;;  %v7356_v17 = vsel %vm17580_vm7, %v15128_v58, 0.0  ;;  %vm17585_vm7 = vcmask 392384  }
 0x590   : > { %6389 = vrot.lane.b32.xlu1 %v6348_v56, %s17108_s20  ;;  %7621 = vst.msk [vmem:[#allocation4 + $0x138] sm:$0xff] %vm17566_vm11, %v7573_v59  ;;  %6940 = vrot.lane.b32.xlu0 %v14928_v63, %s17193_s3  ;;  %v7484_v56 = vld [vmem:[#allocation3 + $0x13e] sm:$0xff]  ;;  %v7377_v39 = vpack.c.bf16 %v15126_v44, %v7356_v17 }
 0x591   : > { %v7873_v12 = vpop.permute.xlu1 %7872  ;;  %v6296_v17 = vld [vmem:[#allocation3 + $0xfa] sm:$0xff] }
 0x592   : > { %7915 = vst.msk [vmem:[#allocation4 + $0xe8] sm:$0xff] %vm17567_vm15, %v7873_v12  ;;  %v15246_v22 = vpop.permute.xlu0 %5609  ;;  %vm17581_vm15 = vcmask 326784   ;;  %v7516_v12 = vsel %vm17583_vm3, %v7484_v56, 0.0  ;;  %vm17592_vm3 = vmmov %vm17585_vm7 }
 0x593   : > { %8075 = vst.msk [vmem:[#allocation4 + $0xe8] sm:$0xff] %vm17568_vm13, %v15057_v18  ;;  %vm17582_vm13 = vcmask 523584   ;;  %v7537_v38 = vpack.c.bf16 %v7485_v37, %v7516_v12 }
 0x594   : > { %6550 = vrot.lane.b32.xlu1 %v17571_v15, %s17160_s0  ;;  %7100 = vrot.lane.b32.xlu0 %v17575_v51, %s17043_s17  ;;  %v17586_v15 = vld [vmem:[#allocation49_spill] sm:$0xff] }
 0x595   : > { %v5925_v31 = vpop.permute.xlu1 %5924 }
 0x596   : > { %5973 = vst.msk [vmem:[#allocation4 + $0x198] sm:$0xff] %vm5952_vm4, %v5925_v31  ;;  %v15261_v18 = vpop.permute.xlu0 %4765  ;;  %v8124_v61 = vld [vmem:[#allocation4 + $0x130] sm:$0xff] }
 0x597   : > { %5974 = vst.msk [vmem:[#allocation4 + $0x1a0] sm:$0xff] %vm17576_vm2, %v5925_v31  ;;  %8766 = vmatprep.mubr.bf16.mxu1 %v8124_v61  ;;  %vm17584_vm2 = vcmask 720384   ;;  %v15303_v31 = vpack.c.bf16 %v7659_v40, %v7658_v19  ;;  %v17595_v61 = vld [vmem:[#allocation73_spill] sm:$0xff] }
 0x598   : > { %6711 = vrot.lane.b32.xlu1 %v17579_v21, %s17128_s18  ;;  %7260 = vrot.lane.b32.xlu0 %v7217_v26, %s16920_s28  ;;  %v17594_v21 = vld [vmem:[#allocation71_spill] sm:$0xff] }
 0x599   : > { %8767 = vmatmul.mubr.bf16.gmra.mrb[92].mxu1 %v8123_v11  ;;  %v5144_v16 = vpop.permute.xlu1 %5143  ;;  %v10890_v26 = vld [vmem:[#allocation3 + $0x132] sm:$0xff] }
 0x59a   : > { %5191 = vst.msk [vmem:[#allocation4 + $0x1e0] sm:$0xff] %vm17565_vm9, %v5144_v16  ;;  %v15276_v59 = vpop.permute.xlu0 %4989  ;;  %vm17588_vm9 = vcmask 589184  }
 0x59b   : > { %5192 = vst.msk [vmem:[#allocation4 + $0x1e8] sm:$0xff] %vm17566_vm11, %v5144_v16  ;;  %vm17589_vm11 = vcmask 785984   ;;  %v6166_v16 = vld [vmem:[#allocation3 + $0xf0] sm:$0xff] }
 0x59c   : > { %5355 = vst.msk [vmem:[#allocation4 + $0x1e8] sm:$0xff] %vm17581_vm15, %v15068_v52  ;;  %7720 = vrot.lane.b32.xlu1 %v14928_v63, %s17181_s23  ;;  %7420 = vrot.lane.b32.xlu0 %v7377_v39, %s17167_s30  ;;  %v8136_v63 = vld [vmem:[#allocation4 + $0x190] sm:$0xff]  ;;  %vm17590_vm15 = vcmask 982784  }
 0x59d   : > { %5483 = vst.msk [vmem:[#allocation4 + $0x1e8] sm:$0xff] %vm17582_vm13, %v15089_v43  ;;  %v4412_v52 = vpop.permute.xlu1 %4411  ;;  %v8137_v41 = vld [vmem:[#allocation4 + $0x198] sm:$0xff]  ;;  %v17587_v43 = vpack.c.bf16 %v17586_v15, %v17574_v55  ;;  %vm17591_vm13 = vcmp.lt.s32.totalorder %v13245_v14, 16 }
 0x59e   : > { %5643 = vst.msk [vmem:[#allocation4 + $0x1e8] sm:$0xff] %vm17584_vm2, %v15133_v46  ;;  %8629 = vmatprep.mubr.bf16.mxu0 %v8137_v41  ;;  %v15289_v30 = vpop.permute.xlu0 %5323  ;;  %v10889_v55 = vld [vmem:[#allocation3 + $0x13a] sm:$0xff]  ;;  %vm17593_vm2 = vmmov %vm17588_vm9 }
 0x59f   : > { %4445 = vst.msk [vmem:[#allocation4 + $0x230] sm:$0xff] %vm17585_vm7, %v4412_v52  ;;  %8630 = vmatmul.mubr.bf16.gmra.mrb[72].mxu0 %v8136_v63  ;;  %v7819_v6 = vsel %vm17591_vm13, %v10889_v55, 0.0  ;;  %vm17597_vm7 = vcmp.lt.s32.totalorder %v17292_v53, 16  ;;  %v6295_v53 = vld [vmem:[#allocation3 + $0xf2] sm:$0xff] }
 0x5a0   : > { %7880 = vrot.lane.b32.xlu1 %v17587_v43, %s17049_s19  ;;  %7580 = vrot.lane.b32.xlu0 %v7537_v38, %s16922_s26  ;;  %v7840_v11 = vpack.c.bf16 %v7819_v6, %v10890_v26  ;;  %v7979_v56 = vsel %vm17597_vm7, %v15128_v58, 0.0  ;;  %vm17604_vm7 = vcmask 130048  }
 0x5a1   : > { %v4540_v46 = vpop.permute.xlu1 %4539  ;;  %v8000_v41 = vpack.c.bf16 %v7979_v56, %v15112_v54 }
 0x5a2   : > { %4573 = vst.msk [vmem:[#allocation4 + $0x230] sm:$0xff] %vm17588_vm9, %v4540_v46  ;;  %v15299_v51 = vpop.permute.xlu0 %5451  ;;  %vm17598_vm9 = vcmask 917184  }
 0x5a3   : > { %4797 = vst.msk [vmem:[#allocation4 + $0x230] sm:$0xff] %vm17589_vm11, %v15154_v29  ;;  %v6167_v29 = vld [vmem:[#allocation3 + $0xf8] sm:$0xff]  ;;  %vm17599_vm11 = vmmov %vm17591_vm13  ;;  %vm17601_vm13 = vcmask 64512  }
 0x5a4   : > { %6938 = vrot.lane.b32.xlu1 %v14888_v10, %s17193_s3  ;;  %5021 = vst.msk [vmem:[#allocation4 + $0x230] sm:$0xff] %vm17590_vm15, %v15170_v48  ;;  %7722 = vrot.lane.b32.xlu0 %v15303_v31, %s17181_s23  ;;  %v17596_v48 = vpack.c.bf16 %v17594_v21, %v17595_v61  ;;  %v6188_v37 = vpack.c.bf16 %v6167_v29, %v6166_v16  ;;  %v6328_v12 = vsel %vm17599_vm11, %v6296_v17, 0.0  ;;  %vm17600_vm15 = vcmp.lt.s32.totalorder %v14350_v0, 16  ;;  %v17608_v16 = vld [vmem:[#allocation70_spill] sm:$0xff] }
 0x5a5   : > { %v6935_v5 = vpop.permute.xlu1 %6934  ;;  %v6349_v38 = vpack.c.bf16 %v6328_v12, %v6295_v53  ;;  %vm17606_vm11 = vcmask 326784   ;;  %v15387_v53 = vld [vmem:[#allocation3 + $0x154] sm:$0xff] }
 0x5a6   : > { %6974 = vst.msk [vmem:[#allocation4 + $0x158] sm:$0xff] %vm17592_vm3, %v6935_v5  ;;  %v15314_v10 = vpop.permute.xlu0 %5611  ;;  %v15343_v5 = vld [vmem:[#allocation3 + $0x10c] sm:$0xff]  ;;  %vm17602_vm3 = vcmp.lt.s32.totalorder %v14456_v42, 16 }
 0x5a7   : > { %7134 = vst.msk [vmem:[#allocation4 + $0x158] sm:$0xff] %vm17593_vm2, %v15181_v60  ;;  %v15324_v60 = vld [vmem:[#allocation3 + $0x14c] sm:$0xff]  ;;  %v7039_v21 = vsel %vm17602_vm3, %v10889_v55, 0.0  ;;  %vm17603_vm2 = vcmask 1048512   ;;  %vm17612_vm3 = vcmp.ge.s32.totalorder %v17510_v9, 0 }
 0x5a8   : > { %6101 = vrot.lane.b32.xlu1 %v17596_v48, %s17131_s27  ;;  %7882 = vrot.lane.b32.xlu0 %v7840_v11, %s17049_s19  ;;  %v7981_v58 = vsel %vm17600_vm15, %v15324_v60, 0.0  ;;  %vm17610_vm15 = vcmask 523584  }
 0x5a9   : > { %v5768_v39 = vpop.permute.xlu1 %5767  ;;  %v8001_v6 = vpack.c.bf16 %v7981_v58, %v15126_v44  ;;  %v17617_v58 = vld [vmem:[#allocation85_spill] sm:$0xff] }
 0x5aa   : > { %5804 = vst.msk [vmem:[#allocation4 + $0x1e8] sm:$0xff] %vm17598_vm9, %v5768_v39  ;;  %v15329_v52 = vpop.permute.xlu0 %5325  ;;  %vm17605_vm9 = vcmp.ge.s32.totalorder %v17337_v32, 0  ;;  %v7058_v39 = vpack.c.bf16 %v7039_v21, %v10890_v26  ;;  %v15370_v32 = vld [vmem:[#allocation3 + $0x164] sm:$0xff] }
 0x5ab   : > { %v10499_v63 = vpop.f32.mrb[72].mxu1  ;;  %v6649_v11 = vsel %vm17605_vm9, %v15343_v5, 0.0  ;;  %vm17615_vm9 = vcmp.ge.s32.totalorder %v17464_v49, 0 }
 0x5ac   : > { %6230 = vrot.lane.b32.xlu1 %v6188_v37, %s17145_s1  ;;  %8042 = vrot.lane.b32.xlu0 %v8000_v41, %s16921_s25  ;;  %v10500_v43 = vpop.f32.mrb[73].mxu1  ;;  %v15365_v37 = vld [vmem:[#allocation3 + $0x15c] sm:$0xff]  ;;  %v6671_v12 = vpack.c.bf16 %v14955_v35, %v6649_v11 }
 0x5ad   : > { %v5927_v15 = vpop.permute.xlu1 %5926  ;;  %v10501_v14 = vadd.f32 %v10500_v43, %v10499_v63  ;;  %v10502_v40 = vpop.f32.mrb[74].mxu1  ;;  %v8141_v41 = vld [vmem:[#allocation4 + $0x1b8] sm:$0xff]  ;;  %v17616_v35 = vld [vmem:[#allocation9_spill] sm:$0xff] }
 0x5ae   : > { %5975 = vst.msk [vmem:[#allocation4 + $0x1c0] sm:$0xff] %vm5952_vm4, %v5927_v15  ;;  %v15339_v46 = vpop.permute.xlu0 %5453  ;;  %v10503_v19 = vpop.f32.mrb[75].mxu1  ;;  %v6168_v11 = vld [vmem:[#allocation3 + $0x100] sm:$0xff] }
 0x5af   : > { %5976 = vst.msk [vmem:[#allocation4 + $0x1c8] sm:$0xff] %vm17601_vm13, %v5927_v15  ;;  %v10504_v29 = vadd.f32 %v10503_v19, %v10502_v40  ;;  %v15348_v61 = vadd.f32 %v10501_v14, %v14793_v62  ;;  %v17607_v62 = vld [vmem:[#allocation77_spill] sm:$0xff]  ;;  %vm17611_vm13 = vcmask 785984   ;;  %v17618_v15 = vpack.c.bf16 %v17616_v35, %v17617_v58  ;;  %v6169_v14 = vld [vmem:[#allocation3 + $0x108] sm:$0xff]  ;;  %v17621_v19 = vld [vmem:[#allocation76_spill] sm:$0xff] }
 0x5b0   : > { %6391 = vrot.lane.b32.xlu1 %v6349_v38, %s17108_s20  ;;  %8044 = vrot.lane.b32.xlu0 %v8001_v6, %s16921_s25  ;;  %v17609_v56 = vpack.c.bf16 %v17607_v62, %v17608_v16  ;;  %v7486_v38 = vld [vmem:[#allocation3 + $0x14e] sm:$0xff]  ;;  %v6189_v16 = vpack.c.bf16 %v6169_v14, %v6168_v11  ;;  %v10892_v11 = vld [vmem:[#allocation3 + $0x104] sm:$0xff] }
 0x5b1   : > { %v5146_v48 = vpop.permute.xlu1 %5145  ;;  %v15357_v17 = vadd.f32 %v10504_v29, %v14802_v4  ;;  %v15375_v4 = vsel %vm17612_vm3, %v15365_v37, 0.0  ;;  %v17622_v6 = vld [vmem:[#allocation78_spill] sm:$0xff] }
 0x5b2   : > { %5193 = vst.msk [vmem:[#allocation4 + $0x208] sm:$0xff] %vm17603_vm2, %v5146_v48  ;;  %v7255_v55 = vpop.permute.xlu0 %7254  ;;  %vm17613_vm2 = vcmask 720384   ;;  %v17623_v29 = vpack.c.bf16 %v17621_v19, %v17622_v6  ;;  %v10891_v6 = vld [vmem:[#allocation3 + $0x14a] sm:$0xff] }
 0x5b3   : > { %5194 = vst.msk [vmem:[#allocation4 + $0x210] sm:$0xff] %vm17604_vm7, %v5146_v48  ;;  %vm17614_vm7 = vcmask 392384   ;;  %v6298_v48 = vld [vmem:[#allocation3 + $0x10a] sm:$0xff] }
 0x5b4   : > { %5356 = vst.msk [vmem:[#allocation4 + $0x210] sm:$0xff] %vm17606_vm11, %v15199_v7  ;;  %6552 = vrot.lane.b32.xlu1 %v17609_v56, %s17160_s0  ;;  %7102 = vrot.lane.b32.xlu0 %v7058_v39, %s17043_s17  ;;  %vm17619_vm11 = vcmask 589184  }
 0x5b5   : > { %5484 = vst.msk [vmem:[#allocation4 + $0x210] sm:$0xff] %vm17610_vm15, %v15211_v47  ;;  %v4414_v7 = vpop.permute.xlu1 %4413  ;;  %v8142_v26 = vld [vmem:[#allocation4 + $0x1c0] sm:$0xff]  ;;  %v6676_v47 = vpack.c.bf16 %v15370_v32, %v15375_v4  ;;  %vm17620_vm15 = vmmov %vm17611_vm13 }
 0x5b6   : > { %7294 = vst.msk [vmem:[#allocation4 + $0x158] sm:$0xff] %vm17611_vm13, %v7255_v55  ;;  %8637 = vmatprep.mubr.bf16.mxu0 %v8142_v26  ;;  %v15384_v63 = vpop.permute.xlu0 %5613  ;;  %vm17624_vm13 = vcmask 982784   ;;  %v7487_v55 = vld [vmem:[#allocation3 + $0x156] sm:$0xff] }
 0x5b7   : > { %5644 = vst.msk [vmem:[#allocation4 + $0x210] sm:$0xff] %vm17613_vm2, %v15246_v22  ;;  %8638 = vmatmul.mubr.bf16.gmra.mrb[76].mxu0 %v8141_v41  ;;  %v7358_v22 = vsel %vm17615_vm9, %v15324_v60, 0.0  ;;  %vm17625_vm3 = vmmov %vm17624_vm13  ;;  %vm17626_vm2 = vcmp.ge.s32.totalorder %v17391_v45, 0  ;;  %vm17628_vm9 = vcmp.lt.s32.totalorder %v17320_v24, 16  ;;  %v6297_v41 = vld [vmem:[#allocation3 + $0x102] sm:$0xff] }
 0x5b8   : > { %4446 = vst.msk [vmem:[#allocation4 + $0x258] sm:$0xff] %vm17614_vm7, %v4414_v7  ;;  %6713 = vrot.lane.b32.xlu1 %v6671_v12, %s17128_s18  ;;  %7262 = vrot.lane.b32.xlu0 %v17618_v15, %s16920_s28  ;;  %v7378_v21 = vpack.c.bf16 %v15387_v53, %v7358_v22  ;;  %v7518_v62 = vsel %vm17626_vm2, %v7486_v38, 0.0  ;;  %vm17627_vm7 = vcmask 917184   ;;  %v6330_v39 = vsel %vm17628_vm9, %v6298_v48, 0.0  ;;  %v6881_v22 = vld [vmem:[#allocation3 + $0x148] sm:$0xff]  ;;  %v6880_v38 = vld [vmem:[#allocation3 + $0x140] sm:$0xff] }
 0x5b9   : > { %v4542_v43 = vpop.permute.xlu1 %4541  ;;  %v6350_v15 = vpack.c.bf16 %v6330_v39, %v6297_v41  ;;  %v15427_v19 = vpack.c.bf16 %v6881_v22, %v6880_v38  ;;  %vm17633_vm2 = vcmask 326784   ;;  %v8146_v39 = vld [vmem:[#allocation4 + $0x1e0] sm:$0xff] }
 0x5ba   : > { %4574 = vst.msk [vmem:[#allocation4 + $0x258] sm:$0xff] %vm17619_vm11, %v4542_v43  ;;  %v7415_v40 = vpop.permute.xlu0 %7414  ;;  %vm17629_vm11 = vcmask 1048512   ;;  %v15457_v41 = vld [vmem:[#allocation3 + $0x15e] sm:$0xff] }
 0x5bb   : > { %4798 = vst.msk [vmem:[#allocation4 + $0x258] sm:$0xff] %vm17620_vm15, %v15261_v18  ;;  %vm17630_vm15 = vcmask 130048  }
 0x5bc   : > { %6103 = vrot.lane.b32.xlu1 %v17623_v29, %s17131_s27  ;;  %5022 = vst.msk [vmem:[#allocation4 + $0x258] sm:$0xff] %vm17624_vm13, %v15276_v59  ;;  %7422 = vrot.lane.b32.xlu0 %v7378_v21, %s17167_s30  ;;  %v7538_v59 = vpack.c.bf16 %v7487_v55, %v7518_v62  ;;  %vm17631_vm13 = vcmask 64512   ;;  %v7041_v21 = vsel %vm1661_vm5, %v10891_v6, 0.0  ;;  %vm17636_vm9 = vmmov %vm17630_vm15  ;;  %v10893_v62 = vld [vmem:[#allocation3 + $0x142] sm:$0xff] }
 0x5bd   : > { %7454 = vst.msk [vmem:[#allocation4 + $0x158] sm:$0xff] %vm17625_vm3, %v7415_v40  ;;  %v5770_v18 = vpop.permute.xlu1 %5769  ;;  %vm17632_vm3 = vcmp.lt.s32.totalorder %v14350_v0, 16  ;;  %v8110_v29 = vld [vmem:[#allocation4 + $0xc0] sm:$0xff] }
 0x5be   : > { %5805 = vst.msk [vmem:[#allocation4 + $0x210] sm:$0xff] %vm17627_vm7, %v5770_v18  ;;  %v10411_v56 = vpop.f32.mrb[56].mxu0  ;;  %v7575_v7 = vpop.permute.xlu0 %7574  ;;  %v6491_v14 = vsel %vm17632_vm3, %v15343_v5, 0.0  ;;  %vm17635_vm7 = vmmov %vm17629_vm11  ;;  %v7059_v18 = vpack.c.bf16 %v7041_v21, %v10893_v62  ;;  %vm17640_vm3 = vcmask 720384  }
 0x5bf   : > { %v10412_v26 = vpop.f32.mrb[57].mxu0  ;;  %7622 = vst.msk [vmem:[#allocation4 + $0x158] sm:$0xff] %vm17629_vm11, %v7575_v7  ;;  %v6511_v55 = vpack.c.bf16 %v6491_v14, %v10892_v11  ;;  %vm17637_vm11 = vmmov %vm17633_vm2 }
 0x5c0   : > { %6232 = vrot.lane.b32.xlu1 %v6189_v16, %s17145_s1  ;;  %7623 = vst.msk [vmem:[#allocation4 + $0x160] sm:$0xff] %vm17630_vm15, %v7575_v7  ;;  %v15416_v45 = vadd.f32 %v10412_v26, %v10411_v56  ;;  %v10414_v12 = vpop.f32.mrb[58].mxu0  ;;  %7582 = vrot.lane.b32.xlu0 %v7538_v59, %s16922_s26  ;;  %vm17638_vm15 = vcmask 523584   ;;  %v7201_v16 = vsel %vm1789_vm6, %v15324_v60, 0.0  ;;  %v17643_v26 = vld [vmem:[#allocation47_spill] sm:$0xff]  ;;  %v17644_v59 = vld [vmem:[#allocation8_spill] sm:$0xff] }
 0x5c1   : > { %v10415_v35 = vpop.f32.mrb[59].mxu0  ;;  %v5929_v58 = vpop.permute.xlu1 %5928 }
 0x5c2   : > { %v15419_v43 = vadd.f32 %v10415_v35, %v10414_v12  ;;  %5977 = vst.msk [vmem:[#allocation4 + $0x1e8] sm:$0xff] %vm5952_vm4, %v5929_v58  ;;  %v7715_v40 = vpop.permute.xlu0 %7714  ;;  %v17645_v12 = vpack.c.bf16 %v17643_v26, %v17644_v59 }
 0x5c3   : > { %5978 = vst.msk [vmem:[#allocation4 + $0x1f0] sm:$0xff] %vm17631_vm13, %v5929_v58  ;;  %vm17639_vm13 = vmmov %vm17638_vm15 }
 0x5c4   : > { %6393 = vrot.lane.b32.xlu1 %v6350_v15, %s17108_s20  ;;  %7756 = vst.msk [vmem:[#allocation4 + $0x110] sm:$0xff] %vm17633_vm2, %v7715_v40  ;;  %6944 = vrot.lane.b32.xlu0 %v15427_v19, %s17193_s3  ;;  %vm17641_vm2 = vcmask 917184   ;;  %v15466_v15 = vld [vmem:[#allocation3 + $0x166] sm:$0xff] }
 0x5c5   : > { %v5148_v48 = vpop.permute.xlu1 %5147 }
 0x5c6   : > { %5195 = vst.msk [vmem:[#allocation4 + $0x230] sm:$0xff] %vm17635_vm7, %v5148_v48  ;;  %v7875_v0 = vpop.permute.xlu0 %7874  ;;  %v8129_v5 = vld [vmem:[#allocation4 + $0x158] sm:$0xff]  ;;  %vm17642_vm7 = vcmp.ge.s32.totalorder %v17478_v13, 0 }
 0x5c7   : > { %5196 = vst.msk [vmem:[#allocation4 + $0x238] sm:$0xff] %vm17636_vm9, %v5148_v48  ;;  %8774 = vmatprep.mubr.bf16.mxu1 %v8129_v5  ;;  %vm17646_vm9 = vmmov %vm17640_vm3 }
 0x5c8   : > { %5357 = vst.msk [vmem:[#allocation4 + $0x238] sm:$0xff] %vm17637_vm11, %v15289_v30  ;;  %6554 = vrot.lane.b32.xlu1 %v6511_v55, %s17160_s0  ;;  %7104 = vrot.lane.b32.xlu0 %v7059_v18, %s17043_s17  ;;  %vm17647_vm11 = vcmask 64512   ;;  %v7791_v55 = vld [vmem:[#allocation3 + $0x15a] sm:$0xff] }
 0x5c9   : > { %5485 = vst.msk [vmem:[#allocation4 + $0x238] sm:$0xff] %vm17638_vm15, %v15299_v51  ;;  %v5772_v30 = vpop.permute.xlu1 %5771  ;;  %v8147_v56 = vld [vmem:[#allocation4 + $0x1e8] sm:$0xff]  ;;  %v7360_v51 = vsel %vm17642_vm7, %v15365_v37, 0.0  ;;  %vm17648_vm15 = vcmp.lt.s32.totalorder %v17320_v24, 16  ;;  %v7662_v24 = vld [vmem:[#allocation3 + $0x150] sm:$0xff]  ;;  %vm17653_vm7 = vcmask 326784  }
 0x5ca   : > { %7916 = vst.msk [vmem:[#allocation4 + $0x110] sm:$0xff] %vm17639_vm13, %v7875_v0  ;;  %8645 = vmatprep.mubr.bf16.mxu0 %v8147_v56  ;;  %v8035_v7 = vpop.permute.xlu0 %8034  ;;  %v7379_v35 = vpack.c.bf16 %v15370_v32, %v7360_v51  ;;  %v7821_v58 = vsel %vm17648_vm15, %v10891_v6, 0.0  ;;  %v7663_v6 = vld [vmem:[#allocation3 + $0x158] sm:$0xff]  ;;  %v8151_v56 = vld [vmem:[#allocation4 + $0x208] sm:$0xff]  ;;  %vm17656_vm15 = vcmp.lt.s32.totalorder %v14456_v42, 16 }
 0x5cb   : > { %5645 = vst.msk [vmem:[#allocation4 + $0x238] sm:$0xff] %vm17640_vm3, %v15314_v10  ;;  %8646 = vmatmul.mubr.bf16.gmra.mrb[80].mxu0 %v8146_v39  ;;  %v7219_v10 = vpack.c.bf16 %v7201_v16, %v15126_v44  ;;  %v17649_v44 = vld [vmem:[#allocation19_spill] sm:$0xff]  ;;  %v7841_v21 = vpack.c.bf16 %v7821_v58, %v10893_v62  ;;  %vm17651_vm3 = vcmask 1048512   ;;  %v15489_v16 = vpack.c.bf16 %v7663_v6, %v7662_v24 }
 0x5cc   : > { %5806 = vst.msk [vmem:[#allocation4 + $0x238] sm:$0xff] %vm17641_vm2, %v5772_v30  ;;  %6715 = vrot.lane.b32.xlu1 %v17645_v12, %s17128_s18  ;;  %vm17650_vm13 = vcmp.ge.s32.totalorder %v17649_v44, 0  ;;  %vm17652_vm2 = vcmask 130048   ;;  %v7790_v39 = vld [vmem:[#allocation3 + $0x152] sm:$0xff] }
 0x5cd   : > { %8076 = vst.msk [vmem:[#allocation4 + $0x110] sm:$0xff] %vm17646_vm9, %v8035_v7  ;;  %7264 = vrot.lane.b32.xlu0 %v7219_v10, %s16920_s28  ;;  %v5931_v22 = vpop.permute.xlu1 %5930  ;;  %v7520_v38 = vsel %vm17650_vm13, %v15457_v41, 0.0  ;;  %vm17654_vm9 = vcmask 523584   ;;  %vm17657_vm13 = vcmask 851584   ;;  %v6171_v10 = vld [vmem:[#allocation3 + $0x118] sm:$0xff]  ;;  %v6170_v24 = vld [vmem:[#allocation3 + $0x110] sm:$0xff] }
 0x5ce   : > { %5979 = vst.msk [vmem:[#allocation4 + $0x210] sm:$0xff] %vm5952_vm4, %v5931_v22  ;;  %v15471_v14 = vpop.permute.xlu0 %8036  ;;  %v7539_v48 = vpack.c.bf16 %v15466_v15, %v7520_v38  ;;  %v17661_v38 = vld [vmem:[#allocation80_spill] sm:$0xff] }
 0x5cf   : > { %5980 = vst.msk [vmem:[#allocation4 + $0x218] sm:$0xff] %vm17647_vm11, %v5931_v22  ;;  %vm17655_vm11 = vcmask 720384   ;;  %v17658_v22 = vld [vmem:[#allocation82_spill] sm:$0xff] }
 0x5d0   : > { %7724 = vrot.lane.b32.xlu1 %v15427_v19, %s17181_s23 }
 0x5d1   : > { %v5150_v40 = vpop.permute.xlu1 %5149  ;;  %7424 = vrot.lane.b32.xlu0 %v7379_v35, %s17167_s30 }
 0x5d2   : > { %5197 = vst.msk [vmem:[#allocation4 + $0x258] sm:$0xff] %vm17651_vm3, %v5150_v40  ;;  %v15481_v11 = vpop.permute.xlu0 %7096  ;;  %vm17659_vm3 = vcmp.lt.s32.totalorder %v17658_v22, 16 }
 0x5d3   : > { %5198 = vst.msk [vmem:[#allocation4 + $0x260] sm:$0xff] %vm17652_vm2, %v5150_v40  ;;  %v10505_v0 = vpop.f32.mrb[76].mxu1  ;;  %v7983_v35 = vsel %vm17659_vm3, %v15365_v37, 0.0  ;;  %vm17663_vm2 = vcmask 917184  }
 0x5d4   : > { %5358 = vst.msk [vmem:[#allocation4 + $0x260] sm:$0xff] %vm17653_vm7, %v15329_v52  ;;  %7884 = vrot.lane.b32.xlu1 %v7841_v21, %s17049_s19  ;;  %v10506_v62 = vpop.f32.mrb[77].mxu1  ;;  %v6300_v21 = vld [vmem:[#allocation3 + $0x11a] sm:$0xff]  ;;  %vm17664_vm7 = vmmov %vm17656_vm15 }
 0x5d5   : > { %5486 = vst.msk [vmem:[#allocation4 + $0x260] sm:$0xff] %vm17654_vm9, %v15339_v46  ;;  %v6388_v5 = vpop.permute.xlu1 %6387  ;;  %v8152_v18 = vld [vmem:[#allocation4 + $0x210] sm:$0xff]  ;;  %7584 = vrot.lane.b32.xlu0 %v7539_v48, %s16922_s26  ;;  %v10507_v52 = vadd.f32 %v10506_v62, %v10505_v0  ;;  %v10508_v30 = vpop.f32.mrb[78].mxu1  ;;  %v7823_v46 = vsel %vm17656_vm15, %v7791_v55, 0.0  ;;  %v6190_v0 = vpack.c.bf16 %v6171_v10, %v6170_v24  ;;  %vm17665_vm9 = vcmask 130048   ;;  %vm17667_vm15 = vmmov %vm17659_vm3 }
 0x5d6   : > { %5646 = vst.msk [vmem:[#allocation4 + $0x260] sm:$0xff] %vm17655_vm11, %v15384_v63  ;;  %8653 = vmatprep.mubr.bf16.mxu0 %v8152_v18  ;;  %v15494_v51 = vpop.permute.xlu0 %7256  ;;  %v10509_v63 = vpop.f32.mrb[79].mxu1  ;;  %v7842_v12 = vpack.c.bf16 %v7823_v46, %v7790_v39  ;;  %v15516_v48 = vld [vmem:[#allocation3 + $0x16c] sm:$0xff]  ;;  %vm17666_vm11 = vcmask 64512   ;;  %vm17670_vm3 = vcmask 326784  }
 0x5d7   : > { %6428 = vst.msk [vmem:[#allocation4 + $0x150] sm:$0xff] %vm6419_vm10, %v6388_v5  ;;  %8654 = vmatmul.mubr.bf16.gmra.mrb[84].mxu0 %v8151_v56  ;;  %v10510_v7 = vadd.f32 %v10509_v63, %v10508_v30  ;;  %v15499_v26 = vadd.f32 %v10507_v52, %v14930_v2  ;;  %v17660_v2 = vld [vmem:[#allocation79_spill] sm:$0xff]  ;;  %v8002_v5 = vpack.c.bf16 %v7983_v35, %v15387_v53  ;;  %v7985_v62 = vsel %vm1789_vm6, %v15516_v48, 0.0  ;;  %v6461_v52 = vld [vmem:[#allocation3 + $0x11c] sm:$0xff] }
 0x5d8   : > { %6942 = vrot.lane.b32.xlu1 %v15303_v31, %s17193_s3  ;;  %v17662_v40 = vpack.c.bf16 %v17660_v2, %v17661_v38  ;;  %v6299_v30 = vld [vmem:[#allocation3 + $0x112] sm:$0xff]  ;;  %v8003_v42 = vpack.c.bf16 %v7985_v62, %v15370_v32  ;;  %v6493_v63 = vsel %vm17667_vm15, %v6461_v52, 0.0  ;;  %vm17675_vm15 = vcmask 720384  }
 0x5d9   : > { %v6549_v59 = vpop.permute.xlu1 %6548  ;;  %7726 = vrot.lane.b32.xlu0 %v15489_v16, %s17181_s23  ;;  %v15508_v58 = vadd.f32 %v10510_v7, %v14938_v20  ;;  %v6332_v20 = vsel %vm17664_vm7, %v6300_v21, 0.0  ;;  %v17668_v7 = vld [vmem:[#allocation84_spill] sm:$0xff]  ;;  %v15540_v10 = vld [vmem:[#allocation3 + $0x12c] sm:$0xff]  ;;  %vm17672_vm7 = vcmask 523584  }
 0x5da   : > { %6589 = vst.msk [vmem:[#allocation4 + $0x150] sm:$0xff] %vm17657_vm13, %v6549_v59  ;;  %v15510_v44 = vpop.permute.xlu0 %7416  ;;  %v6351_v46 = vpack.c.bf16 %v6332_v20, %v6299_v30  ;;  %vm17669_vm13 = vcmp.lt.s32.totalorder %v17668_v7, 16  ;;  %v6460_v35 = vld [vmem:[#allocation3 + $0x114] sm:$0xff] }
 0x5db   : > { %v7043_v59 = vsel %vm17669_vm13, %v7791_v55, 0.0  ;;  %v6512_v38 = vpack.c.bf16 %v6493_v63, %v6460_v35  ;;  %v7203_v55 = vsel %vm1791_vm0, %v15365_v37, 0.0  ;;  %v8156_v37 = vld [vmem:[#allocation4 + $0x230] sm:$0xff]  ;;  %v6173_v35 = vld [vmem:[#allocation3 + $0x128] sm:$0xff] }
 0x5dc   : > { %6105 = vrot.lane.b32.xlu1 %v17662_v40, %s17131_s27  ;;  %v7060_v40 = vpack.c.bf16 %v7043_v59, %v7790_v39  ;;  %v7220_v39 = vpack.c.bf16 %v7203_v55, %v15387_v53  ;;  %v17679_v55 = vld [vmem:[#allocation10_spill] sm:$0xff] }
 0x5dd   : > { %v5774_v6 = vpop.permute.xlu1 %5773  ;;  %7886 = vrot.lane.b32.xlu0 %v7842_v12, %s17049_s19 }
 0x5de   : > { %5807 = vst.msk [vmem:[#allocation4 + $0x260] sm:$0xff] %vm17663_vm2, %v5774_v6  ;;  %v15526_v18 = vpop.permute.xlu0 %7576  ;;  %vm17671_vm2 = vcmp.ge.s32.totalorder %v17464_v49, 0 }
 0x5df   : > { %7625 = vst.msk [vmem:[#allocation4 + $0x188] sm:$0xff] %vm17665_vm9, %v15526_v18  ;;  %v6653_v22 = vsel %vm17671_vm2, %v15540_v10, 0.0  ;;  %vm17673_vm9 = vmmov %vm17666_vm11 }
 0x5e0   : > { %6234 = vrot.lane.b32.xlu1 %v6190_v0, %s17145_s1  ;;  %v6673_v0 = vpack.c.bf16 %v15112_v54, %v6653_v22  ;;  %v7490_v54 = vld [vmem:[#allocation3 + $0x16e] sm:$0xff]  ;;  %vm17683_vm2 = vmmov %vm17675_vm15 }
 0x5e1   : > { %v5933_v56 = vpop.permute.xlu1 %5932  ;;  %8046 = vrot.lane.b32.xlu0 %v8002_v5, %s16921_s25  ;;  %v15558_v5 = vld [vmem:[#allocation3 + $0x174] sm:$0xff] }
 0x5e2   : > { %5981 = vst.msk [vmem:[#allocation4 + $0x238] sm:$0xff] %vm5952_vm4, %v5933_v56  ;;  %v7719_v12 = vpop.permute.xlu0 %7718 }
 0x5e3   : > { %5982 = vst.msk [vmem:[#allocation4 + $0x240] sm:$0xff] %vm17666_vm11, %v5933_v56  ;;  %vm17674_vm11 = vcmp.ge.s32.totalorder %v17493_v57, 0 }
 0x5e4   : > { %6395 = vrot.lane.b32.xlu1 %v6351_v46, %s17108_s20  ;;  %7758 = vst.msk [vmem:[#allocation4 + $0x160] sm:$0xff] %vm17670_vm3, %v7719_v12  ;;  %v7362_v20 = vsel %vm17674_vm11, %v15516_v48, 0.0  ;;  %vm17686_vm11 = vcmp.lt.s32.totalorder %v13868_v1, 16 }
 0x5e5   : > { %v6710_v2 = vpop.permute.xlu1 %6709  ;;  %8048 = vrot.lane.b32.xlu0 %v8003_v42, %s16921_s25  ;;  %v7380_v59 = vpack.c.bf16 %v15558_v5, %v7362_v20 }
 0x5e6   : > { %6750 = vst.msk [vmem:[#allocation4 + $0x150] sm:$0xff] %vm6741_vm1, %v6710_v2  ;;  %v7879_v21 = vpop.permute.xlu0 %7878  ;;  %v7491_v2 = vld [vmem:[#allocation3 + $0x176] sm:$0xff] }
 0x5e7   : > { %7918 = vst.msk [vmem:[#allocation4 + $0x160] sm:$0xff] %vm17672_vm7, %v7879_v21  ;;  %v17680_v21 = vld [vmem:[#allocation25_spill] sm:$0xff] }
 0x5e8   : > { %6556 = vrot.lane.b32.xlu1 %v6512_v38, %s17160_s0  ;;  %v17677_v38 = vld [vmem:[#allocation15_spill] sm:$0xff] }
 0x5e9   : > { %v5935_v24 = vpop.permute.xlu1 %5934  ;;  %v8157_v6 = vld [vmem:[#allocation4 + $0x238] sm:$0xff]  ;;  %7106 = vrot.lane.b32.xlu0 %v7060_v40, %s17043_s17  ;;  %vm17678_vm13 = vcmp.ge.s32.totalorder %v17677_v38, 0 }
 0x5ea   : > { %5983 = vst.msk [vmem:[#allocation4 + $0x260] sm:$0xff] %vm5952_vm4, %v5935_v24  ;;  %v10417_v49 = vpop.f32.mrb[60].mxu0  ;;  %8661 = vmatprep.mubr.bf16.mxu0 %v8157_v6  ;;  %v8039_v62 = vpop.permute.xlu0 %8038  ;;  %vm17676_vm4 = vmmov %vm17670_vm3  ;;  %v7522_v40 = vsel %vm17678_vm13, %v7490_v54, 0.0  ;;  %v6302_v6 = vld [vmem:[#allocation3 + $0x12a] sm:$0xff]  ;;  %vm17690_vm13 = vcmask 1048512  }
 0x5eb   : > { %5984 = vst.msk [vmem:[#allocation4 + $0x268] sm:$0xff] %vm17673_vm9, %v5935_v24  ;;  %v10418_v52 = vpop.f32.mrb[61].mxu0  ;;  %8662 = vmatmul.mubr.bf16.gmra.mrb[88].mxu0 %v8156_v37  ;;  %v17681_v24 = vpack.c.bf16 %v17679_v55, %v17680_v21  ;;  %v7540_v20 = vpack.c.bf16 %v7491_v2, %v7522_v40  ;;  %vm17682_vm3 = vmmov %vm17672_vm7  ;;  %vm17684_vm7 = vcmask 719872   ;;  %v7793_v2 = vld [vmem:[#allocation3 + $0x16a] sm:$0xff]  ;;  %vm17685_vm9 = vcmask 392384   ;;  %v15602_v55 = vld [vmem:[#allocation3 + $0x13c] sm:$0xff] }
 0x5ec   : > { %6717 = vrot.lane.b32.xlu1 %v6673_v0, %s17128_s18  ;;  %8078 = vst.msk [vmem:[#allocation4 + $0x160] sm:$0xff] %vm17675_vm15, %v8039_v62  ;;  %v15565_v30 = vadd.f32 %v10418_v52, %v10417_v49  ;;  %v10420_v56 = vpop.f32.mrb[62].mxu0  ;;  %v6172_v0 = vld [vmem:[#allocation3 + $0x120] sm:$0xff]  ;;  %v8161_v62 = vld [vmem:[#allocation4 + $0x258] sm:$0xff]  ;;  %v6334_v52 = vsel %vm1661_vm5, %v6302_v6, 0.0  ;;  %v7045_v38 = vsel %vm17686_vm11, %v7793_v2, 0.0 }
 0x5ed   : > { %v10421_v46 = vpop.f32.mrb[63].mxu0  ;;  %v7717_v42 = vpop.permute.xlu1 %7716  ;;  %v8128_v63 = vld [vmem:[#allocation4 + $0x150] sm:$0xff]  ;;  %7266 = vrot.lane.b32.xlu0 %v7220_v39, %s16920_s28  ;;  %v6191_v37 = vpack.c.bf16 %v6173_v35, %v6172_v0  ;;  %vm17687_vm15 = vcmask 589184   ;;  %v6462_v6 = vld [vmem:[#allocation3 + $0x124] sm:$0xff]  ;;  %vm17695_vm11 = vcmask 130048  }
 0x5ee   : > { %v15569_v12 = vadd.f32 %v10421_v46, %v10420_v56  ;;  %7757 = vst.msk [vmem:[#allocation4 + $0x138] sm:$0xff] %vm17676_vm4, %v7717_v42  ;;  %8775 = vmatmul.mubr.bf16.gmra.mrb[96].mxu1 %v8128_v63  ;;  %v15574_v22 = vpop.permute.xlu0 %8040  ;;  %v8090_v56 = vld [vmem:[#allocation4 + $0x20] sm:$0xff]  ;;  %v7665_v63 = vld [vmem:[#allocation3 + $0x168] sm:$0xff]  ;;  %vm17688_vm4 = vcmask 785984  }
 0x5ef   : > { %v6301_v46 = vld [vmem:[#allocation3 + $0x122] sm:$0xff] }
 0x5f0   : > { %6107 = vrot.lane.b32.xlu1 %v17681_v24, %s17131_s27  ;;  %v7664_v42 = vld [vmem:[#allocation3 + $0x160] sm:$0xff]  ;;  %v6352_v35 = vpack.c.bf16 %v6334_v52, %v6301_v46 }
 0x5f1   : > { %v7877_v39 = vpop.permute.xlu1 %7876  ;;  %v8162_v49 = vld [vmem:[#allocation4 + $0x260] sm:$0xff]  ;;  %7426 = vrot.lane.b32.xlu0 %v7380_v59, %s17167_s30  ;;  %v7683_v21 = vpack.c.bf16 %v7665_v63, %v7664_v42 }
 0x5f2   : > { %7917 = vst.msk [vmem:[#allocation4 + $0x138] sm:$0xff] %vm17682_vm3, %v7877_v39  ;;  %8669 = vmatprep.mubr.bf16.mxu0 %v8162_v49  ;;  %v15586_v54 = vpop.permute.xlu0 %7098  ;;  %vm17691_vm3 = vcmp.ge.s32.totalorder %v17478_v13, 0  ;;  %v7332_v46 = vld [vmem:[#allocation3 + $0x17c] sm:$0xff] }
 0x5f3   : > { %8077 = vst.msk [vmem:[#allocation4 + $0x138] sm:$0xff] %vm17683_vm2, %v15471_v14  ;;  %8670 = vmatmul.mubr.bf16.gmra.mrb[92].mxu0 %v8161_v62  ;;  %v6495_v14 = vsel %vm1789_vm6, %v15540_v10, 0.0  ;;  %vm17689_vm6 = vcmask 982784   ;;  %v7205_v62 = vsel %vm1793_vm14, %v15516_v48, 0.0  ;;  %vm17692_vm2 = vmmov %vm17684_vm7 }
 0x5f4   : > { %6236 = vrot.lane.b32.xlu1 %v6191_v37, %s17145_s1  ;;  %10687 = vmatprep.mubr.msk.bf16.mxu0 %vm17684_vm7, %v8090_v56  ;;  %v6513_v39 = vpack.c.bf16 %v6495_v14, %v6462_v6  ;;  %v8100_v56 = vld [vmem:[#allocation4 + $0x70] sm:$0xff]  ;;  %vm17693_vm7 = vmmov %vm17692_vm2  ;;  %v7221_v48 = vpack.c.bf16 %v7205_v62, %v15370_v32  ;;  %v7825_v6 = vsel %vm1661_vm5, %v7793_v2, 0.0  ;;  %vm17698_vm5 = vcmask 392384   ;;  %v7667_v62 = vld [vmem:[#allocation3 + $0x178] sm:$0xff] }
 0x5f5   : > { %v6937_v59 = vpop.permute.xlu1 %6936  ;;  %7586 = vrot.lane.b32.xlu0 %v7540_v20, %s16922_s26  ;;  %v15612_v20 = vld [vmem:[#allocation3 + $0x144] sm:$0xff]  ;;  %v7843_v2 = vpack.c.bf16 %v7825_v6, %v7792_v28 }
 0x5f6   : > { %6975 = vst.msk [vmem:[#allocation4 + $0x180] sm:$0xff] %vm17685_vm9, %v6937_v59  ;;  %v15599_v40 = vpop.permute.xlu0 %7258  ;;  %vm17694_vm9 = vcmp.ge.s32.totalorder %v17510_v9, 0 }
 0x5f7   : > { %7135 = vst.msk [vmem:[#allocation4 + $0x180] sm:$0xff] %vm17687_vm15, %v15481_v11  ;;  %v10511_v24 = vpop.f32.mrb[80].mxu1  ;;  %v7061_v11 = vpack.c.bf16 %v7045_v38, %v7792_v28  ;;  %v7364_v14 = vsel %vm17694_vm9, %v7332_v46, 0.0  ;;  %vm17696_vm15 = vcmp.ge.s32.totalorder %v13855_v27, 0  ;;  %vm17704_vm9 = vcmask 785984  }
 0x5f8   : > { %6397 = vrot.lane.b32.xlu1 %v6352_v35, %s17108_s20  ;;  %7295 = vst.msk [vmem:[#allocation4 + $0x180] sm:$0xff] %vm17688_vm4, %v15494_v51  ;;  %v10512_v0 = vpop.f32.mrb[81].mxu1  ;;  %v8095_v51 = vld [vmem:[#allocation4 + $0x48] sm:$0xff]  ;;  %vm17697_vm4 = vmmov %vm17692_vm2 }
 0x5f9   : > { %7455 = vst.msk [vmem:[#allocation4 + $0x180] sm:$0xff] %vm17689_vm6, %v15510_v44  ;;  %6948 = vrot.lane.b32.xlu0 %v7683_v21, %s17193_s3  ;;  %v10513_v49 = vadd.f32 %v10512_v0, %v10511_v24  ;;  %v10514_v37 = vpop.f32.mrb[82].mxu1  ;;  %v6655_v44 = vsel %vm17691_vm3, %v15602_v55, 0.0  ;;  %v15632_v35 = vld [vmem:[#allocation3 + $0x184] sm:$0xff]  ;;  %vm17699_vm6 = vmmov %vm17692_vm2  ;;  %vm17701_vm3 = vcmask 589184  }
 0x5fa   : > { %v6100_v10 = vpop.permute.xlu1 %6099  ;;  %7624 = vst.msk [vmem:[#allocation4 + $0x180] sm:$0xff] %vm17690_vm13, %v15526_v18  ;;  %v15620_v52 = vpop.permute.xlu0 %7418  ;;  %v6674_v59 = vpack.c.bf16 %v15612_v20, %v6655_v44  ;;  %v7381_v9 = vpack.c.bf16 %v15632_v35, %v7364_v14  ;;  %vm17700_vm13 = vcmask 851584   ;;  %v7666_v44 = vld [vmem:[#allocation3 + $0x170] sm:$0xff] }
 0x5fb   : > { %6139 = vst.msk [vmem:[#allocation4 + $0x178] sm:$0xff] %vm6129_vm8, %v6100_v10  ;;  %v10515_v18 = vpop.f32.mrb[83].mxu1  ;;  %10688 = vmatmul.mubr.msk.bf16.vlgmr.msra.gmra.mrb[96].mxu0 %vm17692_vm2, %v8095_v51  ;;  %v15626_v63 = vadd.f32 %v10513_v49, %v15074_v33  ;;  %v7492_v33 = vld [vmem:[#allocation3 + $0x17e] sm:$0xff]  ;;  %v7684_v28 = vpack.c.bf16 %v7667_v62, %v7666_v44  ;;  %vm17702_vm2 = vcmp.lt.s32.totalorder %v17668_v7, 16  ;;  %v8120_v14 = vld [vmem:[#allocation4 + $0x110] sm:$0xff]  ;;  %v7987_v7 = vsel %vm1791_vm0, %v7332_v46, 0.0 }
 0x5fc   : > { %6558 = vrot.lane.b32.xlu1 %v6513_v39, %s17160_s0  ;;  %v10516_v42 = vadd.f32 %v10515_v18, %v10514_v37  ;;  %10691 = vmatprep.mubr.msk.bf16.mxu0 %vm17693_vm7, %v8100_v56  ;;  %v7493_v39 = vld [vmem:[#allocation3 + $0x186] sm:$0xff]  ;;  %vm17703_vm7 = vmmov %vm17697_vm4 }
 0x5fd   : > { %7108 = vrot.lane.b32.xlu0 %v7061_v11, %s17043_s17  ;;  %v7524_v11 = vsel %vm17696_vm15, %v7492_v33, 0.0  ;;  %vm17706_vm15 = vcmask 326784  }
 0x5fe   : > { %v6229_v13 = vpop.permute.xlu1 %6228  ;;  %v15637_v38 = vadd.f32 %v10516_v42, %v15083_v25  ;;  %v15639_v24 = vpop.permute.xlu0 %7578  ;;  %v8105_v25 = vld [vmem:[#allocation4 + $0x98] sm:$0xff]  ;;  %v7541_v51 = vpack.c.bf16 %v7493_v39, %v7524_v11  ;;  %v8115_v42 = vld [vmem:[#allocation4 + $0xe8] sm:$0xff]  ;;  %v8004_v11 = vpack.c.bf16 %v7987_v7, %v15558_v5 }
 0x5ff   : > { %6268 = vst.msk [vmem:[#allocation4 + $0x178] sm:$0xff] %vm6258_vm12, %v6229_v13  ;;  %v7794_v13 = vld [vmem:[#allocation3 + $0x172] sm:$0xff] }
 0x600   : > { %6719 = vrot.lane.b32.xlu1 %v6674_v59, %s17128_s18  ;;  %7627 = vst.msk [vmem:[#allocation4 + $0x1b0] sm:$0xff] %vm17695_vm11, %v15639_v24  ;;  %vm17705_vm11 = vmmov %vm17697_vm4 }
 0x601   : > { %v8134_v0 = vld [vmem:[#allocation4 + $0x180] sm:$0xff]  ;;  %7268 = vrot.lane.b32.xlu0 %v7221_v48, %s16920_s28 }
 0x602   : > { %v6390_v10 = vpop.permute.xlu1 %6389  ;;  %8782 = vmatprep.mubr.bf16.mxu1 %v8134_v0  ;;  %v6941_v49 = vpop.permute.xlu0 %6940  ;;  %v17707_v0 = vld [vmem:[#allocation81_spill] sm:$0xff] }
 0x603   : > { %6429 = vst.msk [vmem:[#allocation4 + $0x178] sm:$0xff] %vm6419_vm10, %v6390_v10  ;;  %10692 = vmatmul.mubr.msk.bf16.gmra.mrb[100].mxu0 %vm17697_vm4, %v8105_v25  ;;  %vm17710_vm4 = vcmask 982784  }
 0x604   : > { %7728 = vrot.lane.b32.xlu1 %v7683_v21, %s17181_s23  ;;  %6977 = vst.msk [vmem:[#allocation4 + $0x1d0] sm:$0xff] %vm17698_vm5, %v6941_v49  ;;  %10695 = vmatprep.mubr.msk.bf16.mxu0 %vm17699_vm6, %v8110_v29  ;;  %v7795_v21 = vld [vmem:[#allocation3 + $0x17a] sm:$0xff]  ;;  %vm17711_vm5 = vcmask 523584   ;;  %vm17712_vm6 = vcmp.ge.s32.totalorder %v13855_v27, 0 }
 0x605   : > { %7428 = vrot.lane.b32.xlu0 %v7381_v9, %s17167_s30  ;;  %v7827_v59 = vsel %vm17702_vm2, %v7795_v21, 0.0  ;;  %v8125_v49 = vld [vmem:[#allocation4 + $0x138] sm:$0xff]  ;;  %v6820_v46 = vsel %vm17712_vm6, %v15457_v41, 0.0  ;;  %vm17715_vm2 = vcmask 1048512   ;;  %vm17725_vm6 = vcmask 326784  }
 0x606   : > { %v6551_v37 = vpop.permute.xlu1 %6550  ;;  %v7101_v18 = vpop.permute.xlu0 %7100  ;;  %v7844_v6 = vpack.c.bf16 %v7827_v59, %v7794_v13  ;;  %v6837_v5 = vpack.c.bf16 %v15466_v15, %v6820_v46  ;;  %v17721_v15 = vld [vmem:[#allocation88_spill] sm:$0xff] }
 0x607   : > { %6590 = vst.msk [vmem:[#allocation4 + $0x178] sm:$0xff] %vm17700_vm13, %v6551_v37  ;;  %vm17713_vm13 = vcmask 720384  }
 0x608   : > { %7888 = vrot.lane.b32.xlu1 %v7843_v2, %s17049_s19  ;;  %7137 = vst.msk [vmem:[#allocation4 + $0x1d0] sm:$0xff] %vm17701_vm3, %v7101_v18  ;;  %vm17714_vm3 = vmmov %vm17703_vm7  ;;  %v8130_v2 = vld [vmem:[#allocation4 + $0x160] sm:$0xff] }
 0x609   : > { %7588 = vrot.lane.b32.xlu0 %v7541_v51, %s16922_s26  ;;  %v6464_v51 = vld [vmem:[#allocation3 + $0x134] sm:$0xff] }
 0x60a   : > { %v6712_v56 = vpop.permute.xlu1 %6711  ;;  %v7261_v48 = vpop.permute.xlu0 %7260 }
 0x60b   : > { %6751 = vst.msk [vmem:[#allocation4 + $0x178] sm:$0xff] %vm6741_vm1, %v6712_v56  ;;  %10696 = vmatmul.mubr.msk.bf16.gmra.mrb[104].mxu0 %vm17703_vm7, %v8115_v42  ;;  %vm17716_vm7 = vcmask 130048   ;;  %v17733_v42 = vld [vmem:[#allocation89_spill] sm:$0xff] }
 0x60c   : > { %6946 = vrot.lane.b32.xlu1 %v15489_v16, %s17193_s3  ;;  %7297 = vst.msk [vmem:[#allocation4 + $0x1d0] sm:$0xff] %vm17704_vm9, %v7261_v48  ;;  %10699 = vmatprep.mubr.msk.bf16.mxu0 %vm17705_vm11, %v8120_v14  ;;  %v17708_v16 = vld [vmem:[#allocation83_spill] sm:$0xff]  ;;  %vm17717_vm9 = vmmov %vm17714_vm3  ;;  %vm17718_vm11 = vcmask 195584  }
 0x60d   : > { %7730 = vrot.lane.b32.xlu0 %v7684_v28, %s17181_s23  ;;  %v17709_v9 = vpack.c.bf16 %v17707_v0, %v17708_v16  ;;  %6853 = vst.msk [vmem:[#allocation4 + $0x270] sm:$0xff] %vm17718_vm11, %v6837_v5  ;;  %v17732_v28 = vld [vmem:[#allocation5_spill] sm:$0xff]  ;;  %vm17735_vm11 = vcmask 851584   ;;  %v17737_v5 = vld [vmem:[#allocation90_spill] sm:$0xff] }
 0x60e   : > { %v7721_v33 = vpop.permute.xlu1 %7720  ;;  %v7421_v10 = vpop.permute.xlu0 %7420 }
 0x60f   : > { %7759 = vst.msk [vmem:[#allocation4 + $0x188] sm:$0xff] %vm17706_vm15, %v7721_v33  ;;  %vm17719_vm15 = vcmask 392384  }
 0x610   : > { %6109 = vrot.lane.b32.xlu1 %v17709_v9, %s17131_s27  ;;  %7457 = vst.msk [vmem:[#allocation4 + $0x1d0] sm:$0xff] %vm17710_vm4, %v7421_v10  ;;  %vm17720_vm4 = vcmask 589184  }
 0x611   : > { %7890 = vrot.lane.b32.xlu0 %v7844_v6, %s17049_s19 }
 0x612   : > { %v7881_v25 = vpop.permute.xlu1 %7880  ;;  %v8133_v39 = vld [vmem:[#allocation4 + $0x178] sm:$0xff]  ;;  %v7581_v29 = vpop.permute.xlu0 %7580 }
 0x613   : > { %7919 = vst.msk [vmem:[#allocation4 + $0x188] sm:$0xff] %vm17711_vm5, %v7881_v25  ;;  %8783 = vmatmul.mubr.bf16.gmra.mrb[100].mxu1 %v8133_v39  ;;  %10700 = vmatmul.mubr.msk.bf16.gmra.mrb[108].mxu0 %vm17714_vm3, %v8125_v49  ;;  %vm17724_vm5 = vcmask 785984   ;;  %vm17728_vm3 = vcmp.ge.s32.totalorder %v17493_v57, 0  ;;  %v6467_v25 = vld [vmem:[#allocation3 + $0x14c] sm:$0xff] }
 0x614   : > { %8079 = vst.msk [vmem:[#allocation4 + $0x188] sm:$0xff] %vm17713_vm13, %v15574_v22  ;;  %6238 = vrot.lane.b32.xlu1 %v15303_v31, %s17145_s1  ;;  %10703 = vmatprep.mubr.msk.bf16.mxu0 %vm17717_vm9, %v8130_v2  ;;  %v6497_v31 = vsel %vm1791_vm0, %v15602_v55, 0.0  ;;  %v17722_v22 = vld [vmem:[#allocation86_spill] sm:$0xff]  ;;  %vm17726_vm13 = vcmask 982784   ;;  %vm17727_vm0 = vmmov %vm17715_vm2  ;;  %v6657_v44 = vsel %vm17728_vm3, %v15324_v60, 0.0  ;;  %vm17745_vm3 = vcmask 785984  }
 0x615   : > { %7628 = vst.msk [vmem:[#allocation4 + $0x1d0] sm:$0xff] %vm17715_vm2, %v7581_v29  ;;  %8050 = vrot.lane.b32.xlu0 %v8004_v11, %s16921_s25  ;;  %v17723_v37 = vpack.c.bf16 %v17721_v15, %v17722_v22  ;;  %v6514_v55 = vpack.c.bf16 %v6497_v31, %v6464_v51  ;;  %vm17729_vm2 = vmmov %vm17717_vm9  ;;  %vm17731_vm9 = vcmask 720384   ;;  %v7668_v22 = vld [vmem:[#allocation3 + $0x180] sm:$0xff] }
 0x616   : > { %7629 = vst.msk [vmem:[#allocation4 + $0x1d8] sm:$0xff] %vm17716_vm7, %v7581_v29  ;;  %v6939_v27 = vpop.permute.xlu1 %6938  ;;  %v7723_v41 = vpop.permute.xlu0 %7722  ;;  %vm17730_vm7 = vcmask 523584   ;;  %v6499_v29 = vsel %vm1793_vm14, %v6467_v25, 0.0 }
 0x617   : > { %6976 = vst.msk [vmem:[#allocation4 + $0x1a8] sm:$0xff] %vm17719_vm15, %v6939_v27  ;;  %vm17736_vm15 = vmmov %vm17729_vm2  ;;  %v17738_v27 = vld [vmem:[#allocation87_spill] sm:$0xff]  ;;  %v6515_v15 = vpack.c.bf16 %v6499_v29, %v15612_v20  ;;  %v7796_v20 = vld [vmem:[#allocation3 + $0x182] sm:$0xff] }
 0x618   : > { %7136 = vst.msk [vmem:[#allocation4 + $0x1a8] sm:$0xff] %vm17720_vm4, %v15586_v54  ;;  %6399 = vrot.lane.b32.xlu1 %v17723_v37, %s17108_s20  ;;  %v7669_v37 = vld [vmem:[#allocation3 + $0x188] sm:$0xff]  ;;  %vm17740_vm4 = vcmask 130048  }
 0x619   : > { %7296 = vst.msk [vmem:[#allocation4 + $0x1a8] sm:$0xff] %vm17724_vm5, %v15599_v40  ;;  %vm17741_vm5 = vcmp.lt.s32.totalorder %v13868_v1, 16 }
 0x61a   : > { %7760 = vst.msk [vmem:[#allocation4 + $0x1b0] sm:$0xff] %vm17725_vm6, %v7723_v41  ;;  %v6102_v50 = vpop.permute.xlu1 %6101  ;;  %v7883_v62 = vpop.permute.xlu0 %7882  ;;  %vm17742_vm6 = vcmask 392384  }
 0x61b   : > { %7456 = vst.msk [vmem:[#allocation4 + $0x1a8] sm:$0xff] %vm17726_vm13, %v15620_v52  ;;  %v8135_v54 = vld [vmem:[#allocation4 + $0x188] sm:$0xff]  ;;  %v6675_v52 = vpack.c.bf16 %v15387_v53, %v6657_v44  ;;  %v17734_v53 = vpack.c.bf16 %v17732_v28, %v17733_v42  ;;  %vm17743_vm13 = vmmov %vm17735_vm11 }
 0x61c   : > { %7626 = vst.msk [vmem:[#allocation4 + $0x1a8] sm:$0xff] %vm17727_vm0, %v15639_v24  ;;  %6560 = vrot.lane.b32.xlu1 %v6514_v55, %s17160_s0  ;;  %10704 = vmatmul.mubr.msk.bf16.gmra.mrb[112].mxu0 %vm17729_vm2, %v8135_v54  ;;  %v7797_v55 = vld [vmem:[#allocation3 + $0x18a] sm:$0xff]  ;;  %vm17744_vm0 = vcmask 589184   ;;  %vm17747_vm2 = vcmask 982784  }
 0x61d   : > { %6140 = vst.msk [vmem:[#allocation4 + $0x1a0] sm:$0xff] %vm6129_vm8, %v6102_v50  ;;  %v8144_v54 = vld [vmem:[#allocation4 + $0x1d0] sm:$0xff] }
 0x61e   : > { %7920 = vst.msk [vmem:[#allocation4 + $0x1b0] sm:$0xff] %vm17730_vm7, %v7883_v62  ;;  %v6231_v40 = vpop.permute.xlu1 %6230  ;;  %v8043_v24 = vpop.permute.xlu0 %8042  ;;  %v7829_v62 = vsel %vm17741_vm5, %v7797_v55, 0.0  ;;  %vm17751_vm5 = vmmov %vm17744_vm0 }
 0x61f   : > { %6269 = vst.msk [vmem:[#allocation4 + $0x1a0] sm:$0xff] %vm6258_vm12, %v6231_v40 }
 0x620   : > { %6721 = vrot.lane.b32.xlu1 %v6675_v52, %s17128_s18  ;;  %8080 = vst.msk [vmem:[#allocation4 + $0x1b0] sm:$0xff] %vm17731_vm9, %v8043_v24  ;;  %v7957_v52 = vld [vmem:[#allocation3 + $0x18c] sm:$0xff] }
 0x621   : > { %v7989_v32 = vsel %vm1793_vm14, %v7957_v52, 0.0  ;;  %vm17746_vm14 = vcmask 326784  }
 0x622   : > { %v6392_v18 = vpop.permute.xlu1 %6391  ;;  %v10423_v60 = vpop.f32.mrb[64].mxu0  ;;  %v8005_v1 = vpack.c.bf16 %v7989_v32, %v15632_v35 }
 0x623   : > { %v8139_v57 = vld [vmem:[#allocation4 + $0x1a8] sm:$0xff]  ;;  %6430 = vst.msk [vmem:[#allocation4 + $0x1a0] sm:$0xff] %vm6419_vm10, %v6392_v18  ;;  %v15723_v21 = vpop.permute.xlu0 %8044  ;;  %v10424_v56 = vpop.f32.mrb[65].mxu0  ;;  %v7845_v18 = vpack.c.bf16 %v7829_v62, %v7796_v20 }
 0x624   : > { %8790 = vmatprep.mubr.bf16.mxu1 %v8139_v57  ;;  %6111 = vrot.lane.b32.xlu1 %v17734_v53, %s17131_s27  ;;  %v15729_v13 = vadd.f32 %v10424_v56, %v10423_v60  ;;  %v10426_v59 = vpop.f32.mrb[66].mxu0  ;;  %v10517_v48 = vpop.f32.mrb[84].mxu1 }
 0x625   : > { %v10427_v14 = vpop.f32.mrb[67].mxu0  ;;  %v10518_v7 = vpop.f32.mrb[85].mxu1 }
 0x626   : > { %v6553_v33 = vpop.permute.xlu1 %6552  ;;  %v15731_v6 = vadd.f32 %v10427_v14, %v10426_v59  ;;  %v10519_v10 = vadd.f32 %v10518_v7, %v10517_v48  ;;  %v10520_v0 = vpop.f32.mrb[86].mxu1 }
 0x627   : > { %6591 = vst.msk [vmem:[#allocation4 + $0x1a0] sm:$0xff] %vm17735_vm11, %v6553_v33  ;;  %v15734_v16 = vpop.permute.xlu0 %7102  ;;  %v8140_v9 = vld [vmem:[#allocation4 + $0x1b0] sm:$0xff]  ;;  %v10521_v39 = vpop.f32.mrb[87].mxu1  ;;  %vm17748_vm11 = vcmask 1048512  }
 0x628   : > { %6240 = vrot.lane.b32.xlu1 %v15427_v19, %s17145_s1  ;;  %10707 = vmatprep.mubr.msk.bf16.mxu0 %vm17736_vm15, %v8140_v9  ;;  %v10522_v11 = vadd.f32 %v10521_v39, %v10520_v0  ;;  %v15740_v46 = vadd.f32 %v10519_v10, %v15232_v8  ;;  %v17739_v19 = vpack.c.bf16 %v17737_v5, %v17738_v27  ;;  %vm17749_vm15 = vmmov %vm17740_vm4 }
 0x62a   : > { %v6714_v49 = vpop.permute.xlu1 %6713  ;;  %v15750_v31 = vadd.f32 %v10522_v11, %v15235_v3  ;;  %v7685_v3 = vpack.c.bf16 %v7669_v37, %v7668_v22 }
 0x62b   : > { %6752 = vst.msk [vmem:[#allocation4 + $0x1a0] sm:$0xff] %vm6741_vm1, %v6714_v49  ;;  %v7263_v2 = vpop.permute.xlu0 %7262 }
 0x62c   : > { %6401 = vrot.lane.b32.xlu1 %v17739_v19, %s17108_s20 }
 0x62e   : > { %v6104_v41 = vpop.permute.xlu1 %6103 }
 0x62f   : > { %6141 = vst.msk [vmem:[#allocation4 + $0x1c8] sm:$0xff] %vm6129_vm8, %v6104_v41  ;;  %v7423_v8 = vpop.permute.xlu0 %7422 }
 0x630   : > { %6562 = vrot.lane.b32.xlu1 %v6515_v15, %s17160_s0 }
 0x632   : > { %v6233_v51 = vpop.permute.xlu1 %6232  ;;  %v8138_v50 = vld [vmem:[#allocation4 + $0x1a0] sm:$0xff] }
 0x633   : > { %6270 = vst.msk [vmem:[#allocation4 + $0x1c8] sm:$0xff] %vm6258_vm12, %v6233_v51  ;;  %8791 = vmatmul.mubr.bf16.gmra.mrb[104].mxu1 %v8138_v50  ;;  %v7583_v44 = vpop.permute.xlu0 %7582 }
 0x634   : > { %6723 = vrot.lane.b32.xlu1 %v6676_v47, %s17128_s18  ;;  %8798 = vmatprep.mubr.bf16.mxu1 %v8144_v54  ;;  %7631 = vst.msk [vmem:[#allocation4 + $0x200] sm:$0xff] %vm17740_vm4, %v7583_v44  ;;  %vm17750_vm4 = vmmov %vm17742_vm6 }
 0x636   : > { %v6394_v40 = vpop.permute.xlu1 %6393 }
 0x637   : > { %6431 = vst.msk [vmem:[#allocation4 + $0x1c8] sm:$0xff] %vm6419_vm10, %v6394_v40  ;;  %v6945_v24 = vpop.permute.xlu0 %6944 }
 0x638   : > { %7732 = vrot.lane.b32.xlu1 %v7685_v3, %s17181_s23  ;;  %6979 = vst.msk [vmem:[#allocation4 + $0x220] sm:$0xff] %vm17742_vm6, %v6945_v24  ;;  %vm17752_vm6 = vmmov %vm17745_vm3 }
 0x63a   : > { %v6555_v4 = vpop.permute.xlu1 %6554 }
 0x63b   : > { %6592 = vst.msk [vmem:[#allocation4 + $0x1c8] sm:$0xff] %vm17743_vm13, %v6555_v4  ;;  %v7105_v47 = vpop.permute.xlu0 %7104  ;;  %vm17753_vm13 = vmmov %vm17746_vm14 }
 0x63c   : > { %7892 = vrot.lane.b32.xlu1 %v7845_v18, %s17049_s19  ;;  %7139 = vst.msk [vmem:[#allocation4 + $0x220] sm:$0xff] %vm17744_vm0, %v7105_v47  ;;  %vm17754_vm0 = vmmov %vm17747_vm2 }
 0x63e   : > { %v6716_v57 = vpop.permute.xlu1 %6715 }
 0x63f   : > { %6753 = vst.msk [vmem:[#allocation4 + $0x1c8] sm:$0xff] %vm6741_vm1, %v6716_v57  ;;  %v7265_v60 = vpop.permute.xlu0 %7264 }
 0x640   : > { %8052 = vrot.lane.b32.xlu1 %v8005_v1, %s16921_s25  ;;  %7299 = vst.msk [vmem:[#allocation4 + $0x220] sm:$0xff] %vm17745_vm3, %v7265_v60  ;;  %vm17755_vm3 = vmmov %vm17748_vm11 }
 0x642   : > { %v7725_v34 = vpop.permute.xlu1 %7724 }
 0x643   : > { %7761 = vst.msk [vmem:[#allocation4 + $0x1d8] sm:$0xff] %vm17746_vm14, %v7725_v34  ;;  %v7425_v56 = vpop.permute.xlu0 %7424  ;;  %vm17756_vm14 = vcmask 719872  }
 0x644   : > { %7459 = vst.msk [vmem:[#allocation4 + $0x220] sm:$0xff] %vm17747_vm2, %v7425_v56  ;;  %vm17757_vm2 = vmmov %vm17730_vm7 }
 0x646   : > { %v7885_v28 = vpop.permute.xlu1 %7884  ;;  %v8143_v42 = vld [vmem:[#allocation4 + $0x1c8] sm:$0xff] }
 0x647   : > { %7921 = vst.msk [vmem:[#allocation4 + $0x1d8] sm:$0xff] %vm17730_vm7, %v7885_v28  ;;  %8799 = vmatmul.mubr.bf16.gmra.mrb[108].mxu1 %v8143_v42  ;;  %v7585_v35 = vpop.permute.xlu0 %7584  ;;  %vm17758_vm7 = vmmov %vm17731_vm9 }
 0x648   : > { %8081 = vst.msk [vmem:[#allocation4 + $0x1d8] sm:$0xff] %vm17731_vm9, %v15723_v21  ;;  %vm17759_vm9 = vcmask 851584  }
 0x649   : > { %7632 = vst.msk [vmem:[#allocation4 + $0x220] sm:$0xff] %vm17748_vm11, %v7585_v35  ;;  %vm17760_vm11 = vmmov %vm17756_vm14 }
 0x64a   : > { %7633 = vst.msk [vmem:[#allocation4 + $0x228] sm:$0xff] %vm17749_vm15, %v7585_v35  ;;  %v6943_v53 = vpop.permute.xlu1 %6942 }
 0x64b   : > { %6978 = vst.msk [vmem:[#allocation4 + $0x1f8] sm:$0xff] %vm17750_vm4, %v6943_v53  ;;  %v7727_v59 = vpop.permute.xlu0 %7726  ;;  %v10523_v48 = vpop.f32.mrb[88].mxu1 }
 0x64c   : > { %7138 = vst.msk [vmem:[#allocation4 + $0x1f8] sm:$0xff] %vm17751_vm5, %v15734_v16  ;;  %v10524_v14 = vpop.f32.mrb[89].mxu1  ;;  %vm17761_vm5 = vmmov %vm17759_vm9 }
 0x64d   : > { %7298 = vst.msk [vmem:[#allocation4 + $0x1f8] sm:$0xff] %vm17752_vm6, %v7263_v2  ;;  %v10525_v33 = vadd.f32 %v10524_v14, %v10523_v48  ;;  %v10526_v10 = vpop.f32.mrb[90].mxu1  ;;  %vm17762_vm6 = vcmask 589184  }
 0x64e   : > { %7762 = vst.msk [vmem:[#allocation4 + $0x200] sm:$0xff] %vm17753_vm13, %v7727_v59  ;;  %v6106_v21 = vpop.permute.xlu1 %6105  ;;  %v10429_v7 = vpop.f32.mrb[68].mxu0  ;;  %vm17763_vm13 = vcmask 785984  }
 0x64f   : > { %7458 = vst.msk [vmem:[#allocation4 + $0x1f8] sm:$0xff] %vm17754_vm0, %v7423_v8  ;;  %v8145_v0 = vld [vmem:[#allocation4 + $0x1d8] sm:$0xff]  ;;  %v10430_v9 = vpop.f32.mrb[69].mxu0  ;;  %v10527_v16 = vpop.f32.mrb[91].mxu1  ;;  %v15794_v29 = vadd.f32 %v10525_v33, %v15416_v45  ;;  %vm17764_vm0 = vcmask 326784  }
 0x650   : > { %7630 = vst.msk [vmem:[#allocation4 + $0x1f8] sm:$0xff] %vm17755_vm3, %v7583_v44  ;;  %10708 = vmatmul.mubr.msk.bf16.gmra.mrb[116].mxu0 %vm17756_vm14, %v8145_v0  ;;  %v15791_v25 = vadd.f32 %v10430_v9, %v10429_v7  ;;  %v10528_v39 = vadd.f32 %v10527_v16, %v10526_v10  ;;  %v10432_v11 = vpop.f32.mrb[70].mxu0  ;;  %v7887_v49 = vpop.permute.xlu0 %7886  ;;  %v8154_v54 = vld [vmem:[#allocation4 + $0x220] sm:$0xff]  ;;  %vm17765_vm3 = vcmask 982784   ;;  %vm17766_vm14 = vmmov %vm17757_vm2 }
 0x651   : > { %6142 = vst.msk [vmem:[#allocation4 + $0x1f0] sm:$0xff] %vm6129_vm8, %v6106_v21  ;;  %v10433_v2 = vpop.f32.mrb[71].mxu0 }
 0x652   : > { %v6235_v5 = vpop.permute.xlu1 %6234  ;;  %7922 = vst.msk [vmem:[#allocation4 + $0x200] sm:$0xff] %vm17757_vm2, %v7887_v49  ;;  %v15797_v27 = vadd.f32 %v10433_v2, %v10432_v11  ;;  %v15801_v19 = vadd.f32 %v10528_v39, %v15419_v43  ;;  %vm17767_vm2 = vmmov %vm17758_vm7 }
 0x653   : > { %6271 = vst.msk [vmem:[#allocation4 + $0x1f0] sm:$0xff] %vm6258_vm12, %v6235_v5 }
 0x654   : > { %v8047_v41 = vpop.permute.xlu0 %8046 }
 0x655   : > { %8082 = vst.msk [vmem:[#allocation4 + $0x200] sm:$0xff] %vm17758_vm7, %v8047_v41  ;;  %vm17768_vm7 = vcmask 1048512  }
 0x656   : > { %v6396_v15 = vpop.permute.xlu1 %6395 }
 0x657   : > { %v8149_v8 = vld [vmem:[#allocation4 + $0x1f8] sm:$0xff]  ;;  %6432 = vst.msk [vmem:[#allocation4 + $0x1f0] sm:$0xff] %vm6419_vm10, %v6396_v15 }
 0x658   : > { %8806 = vmatprep.mubr.bf16.mxu1 %v8149_v8  ;;  %v8049_v45 = vpop.permute.xlu0 %8048 }
 0x65a   : > { %v6557_v22 = vpop.permute.xlu1 %6556 }
 0x65b   : > { %6593 = vst.msk [vmem:[#allocation4 + $0x1f0] sm:$0xff] %vm17759_vm9, %v6557_v22  ;;  %vm17769_vm9 = vmmov %vm17749_vm15 }
 0x65c   : > { %v8150_v37 = vld [vmem:[#allocation4 + $0x200] sm:$0xff]  ;;  %v7107_v51 = vpop.permute.xlu0 %7106 }
 0x65d   : > { %10711 = vmatprep.mubr.msk.bf16.mxu0 %vm17760_vm11, %v8150_v37  ;;  %vm17770_vm11 = vmmov %vm17750_vm4 }
 0x65e   : > { %v6718_v50 = vpop.permute.xlu1 %6717 }
 0x65f   : > { %6754 = vst.msk [vmem:[#allocation4 + $0x1f0] sm:$0xff] %vm6741_vm1, %v6718_v50 }
 0x660   : > { %v7267_v43 = vpop.permute.xlu0 %7266 }
 0x662   : > { %v6108_v55 = vpop.permute.xlu1 %6107 }
 0x663   : > { %6143 = vst.msk [vmem:[#allocation4 + $0x218] sm:$0xff] %vm6129_vm8, %v6108_v55 }
 0x664   : > { %v7427_v44 = vpop.permute.xlu0 %7426 }
 0x666   : > { %v6237_v3 = vpop.permute.xlu1 %6236  ;;  %v8148_v20 = vld [vmem:[#allocation4 + $0x1f0] sm:$0xff] }
 0x667   : > { %6272 = vst.msk [vmem:[#allocation4 + $0x218] sm:$0xff] %vm6258_vm12, %v6237_v3  ;;  %8807 = vmatmul.mubr.bf16.gmra.mrb[112].mxu1 %v8148_v20 }
 0x668   : > { %8814 = vmatprep.mubr.bf16.mxu1 %v8154_v54  ;;  %v7587_v62 = vpop.permute.xlu0 %7586 }
 0x669   : > { %7635 = vst.msk [vmem:[#allocation4 + $0x250] sm:$0xff] %vm17749_vm15, %v7587_v62  ;;  %vm17771_vm15 = vmmov %vm17762_vm6 }
 0x66a   : > { %v6398_v40 = vpop.permute.xlu1 %6397 }
 0x66b   : > { %6433 = vst.msk [vmem:[#allocation4 + $0x218] sm:$0xff] %vm6419_vm10, %v6398_v40 }
 0x66c   : > { %v10529_v52 = vpop.f32.mrb[92].mxu1  ;;  %v6949_v24 = vpop.permute.xlu0 %6948 }
 0x66d   : > { %v10530_v32 = vpop.f32.mrb[93].mxu1  ;;  %6981 = vst.msk [vmem:[#allocation4 + $0x270] sm:$0xff] %vm17750_vm4, %v6949_v24  ;;  %vm17772_vm4 = vmmov %vm17763_vm13 }
 0x66e   : > { %v6559_v18 = vpop.permute.xlu1 %6558  ;;  %v10531_v4 = vadd.f32 %v10530_v32, %v10529_v52  ;;  %v10532_v47 = vpop.f32.mrb[94].mxu1 }
 0x66f   : > { %6594 = vst.msk [vmem:[#allocation4 + $0x218] sm:$0xff] %vm17761_vm5, %v6559_v18  ;;  %v10533_v1 = vpop.f32.mrb[95].mxu1  ;;  %vm17773_vm5 = vmmov %vm17765_vm3 }
 0x670   : > { %v10534_v57 = vadd.f32 %v10533_v1, %v10532_v47  ;;  %v7109_v60 = vpop.permute.xlu0 %7108  ;;  %v15815_v34 = vadd.f32 %v10531_v4, %v15565_v30 }
 0x671   : > { %7141 = vst.msk [vmem:[#allocation4 + $0x270] sm:$0xff] %vm17762_vm6, %v7109_v60  ;;  %vm17774_vm6 = vmmov %vm17764_vm0 }
 0x672   : > { %v6720_v56 = vpop.permute.xlu1 %6719  ;;  %v10435_v28 = vpop.f32.mrb[72].mxu0  ;;  %v15820_v42 = vadd.f32 %v10534_v57, %v15569_v12 }
 0x673   : > { %6755 = vst.msk [vmem:[#allocation4 + $0x218] sm:$0xff] %vm6741_vm1, %v6720_v56  ;;  %v10436_v35 = vpop.f32.mrb[73].mxu0 }
 0x674   : > { %v15822_v53 = vadd.f32 %v10436_v35, %v10435_v28  ;;  %v10438_v59 = vpop.f32.mrb[74].mxu0  ;;  %v7269_v48 = vpop.permute.xlu0 %7268 }
 0x675   : > { %v10439_v21 = vpop.f32.mrb[75].mxu0  ;;  %7301 = vst.msk [vmem:[#allocation4 + $0x270] sm:$0xff] %vm17763_vm13, %v7269_v48  ;;  %vm17775_vm13 = vmmov %vm17768_vm7 }
 0x676   : > { %v7729_v14 = vpop.permute.xlu1 %7728  ;;  %v15825_v30 = vadd.f32 %v10439_v21, %v10438_v59 }
 0x677   : > { %7763 = vst.msk [vmem:[#allocation4 + $0x228] sm:$0xff] %vm17764_vm0, %v7729_v14  ;;  %vm17776_vm0 = vcmask 719872  }
 0x678   : > { %v7429_v33 = vpop.permute.xlu0 %7428 }
 0x679   : > { %7461 = vst.msk [vmem:[#allocation4 + $0x270] sm:$0xff] %vm17765_vm3, %v7429_v33  ;;  %vm17777_vm3 = vmmov %vm17766_vm14 }
 0x67a   : > { %v7889_v7 = vpop.permute.xlu1 %7888  ;;  %v8153_v10 = vld [vmem:[#allocation4 + $0x218] sm:$0xff] }
 0x67b   : > { %7923 = vst.msk [vmem:[#allocation4 + $0x228] sm:$0xff] %vm17766_vm14, %v7889_v7  ;;  %8815 = vmatmul.mubr.bf16.gmra.mrb[116].mxu1 %v8153_v10  ;;  %vm17778_vm14 = vmmov %vm17767_vm2 }
 0x67c   : > { %8083 = vst.msk [vmem:[#allocation4 + $0x228] sm:$0xff] %vm17767_vm2, %v8049_v45  ;;  %v7589_v12 = vpop.permute.xlu0 %7588  ;;  %vm17779_vm2 = vcmask 851584  }
 0x67d   : > { %7636 = vst.msk [vmem:[#allocation4 + $0x270] sm:$0xff] %vm17768_vm7, %v7589_v12  ;;  %vm17780_vm7 = vmmov %vm17776_vm0 }
 0x67e   : > { %v6947_v0 = vpop.permute.xlu1 %6946  ;;  %7637 = vst.msk [vmem:[#allocation4 + $0x278] sm:$0xff] %vm17769_vm9, %v7589_v12  ;;  %vm17784_vm9 = vmmov %vm17778_vm14 }
 0x67f   : > { %6980 = vst.msk [vmem:[#allocation4 + $0x248] sm:$0xff] %vm17770_vm11, %v6947_v0 }
 0x680   : > { %7140 = vst.msk [vmem:[#allocation4 + $0x248] sm:$0xff] %vm17771_vm15, %v7107_v51  ;;  %v7731_v9 = vpop.permute.xlu0 %7730  ;;  %vm17788_vm15 = vmmov %vm17770_vm11 }
 0x681   : > { %7300 = vst.msk [vmem:[#allocation4 + $0x248] sm:$0xff] %vm17772_vm4, %v7267_v43  ;;  %vm17789_vm4 = vmmov %vm17770_vm11 }
 0x682   : > { %v6110_v16 = vpop.permute.xlu1 %6109  ;;  %7460 = vst.msk [vmem:[#allocation4 + $0x248] sm:$0xff] %vm17773_vm5, %v7427_v44  ;;  %vm17790_vm5 = vmmov %vm17789_vm4 }
 0x683   : > { %7764 = vst.msk [vmem:[#allocation4 + $0x250] sm:$0xff] %vm17774_vm6, %v7731_v9  ;;  %v8155_v39 = vld [vmem:[#allocation4 + $0x228] sm:$0xff] }
 0x684   : > { %6144 = vst.msk [vmem:[#allocation4 + $0x240] sm:$0xff] %vm6129_vm8, %v6110_v16  ;;  %10712 = vmatmul.mubr.msk.bf16.gmra.mrb[120].mxu0 %vm17776_vm0, %v8155_v39  ;;  %v7891_v11 = vpop.permute.xlu0 %7890  ;;  %v8164_v44 = vld [vmem:[#allocation4 + $0x270] sm:$0xff] }
 0x685   : > { %7634 = vst.msk [vmem:[#allocation4 + $0x248] sm:$0xff] %vm17775_vm13, %v7587_v62  ;;  %vm17792_vm13 = vmmov %vm17789_vm4 }
 0x686   : > { %v6239_v49 = vpop.permute.xlu1 %6238  ;;  %7924 = vst.msk [vmem:[#allocation4 + $0x250] sm:$0xff] %vm17777_vm3, %v7891_v11 }
 0x687   : > { %6273 = vst.msk [vmem:[#allocation4 + $0x240] sm:$0xff] %vm6258_vm12, %v6239_v49 }
 0x688   : > { %v8051_v2 = vpop.permute.xlu0 %8050 }
 0x689   : > { %8084 = vst.msk [vmem:[#allocation4 + $0x250] sm:$0xff] %vm17778_vm14, %v8051_v2 }
 0x68a   : > { %v6400_v5 = vpop.permute.xlu1 %6399  ;;  %v10441_v15 = vpop.f32.mrb[76].mxu0 }
 0x68b   : > { %6434 = vst.msk [vmem:[#allocation4 + $0x240] sm:$0xff] %vm6419_vm10, %v6400_v5  ;;  %v10442_v8 = vpop.f32.mrb[77].mxu0 }
 0x68c   : > { %v8159_v41 = vld [vmem:[#allocation4 + $0x248] sm:$0xff]  ;;  %v15845_v45 = vadd.f32 %v10442_v8, %v10441_v15  ;;  %v10444_v22 = vpop.f32.mrb[78].mxu0 }
 0x68d   : > { %8822 = vmatprep.mubr.bf16.mxu1 %v8159_v41  ;;  %v10445_v37 = vpop.f32.mrb[79].mxu0 }
 0x68e   : > { %v6561_v51 = vpop.permute.xlu1 %6560  ;;  %v15847_v50 = vadd.f32 %v10445_v37, %v10444_v22 }
 0x68f   : > { %6595 = vst.msk [vmem:[#allocation4 + $0x240] sm:$0xff] %vm17779_vm2, %v6561_v51 }
 0x690   : > { %v8160_v43 = vld [vmem:[#allocation4 + $0x250] sm:$0xff] }
 0x691   : > { %10715 = vmatprep.mubr.msk.bf16.mxu0 %vm17780_vm7, %v8160_v43 }
 0x692   : > { %v6722_v55 = vpop.permute.xlu1 %6721 }
 0x693   : > { %6756 = vst.msk [vmem:[#allocation4 + $0x240] sm:$0xff] %vm6741_vm1, %v6722_v55 }
 0x696   : > { %v6112_v54 = vpop.permute.xlu1 %6111 }
 0x697   : > { %6145 = vst.msk [vmem:[#allocation4 + $0x268] sm:$0xff] %vm6129_vm8, %v6112_v54  ;;  %vm17781_vm8 = vmmov %vm17779_vm2 }
 0x69a   : > { %v6241_v3 = vpop.permute.xlu1 %6240  ;;  %v8158_v20 = vld [vmem:[#allocation4 + $0x240] sm:$0xff] }
 0x69b   : > { %6274 = vst.msk [vmem:[#allocation4 + $0x268] sm:$0xff] %vm6258_vm12, %v6241_v3  ;;  %8823 = vmatmul.mubr.bf16.gmra.mrb[120].mxu1 %v8158_v20  ;;  %vm17782_vm12 = vmmov %vm17774_vm6 }
 0x69c   : > { %8830 = vmatprep.mubr.bf16.mxu1 %v8164_v44  ;;  %vm17791_vm6 = vmmov %vm17789_vm4 }
 0x69e   : > { %v6402_v62 = vpop.permute.xlu1 %6401  ;;  %v10447_v40 = vpop.f32.mrb[80].mxu0 }
 0x69f   : > { %6435 = vst.msk [vmem:[#allocation4 + $0x268] sm:$0xff] %vm6419_vm10, %v6402_v62  ;;  %v10448_v52 = vpop.f32.mrb[81].mxu0  ;;  %vm17783_vm10 = vmmov %vm17777_vm3  ;;  %v15887_v62 = vld [vmem:[%s16538_s8] ss:$0 sm:$0xff] }
 0x6a0   : > { %v15855_v24 = vadd.f32 %v10448_v52, %v10447_v40  ;;  %v10450_v18 = vpop.f32.mrb[82].mxu0  ;;  %v17786_v40 = vld [vmem:[#allocation13_spill] sm:$0xff] }
 0x6a1   : > { %v10451_v32 = vpop.f32.mrb[83].mxu0 }
 0x6a2   : > { %v6563_v4 = vpop.permute.xlu1 %6562  ;;  %v15857_v47 = vadd.f32 %v10451_v32, %v10450_v18 }
 0x6a3   : > { %6596 = vst.msk [vmem:[#allocation4 + $0x268] sm:$0xff] %vm17781_vm8, %v6563_v4 }
 0x6a6   : > { %v6724_v1 = vpop.permute.xlu1 %6723 }
 0x6a7   : > { %6757 = vst.msk [vmem:[#allocation4 + $0x268] sm:$0xff] %vm6741_vm1, %v6724_v1  ;;  %vm17785_vm1 = vmmov %vm17776_vm0 }
 0x6a8   : > { %vm17793_vm0 = vmmov %vm17789_vm4 }
 0x6a9   : > { %vm17794_vm3 = vmmov %vm17793_vm0 }
 0x6aa   : > { %v7733_v57 = vpop.permute.xlu1 %7732  ;;  %v10453_v60 = vpop.f32.mrb[84].mxu0  ;;  %vm17795_vm14 = vmmov %vm17793_vm0 }
 0x6ab   : > { %7765 = vst.msk [vmem:[#allocation4 + $0x278] sm:$0xff] %vm17782_vm12, %v7733_v57  ;;  %v10454_v56 = vpop.f32.mrb[85].mxu0  ;;  %v17787_v57 = vld [vmem:[#allocation21_spill] sm:$0xff]  ;;  %vm17796_vm2 = vmmov %vm17793_vm0 }
 0x6ac   : > { %v15862_v28 = vadd.f32 %v10454_v56, %v10453_v60  ;;  %v10456_v35 = vpop.f32.mrb[86].mxu0  ;;  %vm17797_vm7 = vmmov %vm17793_vm0 }
 0x6ad   : > { %v10457_v59 = vpop.f32.mrb[87].mxu0  ;;  %vm17798_vm8 = vmmov %vm17793_vm0 }
 0x6ae   : > { %v7893_v48 = vpop.permute.xlu1 %7892  ;;  %v8163_v21 = vld [vmem:[#allocation4 + $0x268] sm:$0xff]  ;;  %v15864_v14 = vadd.f32 %v10457_v59, %v10456_v35  ;;  %vm17799_vm12 = vmmov %vm17793_vm0 }
 0x6af   : > { %7925 = vst.msk [vmem:[#allocation4 + $0x278] sm:$0xff] %vm17783_vm10, %v7893_v48  ;;  %8831 = vmatmul.mubr.bf16.gmra.mrb[124].mxu1 %v8163_v21  ;;  %vm17800_vm10 = vmmov %vm17793_vm0 }
 0x6b2   : > { %v8053_v33 = vpop.permute.xlu1 %8052 }
 0x6b3   : > { %8085 = vst.msk [vmem:[#allocation4 + $0x278] sm:$0xff] %vm17784_vm9, %v8053_v33  ;;  %vm17801_vm9 = vmmov %vm17793_vm0 }
 0x6ba   : > { %v8165_v7 = vld [vmem:[#allocation4 + $0x278] sm:$0xff] }
 0x6bb   : > { %10716 = vmatmul.mubr.msk.bf16.gmra.mrb[124].mxu0 %vm17785_vm1, %v8165_v7  ;;  %vm17802_vm1 = vmmov %vm17793_vm0 }
 0x6be   : > { %v10459_v10 = vpop.f32.mrb[88].mxu0 }
 0x6bf   : > { %v10460_v12 = vpop.f32.mrb[89].mxu0 }
 0x6c0   : > { %v15869_v0 = vadd.f32 %v10460_v12, %v10459_v10  ;;  %v10462_v9 = vpop.f32.mrb[90].mxu0 }
 0x6c1   : > { %v10463_v16 = vpop.f32.mrb[91].mxu0  ;;  %v10535_v39 = vpop.f32.mrb[96].mxu1 }
 0x6c2   : > { %v15871_v11 = vadd.f32 %v10463_v16, %v10462_v9  ;;  %v10536_v49 = vpop.f32.mrb[97].mxu1 }
 0x6c3   : > { %v10537_v2 = vadd.f32 %v10536_v49, %v10535_v39  ;;  %v10538_v5 = vpop.f32.mrb[98].mxu1 }
 0x6c4   : > { %v10539_v41 = vpop.f32.mrb[99].mxu1 }
 0x6c5   : > { %v10540_v15 = vadd.f32 %v10539_v41, %v10538_v5  ;;  %v15874_v8 = vadd.f32 %v10537_v2, %v15729_v13 }
 0x6c6   : > { %v10465_v22 = vpop.f32.mrb[92].mxu0 }
 0x6c7   : > { %v10466_v37 = vpop.f32.mrb[93].mxu0  ;;  %v15877_v51 = vadd.f32 %v10540_v15, %v15731_v6  ;;  %v15893_v6 = vld [vmem:[%s16539_s9] ss:$0 sm:$0xff] }
 0x6c8   : > { %v15879_v43 = vadd.f32 %v10466_v37, %v10465_v22  ;;  %v10468_v55 = vpop.f32.mrb[94].mxu0 }
 0x6c9   : > { %v10469_v54 = vpop.f32.mrb[95].mxu0 }
 0x6ca   : > { %v15881_v44 = vadd.f32 %v10469_v54, %v10468_v55 }
 0x6ce   : > { %v10689_v3 = vpop.f32.mrb[96].mxu0 }
 0x6cf   : > { %v8882_v20 = vadd.f32 %v10689_v3, %v15221_v36  ;;  %v8873_v13 = vpop.f32.mrb[97].mxu0 }
 0x6d0   : > { %v8874_v52 = vadd.f32 %v8873_v13, %v17786_v40  ;;  %v10690_v18 = vpop.f32.mrb[98].mxu0 }
 0x6d1   : > { %v8885_v32 = vadd.f32 %v10690_v18, %v15228_v23  ;;  %v8876_v4 = vpop.f32.mrb[99].mxu0  ;;  %v9009_v1 = vmul.f32 %v15887_v62, %v8882_v20 }
 0x6d2   : > { %v9007_v36 = vmul.f32 %v15887_v62, %v8874_v52  ;;  %v8877_v60 = vadd.f32 %v8876_v4, %v17787_v57 }
 0x6d3   : > { %v9010_v35 = vmul.f32 %v15887_v62, %v8885_v32  ;;  %v15905_v48 = vadd.f32 %v15893_v6, %v9009_v1 }
 0x6d4   : > { %v15900_v56 = vadd.f32 %v15893_v6, %v9007_v36  ;;  %v9008_v59 = vmul.f32 %v15887_v62, %v8877_v60 }
 0x6d5   : > { %v15913_v12 = vadd.f32 %v15893_v6, %v9010_v35  ;;  %v9080_v5 = vmax.f32 %v15905_v48, 0.0 }
 0x6d6   : > { %v9078_v21 = vmax.f32 %v15900_v56, 0.0  ;;  %v15909_v23 = vadd.f32 %v15893_v6, %v9008_v59  ;;  %v10693_v33 = vpop.f32.mrb[100].mxu0 }
 0x6d7   : > { %v8898_v7 = vadd.f32 %v10693_v33, %v15499_v26  ;;  %v8889_v10 = vpop.f32.mrb[101].mxu0 }
 0x6d8   : > { %v9079_v9 = vmax.f32 %v15909_v23, 0.0  ;;  %v8890_v16 = vadd.f32 %v8889_v10, %v15348_v61  ;;  %v10694_v39 = vpop.f32.mrb[102].mxu0  ;;  %9142 = vrot.lane.b32.xlu0 %v9078_v21, %s17193_s3  ;;  %v9081_v61 = vmax.f32 %v15913_v12, 0.0 }
 0x6d9   : > { %v8901_v49 = vadd.f32 %v10694_v39, %v15508_v58  ;;  %v8892_v2 = vpop.f32.mrb[103].mxu0  ;;  %v9013_v26 = vmul.f32 %v15887_v62, %v8898_v7 }
 0x6da   : > { %v9011_v41 = vmul.f32 %v15887_v62, %v8890_v16  ;;  %v8893_v15 = vadd.f32 %v8892_v2, %v15357_v17  ;;  %9144 = vrot.lane.b32.xlu1 %v9079_v9, %s17193_s3 }
 0x6db   : > { %v9014_v58 = vmul.f32 %v15887_v62, %v8901_v49  ;;  %v15938_v55 = vadd.f32 %v15893_v6, %v9013_v26 }
 0x6dc   : > { %v15930_v22 = vadd.f32 %v15893_v6, %v9011_v41  ;;  %v9012_v37 = vmul.f32 %v15887_v62, %v8893_v15  ;;  %9146 = vrot.lane.b32.xlu0 %v9080_v5, %s17193_s3 }
 0x6dd   : > { %v15949_v40 = vadd.f32 %v15893_v6, %v9014_v58  ;;  %v9084_v36 = vmax.f32 %v15938_v55, 0.0 }
 0x6de   : > { %v9082_v17 = vmax.f32 %v15930_v22, 0.0  ;;  %v15942_v54 = vadd.f32 %v15893_v6, %v9012_v37  ;;  %v10697_v3 = vpop.f32.mrb[104].mxu0  ;;  %9148 = vrot.lane.b32.xlu1 %v9081_v61, %s17193_s3 }
 0x6df   : > { %v8914_v20 = vadd.f32 %v10697_v3, %v15740_v46  ;;  %v8905_v13 = vpop.f32.mrb[105].mxu0 }
 0x6e0   : > { %v9083_v52 = vmax.f32 %v15942_v54, 0.0  ;;  %v8906_v18 = vadd.f32 %v8905_v13, %v15626_v63  ;;  %v10698_v32 = vpop.f32.mrb[106].mxu0  ;;  %9150 = vrot.lane.b32.xlu0 %v9082_v17, %s17193_s3  ;;  %v9085_v63 = vmax.f32 %v15949_v40, 0.0 }
 0x6e1   : > { %v8917_v4 = vadd.f32 %v10698_v32, %v15750_v31  ;;  %v8908_v1 = vpop.f32.mrb[107].mxu0  ;;  %v9017_v46 = vmul.f32 %v15887_v62, %v8914_v20 }
 0x6e2   : > { %v9015_v57 = vmul.f32 %v15887_v62, %v8906_v18  ;;  %v8909_v60 = vadd.f32 %v8908_v1, %v15637_v38  ;;  %9152 = vrot.lane.b32.xlu1 %v9083_v52, %s17193_s3 }
 0x6e3   : > { %v9018_v31 = vmul.f32 %v15887_v62, %v8917_v4  ;;  %v15974_v38 = vadd.f32 %v15893_v6, %v9017_v46 }
 0x6e4   : > { %v15966_v35 = vadd.f32 %v15893_v6, %v9015_v57  ;;  %v9016_v59 = vmul.f32 %v15887_v62, %v8909_v60  ;;  %9154 = vrot.lane.b32.xlu0 %v9084_v36, %s17193_s3 }
 0x6e5   : > { %v15985_v15 = vadd.f32 %v15893_v6, %v9018_v31  ;;  %v9088_v4 = vmax.f32 %v15974_v38, 0.0 }
 0x6e6   : > { %v10541_v33 = vpop.f32.mrb[100].mxu1  ;;  %v9086_v7 = vmax.f32 %v15966_v35, 0.0  ;;  %v15978_v10 = vadd.f32 %v15893_v6, %v9016_v59  ;;  %v10701_v39 = vpop.f32.mrb[108].mxu0  ;;  %9156 = vrot.lane.b32.xlu1 %v9085_v63, %s17193_s3 }
 0x6e7   : > { %v10542_v16 = vpop.f32.mrb[101].mxu1  ;;  %v8930_v2 = vadd.f32 %v10701_v39, %v15815_v34  ;;  %v8921_v41 = vpop.f32.mrb[109].mxu0  ;;  %v16887_v60 = vmax.f32 %v15985_v15, 0.0 }
 0x6e8   : > { %v10543_v49 = vadd.f32 %v10542_v16, %v10541_v33  ;;  %v10544_v26 = vpop.f32.mrb[102].mxu1  ;;  %v9087_v58 = vmax.f32 %v15978_v10, 0.0  ;;  %v8922_v37 = vadd.f32 %v8921_v41, %v15794_v29  ;;  %v10702_v20 = vpop.f32.mrb[110].mxu0  ;;  %9158 = vrot.lane.b32.xlu0 %v9086_v7, %s17193_s3 }
 0x6e9   : > { %v10545_v3 = vpop.f32.mrb[103].mxu1  ;;  %v8933_v18 = vadd.f32 %v10702_v20, %v15820_v42  ;;  %v8924_v32 = vpop.f32.mrb[111].mxu0  ;;  %v9021_v1 = vmul.f32 %v15887_v62, %v8930_v2 }
 0x6ea   : > { %v10546_v13 = vadd.f32 %v10545_v3, %v10544_v26  ;;  %v8785_v34 = vadd.f32 %v10543_v49, %v15791_v25  ;;  %v9019_v46 = vmul.f32 %v15887_v62, %v8922_v37  ;;  %v8925_v29 = vadd.f32 %v8924_v32, %v15801_v19  ;;  %9160 = vrot.lane.b32.xlu1 %v9087_v58, %s17193_s3 }
 0x6eb   : > { %v9022_v25 = vmul.f32 %v15887_v62, %v8933_v18  ;;  %v16012_v19 = vadd.f32 %v15893_v6, %v9021_v1 }
 0x6ec   : > { %v8788_v57 = vadd.f32 %v10546_v13, %v15797_v27  ;;  %v16004_v42 = vadd.f32 %v15893_v6, %v9019_v46  ;;  %v9020_v31 = vmul.f32 %v15887_v62, %v8925_v29  ;;  %9162 = vrot.lane.b32.xlu0 %v9088_v4, %s17193_s3 }
 0x6ed   : > { %v16022_v49 = vadd.f32 %v15893_v6, %v9022_v25  ;;  %v16883_v20 = vmax.f32 %v16012_v19, 0.0 }
 0x6ee   : > { %v16886_v59 = vmax.f32 %v16004_v42, 0.0  ;;  %v16016_v27 = vadd.f32 %v15893_v6, %v9020_v31  ;;  %9164 = vrot.lane.b32.xlu1 %v16887_v60, %s17193_s3 }
 0x6ef   : > { %v10705_v33 = vpop.f32.mrb[112].mxu0 }
 0x6f0   : > { %v8946_v16 = vadd.f32 %v10705_v33, %v8785_v34  ;;  %v8937_v39 = vpop.f32.mrb[113].mxu0  ;;  %v16885_v2 = vmax.f32 %v16016_v27, 0.0  ;;  %9166 = vrot.lane.b32.xlu0 %v16886_v59, %s17193_s3 }
 0x6f1   : > { %v8938_v26 = vadd.f32 %v8937_v39, %v15874_v8  ;;  %v10706_v41 = vpop.f32.mrb[114].mxu0  ;;  %v16881_v8 = vmax.f32 %v16022_v49, 0.0 }
 0x6f2   : > { %v8949_v37 = vadd.f32 %v10706_v41, %v8788_v57  ;;  %v8940_v3 = vpop.f32.mrb[115].mxu0  ;;  %v9025_v13 = vmul.f32 %v15887_v62, %v8946_v16  ;;  %9168 = vrot.lane.b32.xlu1 %v16885_v2, %s17193_s3 }
 0x6f3   : > { %v9023_v18 = vmul.f32 %v15887_v62, %v8938_v26  ;;  %v8941_v32 = vadd.f32 %v8940_v3, %v15877_v51 }
 0x6f4   : > { %v9026_v1 = vmul.f32 %v15887_v62, %v8949_v37  ;;  %9170 = vrot.lane.b32.xlu0 %v16883_v20, %s17193_s3  ;;  %v16046_v29 = vadd.f32 %v15893_v6, %v9025_v13 }
 0x6f5   : > { %v16038_v34 = vadd.f32 %v15893_v6, %v9023_v18  ;;  %v9024_v46 = vmul.f32 %v15887_v62, %v8941_v32 }
 0x6f6   : > { %9172 = vrot.lane.b32.xlu1 %v16881_v8, %s17193_s3  ;;  %v16056_v25 = vadd.f32 %v15893_v6, %v9026_v1  ;;  %v16882_v33 = vmax.f32 %v16046_v29, 0.0 }
 0x6f7   : > { %v16880_v51 = vmax.f32 %v16038_v34, 0.0  ;;  %v16050_v57 = vadd.f32 %v15893_v6, %v9024_v46 }
 0x6f8   : > { %v16884_v16 = vmax.f32 %v16056_v25, 0.0 }
 0x6f9   : > { %v16879_v31 = vmax.f32 %v16050_v57, 0.0  ;;  %9174 = vrot.lane.b32.xlu0 %v16880_v51, %s17193_s3 }
 0x6fb   : > { %9176 = vrot.lane.b32.xlu1 %v16879_v31, %s17193_s3 }
 0x6fd   : > { %9178 = vrot.lane.b32.xlu0 %v16882_v33, %s17193_s3 }
 0x6ff   : > { %9180 = vrot.lane.b32.xlu1 %v16884_v16, %s17193_s3 }
 0x706   : > { %v10547_v39 = vpop.f32.mrb[104].mxu1 }
 0x707   : > { %v10548_v26 = vpop.f32.mrb[105].mxu1 }
 0x708   : > { %v10549_v41 = vadd.f32 %v10548_v26, %v10547_v39  ;;  %v10550_v37 = vpop.f32.mrb[106].mxu1 }
 0x709   : > { %v10551_v3 = vpop.f32.mrb[107].mxu1 }
 0x70a   : > { %v10552_v13 = vadd.f32 %v10551_v3, %v10550_v37  ;;  %v8793_v18 = vadd.f32 %v10549_v41, %v15822_v53 }
 0x70c   : > { %v8796_v32 = vadd.f32 %v10552_v13, %v15825_v30 }
 0x71a   : > { %v10553_v1 = vpop.f32.mrb[108].mxu1 }
 0x71b   : > { %v10554_v46 = vpop.f32.mrb[109].mxu1 }
 0x71c   : > { %v10555_v31 = vadd.f32 %v10554_v46, %v10553_v1  ;;  %v10556_v51 = vpop.f32.mrb[110].mxu1 }
 0x71d   : > { %v10557_v8 = vpop.f32.mrb[111].mxu1 }
 0x71e   : > { %v10558_v33 = vadd.f32 %v10557_v8, %v10556_v51  ;;  %v8801_v20 = vadd.f32 %v10555_v31, %v15845_v45 }
 0x720   : > { %v8804_v16 = vadd.f32 %v10558_v33, %v15847_v50 }
 0x723   : > { %v10709_v2 = vpop.f32.mrb[116].mxu0 }
 0x724   : > { %v8962_v59 = vadd.f32 %v10709_v2, %v8801_v20  ;;  %v8953_v39 = vpop.f32.mrb[117].mxu0 }
 0x725   : > { %v8954_v26 = vadd.f32 %v8953_v39, %v8793_v18  ;;  %v10710_v60 = vpop.f32.mrb[118].mxu0 }
 0x726   : > { %v9029_v37 = vmul.f32 %v15887_v62, %v8962_v59  ;;  %v8965_v53 = vadd.f32 %v10710_v60, %v8804_v16  ;;  %v8956_v41 = vpop.f32.mrb[119].mxu0 }
 0x727   : > { %v9027_v30 = vmul.f32 %v15887_v62, %v8954_v26  ;;  %v8957_v3 = vadd.f32 %v8956_v41, %v8796_v32 }
 0x728   : > { %v16080_v13 = vadd.f32 %v15893_v6, %v9029_v37  ;;  %v9030_v8 = vmul.f32 %v15887_v62, %v8965_v53 }
 0x729   : > { %v9028_v45 = vmul.f32 %v15887_v62, %v8957_v3  ;;  %v16086_v2 = vadd.f32 %v15893_v6, %v9027_v30 }
 0x72a   : > { %v16893_v50 = vmax.f32 %v16080_v13, 0.0  ;;  %v16089_v20 = vadd.f32 %v15893_v6, %v9030_v8 }
 0x72b   : > { %v16093_v59 = vadd.f32 %v15893_v6, %v9028_v45  ;;  %v16895_v51 = vmax.f32 %v16086_v2, 0.0 }
 0x72c   : > { %v16892_v60 = vmax.f32 %v16089_v20, 0.0  ;;  %9186 = vrot.lane.b32.xlu0 %v16893_v50, %s17193_s3 }
 0x72d   : > { %v16894_v31 = vmax.f32 %v16093_v59, 0.0 }
 0x72e   : > { %9188 = vrot.lane.b32.xlu1 %v16892_v60, %s17193_s3 }
 0x730   : > { %9182 = vrot.lane.b32.xlu0 %v16895_v51, %s17193_s3 }
 0x732   : > { %9184 = vrot.lane.b32.xlu1 %v16894_v31, %s17193_s3 }
 0x73a   : > { %v10559_v33 = vpop.f32.mrb[112].mxu1 }
 0x73b   : > { %v10560_v16 = vpop.f32.mrb[113].mxu1 }
 0x73c   : > { %v10561_v18 = vadd.f32 %v10560_v16, %v10559_v33  ;;  %v10562_v32 = vpop.f32.mrb[114].mxu1 }
 0x73d   : > { %v10563_v1 = vpop.f32.mrb[115].mxu1 }
 0x73e   : > { %v10564_v46 = vadd.f32 %v10563_v1, %v10562_v32  ;;  %v8809_v39 = vadd.f32 %v10561_v18, %v15855_v24 }
 0x740   : > { %v8812_v26 = vadd.f32 %v10564_v46, %v15857_v47 }
 0x74a   : > { %v9143_v37 = vpop.permute.xlu0 %9142 }
 0x74b   : > { %9238 = vst.msk [vmem:[#allocation2] sm:$0xff] %vm17770_vm11, %v9143_v37  ;;  %vm17803_vm11 = vmmov %vm17793_vm0 }
 0x74c   : > { %v9145_v53 = vpop.permute.xlu1 %9144 }
 0x74d   : > { %9239 = vst.msk [vmem:[#allocation2 + $0x8] sm:$0xff] %vm17788_vm15, %v9145_v53  ;;  %vm17804_vm15 = vmmov %vm17793_vm0 }
 0x74e   : > { %v10565_v41 = vpop.f32.mrb[116].mxu1  ;;  %v9147_v3 = vpop.permute.xlu0 %9146 }
 0x74f   : > { %v10566_v30 = vpop.f32.mrb[117].mxu1  ;;  %9240 = vst.msk [vmem:[#allocation2 + $0x10] sm:$0xff] %vm17789_vm4, %v9147_v3  ;;  %vm17805_vm4 = vmmov %vm17793_vm0 }
 0x750   : > { %v10567_v8 = vadd.f32 %v10566_v30, %v10565_v41  ;;  %v10568_v45 = vpop.f32.mrb[118].mxu1  ;;  %v9149_v16 = vpop.permute.xlu1 %9148 }
 0x751   : > { %v10569_v33 = vpop.f32.mrb[119].mxu1  ;;  %9241 = vst.msk [vmem:[#allocation2 + $0x18] sm:$0xff] %vm17790_vm5, %v9149_v16  ;;  %vm17806_vm5 = vmmov %vm17793_vm0 }
 0x752   : > { %v10570_v32 = vadd.f32 %v10569_v33, %v10568_v45  ;;  %v8817_v24 = vadd.f32 %v10567_v8, %v15862_v28  ;;  %v9151_v47 = vpop.permute.xlu0 %9150 }
 0x753   : > { %9242 = vst.msk [vmem:[#allocation2 + $0x20] sm:$0xff] %vm17791_vm6, %v9151_v47  ;;  %vm17807_vm6 = vcmask 1043456  }
 0x754   : > { %v8820_v18 = vadd.f32 %v10570_v32, %v15864_v14  ;;  %v9153_v1 = vpop.permute.xlu1 %9152 }
 0x755   : > { %9243 = vst.msk [vmem:[#allocation2 + $0x28] sm:$0xff] %vm17792_vm13, %v9153_v1  ;;  %vm17808_vm13 = vmmov %vm17807_vm6 }
 0x756   : > { %v9155_v37 = vpop.permute.xlu0 %9154 }
 0x757   : > { %v10713_v46 = vpop.f32.mrb[120].mxu0  ;;  %9244 = vst.msk [vmem:[#allocation2 + $0x30] sm:$0xff] %vm17793_vm0, %v9155_v37 }
 0x758   : > { %v8978_v53 = vadd.f32 %v10713_v46, %v8817_v24  ;;  %v8969_v41 = vpop.f32.mrb[121].mxu0  ;;  %v9157_v45 = vpop.permute.xlu1 %9156 }
 0x759   : > { %v8970_v30 = vadd.f32 %v8969_v41, %v8809_v39  ;;  %v10714_v3 = vpop.f32.mrb[122].mxu0  ;;  %9245 = vst.msk [vmem:[#allocation2 + $0x38] sm:$0xff] %vm17794_vm3, %v9157_v45  ;;  %vm17809_vm3 = vmmov %vm17793_vm0 }
 0x75a   : > { %v9033_v33 = vmul.f32 %v15887_v62, %v8978_v53  ;;  %v8981_v28 = vadd.f32 %v10714_v3, %v8820_v18  ;;  %v8972_v8 = vpop.f32.mrb[123].mxu0  ;;  %v9159_v32 = vpop.permute.xlu0 %9158 }
 0x75b   : > { %v9031_v14 = vmul.f32 %v15887_v62, %v8970_v30  ;;  %v8973_v16 = vadd.f32 %v8972_v8, %v8812_v26  ;;  %9246 = vst.msk [vmem:[#allocation2 + $0x40] sm:$0xff] %vm17795_vm14, %v9159_v32  ;;  %vm17810_vm14 = vmmov %vm17793_vm0 }
 0x75c   : > { %v16124_v47 = vadd.f32 %v15893_v6, %v9033_v33  ;;  %v9034_v24 = vmul.f32 %v15887_v62, %v8981_v28  ;;  %v9161_v1 = vpop.permute.xlu1 %9160 }
 0x75d   : > { %v9032_v39 = vmul.f32 %v15887_v62, %v8973_v16  ;;  %v16131_v18 = vadd.f32 %v15893_v6, %v9031_v14  ;;  %9247 = vst.msk [vmem:[#allocation2 + $0x48] sm:$0xff] %vm17796_vm2, %v9161_v1  ;;  %vm17811_vm2 = vmmov %vm17793_vm0 }
 0x75e   : > { %v16889_v46 = vmax.f32 %v16124_v47, 0.0  ;;  %v16134_v37 = vadd.f32 %v15893_v6, %v9034_v24  ;;  %v9163_v26 = vpop.permute.xlu0 %9162 }
 0x75f   : > { %v16139_v41 = vadd.f32 %v15893_v6, %v9032_v39  ;;  %9248 = vst.msk [vmem:[#allocation2 + $0x50] sm:$0xff] %vm17797_vm7, %v9163_v26  ;;  %v16891_v3 = vmax.f32 %v16131_v18, 0.0  ;;  %vm17812_vm7 = vmmov %vm17793_vm0 }
 0x760   : > { %v16888_v53 = vmax.f32 %v16134_v37, 0.0  ;;  %9194 = vrot.lane.b32.xlu0 %v16889_v46, %s17193_s3  ;;  %v9165_v30 = vpop.permute.xlu1 %9164 }
 0x761   : > { %9249 = vst.msk [vmem:[#allocation2 + $0x58] sm:$0xff] %vm17798_vm8, %v9165_v30  ;;  %v16890_v33 = vmax.f32 %v16139_v41, 0.0  ;;  %vm17813_vm8 = vmmov %vm17793_vm0 }
 0x762   : > { %9196 = vrot.lane.b32.xlu1 %v16888_v53, %s17193_s3  ;;  %v9167_v45 = vpop.permute.xlu0 %9166 }
 0x763   : > { %9250 = vst.msk [vmem:[#allocation2 + $0x60] sm:$0xff] %vm17799_vm12, %v9167_v45  ;;  %vm17814_vm12 = vmmov %vm17793_vm0 }
 0x764   : > { %9190 = vrot.lane.b32.xlu0 %v16891_v3, %s17193_s3  ;;  %v9169_v28 = vpop.permute.xlu1 %9168 }
 0x765   : > { %9251 = vst.msk [vmem:[#allocation2 + $0x68] sm:$0xff] %vm17800_vm10, %v9169_v28  ;;  %vm17815_vm10 = vmmov %vm17793_vm0 }
 0x766   : > { %9192 = vrot.lane.b32.xlu1 %v16890_v33, %s17193_s3  ;;  %v9171_v8 = vpop.permute.xlu0 %9170 }
 0x767   : > { %9252 = vst.msk [vmem:[#allocation2 + $0x70] sm:$0xff] %vm17801_vm9, %v9171_v8  ;;  %vm17816_vm9 = vmmov %vm17793_vm0 }
 0x768   : > { %v9173_v14 = vpop.permute.xlu1 %9172 }
 0x769   : > { %9253 = vst.msk [vmem:[#allocation2 + $0x78] sm:$0xff] %vm17802_vm1, %v9173_v14  ;;  %vm17817_vm1 = vmmov %vm17793_vm0 }
 0x76b   : > { %v9175_v16 = vpop.permute.xlu0 %9174 }
 0x76c   : > { %9254 = vst.msk [vmem:[#allocation2 + $0x80] sm:$0xff] %vm17803_vm11, %v9175_v16  ;;  %vm17818_vm11 = vcmask 195584  }
 0x76d   : > { %v9177_v32 = vpop.permute.xlu1 %9176 }
 0x76e   : > { %9255 = vst.msk [vmem:[#allocation2 + $0x88] sm:$0xff] %vm17804_vm15, %v9177_v32  ;;  %v10571_v24 = vpop.f32.mrb[120].mxu1  ;;  %vm17819_vm15 = vmmov %vm17818_vm11 }
 0x76f   : > { %v10572_v39 = vpop.f32.mrb[121].mxu1  ;;  %v9179_v1 = vpop.permute.xlu0 %9178 }
 0x770   : > { %v10573_v26 = vadd.f32 %v10572_v39, %v10571_v24  ;;  %9256 = vst.msk [vmem:[#allocation2 + $0x90] sm:$0xff] %vm17805_vm4, %v9179_v1  ;;  %v10574_v30 = vpop.f32.mrb[122].mxu1  ;;  %vm17820_vm4 = vmmov %vm17793_vm0 }
 0x771   : > { %v10575_v45 = vpop.f32.mrb[123].mxu1  ;;  %v9181_v28 = vpop.permute.xlu1 %9180 }
 0x772   : > { %v10576_v53 = vadd.f32 %v10575_v45, %v10574_v30  ;;  %9257 = vst.msk [vmem:[#allocation2 + $0x98] sm:$0xff] %vm17806_vm5, %v9181_v28  ;;  %v8825_v8 = vadd.f32 %v10573_v26, %v15869_v0  ;;  %v9273_v26 = vld [vmem:[#allocation2 + $0x18] sm:$0xff]  ;;  %vm17821_vm5 = vmmov %vm17793_vm0 }
 0x774   : > { %v8828_v14 = vadd.f32 %v10576_v53, %v15871_v11 }
 0x782   : > { %v10577_v16 = vpop.f32.mrb[124].mxu1 }
 0x783   : > { %v10578_v46 = vpop.f32.mrb[125].mxu1 }
 0x784   : > { %v10579_v33 = vadd.f32 %v10578_v46, %v10577_v16  ;;  %v10580_v32 = vpop.f32.mrb[126].mxu1  ;;  %v10861_v46 = vld [vmem:[%s16540_s10] sm:$0xff]  }
 0x785   : > { %v10581_v3 = vpop.f32.mrb[127].mxu1  ;;  %10719 = vmatprep.subr.bf16.mxu0 %v10861_v46 }
 0x786   : > { %v10582_v60 = vadd.f32 %v10581_v3, %v10580_v32  ;;  %v8833_v24 = vadd.f32 %v10579_v33, %v15879_v43  ;;  %10720 = vmatpush3.bf16.msra.mxu0 %v10861_v46  ;;  %v9272_v33 = vld [vmem:[#allocation2 + $0x10] sm:$0xff]  ;;  %v9271_v32 = vld [vmem:[#allocation2 + $0x8] sm:$0xff] }
 0x788   : > { %v8836_v39 = vadd.f32 %v10582_v60, %v15881_v44 }
 0x78e   : > { %v10717_v1 = vpop.f32.mrb[124].mxu0 }
 0x78f   : > { %v8994_v50 = vadd.f32 %v10717_v1, %v8833_v24  ;;  %v8985_v31 = vpop.f32.mrb[125].mxu0  ;;  %v9276_v1 = vld [vmem:[#allocation2 + $0x30] sm:$0xff] }
 0x790   : > { %v8986_v30 = vadd.f32 %v8985_v31, %v8825_v8  ;;  %v10718_v45 = vpop.f32.mrb[126].mxu0 }
 0x791   : > { %v8997_v28 = vadd.f32 %v10718_v45, %v8836_v39  ;;  %v8988_v51 = vpop.f32.mrb[127].mxu0  ;;  %v9037_v24 = vmul.f32 %v15887_v62, %v8994_v50  ;;  %v9274_v50 = vld [vmem:[#allocation2 + $0x20] sm:$0xff] }
 0x792   : > { %v9035_v0 = vmul.f32 %v15887_v62, %v8986_v30  ;;  %v8989_v11 = vadd.f32 %v8988_v51, %v8828_v14  ;;  %v10862_v51 = vld [vmem:[%s16540_s10 + $0x8] ss:$0 sps:$4 sm:$0xff]   ;;  %v9270_v14 = vld [vmem:[#allocation2] sm:$0xff] }
 0x793   : > { %10757 = vmatprep.subr.msk.bf16.mxu0 %vm17807_vm6, %v10862_v51  ;;  %v9539_v3 = vsel %vm17808_vm13, %v10862_v51, 0  ;;  %v9038_v30 = vmul.f32 %v15887_v62, %v8997_v28  ;;  %v9278_v51 = vld [vmem:[#allocation2 + $0x40] sm:$0xff]  ;;  %vm17822_vm6 = vmmov %vm17818_vm11 }
 0x794   : > { %v16174_v53 = vadd.f32 %v15893_v6, %v9035_v0  ;;  %v9036_v43 = vmul.f32 %v15887_v62, %v8989_v11  ;;  %10722 = vmatpush3.bf16.msra.mxu0 %v9539_v3  ;;  %v9277_v0 = vld [vmem:[#allocation2 + $0x38] sm:$0xff]  ;;  %v16205_v11 = vadd.f32 %v15893_v6, %v9037_v24  ;;  %v9280_v3 = vld [vmem:[#allocation2 + $0x50] sm:$0xff]  ;;  %v9287_v24 = vld [vmem:[#allocation2 + $0x88] sm:$0xff] }
 0x795   : > { %v16209_v46 = vadd.f32 %v15893_v6, %v9038_v30  ;;  %vm17823_vm13 = vmmov %vm17822_vm6 }
 0x796   : > { %v9106_v44 = vmax.f32 %v16174_v53, 0.0  ;;  %v16179_v60 = vadd.f32 %v15893_v6, %v9036_v43  ;;  %v9275_v43 = vld [vmem:[#allocation2 + $0x28] sm:$0xff]  ;;  %v9108_v62 = vmax.f32 %v16205_v11, 0.0  ;;  %v16336_v53 = vld [vmem:[%s16541_s11] ss:$0 sm:$0xff] }
 0x797   : > { %v9109_v28 = vmax.f32 %v16209_v46, 0.0  ;;  %v9279_v6 = vld [vmem:[#allocation2 + $0x48] sm:$0xff] }
 0x798   : > { %v9107_v31 = vmax.f32 %v16179_v60, 0.0  ;;  %9198 = vrot.lane.b32.xlu0 %v9106_v44, %s17193_s3  ;;  %v16341_v60 = vld [vmem:[%s16542_s12] ss:$0 sm:$0xff] }
 0x79a   : > { %9200 = vrot.lane.b32.xlu1 %v9107_v31, %s17193_s3 }
 0x79c   : > { %9338 = vrot.lane.b32.xlu0 %v9272_v33, %s17160_s0  ;;  %v9281_v33 = vld [vmem:[#allocation2 + $0x58] sm:$0xff] }
 0x79e   : > { %9340 = vrot.lane.b32.xlu1 %v9273_v26, %s17160_s0  ;;  %v9187_v8 = vpop.permute.xlu0 %9186  ;;  %v9282_v26 = vld [vmem:[#allocation2 + $0x60] sm:$0xff] }
 0x79f   : > { %9260 = vst.msk [vmem:[#allocation2 + $0xb0] sm:$0xff] %vm17793_vm0, %v9187_v8  ;;  %v9283_v8 = vld [vmem:[#allocation2 + $0x68] sm:$0xff]  ;;  %vm17825_vm0 = vmmov %vm17822_vm6 }
 0x7a0   : > { %v9189_v16 = vpop.permute.xlu1 %9188  ;;  %9334 = vrot.lane.b32.xlu0 %v9270_v14, %s17160_s0  ;;  %v9284_v14 = vld [vmem:[#allocation2 + $0x70] sm:$0xff] }
 0x7a1   : > { %9261 = vst.msk [vmem:[#allocation2 + $0xb8] sm:$0xff] %vm17809_vm3, %v9189_v16  ;;  %v9285_v16 = vld [vmem:[#allocation2 + $0x78] sm:$0xff]  ;;  %vm17828_vm3 = vmmov %vm17825_vm0 }
 0x7a2   : > { %9336 = vrot.lane.b32.xlu1 %v9271_v32, %s17160_s0  ;;  %v9183_v39 = vpop.permute.xlu0 %9182  ;;  %v9286_v32 = vld [vmem:[#allocation2 + $0x80] sm:$0xff] }
 0x7a3   : > { %9258 = vst.msk [vmem:[#allocation2 + $0xa0] sm:$0xff] %vm17810_vm14, %v9183_v39  ;;  %v9288_v39 = vld [vmem:[#allocation2 + $0x90] sm:$0xff]  ;;  %vm17831_vm14 = vmmov %vm17825_vm0 }
 0x7a4   : > { %v9185_v45 = vpop.permute.xlu1 %9184  ;;  %9346 = vrot.lane.b32.xlu0 %v9276_v1, %s17160_s0  ;;  %v9289_v1 = vld [vmem:[#allocation2 + $0x98] sm:$0xff] }
 0x7a5   : > { %9259 = vst.msk [vmem:[#allocation2 + $0xa8] sm:$0xff] %vm17811_vm2, %v9185_v45  ;;  %vm17834_vm2 = vmmov %vm17825_vm0 }
 0x7a6   : > { %9348 = vrot.lane.b32.xlu1 %v9277_v0, %s17160_s0  ;;  %v9292_v0 = vld [vmem:[#allocation2 + $0xb0] sm:$0xff] }
 0x7a8   : > { %9342 = vrot.lane.b32.xlu0 %v9274_v50, %s17160_s0  ;;  %v9293_v50 = vld [vmem:[#allocation2 + $0xb8] sm:$0xff] }
 0x7aa   : > { %9344 = vrot.lane.b32.xlu1 %v9275_v43, %s17160_s0  ;;  %v9290_v30 = vld [vmem:[#allocation2 + $0xa0] sm:$0xff] }
 0x7ac   : > { %9202 = vrot.lane.b32.xlu0 %v9108_v62, %s17193_s3  ;;  %v9291_v45 = vld [vmem:[#allocation2 + $0xa8] sm:$0xff] }
 0x7ae   : > { %9204 = vrot.lane.b32.xlu1 %v9109_v28, %s17193_s3 }
 0x7b0   : > { %9350 = vrot.lane.b32.xlu0 %v9278_v51, %s17160_s0 }
 0x7b2   : > { %9352 = vrot.lane.b32.xlu1 %v9279_v6, %s17160_s0 }
 0x7b4   : > { %9354 = vrot.lane.b32.xlu0 %v9280_v3, %s17160_s0 }
 0x7b6   : > { %9356 = vrot.lane.b32.xlu1 %v9281_v33, %s17160_s0 }
 0x7b8   : > { %9358 = vrot.lane.b32.xlu0 %v9282_v26, %s17160_s0 }
 0x7ba   : > { %9360 = vrot.lane.b32.xlu1 %v9283_v8, %s17160_s0 }
 0x7bc   : > { %9362 = vrot.lane.b32.xlu0 %v9284_v14, %s17160_s0 }
 0x7be   : > { %9364 = vrot.lane.b32.xlu1 %v9285_v16, %s17160_s0 }
 0x7c0   : > { %9366 = vrot.lane.b32.xlu0 %v9286_v32, %s17160_s0 }
 0x7c2   : > { %9368 = vrot.lane.b32.xlu1 %v9287_v24, %s17160_s0 }
 0x7c4   : > { %9370 = vrot.lane.b32.xlu0 %v9288_v39, %s17160_s0 }
 0x7c6   : > { %9372 = vrot.lane.b32.xlu1 %v9289_v1, %s17160_s0 }
 0x7c8   : > { %9374 = vrot.lane.b32.xlu0 %v9290_v30, %s17160_s0 }
 0x7ca   : > { %9376 = vrot.lane.b32.xlu1 %v9291_v45, %s17160_s0 }
 0x7cc   : > { %9378 = vrot.lane.b32.xlu0 %v9292_v0, %s17160_s0 }
 0x7ce   : > { %9380 = vrot.lane.b32.xlu1 %v9293_v50, %s17160_s0 }
 0x7d2   : > { %v9195_v43 = vpop.permute.xlu0 %9194 }
 0x7d3   : > { %9264 = vst.msk [vmem:[#allocation2 + $0xd0] sm:$0xff] %vm17812_vm7, %v9195_v43  ;;  %vm17837_vm7 = vmmov %vm17825_vm0 }
 0x7d4   : > { %v9197_v51 = vpop.permute.xlu1 %9196 }
 0x7d5   : > { %9265 = vst.msk [vmem:[#allocation2 + $0xd8] sm:$0xff] %vm17813_vm8, %v9197_v51  ;;  %vm17840_vm8 = vmmov %vm17825_vm0 }
 0x7d6   : > { %v9191_v6 = vpop.permute.xlu0 %9190 }
 0x7d7   : > { %9262 = vst.msk [vmem:[#allocation2 + $0xc0] sm:$0xff] %vm17814_vm12, %v9191_v6  ;;  %vm17843_vm12 = vmmov %vm17825_vm0 }
 0x7d8   : > { %v9193_v3 = vpop.permute.xlu1 %9192 }
 0x7d9   : > { %9263 = vst.msk [vmem:[#allocation2 + $0xc8] sm:$0xff] %vm17815_vm10, %v9193_v3  ;;  %vm17844_vm10 = vmmov %vm17825_vm0 }
 0x7da   : > { %v9296_v8 = vld [vmem:[#allocation2 + $0xd0] sm:$0xff] }
 0x7dc   : > { %v9297_v14 = vld [vmem:[#allocation2 + $0xd8] sm:$0xff] }
 0x7de   : > { %v9294_v33 = vld [vmem:[#allocation2 + $0xc0] sm:$0xff] }
 0x7df   : > { %9382 = vrot.lane.b32.xlu0 %v9294_v33, %s17160_s0 }
 0x7e0   : > { %v9295_v26 = vld [vmem:[#allocation2 + $0xc8] sm:$0xff] }
 0x7e1   : > { %9384 = vrot.lane.b32.xlu1 %v9295_v26, %s17160_s0 }
 0x7e3   : > { %9386 = vrot.lane.b32.xlu0 %v9296_v8, %s17160_s0 }
 0x7e5   : > { %9388 = vrot.lane.b32.xlu1 %v9297_v14, %s17160_s0 }
 0x80a   : > { %v9199_v16 = vpop.permute.xlu0 %9198 }
 0x80b   : > { %9266 = vst.msk [vmem:[#allocation2 + $0xe0] sm:$0xff] %vm17816_vm9, %v9199_v16  ;;  %vm17849_vm9 = vmmov %vm17825_vm0 }
 0x80c   : > { %v9201_v32 = vpop.permute.xlu1 %9200 }
 0x80d   : > { %9267 = vst.msk [vmem:[#allocation2 + $0xe8] sm:$0xff] %vm17817_vm1, %v9201_v32  ;;  %vm17850_vm1 = vmmov %vm17825_vm0 }
 0x80e   : > { %v9339_v24 = vpop.permute.xlu0 %9338 }
 0x80f   : > { %v9432_v6 = vadd.f32 %v9339_v24, %v9080_v5 }
 0x810   : > { %v9341_v39 = vpop.permute.xlu1 %9340 }
 0x811   : > { %v9433_v45 = vadd.f32 %v9341_v39, %v9081_v61  ;;  %v17824_v39 = vmax.f32 %v15985_v15, 0.0  ;;  %v17829_v15 = vmax.f32 %v16012_v19, 0.0 }
 0x812   : > { %v9335_v1 = vpop.permute.xlu0 %9334  ;;  %v9298_v30 = vld [vmem:[#allocation2 + $0xe0] sm:$0xff] }
 0x813   : > { %9390 = vrot.lane.b32.xlu0 %v9298_v30, %s17160_s0  ;;  %v9430_v43 = vadd.f32 %v9335_v1, %v9078_v21  ;;  %v9463_v26 = vpack.c.bf16 %v9433_v45, %v9432_v6  ;;  %v17827_v45 = vmax.f32 %v16016_v27, 0.0 }
 0x814   : > { %v9337_v0 = vpop.permute.xlu1 %9336  ;;  %v9299_v50 = vld [vmem:[#allocation2 + $0xe8] sm:$0xff] }
 0x815   : > { %v9431_v51 = vadd.f32 %v9337_v0, %v9079_v9  ;;  %9392 = vrot.lane.b32.xlu1 %v9299_v50, %s17160_s0 }
 0x816   : > { %v9347_v3 = vpop.permute.xlu0 %9346 }
 0x817   : > { %v9462_v33 = vpack.c.bf16 %v9431_v51, %v9430_v43  ;;  %v9436_v9 = vadd.f32 %v9347_v3, %v9084_v36  ;;  %v17830_v51 = vmax.f32 %v16022_v49, 0.0 }
 0x818   : > { %v9349_v8 = vpop.permute.xlu1 %9348 }
 0x819   : > { %10723 = vmatprep.mubr.msk.bf16.mxu0 %vm17818_vm11, %v9462_v33  ;;  %v9437_v56 = vadd.f32 %v9349_v8, %v9085_v63  ;;  %v17833_v8 = vmax.f32 %v16050_v57, 0.0  ;;  %vm17851_vm11 = vmmov %vm17825_vm0 }
 0x81a   : > { %10724 = vmatmul.mubr.msk.bf16.vlgmr.msra.gmra.mrb[128].mxu0 %vm17819_vm15, %v9463_v26  ;;  %v9343_v12 = vpop.permute.xlu0 %9342  ;;  %v17832_v26 = vmax.f32 %v16038_v34, 0.0  ;;  %vm17852_vm15 = vmmov %vm17825_vm0 }
 0x81b   : > { %v9434_v23 = vadd.f32 %v9343_v12, %v9082_v17  ;;  %v9465_v14 = vpack.c.bf16 %v9437_v56, %v9436_v9 }
 0x81c   : > { %v9345_v21 = vpop.permute.xlu1 %9344 }
 0x81d   : > { %v9435_v48 = vadd.f32 %v9345_v21, %v9083_v52 }
 0x81e   : > { %v9203_v5 = vpop.permute.xlu0 %9202 }
 0x81f   : > { %v9464_v61 = vpack.c.bf16 %v9435_v48, %v9434_v23  ;;  %9268 = vst.msk [vmem:[#allocation2 + $0xf0] sm:$0xff] %vm17820_vm4, %v9203_v5  ;;  %v17835_v23 = vmax.f32 %v16046_v29, 0.0  ;;  %v17836_v48 = vmax.f32 %v16056_v25, 0.0  ;;  %vm17853_vm4 = vcmask 589184  }
 0x820   : > { %v9205_v16 = vpop.permute.xlu1 %9204 }
 0x821   : > { %9269 = vst.msk [vmem:[#allocation2 + $0xf8] sm:$0xff] %vm17821_vm5, %v9205_v16  ;;  %10727 = vmatprep.mubr.msk.bf16.mxu0 %vm17822_vm6, %v9464_v61  ;;  %v17839_v16 = vmax.f32 %v16093_v59, 0.0  ;;  %v17845_v59 = vmax.f32 %v16131_v18, 0.0  ;;  %vm17854_vm5 = vmmov %vm17853_vm4  ;;  %vm17855_vm6 = vcmask 785408  }
 0x822   : > { %10728 = vmatmul.mubr.msk.bf16.gmra.mrb[132].mxu0 %vm17823_vm13, %v9465_v14  ;;  %v9351_v22 = vpop.permute.xlu0 %9350  ;;  %v17838_v14 = vmax.f32 %v16086_v2, 0.0  ;;  %vm17856_vm13 = vmmov %vm17853_vm4 }
 0x823   : > { %v9438_v54 = vadd.f32 %v9351_v22, %v9086_v7 }
 0x824   : > { %v9353_v17 = vpop.permute.xlu1 %9352 }
 0x825   : > { %v9439_v55 = vadd.f32 %v9353_v17, %v9087_v58  ;;  %v17826_v58 = vmax.f32 %v16004_v42, 0.0 }
 0x826   : > { %v9355_v40 = vpop.permute.xlu0 %9354  ;;  %v9300_v52 = vld [vmem:[#allocation2 + $0xf0] sm:$0xff] }
 0x827   : > { %v9466_v36 = vpack.c.bf16 %v9439_v55, %v9438_v54  ;;  %9394 = vrot.lane.b32.xlu0 %v9300_v52, %s17160_s0  ;;  %v9440_v24 = vadd.f32 %v9355_v40, %v9088_v4  ;;  %v17841_v55 = vmax.f32 %v16080_v13, 0.0  ;;  %v17842_v40 = vmax.f32 %v16089_v20, 0.0 }
 0x828   : > { %v9357_v63 = vpop.permute.xlu1 %9356  ;;  %v9301_v32 = vld [vmem:[#allocation2 + $0xf8] sm:$0xff] }
 0x829   : > { %v9441_v1 = vadd.f32 %v9357_v63, %v17824_v39  ;;  %9396 = vrot.lane.b32.xlu1 %v9301_v32, %s17160_s0  ;;  %10731 = vmatprep.mubr.msk.bf16.mxu0 %vm17825_vm0, %v9466_v36  ;;  %vm17857_vm0 = vmmov %vm17853_vm4 }
 0x82a   : > { %v9359_v35 = vpop.permute.xlu0 %9358 }
 0x82b   : > { %v9467_v7 = vpack.c.bf16 %v9441_v1, %v9440_v24  ;;  %v9442_v30 = vadd.f32 %v9359_v35, %v17826_v58  ;;  %v17846_v24 = vmax.f32 %v16139_v41, 0.0 }
 0x82c   : > { %v9361_v10 = vpop.permute.xlu1 %9360 }
 0x82d   : > { %v9443_v0 = vadd.f32 %v9361_v10, %v17827_v45  ;;  %10732 = vmatmul.mubr.msk.bf16.gmra.mrb[136].mxu0 %vm17828_vm3, %v9467_v7  ;;  %v17847_v7 = vmax.f32 %v16124_v47, 0.0  ;;  %v17848_v10 = vmax.f32 %v16134_v37, 0.0  ;;  %vm17858_vm3 = vmmov %vm17857_vm0 }
 0x82e   : > { %v9363_v38 = vpop.permute.xlu0 %9362 }
 0x82f   : > { %v9468_v4 = vpack.c.bf16 %v9443_v0, %v9442_v30  ;;  %v9444_v43 = vadd.f32 %v9363_v38, %v17829_v15 }
 0x830   : > { %v9365_v50 = vpop.permute.xlu1 %9364 }
 0x831   : > { %v9445_v6 = vadd.f32 %v9365_v50, %v17830_v51  ;;  %10735 = vmatprep.mubr.msk.bf16.mxu0 %vm17831_vm14, %v9468_v4  ;;  %vm17859_vm14 = vmmov %vm17857_vm0 }
 0x832   : > { %v9367_v3 = vpop.permute.xlu0 %9366 }
 0x833   : > { %v9469_v33 = vpack.c.bf16 %v9445_v6, %v9444_v43  ;;  %v9446_v27 = vadd.f32 %v9367_v3, %v17832_v26 }
 0x834   : > { %v9369_v42 = vpop.permute.xlu1 %9368 }
 0x835   : > { %v9447_v12 = vadd.f32 %v9369_v42, %v17833_v8  ;;  %10736 = vmatmul.mubr.msk.bf16.gmra.mrb[140].mxu0 %vm17834_vm2, %v9469_v33  ;;  %vm17860_vm2 = vmmov %vm17857_vm0 }
 0x836   : > { %v9371_v56 = vpop.permute.xlu0 %9370 }
 0x837   : > { %v9470_v21 = vpack.c.bf16 %v9447_v12, %v9446_v27  ;;  %v9448_v49 = vadd.f32 %v9371_v56, %v17835_v23 }
 0x838   : > { %v9373_v19 = vpop.permute.xlu1 %9372 }
 0x839   : > { %v9449_v9 = vadd.f32 %v9373_v19, %v17836_v48  ;;  %10739 = vmatprep.mubr.msk.bf16.mxu0 %vm17837_vm7, %v9470_v21  ;;  %vm17861_vm7 = vmmov %vm17857_vm0 }
 0x83a   : > { %v9375_v5 = vpop.permute.xlu0 %9374 }
 0x83b   : > { %v9471_v61 = vpack.c.bf16 %v9449_v9, %v9448_v49  ;;  %v9450_v57 = vadd.f32 %v9375_v5, %v17838_v14 }
 0x83c   : > { %v9377_v34 = vpop.permute.xlu1 %9376 }
 0x83d   : > { %v9451_v22 = vadd.f32 %v9377_v34, %v17839_v16  ;;  %10740 = vmatmul.mubr.msk.bf16.gmra.mrb[144].mxu0 %vm17840_vm8, %v9471_v61  ;;  %vm17862_vm8 = vmmov %vm17857_vm0 }
 0x83e   : > { %v9379_v17 = vpop.permute.xlu0 %9378 }
 0x83f   : > { %v9472_v54 = vpack.c.bf16 %v9451_v22, %v9450_v57  ;;  %v9452_v25 = vadd.f32 %v9379_v17, %v17841_v55 }
 0x840   : > { %v9381_v29 = vpop.permute.xlu1 %9380 }
 0x841   : > { %v9453_v52 = vadd.f32 %v9381_v29, %v17842_v40  ;;  %10743 = vmatprep.mubr.msk.bf16.mxu0 %vm17843_vm12, %v9472_v54  ;;  %vm17863_vm12 = vmmov %vm17855_vm6 }
 0x843   : > { %v9473_v36 = vpack.c.bf16 %v9453_v52, %v9452_v25 }
 0x845   : > { %10744 = vmatmul.mubr.msk.bf16.gmra.mrb[148].mxu0 %vm17844_vm10, %v9473_v36  ;;  %vm17864_vm10 = vmmov %vm17855_vm6 }
 0x851   : > { %v9383_v2 = vpop.permute.xlu0 %9382 }
 0x852   : > { %v9454_v32 = vadd.f32 %v9383_v2, %v17845_v59 }
 0x853   : > { %v9385_v63 = vpop.permute.xlu1 %9384 }
 0x854   : > { %v9455_v39 = vadd.f32 %v9385_v63, %v17846_v24 }
 0x855   : > { %v9387_v1 = vpop.permute.xlu0 %9386 }
 0x856   : > { %v9474_v35 = vpack.c.bf16 %v9455_v39, %v9454_v32  ;;  %v9456_v20 = vadd.f32 %v9387_v1, %v17847_v7 }
 0x857   : > { %v9389_v13 = vpop.permute.xlu1 %9388 }
 0x858   : > { %v9457_v58 = vadd.f32 %v9389_v13, %v17848_v10  ;;  %10747 = vmatprep.mubr.msk.bf16.mxu0 %vm17849_vm9, %v9474_v35  ;;  %vm17865_vm9 = vmmov %vm17857_vm0 }
 0x85a   : > { %v9475_v30 = vpack.c.bf16 %v9457_v58, %v9456_v20 }
 0x85c   : > { %10748 = vmatmul.mubr.msk.bf16.gmra.mrb[152].mxu0 %vm17850_vm1, %v9475_v30  ;;  %vm17866_vm1 = vmmov %vm17857_vm0 }
 0x885   : > { %v9391_v45 = vpop.permute.xlu0 %9390 }
 0x886   : > { %v9458_v41 = vadd.f32 %v9391_v45, %v9106_v44 }
 0x887   : > { %v9393_v18 = vpop.permute.xlu1 %9392 }
 0x888   : > { %v9459_v0 = vadd.f32 %v9393_v18, %v9107_v31 }
 0x88a   : > { %v9476_v38 = vpack.c.bf16 %v9459_v0, %v9458_v41 }
 0x88c   : > { %10751 = vmatprep.mubr.msk.bf16.mxu0 %vm17851_vm11, %v9476_v38  ;;  %vm17867_vm11 = vmmov %vm17857_vm0 }
 0x899   : > { %v9395_v47 = vpop.permute.xlu0 %9394 }
 0x89a   : > { %v9460_v37 = vadd.f32 %v9395_v47, %v9108_v62 }
 0x89b   : > { %v9397_v4 = vpop.permute.xlu1 %9396 }
 0x89c   : > { %v9461_v50 = vadd.f32 %v9397_v4, %v9109_v28 }
 0x89e   : > { %v9477_v15 = vpack.c.bf16 %v9461_v50, %v9460_v37 }
 0x8a0   : > { %10752 = vmatmul.mubr.msk.bf16.gmra.mrb[156].mxu0 %vm17852_vm15, %v9477_v15  ;;  %vm17868_vm15 = vmmov %vm17857_vm0 }
 0x8ed   : > { %v10725_v44 = vpop.f32.mrb[128].mxu0 }
 0x8ee   : > { %v9575_v31 = vpop.f32.mrb[129].mxu0  ;;  %v9711_v61 = vmul.f32 %v10725_v44, %v16336_v53 }
 0x8ef   : > { %v9709_v11 = vmul.f32 %v16336_v53, %v9575_v31  ;;  %v10726_v62 = vpop.f32.mrb[130].mxu0 }
 0x8f0   : > { %v9578_v46 = vpop.f32.mrb[131].mxu0  ;;  %v9712_v16 = vmul.f32 %v10726_v62, %v16336_v53  ;;  %v9750_v54 = vadd.f32 %v16341_v60, %v9711_v61 }
 0x8f1   : > { %v9748_v28 = vadd.f32 %v16341_v60, %v9709_v11  ;;  %v9710_v43 = vmul.f32 %v16336_v53, %v9578_v46 }
 0x8f2   : > { %v9751_v40 = vadd.f32 %v16341_v60, %v9712_v16  ;;  %v9782_v59 = vmax.f32 %v9750_v54, 0.0 }
 0x8f3   : > { %v9780_v51 = vmax.f32 %v9748_v28, 0.0  ;;  %v9749_v6 = vadd.f32 %v16341_v60, %v9710_v43 }
 0x8f4   : > { %v9783_v35 = vmax.f32 %v9751_v40, 0.0 }
 0x8f5   : > { %v9781_v3 = vmax.f32 %v9749_v6, 0.0  ;;  %v10729_v33 = vpop.f32.mrb[132].mxu0  ;;  %9844 = vrot.lane.b32.xlu0 %v9780_v51, %s17043_s17 }
 0x8f6   : > { %v9591_v42 = vpop.f32.mrb[133].mxu0  ;;  %v9715_v41 = vmul.f32 %v10729_v33, %v16336_v53 }
 0x8f7   : > { %9846 = vrot.lane.b32.xlu1 %v9781_v3, %s17043_s17  ;;  %v10730_v26 = vpop.f32.mrb[134].mxu0  ;;  %v9713_v32 = vmul.f32 %v16336_v53, %v9591_v42 }
 0x8f8   : > { %v9594_v27 = vpop.f32.mrb[135].mxu0  ;;  %v9716_v47 = vmul.f32 %v10730_v26, %v16336_v53  ;;  %v9754_v50 = vadd.f32 %v16341_v60, %v9715_v41 }
 0x8f9   : > { %v9714_v13 = vmul.f32 %v16336_v53, %v9594_v27  ;;  %v9752_v20 = vadd.f32 %v16341_v60, %v9713_v32 }
 0x8fa   : > { %v9755_v31 = vadd.f32 %v16341_v60, %v9716_v47  ;;  %v9786_v46 = vmax.f32 %v9754_v50, 0.0 }
 0x8fb   : > { %v9753_v30 = vadd.f32 %v16341_v60, %v9714_v13  ;;  %v9784_v0 = vmax.f32 %v9752_v20, 0.0 }
 0x8fc   : > { %v9787_v51 = vmax.f32 %v9755_v31, 0.0 }
 0x8fd   : > { %v9785_v4 = vmax.f32 %v9753_v30, 0.0 }
 0x900   : > { %v16349_v8 = vpop.f32.mrb[136].mxu0 }
 0x901   : > { %v9607_v12 = vpop.f32.mrb[137].mxu0 }
 0x902   : > { %v16351_v56 = vpop.f32.mrb[138].mxu0  ;;  %v9717_v28 = vmul.f32 %v16336_v53, %v9607_v12 }
 0x903   : > { %v16353_v21 = vpop.f32.mrb[139].mxu0 }
 0x904   : > { %v9718_v6 = vmul.f32 %v16336_v53, %v16353_v21  ;;  %v9756_v33 = vadd.f32 %v16341_v60, %v9717_v28  ;;  %v9719_v21 = vmul.f32 %v16349_v8, %v16336_v53 }
 0x906   : > { %v9757_v27 = vadd.f32 %v16341_v60, %v9718_v6 }
 0x908   : > { %v16355_v19 = vpop.f32.mrb[140].mxu0 }
 0x909   : > { %v16357_v23 = vpop.f32.mrb[141].mxu0 }
 0x90a   : > { %v16359_v49 = vpop.f32.mrb[142].mxu0 }
 0x90b   : > { %v16361_v48 = vpop.f32.mrb[143].mxu0  ;;  %v9724_v41 = vmul.f32 %v16359_v49, %v16336_v53 }
 0x910   : > { %v10741_v9 = vpop.f32.mrb[144].mxu0 }
 0x911   : > { %v9639_v5 = vpop.f32.mrb[145].mxu0  ;;  %v9727_v29 = vmul.f32 %v10741_v9, %v16336_v53 }
 0x912   : > { %v9725_v34 = vmul.f32 %v16336_v53, %v9639_v5  ;;  %v10742_v14 = vpop.f32.mrb[146].mxu0 }
 0x913   : > { %v9642_v57 = vpop.f32.mrb[147].mxu0  ;;  %v9728_v52 = vmul.f32 %v10742_v14, %v16336_v53  ;;  %v9766_v24 = vadd.f32 %v16341_v60, %v9727_v29 }
 0x914   : > { %v9764_v22 = vadd.f32 %v16341_v60, %v9725_v34  ;;  %v9726_v17 = vmul.f32 %v16336_v53, %v9642_v57  ;;  %v9788_v34 = vmax.f32 %v9756_v33, 0.0 }
 0x915   : > { %v9767_v7 = vadd.f32 %v16341_v60, %v9728_v52  ;;  %v9798_v10 = vmax.f32 %v9766_v24, 0.0 }
 0x916   : > { %v9796_v55 = vmax.f32 %v9764_v22, 0.0  ;;  %v9765_v25 = vadd.f32 %v16341_v60, %v9726_v17  ;;  %v9720_v22 = vmul.f32 %v16351_v56, %v16336_v53  ;;  %v9789_v17 = vmax.f32 %v9757_v27, 0.0 }
 0x917   : > { %v9799_v45 = vmax.f32 %v9767_v7, 0.0 }
 0x918   : > { %v9797_v36 = vmax.f32 %v9765_v25, 0.0  ;;  %9876 = vrot.lane.b32.xlu0 %v9796_v55, %s17043_s17  ;;  %v10745_v2 = vpop.f32.mrb[148].mxu0  ;;  %v9758_v55 = vadd.f32 %v16341_v60, %v9719_v21  ;;  %v9759_v40 = vadd.f32 %v16341_v60, %v9720_v22 }
 0x919   : > { %v9655_v63 = vpop.f32.mrb[149].mxu0  ;;  %v9731_v15 = vmul.f32 %v10745_v2, %v16336_v53 }
 0x91a   : > { %9878 = vrot.lane.b32.xlu1 %v9797_v36, %s17043_s17  ;;  %v10746_v39 = vpop.f32.mrb[150].mxu0  ;;  %v9729_v58 = vmul.f32 %v16336_v53, %v9655_v63  ;;  %v9790_v56 = vmax.f32 %v9758_v55, 0.0  ;;  %v9721_v36 = vmul.f32 %v16336_v53, %v16357_v23  ;;  %v9791_v63 = vmax.f32 %v9759_v40, 0.0 }
 0x91b   : > { %v9658_v1 = vpop.f32.mrb[151].mxu0  ;;  %v9732_v11 = vmul.f32 %v10746_v39, %v16336_v53  ;;  %v9770_v43 = vadd.f32 %v16341_v60, %v9731_v15 }
 0x91c   : > { %9848 = vrot.lane.b32.xlu0 %v9782_v59, %s17043_s17  ;;  %v9730_v18 = vmul.f32 %v16336_v53, %v9658_v1  ;;  %v9768_v38 = vadd.f32 %v16341_v60, %v9729_v58  ;;  %v9722_v59 = vmul.f32 %v16336_v53, %v16361_v48  ;;  %v9760_v24 = vadd.f32 %v16341_v60, %v9721_v36 }
 0x91d   : > { %v9771_v3 = vadd.f32 %v16341_v60, %v9732_v11  ;;  %v9802_v42 = vmax.f32 %v9770_v43, 0.0  ;;  %v9723_v58 = vmul.f32 %v16355_v19, %v16336_v53  ;;  %v9763_v19 = vadd.f32 %v16341_v60, %v9724_v41 }
 0x91e   : > { %9850 = vrot.lane.b32.xlu1 %v9783_v35, %s17043_s17  ;;  %v9769_v37 = vadd.f32 %v16341_v60, %v9730_v18  ;;  %v9800_v44 = vmax.f32 %v9768_v38, 0.0  ;;  %v9761_v1 = vadd.f32 %v16341_v60, %v9722_v59  ;;  %v9792_v35 = vmax.f32 %v9760_v24, 0.0 }
 0x91f   : > { %v9803_v12 = vmax.f32 %v9771_v3, 0.0  ;;  %v9762_v47 = vadd.f32 %v16341_v60, %v9723_v58  ;;  %v9795_v11 = vmax.f32 %v9763_v19, 0.0 }
 0x920   : > { %9880 = vrot.lane.b32.xlu0 %v9798_v10, %s17043_s17  ;;  %v9801_v62 = vmax.f32 %v9769_v37, 0.0  ;;  %v9793_v13 = vmax.f32 %v9761_v1, 0.0 }
 0x921   : > { %v9794_v31 = vmax.f32 %v9762_v47, 0.0 }
 0x922   : > { %9882 = vrot.lane.b32.xlu1 %v9799_v45, %s17043_s17 }
 0x924   : > { %9852 = vrot.lane.b32.xlu0 %v9784_v0, %s17043_s17 }
 0x926   : > { %9854 = vrot.lane.b32.xlu1 %v9785_v4, %s17043_s17 }
 0x928   : > { %9884 = vrot.lane.b32.xlu0 %v9800_v44, %s17043_s17 }
 0x92a   : > { %9886 = vrot.lane.b32.xlu1 %v9801_v62, %s17043_s17 }
 0x92c   : > { %9856 = vrot.lane.b32.xlu0 %v9786_v46, %s17043_s17 }
 0x92e   : > { %9858 = vrot.lane.b32.xlu1 %v9787_v51, %s17043_s17  ;;  %v10121_v51 = vld [vmem:[%s16545_s15] sm:$0xff] }
 0x92f   : > { %v10749_v26 = vpop.f32.mrb[152].mxu0 }
 0x930   : > { %9888 = vrot.lane.b32.xlu0 %v9802_v42, %s17043_s17  ;;  %v9671_v9 = vpop.f32.mrb[153].mxu0  ;;  %v9735_v8 = vmul.f32 %v10749_v26, %v16336_v53 }
 0x931   : > { %v9733_v5 = vmul.f32 %v16336_v53, %v9671_v9  ;;  %v10750_v61 = vpop.f32.mrb[154].mxu0 }
 0x932   : > { %9890 = vrot.lane.b32.xlu1 %v9803_v12, %s17043_s17  ;;  %v9674_v14 = vpop.f32.mrb[155].mxu0  ;;  %v9736_v52 = vmul.f32 %v10750_v61, %v16336_v53  ;;  %v9774_v2 = vadd.f32 %v16341_v60, %v9735_v8 }
 0x933   : > { %v9772_v57 = vadd.f32 %v16341_v60, %v9733_v5  ;;  %v9734_v16 = vmul.f32 %v16336_v53, %v9674_v14 }
 0x934   : > { %9860 = vrot.lane.b32.xlu0 %v9788_v34, %s17043_s17  ;;  %v9775_v32 = vadd.f32 %v16341_v60, %v9736_v52  ;;  %v9806_v39 = vmax.f32 %v9774_v2, 0.0 }
 0x935   : > { %v9804_v54 = vmax.f32 %v9772_v57, 0.0  ;;  %v9773_v29 = vadd.f32 %v16341_v60, %v9734_v16 }
 0x936   : > { %9862 = vrot.lane.b32.xlu1 %v9789_v17, %s17043_s17  ;;  %v9807_v23 = vmax.f32 %v9775_v32, 0.0 }
 0x937   : > { %v9805_v25 = vmax.f32 %v9773_v29, 0.0 }
 0x938   : > { %9892 = vrot.lane.b32.xlu0 %v9804_v54, %s17043_s17 }
 0x93a   : > { %9894 = vrot.lane.b32.xlu1 %v9805_v25, %s17043_s17 }
 0x93c   : > { %9864 = vrot.lane.b32.xlu0 %v9790_v56, %s17043_s17 }
 0x93e   : > { %9866 = vrot.lane.b32.xlu1 %v9791_v63, %s17043_s17 }
 0x940   : > { %9896 = vrot.lane.b32.xlu0 %v9806_v39, %s17043_s17 }
 0x942   : > { %9898 = vrot.lane.b32.xlu1 %v9807_v23, %s17043_s17 }
 0x944   : > { %9868 = vrot.lane.b32.xlu0 %v9792_v35, %s17043_s17 }
 0x946   : > { %9870 = vrot.lane.b32.xlu1 %v9793_v13, %s17043_s17 }
 0x967   : > { %v9845_v48 = vpop.permute.xlu0 %9844 }
 0x968   : > { %9940 = vst.msk [vmem:[#allocation2] sm:$0xff] %vm17853_vm4, %v9845_v48  ;;  %vm17869_vm4 = vmmov %vm17855_vm6 }
 0x969   : > { %v9847_v7 = vpop.permute.xlu1 %9846 }
 0x96a   : > { %9941 = vst.msk [vmem:[#allocation2 + $0x8] sm:$0xff] %vm17854_vm5, %v9847_v7  ;;  %vm17870_vm5 = vmmov %vm17869_vm4 }
 0x96f   : > { %v9972_v27 = vld [vmem:[#allocation2] sm:$0xff] }
 0x971   : > { %v9973_v42 = vld [vmem:[#allocation2 + $0x8] sm:$0xff] }
 0x972   : > { %v10004_v12 = vpack.c.bf16 %v9973_v42, %v9972_v27 }
 0x973   : > { %v10753_v20 = vpop.f32.mrb[156].mxu0 }
 0x974   : > { %v9687_v10 = vpop.f32.mrb[157].mxu0  ;;  %v9739_v4 = vmul.f32 %v10753_v20, %v16336_v53  ;;  %v10025_v14 = vsel %vm17864_vm10, %v10004_v12, 0  ;;  %vm17879_vm10 = vmmov %vm17857_vm0 }
 0x975   : > { %v9737_v30 = vmul.f32 %v16336_v53, %v9687_v10  ;;  %v10754_v45 = vpop.f32.mrb[158].mxu0 }
 0x976   : > { %v9690_v18 = vpop.f32.mrb[159].mxu0  ;;  %v9740_v15 = vmul.f32 %v10754_v45, %v16336_v53  ;;  %v9778_v49 = vadd.f32 %v16341_v60, %v9739_v4 }
 0x977   : > { %v9776_v0 = vadd.f32 %v16341_v60, %v9737_v30  ;;  %v9738_v38 = vmul.f32 %v16336_v53, %v9690_v18  ;;  %v16464_v53 = vld [vmem:[%s16543_s13] sm:$0xf] }
 0x978   : > { %v9779_v62 = vadd.f32 %v16341_v60, %v9740_v15  ;;  %v9810_v46 = vmax.f32 %v9778_v49, 0.0  ;;  %10639 = vmatprep.mubr.msk.bf16.mxu1 %vm17855_vm6, %v16464_v53  ;;  %vm17871_vm6 = vmmov %vm17857_vm0 }
 0x979   : > { %v9808_v37 = vmax.f32 %v9776_v0, 0.0  ;;  %v9777_v50 = vadd.f32 %v16341_v60, %v9738_v38  ;;  %v10113_v60 = vld [vmem:[%s16544_s14] sm:$0xff] }
 0x97a   : > { %v9811_v28 = vmax.f32 %v9779_v62, 0.0 }
 0x97b   : > { %v9809_v44 = vmax.f32 %v9777_v50, 0.0  ;;  %9900 = vrot.lane.b32.xlu0 %v9808_v37, %s17043_s17 }
 0x97d   : > { %9902 = vrot.lane.b32.xlu1 %v9809_v44, %s17043_s17 }
 0x97f   : > { %9872 = vrot.lane.b32.xlu0 %v9794_v31, %s17043_s17 }
 0x981   : > { %9874 = vrot.lane.b32.xlu1 %v9795_v11, %s17043_s17 }
 0x983   : > { %9904 = vrot.lane.b32.xlu0 %v9810_v46, %s17043_s17 }
 0x985   : > { %9906 = vrot.lane.b32.xlu1 %v9811_v28, %s17043_s17  ;;  %s10341_s17 = sshll.u32 %s17901_s22, 4 }
 0x986   : > { %s521_s28 = scalar_lea.vmem %s16546_s16, %s10341_s17 }
 0x987   : > { %10116 = vperm.xlu0 %10791, %v10113_v60  }
 0x989   : > { %10124 = vperm.xlu1 %10792, %v10121_v51  }
 0x98a   : > { %v9877_v43 = vpop.permute.xlu0 %9876 }
 0x98b   : > { %9956 = vst.msk [vmem:[#allocation2 + $0x80] sm:$0xff] %vm17856_vm13, %v9877_v43  ;;  %vm17872_vm13 = vmmov %vm17857_vm0 }
 0x98c   : > { %v9879_v6 = vpop.permute.xlu1 %9878 }
 0x98d   : > { %9957 = vst.msk [vmem:[#allocation2 + $0x88] sm:$0xff] %vm17857_vm0, %v9879_v6 }
 0x98e   : > { %v9849_v3 = vpop.permute.xlu0 %9848 }
 0x98f   : > { %9942 = vst.msk [vmem:[#allocation2 + $0x10] sm:$0xff] %vm17858_vm3, %v9849_v3  ;;  %vm17873_vm3 = vmmov %vm17857_vm0 }
 0x990   : > { %v9851_v33 = vpop.permute.xlu1 %9850 }
 0x991   : > { %9943 = vst.msk [vmem:[#allocation2 + $0x18] sm:$0xff] %vm17859_vm14, %v9851_v33  ;;  %vm17874_vm14 = vmmov %vm17869_vm4 }
 0x992   : > { %v9881_v26 = vpop.permute.xlu0 %9880  ;;  %v9988_v5 = vld [vmem:[#allocation2 + $0x80] sm:$0xff] }
 0x993   : > { %9958 = vst.msk [vmem:[#allocation2 + $0x90] sm:$0xff] %vm17860_vm2, %v9881_v26  ;;  %vm17875_vm2 = vmmov %vm17869_vm4 }
 0x994   : > { %v9883_v9 = vpop.permute.xlu1 %9882  ;;  %v9989_v61 = vld [vmem:[#allocation2 + $0x88] sm:$0xff] }
 0x995   : > { %9959 = vst.msk [vmem:[#allocation2 + $0x98] sm:$0xff] %vm17861_vm7, %v9883_v9  ;;  %v10012_v21 = vpack.c.bf16 %v9989_v61, %v9988_v5  ;;  %vm17876_vm7 = vmmov %vm17857_vm0 }
 0x996   : > { %v9853_v34 = vpop.permute.xlu0 %9852  ;;  %v9974_v17 = vld [vmem:[#allocation2 + $0x10] sm:$0xff] }
 0x997   : > { %9944 = vst.msk [vmem:[#allocation2 + $0x20] sm:$0xff] %vm17862_vm8, %v9853_v34  ;;  %10758 = vmatprep.subr.msk.bf16.mxu1 %vm17863_vm12, %v10012_v21  ;;  %vm17877_vm8 = vmmov %vm17857_vm0 }
 0x998   : > { %v9855_v57 = vpop.permute.xlu1 %9854  ;;  %10624 = vmatpush3.bf16.xpose.msra.mxu1 %v10025_v14  ;;  %v9975_v16 = vld [vmem:[#allocation2 + $0x18] sm:$0xff]  ;;  %vm17878_vm12 = vmmov %vm17857_vm0 }
 0x999   : > { %9945 = vst.msk [vmem:[#allocation2 + $0x28] sm:$0xff] %vm17865_vm9, %v9855_v57  ;;  %v10005_v54 = vpack.c.bf16 %v9975_v16, %v9974_v17  ;;  %vm17880_vm9 = vmmov %vm17875_vm2 }
 0x99a   : > { %v9885_v22 = vpop.permute.xlu0 %9884  ;;  %v9990_v55 = vld [vmem:[#allocation2 + $0x90] sm:$0xff] }
 0x99b   : > { %9960 = vst.msk [vmem:[#allocation2 + $0xa0] sm:$0xff] %vm17866_vm1, %v9885_v22  ;;  %v10028_v52 = vsel %vm17870_vm5, %v10005_v54, 0  ;;  %vm17881_vm1 = vmmov %vm17875_vm2 }
 0x99c   : > { %v9887_v29 = vpop.permute.xlu1 %9886  ;;  %v9991_v8 = vld [vmem:[#allocation2 + $0x98] sm:$0xff]  ;;  %vm17885_vm5 = vmmov %vm17857_vm0 }
 0x99d   : > { %9961 = vst.msk [vmem:[#allocation2 + $0xa8] sm:$0xff] %vm17867_vm11, %v9887_v29  ;;  %v10013_v25 = vpack.c.bf16 %v9991_v8, %v9990_v55  ;;  %vm17882_vm11 = vmmov %vm17857_vm0 }
 0x99e   : > { %v9857_v40 = vpop.permute.xlu0 %9856  ;;  %v9976_v63 = vld [vmem:[#allocation2 + $0x20] sm:$0xff] }
 0x99f   : > { %9946 = vst.msk [vmem:[#allocation2 + $0x30] sm:$0xff] %vm17868_vm15, %v9857_v40  ;;  %10759 = vmatprep.subr.msk.bf16.mxu1 %vm17869_vm4, %v10013_v25  ;;  %vm17883_vm15 = vmmov %vm17857_vm0 }
 0x9a0   : > { %v9859_v56 = vpop.permute.xlu1 %9858  ;;  %10626 = vmatpush3.bf16.xpose.msra.mxu1 %v10028_v52  ;;  %v9977_v36 = vld [vmem:[#allocation2 + $0x28] sm:$0xff]  ;;  %vm17884_vm4 = vmmov %vm17857_vm0 }
 0x9a1   : > { %9947 = vst.msk [vmem:[#allocation2 + $0x38] sm:$0xff] %vm17871_vm6, %v9859_v56  ;;  %v10006_v59 = vpack.c.bf16 %v9977_v36, %v9976_v63  ;;  %vm17886_vm6 = vmmov %vm17881_vm1 }
 0x9a2   : > { %v9889_v2 = vpop.permute.xlu0 %9888  ;;  %v9992_v24 = vld [vmem:[#allocation2 + $0xa0] sm:$0xff] }
 0x9a3   : > { %9962 = vst.msk [vmem:[#allocation2 + $0xb0] sm:$0xff] %vm17872_vm13, %v9889_v2  ;;  %v10031_v35 = vsel %vm17875_vm2, %v10006_v59, 0  ;;  %vm17887_vm13 = vmmov %vm17881_vm1 }
 0x9a4   : > { %v9891_v32 = vpop.permute.xlu1 %9890  ;;  %v9993_v39 = vld [vmem:[#allocation2 + $0xa8] sm:$0xff]  ;;  %vm17890_vm2 = vmmov %vm17857_vm0 }
 0x9a5   : > { %9963 = vst.msk [vmem:[#allocation2 + $0xb8] sm:$0xff] %vm17857_vm0, %v9891_v32  ;;  %v10014_v1 = vpack.c.bf16 %v9993_v39, %v9992_v24 }
 0x9a6   : > { %v9861_v23 = vpop.permute.xlu0 %9860  ;;  %v9978_v20 = vld [vmem:[#allocation2 + $0x30] sm:$0xff] }
 0x9a7   : > { %9948 = vst.msk [vmem:[#allocation2 + $0x40] sm:$0xff] %vm17873_vm3, %v9861_v23  ;;  %10760 = vmatprep.subr.msk.bf16.mxu1 %vm17874_vm14, %v10014_v1  ;;  %vm17888_vm3 = vmmov %vm17881_vm1 }
 0x9a8   : > { %v9863_v13 = vpop.permute.xlu1 %9862  ;;  %10628 = vmatpush3.bf16.xpose.msra.mxu1 %v10031_v35  ;;  %v9979_v48 = vld [vmem:[#allocation2 + $0x38] sm:$0xff]  ;;  %vm17889_vm14 = vmmov %vm17881_vm1 }
 0x9a9   : > { %9949 = vst.msk [vmem:[#allocation2 + $0x48] sm:$0xff] %vm17876_vm7, %v9863_v13  ;;  %v10007_v10 = vpack.c.bf16 %v9979_v48, %v9978_v20  ;;  %vm17891_vm7 = vmmov %vm17857_vm0 }
 0x9aa   : > { %v9893_v7 = vpop.permute.xlu0 %9892  ;;  %v9994_v30 = vld [vmem:[#allocation2 + $0xb0] sm:$0xff] }
 0x9ab   : > { %9964 = vst.msk [vmem:[#allocation2 + $0xc0] sm:$0xff] %vm17877_vm8, %v9893_v7  ;;  %v10034_v0 = vsel %vm17881_vm1, %v10007_v10, 0  ;;  %vm17892_vm8 = vmmov %vm17857_vm0 }
 0x9ac   : > { %v9895_v58 = vpop.permute.xlu1 %9894  ;;  %v9995_v45 = vld [vmem:[#allocation2 + $0xb8] sm:$0xff] }
 0x9ad   : > { %9965 = vst.msk [vmem:[#allocation2 + $0xc8] sm:$0xff] %vm17878_vm12, %v9895_v58  ;;  %v10015_v18 = vpack.c.bf16 %v9995_v45, %v9994_v30  ;;  %vm17893_vm12 = vmmov %vm17857_vm0 }
 0x9ae   : > { %v9865_v41 = vpop.permute.xlu0 %9864  ;;  %v9980_v37 = vld [vmem:[#allocation2 + $0x40] sm:$0xff] }
 0x9af   : > { %9950 = vst.msk [vmem:[#allocation2 + $0x50] sm:$0xff] %vm17879_vm10, %v9865_v41  ;;  %10761 = vmatprep.subr.msk.bf16.mxu1 %vm17880_vm9, %v10015_v18  ;;  %vm17894_vm10 = vmmov %vm17857_vm0 }
 0x9b0   : > { %v9867_v38 = vpop.permute.xlu1 %9866  ;;  %10630 = vmatpush3.bf16.xpose.msra.mxu1 %v10034_v0  ;;  %v9981_v47 = vld [vmem:[#allocation2 + $0x48] sm:$0xff]  ;;  %vm17895_vm9 = vmmov %vm17857_vm0 }
 0x9b1   : > { %9951 = vst.msk [vmem:[#allocation2 + $0x58] sm:$0xff] %vm17882_vm11, %v9867_v38  ;;  %v10008_v50 = vpack.c.bf16 %v9981_v47, %v9980_v37  ;;  %vm17896_vm11 = vmmov %vm17881_vm1 }
 0x9b2   : > { %v9897_v4 = vpop.permute.xlu0 %9896  ;;  %v9996_v15 = vld [vmem:[#allocation2 + $0xc0] sm:$0xff] }
 0x9b3   : > { %9966 = vst.msk [vmem:[#allocation2 + $0xd0] sm:$0xff] %vm17883_vm15, %v9897_v4  ;;  %v10037_v11 = vsel %vm17887_vm13, %v10008_v50, 0  ;;  %vm17897_vm15 = vmmov %vm17881_vm1 }
 0x9b4   : > { %v9899_v19 = vpop.permute.xlu1 %9898  ;;  %v9997_v44 = vld [vmem:[#allocation2 + $0xc8] sm:$0xff] }
 0x9b5   : > { %9967 = vst.msk [vmem:[#allocation2 + $0xd8] sm:$0xff] %vm17884_vm4, %v9899_v19  ;;  %v10016_v31 = vpack.c.bf16 %v9997_v44, %v9996_v15  ;;  %vm17898_vm4 = vmmov %vm17881_vm1 }
 0x9b6   : > { %v9869_v49 = vpop.permute.xlu0 %9868  ;;  %v9982_v28 = vld [vmem:[#allocation2 + $0x50] sm:$0xff] }
 0x9b7   : > { %9952 = vst.msk [vmem:[#allocation2 + $0x60] sm:$0xff] %vm17885_vm5, %v9869_v49  ;;  %10762 = vmatprep.subr.msk.bf16.mxu1 %vm17886_vm6, %v10016_v31  ;;  %vm17899_vm5 = vmmov %vm17881_vm1 }
 0x9b8   : > { %v9871_v62 = vpop.permute.xlu1 %9870  ;;  %10632 = vmatpush3.bf16.xpose.msra.mxu1 %v10037_v11  ;;  %v9983_v46 = vld [vmem:[#allocation2 + $0x58] sm:$0xff] }
 0x9b9   : > { %9953 = vst.msk [vmem:[#allocation2 + $0x68] sm:$0xff] %vm17857_vm0, %v9871_v62  ;;  %v10009_v43 = vpack.c.bf16 %v9983_v46, %v9982_v28 }
 0x9ba   : > { %v9998_v60 = vld [vmem:[#allocation2 + $0xd0] sm:$0xff] }
 0x9bb   : > { %v10040_v3 = vsel %vm17889_vm14, %v10009_v43, 0 }
 0x9bc   : > { %v9999_v51 = vld [vmem:[#allocation2 + $0xd8] sm:$0xff] }
 0x9bd   : > { %v10017_v6 = vpack.c.bf16 %v9999_v51, %v9998_v60 }
 0x9be   : > { %v9984_v5 = vld [vmem:[#allocation2 + $0x60] sm:$0xff] }
 0x9bf   : > { %10763 = vmatprep.subr.msk.bf16.mxu1 %vm17888_vm3, %v10017_v6 }
 0x9c0   : > { %10634 = vmatpush3.bf16.xpose.msra.mxu1 %v10040_v3  ;;  %v9985_v12 = vld [vmem:[#allocation2 + $0x68] sm:$0xff] }
 0x9c1   : > { %v10010_v61 = vpack.c.bf16 %v9985_v12, %v9984_v5 }
 0x9c3   : > { %v10043_v16 = vsel %vm17896_vm11, %v10010_v61, 0 }
 0x9ed   : > { %v9901_v33 = vpop.permute.xlu0 %9900 }
 0x9ee   : > { %9968 = vst.msk [vmem:[#allocation2 + $0xe0] sm:$0xff] %vm17890_vm2, %v9901_v33 }
 0x9ef   : > { %v9903_v42 = vpop.permute.xlu1 %9902 }
 0x9f0   : > { %9969 = vst.msk [vmem:[#allocation2 + $0xe8] sm:$0xff] %vm17891_vm7, %v9903_v42 }
 0x9f1   : > { %v9873_v26 = vpop.permute.xlu0 %9872 }
 0x9f2   : > { %9954 = vst.msk [vmem:[#allocation2 + $0x70] sm:$0xff] %vm17892_vm8, %v9873_v26 }
 0x9f3   : > { %v9875_v27 = vpop.permute.xlu1 %9874 }
 0x9f4   : > { %9955 = vst.msk [vmem:[#allocation2 + $0x78] sm:$0xff] %vm17893_vm12, %v9875_v27 }
 0x9f5   : > { %v9905_v9 = vpop.permute.xlu0 %9904  ;;  %v10000_v34 = vld [vmem:[#allocation2 + $0xe0] sm:$0xff] }
 0x9f6   : > { %9970 = vst.msk [vmem:[#allocation2 + $0xf0] sm:$0xff] %vm17894_vm10, %v9905_v9 }
 0x9f7   : > { %v9907_v21 = vpop.permute.xlu1 %9906  ;;  %v10001_v14 = vld [vmem:[#allocation2 + $0xe8] sm:$0xff] }
 0x9f8   : > { %9971 = vst.msk [vmem:[#allocation2 + $0xf8] sm:$0xff] %vm17895_vm9, %v9907_v21  ;;  %v10018_v57 = vpack.c.bf16 %v10001_v14, %v10000_v34 }
 0x9f9   : > { %v9986_v17 = vld [vmem:[#allocation2 + $0x70] sm:$0xff] }
 0x9fa   : > { %10764 = vmatprep.subr.msk.bf16.mxu1 %vm17881_vm1, %v10018_v57 }
 0x9fb   : > { %10636 = vmatpush3.bf16.xpose.msra.mxu1 %v10043_v16  ;;  %v9987_v22 = vld [vmem:[#allocation2 + $0x78] sm:$0xff] }
 0x9fc   : > { %v10011_v54 = vpack.c.bf16 %v9987_v22, %v9986_v17 }
 0x9fd   : > { %v10002_v29 = vld [vmem:[#allocation2 + $0xf0] sm:$0xff] }
 0x9fe   : > { %v10046_v25 = vsel %vm17898_vm4, %v10011_v54, 0 }
 0x9ff   : > { %v10003_v55 = vld [vmem:[#allocation2 + $0xf8] sm:$0xff] }
 0xa00   : > { %v10019_v8 = vpack.c.bf16 %v10003_v55, %v10002_v29 }
 0xa02   : > { %10765 = vmatprep.subr.msk.bf16.mxu1 %vm17897_vm15, %v10019_v8 }
 0xa03   : > { %10638 = vmatpush3.bf16.xpose.msra.mxu1 %v10046_v25 }
 0xa06   : > { %v10117_v40 = vpop.permute.xlu0 %10116 }
 0xa08   : > { %v10125_v56 = vpop.permute.xlu1 %10124 }
 0xa0a   : > { %10640 = vmatmul.mubr.msk.bf16.vlgmr.msra.gmra.mrb[128].mxu1 %vm17899_vm5, %v16464_v53 }
 0xadd   : > { %v10106_v52 = vpop.f32.mrb[128].mxu1 }
 0xade   : > { %v10108_v36 = vpop.f32.mrb[129].mxu1  ;;  %v10119_v2 = vmul.f32 %v10117_v40, %v10106_v52 }
 0xadf   : > { %v10110_v63 = vpop.f32.mrb[130].mxu1  ;;  %v10120_v59 = vmul.f32 %v10117_v40, %v10108_v36 }
 0xae0   : > { %v10111_v32 = vpop.f32.mrb[131].mxu1  ;;  %v10127_v24 = vadd.f32 %v10125_v56, %v10119_v2 }
 0xae1   : > { %v10128_v39 = vadd.f32 %v10125_v56, %v10120_v59 }
 0xae2   : > { %10129 = vst [vmem:[%s521_s28] sm:$0xff] %v10127_v24 }
 0xae3   : > { %10130 = vst [vmem:[%s521_s28 + $0x8] sm:$0xff] %v10128_v39 }
 0xae4 PF: > { %s26_s21 = sadd.s32 1, %s10900_s21  }
 0xae5   : > { %p23_p4 = scmp.ge.s32.totalorder %s26_s21, 4  }
 0xae7   :  { %25 = sbr.rel (!%p23_p4) target bundleno = 8 (0x8), region = 114 }

</bundles_post_ra>
